<compile_context>
chip_gen: v7x
topology: tpu7x:2x2x1
jax: 0.10.0
libtpu: 0.0.40
codegen_flags: <defaults>
</compile_context>

<pallas_src>
import functools
import numpy as np
import jax
import jax.numpy as jnp
from jax.experimental import pallas as pl
from jax.experimental.pallas import tpu as pltpu

# ------------------------- configuration -------------------------
B = 2
DIM = 32                      # channels
NUM_HEADS = 4
HEAD_DIM = DIM // NUM_HEADS
WINDOW_SIZE = (2, 4, 4)
INPUT_RES = (4, 8, 8)         # (S, H, W) -- divisible by window size (no pad)
SHIFT = (1, 2, 2)             # min(shift) > 0 -> shifted windows + attn mask
MLP_RATIO = 4.0
HIDDEN = int(DIM * MLP_RATIO)
S, H, W = INPUT_RES
L = S * H * W
N = WINDOW_SIZE[0] * WINDOW_SIZE[1] * WINDOW_SIZE[2]          # tokens / window
NW = (S // WINDOW_SIZE[0]) * (H // WINDOW_SIZE[1]) * (W // WINDOW_SIZE[2])
T = NW * N                    # tokens per batch element (== L)
SCALE = HEAD_DIM ** (-0.5)
EPS = 1e-5                    # torch.nn.LayerNorm default


# ------------------------- shared helpers -------------------------
def _layernorm(x, g, b):
    mu = jnp.mean(x, axis=-1, keepdims=True)
    var = jnp.mean(jnp.square(x - mu), axis=-1, keepdims=True)
    return (x - mu) * jax.lax.rsqrt(var + EPS) * g + b


def window_partition_jax(x, ws):
    b, s, h, w, c = x.shape
    x = x.reshape(b, s // ws[0], ws[0], h // ws[1], ws[1], w // ws[2], ws[2], c)
    x = jnp.transpose(x, (0, 1, 3, 5, 2, 4, 6, 7))
    return x.reshape(-1, ws[0], ws[1], ws[2], c)


def window_reverse_jax(wins, ws, s, h, w):
    b = wins.shape[0] // (s * h * w // (ws[0] * ws[1] * ws[2]))
    x = wins.reshape(b, s // ws[0], h // ws[1], w // ws[2], ws[0], ws[1], ws[2], -1)
    x = jnp.transpose(x, (0, 1, 4, 2, 5, 3, 6, 7))
    return x.reshape(b, s, h, w, -1)


# ------------------------- fused Pallas kernel -------------------------
def make_swin_block_kernel(bb):
    """Kernel for one grid step processing `bb` batch elements (bb*T tokens)."""
    TT = bb * T            # tokens in this block
    WB = bb * NW           # windows in this block

    def kernel(x_ref, bias_ref, g1_ref, b1_ref, wqkv_ref, bqkv_ref,
               wp_ref, bp_ref, g2_ref, b2_ref, w1_ref, c1_ref, w2_ref, c2_ref,
               o_ref):
        # x_ref block: (bb, T, DIM) -- all windows of `bb` batch elements,
        # already rolled + window-partitioned (token order = (b, window, n)).
        x = x_ref[...].reshape(TT, DIM).astype(jnp.float32)

        # ---- LayerNorm1 + fused QKV over all TT tokens (one matmul) ----
        # qk scale is already folded into the Q columns of wqkv/bqkv (prep).
        xn = _layernorm(x, g1_ref[...], b1_ref[...])
        qkv = jnp.dot(xn, wqkv_ref[...],
                      preferred_element_type=jnp.float32) + bqkv_ref[...]   # (TT, 3*DIM)

        # ---- build ONE head-major attention batch: (nH*WB, N, HEAD_DIM) ----
        # Per-head column slices (static) + stack along a new leading head
        # axis; only leading-dim reshapes/concats (no lane relayouts).
        def heads(col0):
            return jnp.stack(
                [qkv[:, col0 + hh * HEAD_DIM: col0 + (hh + 1) * HEAD_DIM]
                 .reshape(WB, N, HEAD_DIM) for hh in range(NUM_HEADS)],
                axis=0).reshape(NUM_HEADS * WB, N, HEAD_DIM)

        q = heads(0)
        k = heads(DIM)
        v = heads(2 * DIM)

        # ---- single batched attention over all heads x windows ----
        s = jnp.einsum('bqd,bkd->bqk', q, k,
                       preferred_element_type=jnp.float32)          # (nH*WB, N, N)
        s = s + bias_ref[...]        # rel-pos bias + shift mask (pre-ordered)
        s = s - jnp.max(s, axis=-1, keepdims=True)
        prob = jnp.exp(s)
        prob = prob * pl.reciprocal(jnp.sum(prob, axis=-1, keepdims=True),
                                    approx=True)
        oh = jnp.einsum('bqk,bkd->bqd', prob, v,
                        preferred_element_type=jnp.float32)         # (nH*WB, N, HD)

        # ---- output projection: batched per-head matmul + head-sum ----
        oh = oh.reshape(NUM_HEADS, TT, HEAD_DIM)
        wp3 = wp_ref[...].reshape(NUM_HEADS, HEAD_DIM, DIM)
        proj = jnp.einsum('htd,hdc->htc', oh, wp3,
                          preferred_element_type=jnp.float32)       # (nH, TT, DIM)

        # ---- residual 1 (window order; per-token op commutes w/ permutation) ----
        y1 = x + jnp.sum(proj, axis=0) + bp_ref[...]                # (TT, DIM)

        # ---- LayerNorm2 + MLP (exact GELU) + residual 2 ----
        xn2 = _layernorm(y1, g2_ref[...], b2_ref[...])
        hmid = jnp.dot(xn2, w1_ref[...],
                       preferred_element_type=jnp.float32) + c1_ref[...]    # (TT, HIDDEN)
        hmid = 0.5 * hmid * (1.0 + jax.lax.erf(hmid * 0.7071067811865476))
        y2 = y1 + jnp.dot(hmid, w2_ref[...],
                          preferred_element_type=jnp.float32) + c2_ref[...]

        o_ref[...] = y2.reshape(bb, T, DIM).astype(o_ref.dtype)

    return kernel


# ------------------------- one-time preparation -------------------------
def prepare_params(p):
    """Fold the qk scale into the Q columns of the QKV projection (once)."""
    scale_row = jnp.concatenate([jnp.full((DIM,), SCALE, jnp.float32),
                                 jnp.ones((2 * DIM,), jnp.float32)])
    q = dict(p)
    q['wqkv'] = p['wqkv'] * scale_row[None, :]
    q['bqkv'] = p['bqkv'] * scale_row[None, :]
    return q


def prepare_attn_bias(rel_bias, mask, bb):
    """Combined additive attention bias laid out to match the in-kernel
    head-major batch order: index = h*(bb*NW) + b*NW + w."""
    bias = rel_bias[:, None, :, :] + mask[None, :, :, :]            # (nH, NW, N, N)
    bias = jnp.broadcast_to(bias[:, None], (NUM_HEADS, bb, NW, N, N))
    return bias.reshape(NUM_HEADS * bb * NW, N, N)


def _choose_batch_block():
    """Per-generation grid choice: merge the batch into one grid step on
    single-TensorCore chips (v5e/v6e); keep a 2-way parallel grid on
    dual-TC chips (v7x / megacore) so both cores get work."""
    try:
        kind = jax.devices()[0].device_kind.lower()
    except Exception:
        return 1
    single_tc = any(t in kind for t in
                    ("v5e", "v5 lite", "v5lite", "v6e", "v6 lite", "v6lite"))
    return B if single_tc else 1


# ------------------------- Block forward (Pallas) -------------------------
def block_forward_pallas(x, p, bias_full, *, batch_block):
    # x: (B, L, C); p: scale-folded params; bias_full: (nH*bb*NW, N, N).
    bb = batch_block
    grid_b = B // bb

    # roll + window partition (pure permutations) stay in XLA
    xr = x.reshape(B, S, H, W, DIM)
    xr = jnp.roll(xr, shift=(-SHIFT[0], -SHIFT[1], -SHIFT[2]), axis=(1, 2, 3))
    xw = window_partition_jax(xr, WINDOW_SIZE).reshape(B, T, DIM)

    param2d = lambda b: (0, 0)      # full-array, VMEM-resident weights
    yw = pl.pallas_call(
        make_swin_block_kernel(bb),
        out_shape=jax.ShapeDtypeStruct((B, T, DIM), x.dtype),
        grid_spec=pltpu.PrefetchScalarGridSpec(
            num_scalar_prefetch=0,
            grid=(grid_b,),
            in_specs=[
                pl.BlockSpec((bb, T, DIM), lambda b: (b, 0, 0)),               # x (windowed)
                pl.BlockSpec((NUM_HEADS * bb * NW, N, N),
                             lambda b: (0, 0, 0)),                             # resident bias
                pl.BlockSpec((1, DIM), param2d),            # g1
                pl.BlockSpec((1, DIM), param2d),            # b1
                pl.BlockSpec((DIM, 3 * DIM), param2d),      # wqkv (scaled)
                pl.BlockSpec((1, 3 * DIM), param2d),        # bqkv (scaled)
                pl.BlockSpec((DIM, DIM), param2d),          # wp
                pl.BlockSpec((1, DIM), param2d),            # bp
                pl.BlockSpec((1, DIM), param2d),            # g2
                pl.BlockSpec((1, DIM), param2d),            # b2
                pl.BlockSpec((DIM, HIDDEN), param2d),       # w1
                pl.BlockSpec((1, HIDDEN), param2d),         # c1
                pl.BlockSpec((HIDDEN, DIM), param2d),       # w2
                pl.BlockSpec((1, DIM), param2d),            # c2
            ],
            out_specs=pl.BlockSpec((bb, T, DIM), lambda b: (b, 0, 0)),
        ),
        compiler_params=pltpu.CompilerParams(
            dimension_semantics=("parallel",) if grid_b > 1 else ("arbitrary",)),
    )(xw, bias_full, p['g1'], p['b1'], p['wqkv'], p['bqkv'], p['wp'], p['bp'],
      p['g2'], p['b2'], p['w1'], p['c1'], p['w2'], p['c2'])

    # window reverse + inverse roll (pure permutations)
    yw = yw.reshape(B * NW, WINDOW_SIZE[0], WINDOW_SIZE[1], WINDOW_SIZE[2], DIM)
    xr = window_reverse_jax(yw, WINDOW_SIZE, S, H, W)
    xr = jnp.roll(xr, shift=(SHIFT[0], SHIFT[1], SHIFT[2]), axis=(1, 2, 3))
    return xr.reshape(B, L, DIM)


# ------------------------- pure-JAX reference -------------------------
def block_forward_ref(x, p, rel_bias, mask):
    shortcut = x
    xn = _layernorm(x, p['g1'], p['b1'])
    xr = xn.reshape(B, S, H, W, DIM)
    xr = jnp.roll(xr, shift=(-SHIFT[0], -SHIFT[1], -SHIFT[2]), axis=(1, 2, 3))
    xw = window_partition_jax(xr, WINDOW_SIZE).reshape(-1, N, DIM)     # (B_, N, C)
    qkv = xw @ p['wqkv'] + p['bqkv']
    qkv = qkv.reshape(-1, N, 3, NUM_HEADS, HEAD_DIM).transpose(2, 0, 3, 1, 4)
    q, k, v = qkv[0] * SCALE, qkv[1], qkv[2]
    attn = q @ jnp.swapaxes(k, -2, -1)                                 # (B_, nH, N, N)
    attn = attn + rel_bias[None]
    attn = attn.reshape(B, NW, NUM_HEADS, N, N) + mask[None, :, None]
    attn = jax.nn.softmax(attn.reshape(-1, NUM_HEADS, N, N), axis=-1)
    out = (attn @ v).transpose(0, 2, 1, 3).reshape(-1, N, DIM)
    out = out @ p['wp'] + p['bp']
    out = out.reshape(-1, WINDOW_SIZE[0], WINDOW_SIZE[1], WINDOW_SIZE[2], DIM)
    xr = window_reverse_jax(out, WINDOW_SIZE, S, H, W)
    xr = jnp.roll(xr, shift=(SHIFT[0], SHIFT[1], SHIFT[2]), axis=(1, 2, 3))
    x = shortcut + xr.reshape(B, L, DIM)
    xn2 = _layernorm(x, p['g2'], p['b2'])
    h = xn2 @ p['w1'] + p['c1']
    h = 0.5 * h * (1.0 + jax.lax.erf(h * 0.7071067811865476))
    return x + h @ p['w2'] + p['c2']


# ------------------------- static tables -------------------------
def relative_position_index():
    ws0, ws1, ws2 = WINDOW_SIZE
    coords = np.stack(np.meshgrid(np.arange(ws0), np.arange(ws1), np.arange(ws2),
                                  indexing='ij'))
    cf = coords.reshape(3, -1)
    rel = cf[:, :, None] - cf[:, None, :]
    rel = rel.transpose(1, 2, 0).astype(np.int64)
    rel[:, :, 0] += ws0 - 1
    rel[:, :, 1] += ws1 - 1
    rel[:, :, 2] += ws2 - 1
    rel[:, :, 1] *= 2 * ws2 - 1
    rel[:, :, 0] *= 2 * (ws1 + ws2) - 1
    return rel.sum(-1)                                          # (N, N)


def shifted_window_mask():
    ws, ss = WINDOW_SIZE, SHIFT
    img_mask = np.zeros((1, S, H, W, 1), dtype=np.float32)
    cnt = 0
    for s_sl in (slice(0, -ws[0]), slice(-ws[0], -ss[0]), slice(-ss[0], None)):
        for h_sl in (slice(0, -ws[1]), slice(-ws[1], -ss[1]), slice(-ss[1], None)):
            for w_sl in (slice(0, -ws[2]), slice(-ws[2], -ss[2]), slice(-ss[2], None)):
                img_mask[:, s_sl, h_sl, w_sl, :] = cnt
                cnt += 1
    mw = np.asarray(window_partition_jax(jnp.asarray(img_mask), ws)).reshape(-1, N)
    diff = mw[:, None, :] - mw[:, :, None]
    return jnp.asarray(np.where(diff != 0, -100.0, 0.0).astype(np.float32))  # (NW, N, N)


# ------------------------- main -------------------------
if __name__ == "__main__":
    key = jax.random.PRNGKey(0)
    ks = jax.random.split(key, 10)
    ws0, ws1, ws2 = WINDOW_SIZE
    table_len = (2 * ws0 - 1) * (2 * ws1 - 1) * (2 * ws2 - 1)

    params = {
        'g1': jnp.ones((1, DIM), jnp.float32),
        'b1': jnp.zeros((1, DIM), jnp.float32),
        'wqkv': 0.02 * jax.random.normal(ks[0], (DIM, 3 * DIM), jnp.float32),
        'bqkv': 0.02 * jax.random.normal(ks[1], (1, 3 * DIM), jnp.float32),
        'wp': 0.02 * jax.random.normal(ks[2], (DIM, DIM), jnp.float32),
        'bp': 0.02 * jax.random.normal(ks[3], (1, DIM), jnp.float32),
        'g2': jnp.ones((1, DIM), jnp.float32),
        'b2': jnp.zeros((1, DIM), jnp.float32),
        'w1': 0.02 * jax.random.normal(ks[4], (DIM, HIDDEN), jnp.float32),
        'c1': 0.02 * jax.random.normal(ks[5], (1, HIDDEN), jnp.float32),
        'w2': 0.02 * jax.random.normal(ks[6], (HIDDEN, DIM), jnp.float32),
        'c2': 0.02 * jax.random.normal(ks[7], (1, DIM), jnp.float32),
    }
    rel_table = 0.02 * jax.random.normal(ks[8], (table_len, NUM_HEADS), jnp.float32)

    rpi = jnp.asarray(relative_position_index())
    rel_bias = rel_table[rpi.reshape(-1)].reshape(N, N, NUM_HEADS)
    rel_bias = jnp.transpose(rel_bias, (2, 0, 1))               # (nH, N, N)
    mask = shifted_window_mask()                                # (NW, N, N)

    x = jax.random.normal(ks[9], (B, L, DIM), jnp.float32)

    # One-time prep (scale fold + combined bias layout) outside the jitted call.
    bb = _choose_batch_block()                                  # 1 (dual-TC) or B (single-TC)
    params_k = prepare_params(params)
    attn_bias = prepare_attn_bias(rel_bias, mask, bb)           # (nH*bb*NW, N, N)

    fwd = jax.jit(functools.partial(block_forward_pallas, batch_block=bb))
    out = jax.block_until_ready(fwd(x, params_k, attn_bias))

    ref = block_forward_ref(x, params, rel_bias, mask)
    np.testing.assert_allclose(np.asarray(out), np.asarray(ref), rtol=2e-3, atol=2e-3)

    print("KERNEL_OK")
</pallas_src>

<mosaic_0001>
module attributes {stable_mosaic.version = 11 : i64} {
  func.func @kernel(%arg0: i32, %arg1: memref<1x256x32xf32, #tpu.memory_space<vmem>>, %arg2: memref<32x32x32xf32, #tpu.memory_space<vmem>>, %arg3: memref<1x32xf32, #tpu.memory_space<vmem>>, %arg4: memref<1x32xf32, #tpu.memory_space<vmem>>, %arg5: memref<32x96xf32, #tpu.memory_space<vmem>>, %arg6: memref<1x96xf32, #tpu.memory_space<vmem>>, %arg7: memref<32x32xf32, #tpu.memory_space<vmem>>, %arg8: memref<1x32xf32, #tpu.memory_space<vmem>>, %arg9: memref<1x32xf32, #tpu.memory_space<vmem>>, %arg10: memref<1x32xf32, #tpu.memory_space<vmem>>, %arg11: memref<32x128xf32, #tpu.memory_space<vmem>>, %arg12: memref<1x128xf32, #tpu.memory_space<vmem>>, %arg13: memref<128x32xf32, #tpu.memory_space<vmem>>, %arg14: memref<1x32xf32, #tpu.memory_space<vmem>>, %arg15: memref<1x256x32xf32, #tpu.memory_space<vmem>>) attributes {dimension_semantics = [#tpu.dimension_semantics<parallel>], iteration_bounds = array<i64: 2>, scalar_prefetch = 0 : i64, scratch_operands = 0 : i64, tpu.core_type = #tpu.core_type<tc>, window_params = [{transform_indices = @transform_0, window_bounds = array<i64: 1, 256, 32>}, {pipeline_mode = #tpu.pipeline_mode<synchronous>, transform_indices = @transform_1, window_bounds = array<i64: 32, 32, 32>}, {pipeline_mode = #tpu.pipeline_mode<synchronous>, transform_indices = @transform_2, window_bounds = array<i64: 1, 32>}, {pipeline_mode = #tpu.pipeline_mode<synchronous>, transform_indices = @transform_3, window_bounds = array<i64: 1, 32>}, {pipeline_mode = #tpu.pipeline_mode<synchronous>, transform_indices = @transform_4, window_bounds = array<i64: 32, 96>}, {pipeline_mode = #tpu.pipeline_mode<synchronous>, transform_indices = @transform_5, window_bounds = array<i64: 1, 96>}, {pipeline_mode = #tpu.pipeline_mode<synchronous>, transform_indices = @transform_6, window_bounds = array<i64: 32, 32>}, {pipeline_mode = #tpu.pipeline_mode<synchronous>, transform_indices = @transform_7, window_bounds = array<i64: 1, 32>}, {pipeline_mode = #tpu.pipeline_mode<synchronous>, transform_indices = @transform_8, window_bounds = array<i64: 1, 32>}, {pipeline_mode = #tpu.pipeline_mode<synchronous>, transform_indices = @transform_9, window_bounds = array<i64: 1, 32>}, {pipeline_mode = #tpu.pipeline_mode<synchronous>, transform_indices = @transform_10, window_bounds = array<i64: 32, 128>}, {pipeline_mode = #tpu.pipeline_mode<synchronous>, transform_indices = @transform_11, window_bounds = array<i64: 1, 128>}, {pipeline_mode = #tpu.pipeline_mode<synchronous>, transform_indices = @transform_12, window_bounds = array<i64: 128, 32>}, {pipeline_mode = #tpu.pipeline_mode<synchronous>, transform_indices = @transform_13, window_bounds = array<i64: 1, 32>}, {transform_indices = @transform_14, window_bounds = array<i64: 1, 256, 32>}]} {
    %c0 = arith.constant 0 : index
    %c0_0 = arith.constant 0 : index
    %c0_1 = arith.constant 0 : index
    %0 = vector.load %arg1[%c0, %c0_0, %c0_1] : memref<1x256x32xf32, #tpu.memory_space<vmem>>, vector<1x256x32xf32>
    %1 = vector.shape_cast %0 : vector<1x256x32xf32> to vector<256x32xf32>
    %c0_2 = arith.constant 0 : index
    %c0_3 = arith.constant 0 : index
    %2 = vector.load %arg3[%c0_2, %c0_3] : memref<1x32xf32, #tpu.memory_space<vmem>>, vector<1x32xf32>
    %c0_4 = arith.constant 0 : index
    %c0_5 = arith.constant 0 : index
    %3 = vector.load %arg4[%c0_4, %c0_5] : memref<1x32xf32, #tpu.memory_space<vmem>>, vector<1x32xf32>
    %cst = arith.constant dense<0.000000e+00> : vector<256xf32>
    %4 = vector.multi_reduction <add>, %1, %cst [1] : vector<256x32xf32> to vector<256xf32>
    %5 = vector.shape_cast %4 : vector<256xf32> to vector<256x1xf32>
    %cst_6 = arith.constant 3.200000e+01 : f32
    %6 = vector.broadcast %cst_6 : f32 to vector<256x1xf32>
    %7 = arith.divf %5, %6 : vector<256x1xf32>
    %8 = vector.broadcast %7 : vector<256x1xf32> to vector<256x32xf32>
    %9 = arith.subf %1, %8 : vector<256x32xf32>
    %10 = arith.mulf %9, %9 : vector<256x32xf32>
    %cst_7 = arith.constant dense<0.000000e+00> : vector<256xf32>
    %11 = vector.multi_reduction <add>, %10, %cst_7 [1] : vector<256x32xf32> to vector<256xf32>
    %12 = vector.shape_cast %11 : vector<256xf32> to vector<256x1xf32>
    %cst_8 = arith.constant 3.200000e+01 : f32
    %13 = vector.broadcast %cst_8 : f32 to vector<256x1xf32>
    %14 = arith.divf %12, %13 : vector<256x1xf32>
    %15 = vector.broadcast %7 : vector<256x1xf32> to vector<256x32xf32>
    %16 = arith.subf %1, %15 : vector<256x32xf32>
    %cst_9 = arith.constant 9.99999974E-6 : f32
    %17 = vector.broadcast %cst_9 : f32 to vector<256x1xf32>
    %18 = arith.addf %14, %17 : vector<256x1xf32>
    %19 = math.rsqrt %18 : vector<256x1xf32>
    %20 = vector.broadcast %19 : vector<256x1xf32> to vector<256x32xf32>
    %21 = arith.mulf %16, %20 : vector<256x32xf32>
    %22 = vector.broadcast %2 : vector<1x32xf32> to vector<256x32xf32>
    %23 = arith.mulf %21, %22 : vector<256x32xf32>
    %24 = vector.broadcast %3 : vector<1x32xf32> to vector<256x32xf32>
    %25 = arith.addf %23, %24 : vector<256x32xf32>
    %c0_10 = arith.constant 0 : index
    %c0_11 = arith.constant 0 : index
    %26 = vector.load %arg5[%c0_10, %c0_11] : memref<32x96xf32, #tpu.memory_space<vmem>>, vector<32x96xf32>
    %cst_12 = arith.constant dense<0.000000e+00> : vector<256x96xf32>
    %27 = tpu.matmul %25, %26, %cst_12 {dimension_numbers = #tpu.dot_dimension_numbers<[1], [0], [0], [1], [0, 0, 1, 1], [], []>} : vector<256x32xf32>, vector<32x96xf32>, vector<256x96xf32> -> vector<256x96xf32>
    %c0_13 = arith.constant 0 : index
    %c0_14 = arith.constant 0 : index
    %28 = vector.load %arg6[%c0_13, %c0_14] : memref<1x96xf32, #tpu.memory_space<vmem>>, vector<1x96xf32>
    %29 = vector.broadcast %28 : vector<1x96xf32> to vector<256x96xf32>
    %30 = arith.addf %27, %29 : vector<256x96xf32>
    %31 = vector.extract_strided_slice %30 {offsets = [0, 0], sizes = [256, 8], strides = [1, 1]} : vector<256x96xf32> to vector<256x8xf32>
    %32 = vector.shape_cast %31 : vector<256x8xf32> to vector<8x32x8xf32>
    %33 = vector.extract_strided_slice %30 {offsets = [0, 8], sizes = [256, 8], strides = [1, 1]} : vector<256x96xf32> to vector<256x8xf32>
    %34 = vector.shape_cast %33 : vector<256x8xf32> to vector<8x32x8xf32>
    %35 = vector.extract_strided_slice %30 {offsets = [0, 16], sizes = [256, 8], strides = [1, 1]} : vector<256x96xf32> to vector<256x8xf32>
    %36 = vector.shape_cast %35 : vector<256x8xf32> to vector<8x32x8xf32>
    %37 = vector.extract_strided_slice %30 {offsets = [0, 24], sizes = [256, 8], strides = [1, 1]} : vector<256x96xf32> to vector<256x8xf32>
    %38 = vector.shape_cast %37 : vector<256x8xf32> to vector<8x32x8xf32>
    %39 = vector.shape_cast %32 : vector<8x32x8xf32> to vector<1x8x32x8xf32>
    %40 = vector.shape_cast %34 : vector<8x32x8xf32> to vector<1x8x32x8xf32>
    %41 = vector.shape_cast %36 : vector<8x32x8xf32> to vector<1x8x32x8xf32>
    %42 = vector.shape_cast %38 : vector<8x32x8xf32> to vector<1x8x32x8xf32>
    %43 = tpu.concatenate %39, %40, %41, %42 in 0 : vector<1x8x32x8xf32>, vector<1x8x32x8xf32>, vector<1x8x32x8xf32>, vector<1x8x32x8xf32> -> vector<4x8x32x8xf32>
    %44 = vector.shape_cast %43 : vector<4x8x32x8xf32> to vector<32x32x8xf32>
    %45 = vector.extract_strided_slice %30 {offsets = [0, 32], sizes = [256, 8], strides = [1, 1]} : vector<256x96xf32> to vector<256x8xf32>
    %46 = vector.shape_cast %45 : vector<256x8xf32> to vector<8x32x8xf32>
    %47 = vector.extract_strided_slice %30 {offsets = [0, 40], sizes = [256, 8], strides = [1, 1]} : vector<256x96xf32> to vector<256x8xf32>
    %48 = vector.shape_cast %47 : vector<256x8xf32> to vector<8x32x8xf32>
    %49 = vector.extract_strided_slice %30 {offsets = [0, 48], sizes = [256, 8], strides = [1, 1]} : vector<256x96xf32> to vector<256x8xf32>
    %50 = vector.shape_cast %49 : vector<256x8xf32> to vector<8x32x8xf32>
    %51 = vector.extract_strided_slice %30 {offsets = [0, 56], sizes = [256, 8], strides = [1, 1]} : vector<256x96xf32> to vector<256x8xf32>
    %52 = vector.shape_cast %51 : vector<256x8xf32> to vector<8x32x8xf32>
    %53 = vector.shape_cast %46 : vector<8x32x8xf32> to vector<1x8x32x8xf32>
    %54 = vector.shape_cast %48 : vector<8x32x8xf32> to vector<1x8x32x8xf32>
    %55 = vector.shape_cast %50 : vector<8x32x8xf32> to vector<1x8x32x8xf32>
    %56 = vector.shape_cast %52 : vector<8x32x8xf32> to vector<1x8x32x8xf32>
    %57 = tpu.concatenate %53, %54, %55, %56 in 0 : vector<1x8x32x8xf32>, vector<1x8x32x8xf32>, vector<1x8x32x8xf32>, vector<1x8x32x8xf32> -> vector<4x8x32x8xf32>
    %58 = vector.shape_cast %57 : vector<4x8x32x8xf32> to vector<32x32x8xf32>
    %59 = vector.extract_strided_slice %30 {offsets = [0, 64], sizes = [256, 8], strides = [1, 1]} : vector<256x96xf32> to vector<256x8xf32>
    %60 = vector.shape_cast %59 : vector<256x8xf32> to vector<8x32x8xf32>
    %61 = vector.extract_strided_slice %30 {offsets = [0, 72], sizes = [256, 8], strides = [1, 1]} : vector<256x96xf32> to vector<256x8xf32>
    %62 = vector.shape_cast %61 : vector<256x8xf32> to vector<8x32x8xf32>
    %63 = vector.extract_strided_slice %30 {offsets = [0, 80], sizes = [256, 8], strides = [1, 1]} : vector<256x96xf32> to vector<256x8xf32>
    %64 = vector.shape_cast %63 : vector<256x8xf32> to vector<8x32x8xf32>
    %65 = vector.extract_strided_slice %30 {offsets = [0, 88], sizes = [256, 8], strides = [1, 1]} : vector<256x96xf32> to vector<256x8xf32>
    %66 = vector.shape_cast %65 : vector<256x8xf32> to vector<8x32x8xf32>
    %67 = vector.shape_cast %60 : vector<8x32x8xf32> to vector<1x8x32x8xf32>
    %68 = vector.shape_cast %62 : vector<8x32x8xf32> to vector<1x8x32x8xf32>
    %69 = vector.shape_cast %64 : vector<8x32x8xf32> to vector<1x8x32x8xf32>
    %70 = vector.shape_cast %66 : vector<8x32x8xf32> to vector<1x8x32x8xf32>
    %71 = tpu.concatenate %67, %68, %69, %70 in 0 : vector<1x8x32x8xf32>, vector<1x8x32x8xf32>, vector<1x8x32x8xf32>, vector<1x8x32x8xf32> -> vector<4x8x32x8xf32>
    %72 = vector.shape_cast %71 : vector<4x8x32x8xf32> to vector<32x32x8xf32>
    "tpu.trace_start"() <{level = 10 : i32, message = "bqd,bkd->bqk"}> : () -> ()
    %cst_15 = arith.constant dense<0.000000e+00> : vector<32x32x32xf32>
    %73 = tpu.matmul %44, %58, %cst_15 {dimension_numbers = #tpu.dot_dimension_numbers<[2], [2], [1], [1], [0, 0, 0, 1, 1, 1], [0], [0]>} : vector<32x32x8xf32>, vector<32x32x8xf32>, vector<32x32x32xf32> -> vector<32x32x32xf32>
    "tpu.trace_stop"() : () -> ()
    %c0_16 = arith.constant 0 : index
    %c0_17 = arith.constant 0 : index
    %c0_18 = arith.constant 0 : index
    %74 = vector.load %arg2[%c0_16, %c0_17, %c0_18] : memref<32x32x32xf32, #tpu.memory_space<vmem>>, vector<32x32x32xf32>
    %75 = arith.addf %73, %74 : vector<32x32x32xf32>
    %cst_19 = arith.constant dense<0xFF800000> : vector<32x32xf32>
    %76 = vector.multi_reduction <maximumf>, %75, %cst_19 [2] : vector<32x32x32xf32> to vector<32x32xf32>
    %77 = vector.shape_cast %76 : vector<32x32xf32> to vector<32x32x1xf32>
    %78 = vector.broadcast %77 : vector<32x32x1xf32> to vector<32x32x32xf32>
    %79 = arith.subf %75, %78 : vector<32x32x32xf32>
    %80 = math.exp %79 : vector<32x32x32xf32>
    %cst_20 = arith.constant dense<0.000000e+00> : vector<32x32xf32>
    %81 = vector.multi_reduction <add>, %80, %cst_20 [2] : vector<32x32x32xf32> to vector<32x32xf32>
    %82 = vector.shape_cast %81 : vector<32x32xf32> to vector<32x32x1xf32>
    %83 = tpu.reciprocal %82 {approx = true} : vector<32x32x1xf32> -> vector<32x32x1xf32>
    %84 = vector.broadcast %83 : vector<32x32x1xf32> to vector<32x32x32xf32>
    %85 = arith.mulf %80, %84 : vector<32x32x32xf32>
    "tpu.trace_start"() <{level = 10 : i32, message = "bqk,bkd->bqd"}> : () -> ()
    %cst_21 = arith.constant dense<0.000000e+00> : vector<32x32x8xf32>
    %86 = tpu.matmul %85, %72, %cst_21 {dimension_numbers = #tpu.dot_dimension_numbers<[2], [1], [1], [2], [0, 0, 0, 1, 1, 2], [0], [0]>} : vector<32x32x32xf32>, vector<32x32x8xf32>, vector<32x32x8xf32> -> vector<32x32x8xf32>
    "tpu.trace_stop"() : () -> ()
    %87 = vector.shape_cast %86 : vector<32x32x8xf32> to vector<4x256x8xf32>
    %c0_22 = arith.constant 0 : index
    %c0_23 = arith.constant 0 : index
    %88 = vector.load %arg7[%c0_22, %c0_23] : memref<32x32xf32, #tpu.memory_space<vmem>>, vector<32x32xf32>
    %89 = vector.shape_cast %88 : vector<32x32xf32> to vector<4x8x32xf32>
    "tpu.trace_start"() <{level = 10 : i32, message = "htd,hdc->htc"}> : () -> ()
    %cst_24 = arith.constant dense<0.000000e+00> : vector<4x256x32xf32>
    %90 = tpu.matmul %87, %89, %cst_24 {dimension_numbers = #tpu.dot_dimension_numbers<[2], [1], [1], [2], [0, 0, 0, 1, 1, 2], [0], [0]>} : vector<4x256x8xf32>, vector<4x8x32xf32>, vector<4x256x32xf32> -> vector<4x256x32xf32>
    "tpu.trace_stop"() : () -> ()
    %cst_25 = arith.constant dense<0.000000e+00> : vector<256x32xf32>
    %91 = vector.multi_reduction <add>, %90, %cst_25 [0] : vector<4x256x32xf32> to vector<256x32xf32>
    %92 = arith.addf %1, %91 : vector<256x32xf32>
    %c0_26 = arith.constant 0 : index
    %c0_27 = arith.constant 0 : index
    %93 = vector.load %arg8[%c0_26, %c0_27] : memref<1x32xf32, #tpu.memory_space<vmem>>, vector<1x32xf32>
    %94 = vector.broadcast %93 : vector<1x32xf32> to vector<256x32xf32>
    %95 = arith.addf %92, %94 : vector<256x32xf32>
    %c0_28 = arith.constant 0 : index
    %c0_29 = arith.constant 0 : index
    %96 = vector.load %arg9[%c0_28, %c0_29] : memref<1x32xf32, #tpu.memory_space<vmem>>, vector<1x32xf32>
    %c0_30 = arith.constant 0 : index
    %c0_31 = arith.constant 0 : index
    %97 = vector.load %arg10[%c0_30, %c0_31] : memref<1x32xf32, #tpu.memory_space<vmem>>, vector<1x32xf32>
    %cst_32 = arith.constant dense<0.000000e+00> : vector<256xf32>
    %98 = vector.multi_reduction <add>, %95, %cst_32 [1] : vector<256x32xf32> to vector<256xf32>
    %99 = vector.shape_cast %98 : vector<256xf32> to vector<256x1xf32>
    %cst_33 = arith.constant 3.200000e+01 : f32
    %100 = vector.broadcast %cst_33 : f32 to vector<256x1xf32>
    %101 = arith.divf %99, %100 : vector<256x1xf32>
    %102 = vector.broadcast %101 : vector<256x1xf32> to vector<256x32xf32>
    %103 = arith.subf %95, %102 : vector<256x32xf32>
    %104 = arith.mulf %103, %103 : vector<256x32xf32>
    %cst_34 = arith.constant dense<0.000000e+00> : vector<256xf32>
    %105 = vector.multi_reduction <add>, %104, %cst_34 [1] : vector<256x32xf32> to vector<256xf32>
    %106 = vector.shape_cast %105 : vector<256xf32> to vector<256x1xf32>
    %cst_35 = arith.constant 3.200000e+01 : f32
    %107 = vector.broadcast %cst_35 : f32 to vector<256x1xf32>
    %108 = arith.divf %106, %107 : vector<256x1xf32>
    %109 = vector.broadcast %101 : vector<256x1xf32> to vector<256x32xf32>
    %110 = arith.subf %95, %109 : vector<256x32xf32>
    %cst_36 = arith.constant 9.99999974E-6 : f32
    %111 = vector.broadcast %cst_36 : f32 to vector<256x1xf32>
    %112 = arith.addf %108, %111 : vector<256x1xf32>
    %113 = math.rsqrt %112 : vector<256x1xf32>
    %114 = vector.broadcast %113 : vector<256x1xf32> to vector<256x32xf32>
    %115 = arith.mulf %110, %114 : vector<256x32xf32>
    %116 = vector.broadcast %96 : vector<1x32xf32> to vector<256x32xf32>
    %117 = arith.mulf %115, %116 : vector<256x32xf32>
    %118 = vector.broadcast %97 : vector<1x32xf32> to vector<256x32xf32>
    %119 = arith.addf %117, %118 : vector<256x32xf32>
    %c0_37 = arith.constant 0 : index
    %c0_38 = arith.constant 0 : index
    %120 = vector.load %arg11[%c0_37, %c0_38] : memref<32x128xf32, #tpu.memory_space<vmem>>, vector<32x128xf32>
    %cst_39 = arith.constant dense<0.000000e+00> : vector<256x128xf32>
    %121 = tpu.matmul %119, %120, %cst_39 {dimension_numbers = #tpu.dot_dimension_numbers<[1], [0], [0], [1], [0, 0, 1, 1], [], []>} : vector<256x32xf32>, vector<32x128xf32>, vector<256x128xf32> -> vector<256x128xf32>
    %c0_40 = arith.constant 0 : index
    %c0_41 = arith.constant 0 : index
    %122 = vector.load %arg12[%c0_40, %c0_41] : memref<1x128xf32, #tpu.memory_space<vmem>>, vector<1x128xf32>
    %123 = vector.broadcast %122 : vector<1x128xf32> to vector<256x128xf32>
    %124 = arith.addf %121, %123 : vector<256x128xf32>
    %cst_42 = arith.constant 5.000000e-01 : f32
    %125 = vector.broadcast %cst_42 : f32 to vector<256x128xf32>
    %126 = arith.mulf %125, %124 : vector<256x128xf32>
    %cst_43 = arith.constant 0.707106769 : f32
    %127 = vector.broadcast %cst_43 : f32 to vector<256x128xf32>
    %128 = arith.mulf %124, %127 : vector<256x128xf32>
    %129 = math.erf %128 : vector<256x128xf32>
    %cst_44 = arith.constant 1.000000e+00 : f32
    %130 = vector.broadcast %cst_44 : f32 to vector<256x128xf32>
    %131 = arith.addf %130, %129 : vector<256x128xf32>
    %132 = arith.mulf %126, %131 : vector<256x128xf32>
    %c0_45 = arith.constant 0 : index
    %c0_46 = arith.constant 0 : index
    %133 = vector.load %arg13[%c0_45, %c0_46] : memref<128x32xf32, #tpu.memory_space<vmem>>, vector<128x32xf32>
    %cst_47 = arith.constant dense<0.000000e+00> : vector<256x32xf32>
    %134 = tpu.matmul %132, %133, %cst_47 {dimension_numbers = #tpu.dot_dimension_numbers<[1], [0], [0], [1], [0, 0, 1, 1], [], []>} : vector<256x128xf32>, vector<128x32xf32>, vector<256x32xf32> -> vector<256x32xf32>
    %135 = arith.addf %95, %134 : vector<256x32xf32>
    %c0_48 = arith.constant 0 : index
    %c0_49 = arith.constant 0 : index
    %136 = vector.load %arg14[%c0_48, %c0_49] : memref<1x32xf32, #tpu.memory_space<vmem>>, vector<1x32xf32>
    %137 = vector.broadcast %136 : vector<1x32xf32> to vector<256x32xf32>
    %138 = arith.addf %135, %137 : vector<256x32xf32>
    %139 = vector.shape_cast %138 : vector<256x32xf32> to vector<1x256x32xf32>
    %c0_50 = arith.constant 0 : index
    %c0_51 = arith.constant 0 : index
    %c0_52 = arith.constant 0 : index
    %140 = vector.load %arg15[%c0_50, %c0_51, %c0_52] : memref<1x256x32xf32, #tpu.memory_space<vmem>>, vector<1x256x32xf32>
    tpu.vector_store %arg15[%c0_50, %c0_51, %c0_52], %139 {strides = array<i32>} : memref<1x256x32xf32, #tpu.memory_space<vmem>>, vector<1x256x32xf32>,
    return
  }
  func.func @transform_0(%arg0: i32) -> (i32, i32, i32) {
    %c0_i32 = arith.constant 0 : i32
    %c0_i32_0 = arith.constant 0 : i32
    %c0_i32_1 = arith.constant 0 : i32
    return %arg0, %c0_i32, %c0_i32_0 : i32, i32, i32
  }
  func.func @transform_1(%arg0: i32) -> (i32, i32, i32) {
    %c0_i32 = arith.constant 0 : i32
    %c0_i32_0 = arith.constant 0 : i32
    %c0_i32_1 = arith.constant 0 : i32
    %c0_i32_2 = arith.constant 0 : i32
    return %c0_i32, %c0_i32_0, %c0_i32_1 : i32, i32, i32
  }
  func.func @transform_2(%arg0: i32) -> (i32, i32) {
    %c0_i32 = arith.constant 0 : i32
    %c0_i32_0 = arith.constant 0 : i32
    %c0_i32_1 = arith.constant 0 : i32
    return %c0_i32, %c0_i32_0 : i32, i32
  }
  func.func @transform_3(%arg0: i32) -> (i32, i32) {
    %c0_i32 = arith.constant 0 : i32
    %c0_i32_0 = arith.constant 0 : i32
    %c0_i32_1 = arith.constant 0 : i32
    return %c0_i32, %c0_i32_0 : i32, i32
  }
  func.func @transform_4(%arg0: i32) -> (i32, i32) {
    %c0_i32 = arith.constant 0 : i32
    %c0_i32_0 = arith.constant 0 : i32
    %c0_i32_1 = arith.constant 0 : i32
    return %c0_i32, %c0_i32_0 : i32, i32
  }
  func.func @transform_5(%arg0: i32) -> (i32, i32) {
    %c0_i32 = arith.constant 0 : i32
    %c0_i32_0 = arith.constant 0 : i32
    %c0_i32_1 = arith.constant 0 : i32
    return %c0_i32, %c0_i32_0 : i32, i32
  }
  func.func @transform_6(%arg0: i32) -> (i32, i32) {
    %c0_i32 = arith.constant 0 : i32
    %c0_i32_0 = arith.constant 0 : i32
    %c0_i32_1 = arith.constant 0 : i32
    return %c0_i32, %c0_i32_0 : i32, i32
  }
  func.func @transform_7(%arg0: i32) -> (i32, i32) {
    %c0_i32 = arith.constant 0 : i32
    %c0_i32_0 = arith.constant 0 : i32
    %c0_i32_1 = arith.constant 0 : i32
    return %c0_i32, %c0_i32_0 : i32, i32
  }
  func.func @transform_8(%arg0: i32) -> (i32, i32) {
    %c0_i32 = arith.constant 0 : i32
    %c0_i32_0 = arith.constant 0 : i32
    %c0_i32_1 = arith.constant 0 : i32
    return %c0_i32, %c0_i32_0 : i32, i32
  }
  func.func @transform_9(%arg0: i32) -> (i32, i32) {
    %c0_i32 = arith.constant 0 : i32
    %c0_i32_0 = arith.constant 0 : i32
    %c0_i32_1 = arith.constant 0 : i32
    return %c0_i32, %c0_i32_0 : i32, i32
  }
  func.func @transform_10(%arg0: i32) -> (i32, i32) {
    %c0_i32 = arith.constant 0 : i32
    %c0_i32_0 = arith.constant 0 : i32
    %c0_i32_1 = arith.constant 0 : i32
    return %c0_i32, %c0_i32_0 : i32, i32
  }
  func.func @transform_11(%arg0: i32) -> (i32, i32) {
    %c0_i32 = arith.constant 0 : i32
    %c0_i32_0 = arith.constant 0 : i32
    %c0_i32_1 = arith.constant 0 : i32
    return %c0_i32, %c0_i32_0 : i32, i32
  }
  func.func @transform_12(%arg0: i32) -> (i32, i32) {
    %c0_i32 = arith.constant 0 : i32
    %c0_i32_0 = arith.constant 0 : i32
    %c0_i32_1 = arith.constant 0 : i32
    return %c0_i32, %c0_i32_0 : i32, i32
  }
  func.func @transform_13(%arg0: i32) -> (i32, i32) {
    %c0_i32 = arith.constant 0 : i32
    %c0_i32_0 = arith.constant 0 : i32
    %c0_i32_1 = arith.constant 0 : i32
    return %c0_i32, %c0_i32_0 : i32, i32
  }
  func.func @transform_14(%arg0: i32) -> (i32, i32, i32) {
    %c0_i32 = arith.constant 0 : i32
    %c0_i32_0 = arith.constant 0 : i32
    %c0_i32_1 = arith.constant 0 : i32
    return %arg0, %c0_i32, %c0_i32_0 : i32, i32, i32
  }
}

</mosaic_0001>

<bundles_post_ra>
// kernel: block_forward_pallas.1
= control target key start
LH: loop header
LB: loop body
LE: loop exit
PB: predicated region body
PF: predicated region fallthrough
CT: control target
= control target key end

     0   :  { %s17851_s29 = smov 0   ;;  %s24156_s0 = inlined_call_operand.vmem [shape: f32[2,256,32], index: 0, kind: input, shape index: {}]   ;;  %s24157_s1 = inlined_call_operand.vmem [shape: f32[32,32,32], index: 1, kind: input, shape index: {}]   ;;  %s24158_s2 = inlined_call_operand.vmem [shape: f32[1,32], index: 2, kind: input, shape index: {}]   ;;  %s24159_s3 = inlined_call_operand.vmem [shape: f32[1,32], index: 3, kind: input, shape index: {}]   ;;  %s24160_s4 = inlined_call_operand.vmem [shape: f32[32,96], index: 4, kind: input, shape index: {}]   ;;  %s24161_s5 = inlined_call_operand.vmem [shape: f32[1,96], index: 5, kind: input, shape index: {}]   ;;  %s24162_s6 = inlined_call_operand.vmem [shape: f32[32,32], index: 6, kind: input, shape index: {}]   ;;  %s24163_s7 = inlined_call_operand.vmem [shape: f32[1,32], index: 7, kind: input, shape index: {}]   ;;  %s24164_s8 = inlined_call_operand.vmem [shape: f32[1,32], index: 8, kind: input, shape index: {}]   ;;  %s24165_s9 = inlined_call_operand.vmem [shape: f32[1,32], index: 9, kind: input, shape index: {}]   ;;  %s24166_s10 = inlined_call_operand.vmem [shape: f32[32,128], index: 10, kind: input, shape index: {}]   ;;  %s24167_s11 = inlined_call_operand.vmem [shape: f32[1,128], index: 11, kind: input, shape index: {}]   ;;  %s24168_s12 = inlined_call_operand.vmem [shape: f32[128,32], index: 12, kind: input, shape index: {}]   ;;  %s24169_s13 = inlined_call_operand.vmem [shape: f32[1,32], index: 13, kind: input, shape index: {}]   ;;  %s24170_s14 = inlined_call_operand.vmem [shape: f32[2,256,32], index: 14, kind: output, shape index: {}]  }
   0x1 LB: > { %s13033_s30 = sadd.s32 4294967295, %s17769_s29   ;;  %p13037_p0 = scmp.ge.s32.totalorder %s17769_s29, 1  ;;  %s17769_s29 = sphi %s17851_s29, %s24_s29  }
   0x2   : > { %p412_p1 = scmp.lt.s32.totalorder %s17769_s29, 3 }
   0x4   : > { %p413_p2 = pnand %p13037_p0, %p412_p1 }
   0x6   : > { %416 = sbr.rel (%p413_p2) target bundleno = 4063 (0xfdf), region = 76 }
   0xd   : > { %p458_p3 = scmp.lt.s32.totalorder %s13033_s30, 1  ;;  %vm502_vm0 = vcmask 261120   ;;  %vm1688_vm1 = vcmask 64512   ;;  %s17771_s21 = smov 112  }
   0xe   : > { %s17772_s22 = smov 120   ;;  %s17773_s23 = smov 104   ;;  %vm18605_vm2 = vmpackc.low %vm1688_vm1, %vm1688_vm1 }
   0xf   : > { %s25286_s30 = smov (!%p458_p3, %s13033_s30), 1  ;;  %s17774_s24 = smov 96  }
  0x10   : > { %s13628_s15 = sshll.u32 %s25286_s30, 8  ;;  %s17775_s25 = smov 64  }
  0x11   : > { %s17867_s18 = scalar_lea.vmem %s24156_s0, %s13628_s15 }
  0x12   : > { %v17870_v0 = vld [vmem:[%s17867_s18 + $0x10] sm:$0xff]  ;;  %v17873_v1 = vld [vmem:[%s17867_s18] sm:$0xff]  ;;  %v17876_v2 = vld [vmem:[%s17867_s18 + $0x18] sm:$0xff] }
  0x13   : > { %v509_v3 = vsel %vm502_vm0, %v17870_v0, 0.0  ;;  %v503_v4 = vsel %vm502_vm0, %v17873_v1, 0.0  ;;  %v17883_v5 = vld [vmem:[%s17867_s18 + $0x8] sm:$0xff]  ;;  %v512_v6 = vsel %vm502_vm0, %v17876_v2, 0.0  ;;  %v17893_v9 = vld [vmem:[%s17867_s18 + $0x20] sm:$0xff]  ;;  %v17900_v12 = vld [vmem:[%s17867_s18 + $0x38] sm:$0xff] }
  0x14   : > { %510 = vadd.xlane.f32.xlu1 %v509_v3  ;;  %504 = vadd.xlane.f32.xlu0 %v503_v4  ;;  %v506_v7 = vsel %vm502_vm0, %v17883_v5, 0.0  ;;  %v17890_v8 = vld [vmem:[%s17867_s18 + $0x28] sm:$0xff]  ;;  %v515_v11 = vsel %vm502_vm0, %v17893_v9, 0.0  ;;  %v17903_v13 = vld [vmem:[%s17867_s18 + $0x30] sm:$0xff]  ;;  %v524_v14 = vsel %vm502_vm0, %v17900_v12, 0.0  ;;  %v17913_v17 = vld [vmem:[%s17867_s18 + $0x40] sm:$0xff] }
  0x15   : > { %v518_v10 = vsel %vm502_vm0, %v17890_v8, 0.0  ;;  %v521_v15 = vsel %vm502_vm0, %v17903_v13, 0.0  ;;  %v17910_v16 = vld [vmem:[%s17867_s18 + $0x48] sm:$0xff]  ;;  %v527_v19 = vsel %vm502_vm0, %v17913_v17, 0.0  ;;  %v17920_v20 = vld [vmem:[%s17867_s18 + $0x58] sm:$0xff]  ;;  %v17923_v21 = vld [vmem:[%s17867_s18 + $0x50] sm:$0xff] }
  0x16   : > { %v530_v18 = vsel %vm502_vm0, %v17910_v16, 0.0  ;;  %v536_v22 = vsel %vm502_vm0, %v17920_v20, 0.0  ;;  %v533_v23 = vsel %vm502_vm0, %v17923_v21, 0.0  ;;  %v17930_v24 = vld [vmem:[%s17867_s18 + $0x68] sm:$0xff]  ;;  %v17933_v25 = vld [vmem:[%s17867_s18 + $0x60] sm:$0xff]  ;;  %v17940_v28 = vld [vmem:[%s17867_s18 + $0x78] sm:$0xff] }
  0x17   : > { %v542_v26 = vsel %vm502_vm0, %v17930_v24, 0.0  ;;  %v539_v27 = vsel %vm502_vm0, %v17933_v25, 0.0  ;;  %v17943_v29 = vld [vmem:[%s17867_s18 + $0x70] sm:$0xff]  ;;  %v548_v30 = vsel %vm502_vm0, %v17940_v28, 0.0  ;;  %v17950_v32 = vld [vmem:[%s17867_s18 + $0x88] sm:$0xff]  ;;  %v17953_v33 = vld [vmem:[%s17867_s18 + $0x80] sm:$0xff] }
  0x18   : > { %513 = vadd.xlane.f32.xlu1 %v512_v6  ;;  %507 = vadd.xlane.f32.xlu0 %v506_v7  ;;  %v545_v31 = vsel %vm502_vm0, %v17943_v29, 0.0  ;;  %v554_v34 = vsel %vm502_vm0, %v17950_v32, 0.0  ;;  %v551_v35 = vsel %vm502_vm0, %v17953_v33, 0.0  ;;  %v17960_v36 = vld [vmem:[%s17867_s18 + $0x98] sm:$0xff]  ;;  %v17963_v37 = vld [vmem:[%s17867_s18 + $0x90] sm:$0xff]  ;;  %v17970_v40 = vld [vmem:[%s17867_s18 + $0xa8] sm:$0xff] }
  0x19   : > { %v560_v38 = vsel %vm502_vm0, %v17960_v36, 0.0  ;;  %v557_v39 = vsel %vm502_vm0, %v17963_v37, 0.0  ;;  %v17973_v41 = vld [vmem:[%s17867_s18 + $0xa0] sm:$0xff]  ;;  %v566_v42 = vsel %vm502_vm0, %v17970_v40, 0.0  ;;  %v17980_v44 = vld [vmem:[%s17867_s18 + $0xb8] sm:$0xff]  ;;  %v17983_v45 = vld [vmem:[%s17867_s18 + $0xb0] sm:$0xff] }
  0x1a   : > { %v563_v43 = vsel %vm502_vm0, %v17973_v41, 0.0  ;;  %v572_v46 = vsel %vm502_vm0, %v17980_v44, 0.0  ;;  %v569_v47 = vsel %vm502_vm0, %v17983_v45, 0.0  ;;  %v17990_v48 = vld [vmem:[%s17867_s18 + $0xc8] sm:$0xff]  ;;  %v17993_v49 = vld [vmem:[%s17867_s18 + $0xc0] sm:$0xff]  ;;  %v18000_v52 = vld [vmem:[%s17867_s18 + $0xd8] sm:$0xff] }
  0x1b   : > { %v578_v50 = vsel %vm502_vm0, %v17990_v48, 0.0  ;;  %v575_v51 = vsel %vm502_vm0, %v17993_v49, 0.0  ;;  %v18003_v53 = vld [vmem:[%s17867_s18 + $0xd0] sm:$0xff]  ;;  %v584_v54 = vsel %vm502_vm0, %v18000_v52, 0.0  ;;  %v18010_v56 = vld [vmem:[%s17867_s18 + $0xe0] sm:$0xff]  ;;  %v18015_v58 = vld [vmem:[%s17867_s18 + $0xe8] sm:$0xff] }
  0x1c   : > { %519 = vadd.xlane.f32.xlu1 %v518_v10  ;;  %516 = vadd.xlane.f32.xlu0 %v515_v11  ;;  %v581_v55 = vsel %vm502_vm0, %v18003_v53, 0.0  ;;  %v587_v57 = vsel %vm502_vm0, %v18010_v56, 0.0  ;;  %v590_v59 = vsel %vm502_vm0, %v18015_v58, 0.0  ;;  %v18020_v60 = vld [vmem:[%s17867_s18 + $0xf0] sm:$0xff]  ;;  %v18025_v62 = vld [vmem:[%s17867_s18 + $0xf8] sm:$0xff] }
  0x1d   : > { %v593_v61 = vsel %vm502_vm0, %v18020_v60, 0.0  ;;  %v596_v63 = vsel %vm502_vm0, %v18025_v62, 0.0 }
  0x20   : > { %525 = vadd.xlane.f32.xlu1 %v524_v14  ;;  %522 = vadd.xlane.f32.xlu0 %v521_v15 }
  0x24   : > { %531 = vadd.xlane.f32.xlu1 %v530_v18  ;;  %528 = vadd.xlane.f32.xlu0 %v527_v19 }
  0x28   : > { %537 = vadd.xlane.f32.xlu1 %v536_v22  ;;  %534 = vadd.xlane.f32.xlu0 %v533_v23 }
  0x2c   : > { %543 = vadd.xlane.f32.xlu1 %v542_v26  ;;  %540 = vadd.xlane.f32.xlu0 %v539_v27 }
  0x30   : > { %549 = vadd.xlane.f32.xlu1 %v548_v30  ;;  %546 = vadd.xlane.f32.xlu0 %v545_v31 }
  0x34   : > { %555 = vadd.xlane.f32.xlu1 %v554_v34  ;;  %552 = vadd.xlane.f32.xlu0 %v551_v35 }
  0x38   : > { %561 = vadd.xlane.f32.xlu1 %v560_v38  ;;  %558 = vadd.xlane.f32.xlu0 %v557_v39 }
  0x3c   : > { %567 = vadd.xlane.f32.xlu1 %v566_v42  ;;  %564 = vadd.xlane.f32.xlu0 %v563_v43 }
  0x40   : > { %573 = vadd.xlane.f32.xlu1 %v572_v46  ;;  %570 = vadd.xlane.f32.xlu0 %v569_v47 }
  0x44   : > { %579 = vadd.xlane.f32.xlu1 %v578_v50  ;;  %576 = vadd.xlane.f32.xlu0 %v575_v51 }
  0x48   : > { %585 = vadd.xlane.f32.xlu1 %v584_v54  ;;  %582 = vadd.xlane.f32.xlu0 %v581_v55 }
  0x4c   : > { %588 = vadd.xlane.f32.xlu1 %v587_v57 }
  0x50   : > { %591 = vadd.xlane.f32.xlu1 %v590_v59 }
  0x54   : > { %594 = vadd.xlane.f32.xlu1 %v593_v61 }
  0x58   : > { %597 = vadd.xlane.f32.xlu1 %v596_v63 }
  0xa1   : > { %v511_v3 = vpop.xlane.xlu1 %510  ;;  %v505_v4 = vpop.xlane.xlu0 %504 }
  0xa2   : > { %v602_v6 = vmul.f32 0.03125, %v511_v3  ;;  %v600_v7 = vmul.f32 0.03125, %v505_v4 }
  0xa4   : > { %v18030_v10 = vsub.f32 %v17873_v1, %v600_v7  ;;  %v18033_v15 = vsub.f32 %v17870_v0, %v602_v6 }
  0xa5   : > { %v514_v11 = vpop.xlane.xlu1 %513  ;;  %v508_v14 = vpop.xlane.xlu0 %507 }
  0xa6   : > { %v603_v18 = vmul.f32 0.03125, %v514_v11  ;;  %v601_v19 = vmul.f32 0.03125, %v508_v14  ;;  %v664_v22 = vmul.f32 %v18030_v10, %v18030_v10  ;;  %v666_v34 = vmul.f32 %v18033_v15, %v18033_v15 }
  0xa8   : > { %v18038_v23 = vsub.f32 %v17883_v5, %v601_v19  ;;  %v696_v26 = vsel %vm502_vm0, %v664_v22, 0.0  ;;  %v18042_v27 = vsub.f32 %v17876_v2, %v603_v18  ;;  %v702_v50 = vsel %vm502_vm0, %v666_v34, 0.0 }
  0xa9   : > { %v520_v1 = vpop.xlane.xlu1 %519  ;;  %697 = vadd.xlane.f32.xlu0 %v696_v26  ;;  %v517_v30 = vpop.xlane.xlu0 %516 }
  0xaa   : > { %v605_v31 = vmul.f32 0.03125, %v520_v1  ;;  %v665_v0 = vmul.f32 %v18038_v23, %v18038_v23  ;;  %v604_v35 = vmul.f32 0.03125, %v517_v30  ;;  %v667_v42 = vmul.f32 %v18042_v27, %v18042_v27 }
  0xac   : > { %v18049_v38 = vsub.f32 %v17890_v8, %v605_v31  ;;  %v699_v5 = vsel %vm502_vm0, %v665_v0, 0.0  ;;  %v18053_v2 = vsub.f32 %v17893_v9, %v604_v35  ;;  %v705_v9 = vsel %vm502_vm0, %v667_v42, 0.0 }
  0xad   : > { %v526_v39 = vpop.xlane.xlu1 %525  ;;  %700 = vadd.xlane.f32.xlu0 %v699_v5  ;;  %v523_v43 = vpop.xlane.xlu0 %522 }
  0xae   : > { %v607_v46 = vmul.f32 0.03125, %v526_v39  ;;  %v669_v47 = vmul.f32 %v18049_v38, %v18049_v38  ;;  %v606_v51 = vmul.f32 0.03125, %v523_v43  ;;  %v668_v57 = vmul.f32 %v18053_v2, %v18053_v2 }
  0xb0   : > { %v18061_v8 = vsub.f32 %v17900_v12, %v607_v46  ;;  %v711_v54 = vsel %vm502_vm0, %v669_v47, 0.0  ;;  %v18070_v3 = vsub.f32 %v17903_v13, %v606_v51  ;;  %v708_v11 = vsel %vm502_vm0, %v668_v57, 0.0 }
  0xb1   : > { %712 = vadd.xlane.f32.xlu1 %v711_v54  ;;  %v532_v55 = vpop.xlane.xlu1 %531  ;;  %703 = vadd.xlane.f32.xlu0 %v702_v50  ;;  %v529_v59 = vpop.xlane.xlu0 %528 }
  0xb2   : > { %v609_v61 = vmul.f32 0.03125, %v532_v55  ;;  %v671_v63 = vmul.f32 %v18061_v8, %v18061_v8  ;;  %v608_v12 = vmul.f32 0.03125, %v529_v59  ;;  %v670_v22 = vmul.f32 %v18070_v3, %v18070_v3 }
  0xb4   : > { %v18073_v4 = vsub.f32 %v17910_v16, %v609_v61  ;;  %v717_v6 = vsel %vm502_vm0, %v671_v63, 0.0  ;;  %v18078_v14 = vsub.f32 %v17913_v17, %v608_v12  ;;  %v714_v5 = vsel %vm502_vm0, %v670_v22, 0.0 }
  0xb5   : > { %718 = vadd.xlane.f32.xlu1 %v717_v6  ;;  %v538_v7 = vpop.xlane.xlu1 %537  ;;  %706 = vadd.xlane.f32.xlu0 %v705_v9  ;;  %v535_v18 = vpop.xlane.xlu0 %534 }
  0xb6   : > { %v611_v19 = vmul.f32 0.03125, %v538_v7  ;;  %v673_v13 = vmul.f32 %v18073_v4, %v18073_v4  ;;  %v610_v16 = vmul.f32 0.03125, %v535_v18  ;;  %v672_v31 = vmul.f32 %v18078_v14, %v18078_v14 }
  0xb8   : > { %v18085_v26 = vsub.f32 %v17920_v20, %v611_v19  ;;  %v723_v1 = vsel %vm502_vm0, %v673_v13, 0.0  ;;  %v18089_v17 = vsub.f32 %v17923_v21, %v610_v16  ;;  %v720_v21 = vsel %vm502_vm0, %v672_v31, 0.0 }
  0xb9   : > { %724 = vadd.xlane.f32.xlu1 %v723_v1  ;;  %v544_v30 = vpop.xlane.xlu1 %543  ;;  %709 = vadd.xlane.f32.xlu0 %v708_v11  ;;  %v541_v0 = vpop.xlane.xlu0 %540 }
  0xba   : > { %v613_v34 = vmul.f32 0.03125, %v544_v30  ;;  %v675_v35 = vmul.f32 %v18085_v26, %v18085_v26  ;;  %v612_v20 = vmul.f32 0.03125, %v541_v0  ;;  %v674_v46 = vmul.f32 %v18089_v17, %v18089_v17  ;;  %v996_v30 = vld [vmem:[%s24160_s4] sm:$0xff] }
  0xbc   : > { %v18097_v39 = vsub.f32 %v17930_v24, %v613_v34  ;;  %v729_v42 = vsel %vm502_vm0, %v675_v35, 0.0  ;;  %v18106_v54 = vsub.f32 %v17933_v25, %v612_v20  ;;  %v726_v59 = vsel %vm502_vm0, %v674_v46, 0.0 }
  0xbd   : > { %730 = vadd.xlane.f32.xlu1 %v729_v42  ;;  %v550_v43 = vpop.xlane.xlu1 %549  ;;  %715 = vadd.xlane.f32.xlu0 %v714_v5  ;;  %v547_v47 = vpop.xlane.xlu0 %546 }
  0xbe   : > { %v615_v50 = vmul.f32 0.03125, %v550_v43  ;;  %v677_v51 = vmul.f32 %v18097_v39, %v18097_v39  ;;  %v614_v24 = vmul.f32 0.03125, %v547_v47  ;;  %v676_v6 = vmul.f32 %v18106_v54, %v18106_v54  ;;  %v998_v47 = vld [vmem:[%s24160_s4 + $0x10] sm:$0xff] }
  0xc0   : > { %v18109_v55 = vsub.f32 %v17940_v28, %v615_v50  ;;  %v735_v9 = vsel %vm502_vm0, %v677_v51, 0.0  ;;  %v18114_v61 = vsub.f32 %v17943_v29, %v614_v24  ;;  %v732_v1 = vsel %vm502_vm0, %v676_v6, 0.0  ;;  %v999_v50 = vld [vmem:[%s24160_s4 + $0x18] sm:$0xff] }
  0xc1   : > { %736 = vadd.xlane.f32.xlu1 %v735_v9  ;;  %v556_v57 = vpop.xlane.xlu1 %555  ;;  %721 = vadd.xlane.f32.xlu0 %v720_v21  ;;  %v553_v63 = vpop.xlane.xlu0 %552  ;;  %v15686_v51 = vpack.c.bf16 %v999_v50, %v998_v47 }
  0xc2   : > { %v617_v12 = vmul.f32 0.03125, %v556_v57  ;;  %v679_v25 = vmul.f32 %v18109_v55, %v18109_v55  ;;  %v616_v28 = vmul.f32 0.03125, %v553_v63  ;;  %v678_v19 = vmul.f32 %v18114_v61, %v18114_v61 }
  0xc4   : > { %v18121_v7 = vsub.f32 %v17950_v32, %v617_v12  ;;  %v741_v11 = vsel %vm502_vm0, %v679_v25, 0.0  ;;  %v18125_v29 = vsub.f32 %v17953_v33, %v616_v28  ;;  %v997_v33 = vld [vmem:[%s24160_s4 + $0x8] sm:$0xff]  ;;  %v738_v5 = vsel %vm502_vm0, %v678_v19, 0.0 }
  0xc5   : > { %742 = vadd.xlane.f32.xlu1 %v741_v11  ;;  %v562_v18 = vpop.xlane.xlu1 %561  ;;  %727 = vadd.xlane.f32.xlu0 %v726_v59  ;;  %v559_v13 = vpop.xlane.xlu0 %558  ;;  %v15682_v31 = vpack.c.bf16 %v997_v33, %v996_v30 }
  0xc6   : > { %v619_v22 = vmul.f32 0.03125, %v562_v18  ;;  %v681_v16 = vmul.f32 %v18121_v7, %v18121_v7  ;;  %v618_v32 = vmul.f32 0.03125, %v559_v13  ;;  %v680_v20 = vmul.f32 %v18125_v29, %v18125_v29 }
  0xc7   : > { %15683 = vmatprep.subr.bf16.mxu0 %v15682_v31 }
  0xc8   : > { %v18139_v0 = vsub.f32 %v17960_v36, %v619_v22  ;;  %v747_v34 = vsel %vm502_vm0, %v681_v16, 0.0  ;;  %v18148_v46 = vsub.f32 %v17963_v37, %v618_v32  ;;  %15685 = vmatpush3.bf16.msra.mxu0 %v15682_v31  ;;  %v744_v57 = vsel %vm502_vm0, %v680_v20, 0.0 }
  0xc9   : > { %748 = vadd.xlane.f32.xlu1 %v747_v34  ;;  %v568_v35 = vpop.xlane.xlu1 %567  ;;  %733 = vadd.xlane.f32.xlu0 %v732_v1  ;;  %v565_v42 = vpop.xlane.xlu0 %564 }
  0xca   : > { %v621_v43 = vmul.f32 0.03125, %v568_v35  ;;  %v683_v21 = vmul.f32 %v18139_v0, %v18139_v0  ;;  %v620_v36 = vmul.f32 0.03125, %v565_v42  ;;  %v682_v6 = vmul.f32 %v18148_v46, %v18148_v46  ;;  %15687 = vmatprep.subr.bf16.mxu0 %v15686_v51 }
  0xcc   : > { %v18157_v24 = vsub.f32 %v17970_v40, %v621_v43  ;;  %v753_v9 = vsel %vm502_vm0, %v683_v21, 0.0  ;;  %v18162_v59 = vsub.f32 %v17973_v41, %v620_v36  ;;  %15689 = vmatpush3.bf16.msra.mxu0 %v15686_v51  ;;  %v750_v1 = vsel %vm502_vm0, %v682_v6, 0.0 }
  0xcd   : > { %754 = vadd.xlane.f32.xlu1 %v753_v9  ;;  %v574_v37 = vpop.xlane.xlu1 %573  ;;  %739 = vadd.xlane.f32.xlu0 %v738_v5  ;;  %v571_v63 = vpop.xlane.xlu0 %570 }
  0xce   : > { %v623_v12 = vmul.f32 0.03125, %v574_v37  ;;  %v685_v25 = vmul.f32 %v18157_v24, %v18157_v24  ;;  %v622_v40 = vmul.f32 0.03125, %v571_v63  ;;  %v684_v19 = vmul.f32 %v18162_v59, %v18162_v59 }
  0xd0   : > { %v18169_v28 = vsub.f32 %v17980_v44, %v623_v12  ;;  %v759_v11 = vsel %vm502_vm0, %v685_v25, 0.0  ;;  %v18173_v41 = vsub.f32 %v17983_v45, %v622_v40  ;;  %v756_v45 = vsel %vm502_vm0, %v684_v19, 0.0 }
  0xd1   : > { %760 = vadd.xlane.f32.xlu1 %v759_v11  ;;  %v580_v18 = vpop.xlane.xlu1 %579  ;;  %745 = vadd.xlane.f32.xlu0 %v744_v57  ;;  %v577_v13 = vpop.xlane.xlu0 %576 }
  0xd2   : > { %v625_v22 = vmul.f32 0.03125, %v580_v18  ;;  %v687_v16 = vmul.f32 %v18169_v28, %v18169_v28  ;;  %v624_v44 = vmul.f32 0.03125, %v577_v13  ;;  %v686_v31 = vmul.f32 %v18173_v41, %v18173_v41 }
  0xd4   : > { %v18181_v32 = vsub.f32 %v17990_v48, %v625_v22  ;;  %v765_v30 = vsel %vm502_vm0, %v687_v16, 0.0  ;;  %v18190_v20 = vsub.f32 %v17993_v49, %v624_v44  ;;  %v762_v36 = vsel %vm502_vm0, %v686_v31, 0.0 }
  0xd5   : > { %766 = vadd.xlane.f32.xlu1 %v765_v30  ;;  %v586_v33 = vpop.xlane.xlu1 %585  ;;  %751 = vadd.xlane.f32.xlu0 %v750_v1  ;;  %v583_v34 = vpop.xlane.xlu0 %582 }
  0xd6   : > { %v627_v35 = vmul.f32 0.03125, %v586_v33  ;;  %v689_v5 = vmul.f32 %v18181_v32, %v18181_v32  ;;  %v626_v48 = vmul.f32 0.03125, %v583_v34  ;;  %v688_v49 = vmul.f32 %v18190_v20, %v18190_v20 }
  0xd8   : > { %v18193_v42 = vsub.f32 %v18000_v52, %v627_v35  ;;  %v771_v43 = vsel %vm502_vm0, %v689_v5, 0.0  ;;  %v18200_v51 = vsub.f32 %v18003_v53, %v626_v48  ;;  %v768_v63 = vsel %vm502_vm0, %v688_v49, 0.0 }
  0xd9   : > { %772 = vadd.xlane.f32.xlu1 %v771_v43  ;;  %v589_v21 = vpop.xlane.xlu1 %588  ;;  %757 = vadd.xlane.f32.xlu0 %v756_v45 }
  0xda   : > { %v628_v47 = vmul.f32 0.03125, %v589_v21  ;;  %v691_v50 = vmul.f32 %v18193_v42, %v18193_v42  ;;  %v690_v12 = vmul.f32 %v18200_v51, %v18200_v51 }
  0xdc   : > { %v777_v52 = vsel %vm502_vm0, %v691_v50, 0.0  ;;  %v18206_v37 = vsub.f32 %v18010_v56, %v628_v47  ;;  %v774_v11 = vsel %vm502_vm0, %v690_v12, 0.0  ;;  %v18236_v12 = vld [vmem:[%s24158_s2] ss:$0 sm:$0xff] }
  0xdd   : > { %778 = vadd.xlane.f32.xlu1 %v777_v52  ;;  %v592_v9 = vpop.xlane.xlu1 %591  ;;  %763 = vadd.xlane.f32.xlu0 %v762_v36 }
  0xde   : > { %v629_v57 = vmul.f32 0.03125, %v592_v9  ;;  %v692_v56 = vmul.f32 %v18206_v37, %v18206_v37 }
  0xe0   : > { %v18212_v53 = vsub.f32 %v18015_v58, %v629_v57  ;;  %v780_v22 = vsel %vm502_vm0, %v692_v56, 0.0 }
  0xe1   : > { %v595_v25 = vpop.xlane.xlu1 %594  ;;  %769 = vadd.xlane.f32.xlu0 %v768_v63 }
  0xe2   : > { %v630_v6 = vmul.f32 0.03125, %v595_v25  ;;  %v693_v40 = vmul.f32 %v18212_v53, %v18212_v53 }
  0xe4   : > { %v18220_v18 = vsub.f32 %v18020_v60, %v630_v6  ;;  %v783_v19 = vsel %vm502_vm0, %v693_v40, 0.0 }
  0xe5   : > { %784 = vadd.xlane.f32.xlu1 %v783_v19  ;;  %v598_v13 = vpop.xlane.xlu1 %597  ;;  %775 = vadd.xlane.f32.xlu0 %v774_v11 }
  0xe6   : > { %v631_v58 = vmul.f32 0.03125, %v598_v13  ;;  %v694_v16 = vmul.f32 %v18220_v18, %v18220_v18  ;;  %v18242_v13 = vld [vmem:[%s24159_s3] ss:$0 sm:$0xff] }
  0xe8   : > { %v18227_v1 = vsub.f32 %v18025_v62, %v631_v58  ;;  %v786_v60 = vsel %vm502_vm0, %v694_v16, 0.0 }
  0xe9   : > { %781 = vadd.xlane.f32.xlu0 %v780_v22 }
  0xea   : > { %v695_v44 = vmul.f32 %v18227_v1, %v18227_v1 }
  0xec   : > { %v789_v30 = vsel %vm502_vm0, %v695_v44, 0.0 }
  0xed   : > { %790 = vadd.xlane.f32.xlu1 %v789_v30  ;;  %787 = vadd.xlane.f32.xlu0 %v786_v60 }
 0x136   : > { %v698_v33 = vpop.xlane.xlu0 %697 }
 0x137   : > { %v792_v45 = vmul.f32 0.03125, %v698_v33 }
 0x139   : > { %v824_v31 = vadd.f32 1e-05, %v792_v45 }
 0x13a   : > { %v701_v34 = vpop.xlane.xlu0 %700 }
 0x13b   : > { %17027 = vrsqrt.f32 %v824_v31  ;;  %v793_v35 = vmul.f32 0.03125, %v701_v34 }
 0x13d   : > { %v825_v5 = vadd.f32 1e-05, %v793_v35 }
 0x13e   : > { %v713_v48 = vpop.xlane.xlu1 %712  ;;  %v704_v62 = vpop.xlane.xlu0 %703 }
 0x13f   : > { %17029 = vrsqrt.f32 %v825_v5  ;;  %v797_v43 = vmul.f32 0.03125, %v713_v48  ;;  %v794_v21 = vmul.f32 0.03125, %v704_v62 }
 0x141   : > { %v826_v36 = vadd.f32 1e-05, %v794_v21  ;;  %v829_v49 = vadd.f32 1e-05, %v797_v43 }
 0x142   : > { %v719_v47 = vpop.xlane.xlu1 %718  ;;  %v707_v50 = vpop.xlane.xlu0 %706 }
 0x143   : > { %v799_v52 = vmul.f32 0.03125, %v719_v47  ;;  %v795_v9 = vmul.f32 0.03125, %v707_v50  ;;  %17031 = vrsqrt.f32 %v826_v36 }
 0x144   : > { %17033 = vrsqrt.f32 %v829_v49 }
 0x145   : > { %v17028_v57 = vpop.eup %17027  ;;  %v827_v63 = vadd.f32 1e-05, %v795_v9  ;;  %v831_v11 = vadd.f32 1e-05, %v799_v52 }
 0x146   : > { %v725_v25 = vpop.xlane.xlu1 %724  ;;  %v710_v6 = vpop.xlane.xlu0 %709  ;;  %v888_v40 = vmul.f32 %v17028_v57, %v18030_v10 }
 0x147   : > { %v801_v56 = vmul.f32 0.03125, %v725_v25  ;;  %v796_v19 = vmul.f32 0.03125, %v710_v6  ;;  %17035 = vrsqrt.f32 %v827_v63 }
 0x148   : > { %v926_v58 = vmul.f32 %v18236_v12, %v888_v40  ;;  %17037 = vrsqrt.f32 %v831_v11 }
 0x149   : > { %v17030_v22 = vpop.eup %17029  ;;  %v828_v16 = vadd.f32 1e-05, %v796_v19  ;;  %v833_v44 = vadd.f32 1e-05, %v801_v56 }
 0x14a   : > { %v731_v60 = vpop.xlane.xlu1 %730  ;;  %v716_v30 = vpop.xlane.xlu0 %715  ;;  %v964_v33 = vadd.f32 %v18242_v13, %v926_v58  ;;  %v889_v10 = vmul.f32 %v17030_v22, %v18038_v23 }
 0x14b   : > { %v803_v45 = vmul.f32 0.03125, %v731_v60  ;;  %v798_v31 = vmul.f32 0.03125, %v716_v30  ;;  %17039 = vrsqrt.f32 %v828_v16 }
 0x14c   : > { %14402 = vmatprep.mubr.msk.f32.mxu0 %vm502_vm0, %v964_v33  ;;  %v927_v34 = vmul.f32 %v18236_v12, %v889_v10  ;;  %17041 = vrsqrt.f32 %v833_v44 }
 0x14d   : > { %v830_v35 = vadd.f32 1e-05, %v798_v31  ;;  %v17032_v5 = vpop.eup %17031  ;;  %v835_v21 = vadd.f32 1e-05, %v803_v45 }
 0x14e   : > { %v737_v48 = vpop.xlane.xlu1 %736  ;;  %v722_v62 = vpop.xlane.xlu0 %721  ;;  %v965_v43 = vadd.f32 %v18242_v13, %v927_v34  ;;  %v890_v23 = vmul.f32 %v17032_v5, %v18033_v15 }
 0x14f   : > { %v805_v36 = vmul.f32 0.03125, %v737_v48  ;;  %v800_v47 = vmul.f32 0.03125, %v722_v62  ;;  %17043 = vrsqrt.f32 %v830_v35  ;;  %v17034_v50 = vpop.eup %17033 }
 0x150   : > { %14403 = vmatmul.mubr.msk.f32.vlgmr.msra.gmra.mrb[0].mxu0 %vm502_vm0, %v965_v43  ;;  %v928_v52 = vmul.f32 %v18236_v12, %v890_v23  ;;  %17045 = vrsqrt.f32 %v835_v21  ;;  %v893_v15 = vmul.f32 %v17034_v50, %v18049_v38 }
 0x151   : > { %v832_v49 = vadd.f32 1e-05, %v800_v47  ;;  %v17036_v9 = vpop.eup %17035  ;;  %v837_v57 = vadd.f32 1e-05, %v805_v36 }
 0x152   : > { %v743_v63 = vpop.xlane.xlu1 %742  ;;  %v728_v25 = vpop.xlane.xlu0 %727  ;;  %v966_v11 = vadd.f32 %v18242_v13, %v928_v52  ;;  %v891_v56 = vmul.f32 %v17036_v9, %v18042_v27  ;;  %v931_v38 = vmul.f32 %v18236_v12, %v893_v15 }
 0x153   : > { %v807_v6 = vmul.f32 0.03125, %v743_v63  ;;  %v802_v40 = vmul.f32 0.03125, %v728_v25  ;;  %17047 = vrsqrt.f32 %v832_v49  ;;  %v17038_v19 = vpop.eup %17037 }
 0x154   : > { %14405 = vmatprep.mubr.msk.f32.mxu0 %vm502_vm0, %v966_v11  ;;  %17049 = vrsqrt.f32 %v837_v57  ;;  %v929_v60 = vmul.f32 %v18236_v12, %v891_v56  ;;  %v895_v34 = vmul.f32 %v17038_v19, %v18061_v8  ;;  %v969_v23 = vadd.f32 %v18242_v13, %v931_v38 }
 0x155   : > { %v834_v58 = vadd.f32 1e-05, %v802_v40  ;;  %v17040_v22 = vpop.eup %17039  ;;  %v839_v30 = vadd.f32 1e-05, %v807_v6 }
 0x156   : > { %v749_v16 = vpop.xlane.xlu1 %748  ;;  %v734_v44 = vpop.xlane.xlu0 %733  ;;  %v892_v45 = vmul.f32 %v17040_v22, %v18053_v2  ;;  %v967_v27 = vadd.f32 %v18242_v13, %v929_v60  ;;  %v933_v8 = vmul.f32 %v18236_v12, %v895_v34 }
 0x157   : > { %v809_v33 = vmul.f32 0.03125, %v749_v16  ;;  %v804_v10 = vmul.f32 0.03125, %v734_v44  ;;  %v17042_v31 = vpop.eup %17041  ;;  %17051 = vrsqrt.f32 %v834_v58 }
 0x158   : > { %v930_v5 = vmul.f32 %v18236_v12, %v892_v45  ;;  %14406 = vmatmul.mubr.msk.f32.gmra.mrb[2].mxu0 %vm502_vm0, %v967_v27  ;;  %17053 = vrsqrt.f32 %v839_v30  ;;  %v897_v9 = vmul.f32 %v17042_v31, %v18073_v4  ;;  %v971_v58 = vadd.f32 %v18242_v13, %v933_v8 }
 0x159   : > { %v836_v35 = vadd.f32 1e-05, %v804_v10  ;;  %v17044_v48 = vpop.eup %17043  ;;  %v841_v62 = vadd.f32 1e-05, %v809_v33 }
 0x15a   : > { %v755_v43 = vpop.xlane.xlu1 %754  ;;  %v740_v21 = vpop.xlane.xlu0 %739  ;;  %v968_v47 = vadd.f32 %v18242_v13, %v930_v5  ;;  %v894_v50 = vmul.f32 %v17044_v48, %v18070_v3  ;;  %v935_v16 = vmul.f32 %v18236_v12, %v897_v9 }
 0x15b   : > { %v811_v36 = vmul.f32 0.03125, %v755_v43  ;;  %v806_v2 = vmul.f32 0.03125, %v740_v21  ;;  %17055 = vrsqrt.f32 %v836_v35  ;;  %v17046_v49 = vpop.eup %17045 }
 0x15c   : > { %14408 = vmatprep.mubr.msk.f32.mxu0 %vm502_vm0, %v968_v47  ;;  %17057 = vrsqrt.f32 %v841_v62  ;;  %v932_v6 = vmul.f32 %v18236_v12, %v894_v50  ;;  %v899_v44 = vmul.f32 %v17046_v49, %v18085_v26  ;;  %v973_v26 = vadd.f32 %v18242_v13, %v935_v16 }
 0x15d   : > { %v838_v52 = vadd.f32 1e-05, %v806_v2  ;;  %v17048_v57 = vpop.eup %17047  ;;  %14409 = vmatmul.mubr.msk.f32.gmra.mrb[4].mxu0 %vm502_vm0, %v969_v23  ;;  %v843_v40 = vadd.f32 1e-05, %v811_v36 }
 0x15e   : > { %v761_v63 = vpop.xlane.xlu1 %760  ;;  %v746_v25 = vpop.xlane.xlu0 %745  ;;  %v896_v3 = vmul.f32 %v17048_v57, %v18078_v14  ;;  %v970_v19 = vadd.f32 %v18242_v13, %v932_v6  ;;  %v937_v35 = vmul.f32 %v18236_v12, %v899_v44 }
 0x15f   : > { %v813_v11 = vmul.f32 0.03125, %v761_v63  ;;  %v808_v56 = vmul.f32 0.03125, %v746_v25  ;;  %v17050_v15 = vpop.eup %17049  ;;  %17059 = vrsqrt.f32 %v838_v52 }
 0x160   : > { %v934_v22 = vmul.f32 %v18236_v12, %v896_v3  ;;  %14411 = vmatprep.mubr.msk.f32.mxu0 %vm502_vm0, %v970_v19  ;;  %17061 = vrsqrt.f32 %v843_v40  ;;  %v901_v5 = vmul.f32 %v17050_v15, %v18097_v39  ;;  %v975_v49 = vadd.f32 %v18242_v13, %v937_v35 }
 0x161   : > { %v840_v4 = vadd.f32 1e-05, %v808_v56  ;;  %v17052_v60 = vpop.eup %17051  ;;  %v845_v30 = vadd.f32 1e-05, %v813_v11  ;;  %14412 = vmatmul.mubr.msk.f32.gmra.mrb[6].mxu0 %vm502_vm0, %v971_v58 }
 0x162   : > { %v767_v33 = vpop.xlane.xlu1 %766  ;;  %v752_v10 = vpop.xlane.xlu0 %751  ;;  %v972_v31 = vadd.f32 %v18242_v13, %v934_v22  ;;  %v898_v27 = vmul.f32 %v17052_v60, %v18089_v17  ;;  %v939_v9 = vmul.f32 %v18236_v12, %v901_v5 }
 0x163   : > { %v815_v14 = vmul.f32 0.03125, %v767_v33  ;;  %v810_v45 = vmul.f32 0.03125, %v752_v10  ;;  %17063 = vrsqrt.f32 %v840_v4  ;;  %v17054_v38 = vpop.eup %17053 }
 0x164   : > { %14414 = vmatprep.mubr.msk.f32.mxu0 %vm502_vm0, %v972_v31  ;;  %17065 = vrsqrt.f32 %v845_v30  ;;  %v936_v21 = vmul.f32 %v18236_v12, %v898_v27  ;;  %v903_v8 = vmul.f32 %v17054_v38, %v18109_v55  ;;  %v977_v19 = vadd.f32 %v18242_v13, %v939_v9 }
 0x165   : > { %v842_v34 = vadd.f32 1e-05, %v810_v45  ;;  %v17056_v48 = vpop.eup %17055  ;;  %v847_v36 = vadd.f32 1e-05, %v815_v14  ;;  %14415 = vmatmul.mubr.msk.f32.gmra.mrb[8].mxu0 %vm502_vm0, %v973_v26 }
 0x166   : > { %v773_v62 = vpop.xlane.xlu1 %772  ;;  %v758_v43 = vpop.xlane.xlu0 %757  ;;  %v900_v47 = vmul.f32 %v17056_v48, %v18106_v54  ;;  %v974_v50 = vadd.f32 %v18242_v13, %v936_v21  ;;  %v941_v56 = vmul.f32 %v18236_v12, %v903_v8 }
 0x167   : > { %v817_v17 = vmul.f32 0.03125, %v773_v62  ;;  %v812_v2 = vmul.f32 0.03125, %v758_v43  ;;  %v17058_v23 = vpop.eup %17057  ;;  %17067 = vrsqrt.f32 %v842_v34 }
 0x168   : > { %v938_v52 = vmul.f32 %v18236_v12, %v900_v47  ;;  %14417 = vmatprep.mubr.msk.f32.mxu0 %vm502_vm0, %v974_v50  ;;  %17069 = vrsqrt.f32 %v847_v36  ;;  %v905_v58 = vmul.f32 %v17058_v23, %v18121_v7  ;;  %v979_v10 = vadd.f32 %v18242_v13, %v941_v56 }
 0x169   : > { %v844_v39 = vadd.f32 1e-05, %v812_v2  ;;  %v17060_v57 = vpop.eup %17059  ;;  %v849_v54 = vadd.f32 1e-05, %v817_v17  ;;  %14418 = vmatmul.mubr.msk.f32.gmra.mrb[10].mxu0 %vm502_vm0, %v975_v49 }
 0x16a   : > { %v779_v63 = vpop.xlane.xlu1 %778  ;;  %v764_v25 = vpop.xlane.xlu0 %763  ;;  %v976_v40 = vadd.f32 %v18242_v13, %v938_v52  ;;  %v902_v11 = vmul.f32 %v17060_v57, %v18114_v61  ;;  %v943_v45 = vmul.f32 %v18236_v12, %v905_v58 }
 0x16b   : > { %v814_v6 = vmul.f32 0.03125, %v764_v25  ;;  %17071 = vrsqrt.f32 %v844_v39  ;;  %v819_v55 = vmul.f32 0.03125, %v779_v63  ;;  %v17062_v3 = vpop.eup %17061 }
 0x16c   : > { %14420 = vmatprep.mubr.msk.f32.mxu0 %vm502_vm0, %v976_v40  ;;  %v940_v16 = vmul.f32 %v18236_v12, %v902_v11  ;;  %17073 = vrsqrt.f32 %v849_v54  ;;  %v907_v31 = vmul.f32 %v17062_v3, %v18139_v0  ;;  %v981_v21 = vadd.f32 %v18242_v13, %v943_v45 }
 0x16d   : > { %v846_v15 = vadd.f32 1e-05, %v814_v6  ;;  %v17064_v4 = vpop.eup %17063  ;;  %14421 = vmatmul.mubr.msk.f32.gmra.mrb[12].mxu0 %vm502_vm0, %v977_v19  ;;  %v851_v30 = vadd.f32 1e-05, %v819_v55 }
 0x16e   : > { %v770_v22 = vpop.xlane.xlu0 %769  ;;  %v904_v61 = vmul.f32 %v17064_v4, %v18125_v29  ;;  %v17066_v60 = vpop.eup %17065  ;;  %v978_v33 = vadd.f32 %v18242_v13, %v940_v16  ;;  %v945_v36 = vmul.f32 %v18236_v12, %v907_v31 }
 0x16f   : > { %v816_v44 = vmul.f32 0.03125, %v770_v22  ;;  %17075 = vrsqrt.f32 %v846_v15  ;;  %v909_v48 = vmul.f32 %v17066_v60, %v18157_v24 }
 0x170   : > { %v942_v7 = vmul.f32 %v18236_v12, %v904_v61  ;;  %14423 = vmatprep.mubr.msk.f32.mxu0 %vm502_vm0, %v978_v33  ;;  %v983_v49 = vadd.f32 %v18242_v13, %v945_v36 }
 0x171   : > { %v848_v14 = vadd.f32 1e-05, %v816_v44  ;;  %v17068_v27 = vpop.eup %17067  ;;  %14424 = vmatmul.mubr.msk.f32.gmra.mrb[14].mxu0 %vm502_vm0, %v979_v10  ;;  %v947_v50 = vmul.f32 %v18236_v12, %v909_v48 }
 0x172   : > { %v785_v38 = vpop.xlane.xlu1 %784  ;;  %v776_v34 = vpop.xlane.xlu0 %775  ;;  %v980_v35 = vadd.f32 %v18242_v13, %v942_v7  ;;  %v906_v5 = vmul.f32 %v17068_v27, %v18148_v46 }
 0x173   : > { %17077 = vrsqrt.f32 %v848_v14  ;;  %v821_v29 = vmul.f32 0.03125, %v785_v38  ;;  %v818_v26 = vmul.f32 0.03125, %v776_v34  ;;  %v17070_v62 = vpop.eup %17069  ;;  %v985_v40 = vadd.f32 %v18242_v13, %v947_v50 }
 0x174   : > { %17079 = vrsqrt.f32 %v851_v30  ;;  %14426 = vmatprep.mubr.msk.f32.mxu0 %vm502_vm0, %v980_v35  ;;  %v944_v47 = vmul.f32 %v18236_v12, %v906_v5  ;;  %v911_v9 = vmul.f32 %v17070_v62, %v18169_v28 }
 0x175   : > { %v853_v43 = vadd.f32 1e-05, %v821_v29  ;;  %v850_v0 = vadd.f32 1e-05, %v818_v26  ;;  %v17072_v17 = vpop.eup %17071  ;;  %14427 = vmatmul.mubr.msk.f32.gmra.mrb[16].mxu0 %vm502_vm0, %v981_v21 }
 0x176   : > { %v782_v2 = vpop.xlane.xlu0 %781  ;;  %v908_v46 = vmul.f32 %v17072_v17, %v18162_v59  ;;  %v982_v24 = vadd.f32 %v18242_v13, %v944_v47  ;;  %v17074_v8 = vpop.eup %17073  ;;  %v949_v28 = vmul.f32 %v18236_v12, %v911_v9 }
 0x177   : > { %17081 = vrsqrt.f32 %v853_v43  ;;  %v820_v23 = vmul.f32 0.03125, %v782_v2  ;;  %v913_v15 = vmul.f32 %v17074_v8, %v18181_v32 }
 0x178   : > { %17083 = vrsqrt.f32 %v850_v0  ;;  %v946_v52 = vmul.f32 %v18236_v12, %v908_v46  ;;  %14429 = vmatprep.mubr.msk.f32.mxu0 %vm502_vm0, %v982_v24  ;;  %v987_v44 = vadd.f32 %v18242_v13, %v949_v28 }
 0x179   : > { %v852_v39 = vadd.f32 1e-05, %v820_v23  ;;  %v17076_v57 = vpop.eup %17075  ;;  %14430 = vmatmul.mubr.msk.f32.gmra.mrb[18].mxu0 %vm502_vm0, %v983_v49  ;;  %v951_v61 = vmul.f32 %v18236_v12, %v913_v15 }
 0x17a   : > { %v791_v63 = vpop.xlane.xlu1 %790  ;;  %v788_v25 = vpop.xlane.xlu0 %787  ;;  %v984_v6 = vadd.f32 %v18242_v13, %v946_v52  ;;  %v910_v55 = vmul.f32 %v17076_v57, %v18173_v41 }
 0x17b   : > { %17085 = vrsqrt.f32 %v852_v39  ;;  %v823_v59 = vmul.f32 0.03125, %v791_v63  ;;  %v822_v54 = vmul.f32 0.03125, %v788_v25  ;;  %v989_v10 = vadd.f32 %v18242_v13, %v951_v61 }
 0x17c   : > { %14432 = vmatprep.mubr.msk.f32.mxu0 %vm502_vm0, %v984_v6  ;;  %v948_v58 = vmul.f32 %v18236_v12, %v910_v55 }
 0x17d   : > { %v17078_v11 = vpop.eup %17077  ;;  %v855_v56 = vadd.f32 1e-05, %v823_v59  ;;  %v854_v3 = vadd.f32 1e-05, %v822_v54  ;;  %14433 = vmatmul.mubr.msk.f32.gmra.mrb[20].mxu0 %vm502_vm0, %v985_v40 }
 0x17e   : > { %v17080_v19 = vpop.eup %17079  ;;  %v912_v4 = vmul.f32 %v17078_v11, %v18190_v20  ;;  %v986_v41 = vadd.f32 %v18242_v13, %v948_v58 }
 0x17f   : > { %17087 = vrsqrt.f32 %v855_v56  ;;  %v915_v32 = vmul.f32 %v17080_v19, %v18193_v42 }
 0x180   : > { %17089 = vrsqrt.f32 %v854_v3  ;;  %v950_v22 = vmul.f32 %v18236_v12, %v912_v4  ;;  %14435 = vmatprep.mubr.msk.f32.mxu0 %vm502_vm0, %v986_v41 }
 0x181   : > { %v17082_v16 = vpop.eup %17081  ;;  %14436 = vmatmul.mubr.msk.f32.gmra.mrb[22].mxu0 %vm502_vm0, %v987_v44  ;;  %v953_v7 = vmul.f32 %v18236_v12, %v915_v32 }
 0x182   : > { %v17084_v60 = vpop.eup %17083  ;;  %v988_v20 = vadd.f32 %v18242_v13, %v950_v22  ;;  %v917_v42 = vmul.f32 %v17082_v16, %v18212_v53 }
 0x183   : > { %v914_v30 = vmul.f32 %v17084_v60, %v18200_v51  ;;  %v991_v38 = vadd.f32 %v18242_v13, %v953_v7 }
 0x184   : > { %14438 = vmatprep.mubr.msk.f32.mxu0 %vm502_vm0, %v988_v20  ;;  %v955_v34 = vmul.f32 %v18236_v12, %v917_v42 }
 0x185   : > { %v17086_v33 = vpop.eup %17085  ;;  %v952_v14 = vmul.f32 %v18236_v12, %v914_v30  ;;  %14439 = vmatmul.mubr.msk.f32.gmra.mrb[24].mxu0 %vm502_vm0, %v989_v10 }
 0x186   : > { %v916_v45 = vmul.f32 %v17086_v33, %v18206_v37  ;;  %v993_v5 = vadd.f32 %v18242_v13, %v955_v34 }
 0x187   : > { %v990_v31 = vadd.f32 %v18242_v13, %v952_v14 }
 0x188   : > { %v954_v27 = vmul.f32 %v18236_v12, %v916_v45 }
 0x189   : > { %v17088_v51 = vpop.eup %17087  ;;  %14441 = vmatprep.mubr.msk.f32.mxu0 %vm502_vm0, %v990_v31 }
 0x18a   : > { %v17090_v29 = vpop.eup %17089  ;;  %v992_v26 = vadd.f32 %v18242_v13, %v954_v27  ;;  %v919_v53 = vmul.f32 %v17088_v51, %v18227_v1  ;;  %14442 = vmatmul.mubr.msk.f32.gmra.mrb[26].mxu0 %vm502_vm0, %v991_v38 }
 0x18b   : > { %v918_v37 = vmul.f32 %v17090_v29, %v18220_v18  ;;  %v18374_v18 = vld [vmem:[%s24161_s5] ss:$0 sm:$0xff] }
 0x18c   : > { %14444 = vmatprep.mubr.msk.f32.mxu0 %vm502_vm0, %v992_v26  ;;  %v957_v35 = vmul.f32 %v18236_v12, %v919_v53 }
 0x18d   : > { %v956_v48 = vmul.f32 %v18236_v12, %v918_v37 }
 0x18e   : > { %14445 = vmatmul.mubr.msk.f32.gmra.mrb[28].mxu0 %vm502_vm0, %v993_v5  ;;  %v995_v43 = vadd.f32 %v18242_v13, %v957_v35 }
 0x18f   : > { %v994_v62 = vadd.f32 %v18242_v13, %v956_v48 }
 0x191   : > { %14447 = vmatprep.mubr.msk.f32.mxu0 %vm502_vm0, %v994_v62 }
 0x192   : > { %14448 = vmatmul.mubr.msk.f32.gmra.mrb[30].mxu0 %vm502_vm0, %v995_v43 }
 0x223   : > { %v14404_v1 = vpop.f32.mrb[0].mxu0 }
 0x224   : > { %v18377_v0 = vadd.f32 %v14404_v1, %v18374_v18  ;;  %v1169_v12 = vpop.f32.mrb[1].mxu0 }
 0x225   : > { %v1170_v21 = vadd.f32 %v18374_v18, %v1169_v12 }
 0x226   : > { %1426 = vrot.lane.b32.xlu0 %v18377_v0, %s17771_s21  ;;  %1362 = vrot.lane.b32.xlu1 %v18377_v0, %s17772_s22 }
 0x227   : > { %14458 = vmatprep.mubr.msk.f32.mxu1 %vm1688_vm1, %v1170_v21  ;;  %v16387_v13 = vpack.i.bf16 %v18377_v0, %v1170_v21 }
 0x22a   : > { %1490 = vrot.lane.b32.xlu0 %v18377_v0, %s17773_s23  ;;  %1424 = vrot.lane.b32.xlu1 %v1170_v21, %s17771_s21 }
 0x22b   : > { %v14407_v36 = vpop.f32.mrb[2].mxu0 }
 0x22c   : > { %v18390_v17 = vadd.f32 %v14407_v36, %v18374_v18  ;;  %v1179_v2 = vpop.f32.mrb[3].mxu0 }
 0x22d   : > { %v18395_v47 = vadd.f32 %v18374_v18, %v1179_v2 }
 0x22e   : > { %1488 = vrot.lane.b32.xlu1 %v1170_v21, %s17773_s23  ;;  %16388 = vrot.lane.b32.xlu0 %v16387_v13, %s17774_s24 }
 0x22f   : > { %v16397_v46 = vpack.i.bf16 %v18390_v17, %v18395_v47 }
 0x230   : > { %v14410_v23 = vpop.f32.mrb[4].mxu0 }
 0x231   : > { %v1189_v24 = vpop.f32.mrb[5].mxu0  ;;  %v18409_v52 = vadd.f32 %v14410_v23, %v18374_v18 }
 0x232   : > { %1360 = vrot.lane.b32.xlu0 %v1170_v21, %s17772_s22  ;;  %16398 = vrot.lane.b32.xlu1 %v16397_v46, %s17774_s24  ;;  %v18412_v9 = vadd.f32 %v18374_v18, %v1189_v24 }
 0x234   : > { %v14413_v50 = vpop.f32.mrb[6].mxu0  ;;  %v16407_v25 = vpack.i.bf16 %v18409_v52, %v18412_v9 }
 0x235   : > { %v1199_v8 = vpop.f32.mrb[7].mxu0  ;;  %v18461_v58 = vadd.f32 %v14413_v50, %v18374_v18 }
 0x236   : > { %16393 = vrot.lane.b32.xlu0 %v16387_v13, %s17775_s25  ;;  %1364 = vrot.lane.b32.xlu1 %v18395_v47, %s17772_s22  ;;  %v18464_v4 = vadd.f32 %v18374_v18, %v1199_v8 }
 0x238   : > { %v14416_v39 = vpop.f32.mrb[8].mxu0  ;;  %v16417_v16 = vpack.i.bf16 %v18461_v58, %v18464_v4 }
 0x239   : > { %v1209_v49 = vpop.f32.mrb[9].mxu0  ;;  %v18499_v33 = vadd.f32 %v14416_v39, %v18374_v18 }
 0x23a   : > { %1366 = vrot.lane.b32.xlu0 %v18390_v17, %s17772_s22  ;;  %1428 = vrot.lane.b32.xlu1 %v18395_v47, %s17771_s21  ;;  %v18510_v7 = vadd.f32 %v18374_v18, %v1209_v49 }
 0x23c   : > { %v14419_v57 = vpop.f32.mrb[10].mxu0  ;;  %v16427_v42 = vpack.i.bf16 %v18499_v33, %v18510_v7 }
 0x23d   : > { %v1219_v63 = vpop.f32.mrb[11].mxu0  ;;  %v18519_v45 = vadd.f32 %v14419_v57, %v18374_v18 }
 0x23e   : > { %1430 = vrot.lane.b32.xlu0 %v18390_v17, %s17771_s21  ;;  %1492 = vrot.lane.b32.xlu1 %v18395_v47, %s17773_s23  ;;  %v18522_v31 = vadd.f32 %v18374_v18, %v1219_v63 }
 0x240   : > { %v18420_v59 = vpop.f32.mrb[12].mxu0  ;;  %v16437_v27 = vpack.i.bf16 %v18519_v45, %v18522_v31 }
 0x241   : > { %v18424_v54 = vpop.f32.mrb[13].mxu0  ;;  %v18548_v51 = vadd.f32 %v18420_v59, %v18374_v18 }
 0x242   : > { %1494 = vrot.lane.b32.xlu0 %v18390_v17, %s17773_s23  ;;  %16408 = vrot.lane.b32.xlu1 %v16407_v25, %s17774_s24  ;;  %v18552_v38 = vadd.f32 %v18374_v18, %v18424_v54 }
 0x244   : > { %v18427_v6 = vpop.f32.mrb[14].mxu0  ;;  %v16447_v26 = vpack.i.bf16 %v18548_v51, %v18552_v38 }
 0x245   : > { %v18430_v40 = vpop.f32.mrb[15].mxu0  ;;  %v18564_v34 = vadd.f32 %v18427_v6, %v18374_v18 }
 0x246   : > { %16403 = vrot.lane.b32.xlu0 %v16397_v46, %s17775_s25  ;;  %1368 = vrot.lane.b32.xlu1 %v18412_v9, %s17772_s22  ;;  %v18568_v29 = vadd.f32 %v18374_v18, %v18430_v40 }
 0x248   : > { %v18434_v55 = vpop.f32.mrb[16].mxu0  ;;  %v16457_v53 = vpack.i.bf16 %v18564_v34, %v18568_v29 }
 0x249   : > { %v1249_v11 = vpop.f32.mrb[17].mxu0  ;;  %v18622_v24 = vadd.f32 %v18434_v55, %v18374_v18 }
 0x24a   : > { %1370 = vrot.lane.b32.xlu0 %v18409_v52, %s17772_s22  ;;  %1432 = vrot.lane.b32.xlu1 %v18412_v9, %s17771_s21  ;;  %v18441_v56 = vadd.f32 %v18374_v18, %v1249_v11 }
 0x24c   : > { %v18443_v3 = vpop.f32.mrb[18].mxu0  ;;  %14514 = vmatprep.mubr.msk.f32.mxu0 %vm1688_vm1, %v18441_v56  ;;  %v16472_v59 = vpack.i.bf16 %v18622_v24, %v18441_v56 }
 0x24d   : > { %v18449_v28 = vpop.f32.mrb[19].mxu0  ;;  %v18638_v57 = vadd.f32 %v18443_v3, %v18374_v18 }
 0x24e   : > { %1434 = vrot.lane.b32.xlu0 %v18409_v52, %s17771_s21  ;;  %1496 = vrot.lane.b32.xlu1 %v18412_v9, %s17773_s23  ;;  %v18642_v63 = vadd.f32 %v18374_v18, %v18449_v28 }
 0x250   : > { %v18453_v15 = vpop.f32.mrb[20].mxu0  ;;  %v16477_v40 = vpack.i.bf16 %v18638_v57, %v18642_v63 }
 0x251   : > { %v18457_v19 = vpop.f32.mrb[21].mxu0 }
 0x252   : > { %1498 = vrot.lane.b32.xlu0 %v18409_v52, %s17773_s23  ;;  %16413 = vrot.lane.b32.xlu1 %v16407_v25, %s17775_s25 }
 0x254   : > { %v18466_v41 = vpop.f32.mrb[22].mxu0 }
 0x255   : > { %v18470_v22 = vpop.f32.mrb[23].mxu0 }
 0x256   : > { %1438 = vrot.lane.b32.xlu0 %v18461_v58, %s17771_s21  ;;  %1374 = vrot.lane.b32.xlu1 %v18461_v58, %s17772_s22 }
 0x258   : > { %v18476_v44 = vpop.f32.mrb[24].mxu0 }
 0x259   : > { %v18480_v61 = vpop.f32.mrb[25].mxu0 }
 0x25a   : > { %1502 = vrot.lane.b32.xlu0 %v18461_v58, %s17773_s23  ;;  %16418 = vrot.lane.b32.xlu1 %v16417_v16, %s17774_s24 }
 0x25d   : > { %v18483_v32 = vpop.f32.mrb[26].mxu0 }
 0x25e   : > { %1372 = vrot.lane.b32.xlu0 %v18464_v4, %s17772_s22  ;;  %v18487_v60 = vpop.f32.mrb[27].mxu0  ;;  %1436 = vrot.lane.b32.xlu1 %v18464_v4, %s17771_s21 }
 0x261   : > { %v18491_v20 = vpop.f32.mrb[28].mxu0 }
 0x262   : > { %16423 = vrot.lane.b32.xlu0 %v16417_v16, %s17775_s25  ;;  %v18494_v30 = vpop.f32.mrb[29].mxu0  ;;  %1500 = vrot.lane.b32.xlu1 %v18464_v4, %s17773_s23 }
 0x265   : > { %v18501_v10 = vpop.f32.mrb[30].mxu0 }
 0x266   : > { %1442 = vrot.lane.b32.xlu0 %v18499_v33, %s17771_s21  ;;  %v18505_v14 = vpop.f32.mrb[31].mxu0  ;;  %1378 = vrot.lane.b32.xlu1 %v18499_v33, %s17772_s22 }
 0x26a   : > { %1506 = vrot.lane.b32.xlu0 %v18499_v33, %s17773_s23  ;;  %1440 = vrot.lane.b32.xlu1 %v18510_v7, %s17771_s21 }
 0x26e   : > { %16428 = vrot.lane.b32.xlu0 %v16427_v42, %s17774_s24  ;;  %1504 = vrot.lane.b32.xlu1 %v18510_v7, %s17773_s23 }
 0x272   : > { %1376 = vrot.lane.b32.xlu0 %v18510_v7, %s17772_s22  ;;  %16438 = vrot.lane.b32.xlu1 %v16437_v27, %s17774_s24 }
 0x276   : > { %16433 = vrot.lane.b32.xlu0 %v16427_v42, %s17775_s25  ;;  %1380 = vrot.lane.b32.xlu1 %v18522_v31, %s17772_s22 }
 0x27a   : > { %1382 = vrot.lane.b32.xlu0 %v18519_v45, %s17772_s22  ;;  %1444 = vrot.lane.b32.xlu1 %v18522_v31, %s17771_s21 }
 0x27e   : > { %1446 = vrot.lane.b32.xlu0 %v18519_v45, %s17771_s21  ;;  %1508 = vrot.lane.b32.xlu1 %v18522_v31, %s17773_s23 }
 0x282   : > { %1510 = vrot.lane.b32.xlu0 %v18519_v45, %s17773_s23  ;;  %16443 = vrot.lane.b32.xlu1 %v16437_v27, %s17775_s25 }
 0x286   : > { %1386 = vrot.lane.b32.xlu0 %v18548_v51, %s17772_s22  ;;  %1384 = vrot.lane.b32.xlu1 %v18552_v38, %s17772_s22 }
 0x28a   : > { %1450 = vrot.lane.b32.xlu0 %v18548_v51, %s17771_s21  ;;  %1448 = vrot.lane.b32.xlu1 %v18552_v38, %s17771_s21 }
 0x28e   : > { %1514 = vrot.lane.b32.xlu0 %v18548_v51, %s17773_s23  ;;  %1512 = vrot.lane.b32.xlu1 %v18552_v38, %s17773_s23 }
 0x292   : > { %16448 = vrot.lane.b32.xlu0 %v16447_v26, %s17774_s24  ;;  %16458 = vrot.lane.b32.xlu1 %v16457_v53, %s17774_s24 }
 0x296   : > { %16453 = vrot.lane.b32.xlu0 %v16447_v26, %s17775_s25  ;;  %1388 = vrot.lane.b32.xlu1 %v18568_v29, %s17772_s22 }
 0x298   : > { %v18583_v37 = vpop.permute.xlu1 %1362  ;;  %v18585_v35 = vpop.permute.xlu0 %1426 }
 0x299   : > { %24452 = vst [vmem:[#allocation2_spill] sm:$0xff] %v18583_v37  ;;  %24453 = vst [vmem:[#allocation3_spill] sm:$0xff] %v18585_v35 }
 0x29a   : > { %1390 = vrot.lane.b32.xlu0 %v18564_v34, %s17772_s22  ;;  %1452 = vrot.lane.b32.xlu1 %v18568_v29, %s17771_s21 }
 0x29c   : > { %v18591_v5 = vpop.permute.xlu1 %1424  ;;  %v18593_v48 = vpop.permute.xlu0 %1490 }
 0x29d   : > { %24454 = vst [vmem:[#allocation4_spill] sm:$0xff] %v18593_v48 }
 0x29e   : > { %1454 = vrot.lane.b32.xlu0 %v18564_v34, %s17771_s21  ;;  %1516 = vrot.lane.b32.xlu1 %v18568_v29, %s17773_s23 }
 0x2a0   : > { %v18599_v62 = vpop.permute.xlu1 %1488  ;;  %v16389_v43 = vpop.permute.xlu0 %16388 }
 0x2a1   : > { %24455 = vst [vmem:[#allocation5_spill] sm:$0xff] %v18599_v62  ;;  %v16391_v1 = vunpack.i.h.bf16 %v16389_v43  ;;  %v16390_v12 = vunpack.i.l.bf16 %v16389_v43 }
 0x2a2   : > { %1518 = vrot.lane.b32.xlu0 %v18564_v34, %s17773_s23  ;;  %1392 = vrot.lane.b32.xlu1 %v18441_v56, %s17772_s22 }
 0x2a3   : > { %v15690_v13 = vpack.c.bf16 %v16391_v1, %v16390_v12 }
 0x2a4   : > { %v18611_v36 = vpop.permute.xlu0 %1360  ;;  %v16399_v2 = vpop.permute.xlu1 %16398 }
 0x2a5   : > { %24458 = vst [vmem:[#allocation6_spill] sm:$0xff] %v18611_v36  ;;  %15692 = vmatprep.subr.msk.bf16.mxu1 %vm18605_vm2, %v15690_v13  ;;  %v16401_v23 = vunpack.i.h.bf16 %v16399_v2  ;;  %v16400_v46 = vunpack.i.l.bf16 %v16399_v2 }
 0x2a6   : > { %16463 = vrot.lane.b32.xlu0 %v16457_v53, %s17775_s25  ;;  %15695 = vmatpush3.bf16.xpose.msk.msra.mxu1 %vm18605_vm2, %v15690_v13  ;;  %v18710_v53 = vadd.f32 %v18374_v18, %v18457_v19  ;;  %v18730_v19 = vadd.f32 %v18466_v41, %v18374_v18  ;;  %v18734_v13 = vadd.f32 %v18374_v18, %v18470_v22 }
 0x2a7   : > { %1456 = vrot.lane.b32.xlu1 %v18441_v56, %s17771_s21  ;;  %v15696_v50 = vpack.c.bf16 %v16401_v23, %v16400_v46 }
 0x2a8   : > { %v18624_v8 = vpop.permute.xlu0 %16393  ;;  %v18626_v39 = vpop.permute.xlu1 %1364  ;;  %24472 = vst [vmem:[#allocation20_spill] sm:$0xff] %v18730_v19  ;;  %24473 = vst [vmem:[#allocation21_spill] sm:$0xff] %v18734_v13  ;;  %v16497_v22 = vpack.i.bf16 %v18730_v19, %v18734_v13 }
 0x2a9   : > { %24459 = vst [vmem:[#allocation7_spill] sm:$0xff] %v18624_v8  ;;  %24460 = vst [vmem:[#allocation8_spill] sm:$0xff] %v18626_v39  ;;  %15698 = vmatprep.subr.msk.bf16.mxu1 %vm18605_vm2, %v15696_v50 }
 0x2aa   : > { %1394 = vrot.lane.b32.xlu0 %v18622_v24, %s17772_s22 }
 0x2ab   : > { %1520 = vrot.lane.b32.xlu1 %v18441_v56, %s17773_s23 }
 0x2ac   : > { %v18634_v49 = vpop.permute.xlu0 %1366  ;;  %v18644_v25 = vpop.permute.xlu1 %1428 }
 0x2ad   : > { %24461 = vst [vmem:[#allocation9_spill] sm:$0xff] %v18634_v49  ;;  %24462 = vst [vmem:[#allocation10_spill] sm:$0xff] %v18644_v25 }
 0x2ae   : > { %1458 = vrot.lane.b32.xlu0 %v18622_v24, %s17771_s21  ;;  %15701 = vmatpush3.bf16.xpose.msk.msra.mxu1 %vm18605_vm2, %v15696_v50 }
 0x2af   : > { %16473 = vrot.lane.b32.xlu1 %v16472_v59, %s17775_s25 }
 0x2b0   : > { %v18653_v54 = vpop.permute.xlu0 %1430  ;;  %v18655_v6 = vpop.permute.xlu1 %1492 }
 0x2b1   : > { %24463 = vst [vmem:[#allocation11_spill] sm:$0xff] %v18653_v54  ;;  %24464 = vst [vmem:[#allocation12_spill] sm:$0xff] %v18655_v6 }
 0x2b2   : > { %1522 = vrot.lane.b32.xlu0 %v18622_v24, %s17773_s23 }
 0x2b3   : > { %16478 = vrot.lane.b32.xlu1 %v16477_v40, %s17774_s24 }
 0x2b4   : > { %v18662_v55 = vpop.permute.xlu0 %1494  ;;  %v16409_v11 = vpop.permute.xlu1 %16408 }
 0x2b5   : > { %24465 = vst [vmem:[#allocation13_spill] sm:$0xff] %v18662_v55  ;;  %14459 = vmatmul.mubr.msk.f32.vlgmr.msra.gmra.mrb[0].mxu1 %vm1688_vm1, %v18377_v0  ;;  %v16411_v56 = vunpack.i.h.bf16 %v16409_v11  ;;  %v16410_v3 = vunpack.i.l.bf16 %v16409_v11 }
 0x2b6   : > { %16468 = vrot.lane.b32.xlu0 %v16472_v59, %s17774_s24  ;;  %14461 = vmatprep.mubr.msk.f32.mxu1 %vm1688_vm1, %v18395_v47 }
 0x2b7   : > { %1396 = vrot.lane.b32.xlu1 %v18642_v63, %s17772_s22  ;;  %v15702_v28 = vpack.c.bf16 %v16411_v56, %v16410_v3 }
 0x2b8   : > { %v18671_v16 = vpop.permute.xlu0 %16403  ;;  %v18673_v42 = vpop.permute.xlu1 %1368 }
 0x2b9   : > { %24466 = vst [vmem:[#allocation14_spill] sm:$0xff] %v18671_v16  ;;  %14462 = vmatmul.mubr.msk.f32.gmra.mrb[2].mxu1 %vm1688_vm1, %v18390_v17  ;;  %15704 = vmatprep.subr.msk.bf16.mxu1 %vm18605_vm2, %v15702_v28 }
 0x2ba   : > { %1398 = vrot.lane.b32.xlu0 %v18638_v57, %s17772_s22  ;;  %15707 = vmatpush3.bf16.xpose.msk.msra.mxu1 %vm18605_vm2, %v15702_v28 }
 0x2bb   : > { %1460 = vrot.lane.b32.xlu1 %v18642_v63, %s17771_s21  ;;  %14472 = vmatprep.mubr.msk.f32.mxu1 %vm1688_vm1, %v18412_v9  ;;  %v18704_v9 = vadd.f32 %v18453_v15, %v18374_v18 }
 0x2bc   : > { %v18687_v0 = vpop.permute.xlu0 %1370  ;;  %v18689_v47 = vpop.permute.xlu1 %1432 }
 0x2bd   : > { %24468 = vst [vmem:[#allocation16_spill] sm:$0xff] %v18704_v9  ;;  %v16487_v41 = vpack.i.bf16 %v18704_v9, %v18710_v53 }
 0x2be   : > { %1462 = vrot.lane.b32.xlu0 %v18638_v57, %s17771_s21 }
 0x2bf   : > { %1524 = vrot.lane.b32.xlu1 %v18642_v63, %s17773_s23 }
 0x2c0   : > { %v18695_v17 = vpop.permute.xlu0 %1434  ;;  %v18697_v27 = vpop.permute.xlu1 %1496 }
 0x2c1   : > { %24467 = vst [vmem:[#allocation15_spill] sm:$0xff] %v18697_v27 }
 0x2c2   : > { %1526 = vrot.lane.b32.xlu0 %v18638_v57, %s17773_s23 }
 0x2c3   : > { %16483 = vrot.lane.b32.xlu1 %v16477_v40, %s17775_s25 }
 0x2c4   : > { %v18706_v26 = vpop.permute.xlu0 %1498  ;;  %v18712_v43 = vpop.permute.xlu1 %16413 }
 0x2c5   : > { %24469 = vst [vmem:[#allocation17_spill] sm:$0xff] %v18706_v26  ;;  %24470 = vst [vmem:[#allocation18_spill] sm:$0xff] %v18712_v43 }
 0x2c6   : > { %1402 = vrot.lane.b32.xlu0 %v18704_v9, %s17772_s22 }
 0x2c7   : > { %1400 = vrot.lane.b32.xlu1 %v18710_v53, %s17772_s22 }
 0x2c8   : > { %v18718_v1 = vpop.permute.xlu0 %1438  ;;  %v18720_v12 = vpop.permute.xlu1 %1374 }
 0x2ca   : > { %1466 = vrot.lane.b32.xlu0 %v18704_v9, %s17771_s21 }
 0x2cb   : > { %1464 = vrot.lane.b32.xlu1 %v18710_v53, %s17771_s21 }
 0x2cc   : > { %v18726_v15 = vpop.permute.xlu0 %1502  ;;  %v16419_v2 = vpop.permute.xlu1 %16418 }
 0x2cd   : > { %24471 = vst [vmem:[#allocation19_spill] sm:$0xff] %v18726_v15  ;;  %v16421_v23 = vunpack.i.h.bf16 %v16419_v2  ;;  %v16420_v46 = vunpack.i.l.bf16 %v16419_v2 }
 0x2ce   : > { %1530 = vrot.lane.b32.xlu0 %v18704_v9, %s17773_s23 }
 0x2cf   : > { %1528 = vrot.lane.b32.xlu1 %v18710_v53, %s17773_s23  ;;  %v15708_v50 = vpack.c.bf16 %v16421_v23, %v16420_v46 }
 0x2d0   : > { %v18740_v59 = vpop.permute.xlu0 %1372  ;;  %v18744_v40 = vpop.permute.xlu1 %1436 }
 0x2d1   : > { %15710 = vmatprep.subr.msk.bf16.mxu1 %vm18605_vm2, %v15708_v50 }
 0x2d2   : > { %16488 = vrot.lane.b32.xlu0 %v16487_v41, %s17774_s24  ;;  %15713 = vmatpush3.bf16.xpose.msk.msra.mxu1 %vm18605_vm2, %v15708_v50 }
 0x2d3   : > { %16498 = vrot.lane.b32.xlu1 %v16497_v22, %s17774_s24 }
 0x2d4   : > { %v18754_v11 = vpop.permute.xlu0 %16423  ;;  %v18756_v56 = vpop.permute.xlu1 %1500 }
 0x2d5   : > { %24474 = vst [vmem:[#allocation22_spill] sm:$0xff] %v18754_v11  ;;  %24475 = vst [vmem:[#allocation23_spill] sm:$0xff] %v18756_v56 }
 0x2d6   : > { %16493 = vrot.lane.b32.xlu0 %v16487_v41, %s17775_s25 }
 0x2d7   : > { %1404 = vrot.lane.b32.xlu1 %v18734_v13, %s17772_s22 }
 0x2d8   : > { %v18761_v3 = vpop.permute.xlu0 %1442  ;;  %v18763_v28 = vpop.permute.xlu1 %1378 }
 0x2d9   : > { %14473 = vmatmul.mubr.msk.f32.vlgmr.msra.gmra.mrb[4].mxu1 %vm1688_vm1, %v18409_v52 }
 0x2da   : > { %1406 = vrot.lane.b32.xlu0 %v18730_v19, %s17772_s22  ;;  %14475 = vmatprep.mubr.msk.f32.mxu1 %vm1688_vm1, %v18464_v4  ;;  %v18787_v4 = vadd.f32 %v18374_v18, %v18480_v61 }
 0x2db   : > { %1468 = vrot.lane.b32.xlu1 %v18734_v13, %s17771_s21 }
 0x2dc   : > { %v18773_v2 = vpop.permute.xlu0 %1506  ;;  %v18775_v23 = vpop.permute.xlu1 %1440 }
 0x2dd   : > { %24476 = vst [vmem:[#allocation24_spill] sm:$0xff] %v18773_v2  ;;  %14476 = vmatmul.mubr.msk.f32.gmra.mrb[6].mxu1 %vm1688_vm1, %v18461_v58 }
 0x2de   : > { %1470 = vrot.lane.b32.xlu0 %v18730_v19, %s17771_s21  ;;  %14486 = vmatprep.mubr.msk.f32.mxu1 %vm1688_vm1, %v18510_v7 }
 0x2df   : > { %1532 = vrot.lane.b32.xlu1 %v18734_v13, %s17773_s23 }
 0x2e0   : > { %v16429_v52 = vpop.permute.xlu0 %16428  ;;  %v18789_v46 = vpop.permute.xlu1 %1504 }
 0x2e1   : > { %24477 = vst [vmem:[#allocation25_spill] sm:$0xff] %v18789_v46  ;;  %v16431_v50 = vunpack.i.h.bf16 %v16429_v52  ;;  %v16430_v41 = vunpack.i.l.bf16 %v16429_v52  ;;  %v18806_v52 = vadd.f32 %v18476_v44, %v18374_v18  ;;  %v18822_v44 = vadd.f32 %v18483_v32, %v18374_v18 }
 0x2e2   : > { %1534 = vrot.lane.b32.xlu0 %v18730_v19, %s17773_s23  ;;  %v18890_v19 = vadd.f32 %v18374_v18, %v18494_v30 }
 0x2e3   : > { %v15714_v58 = vpack.c.bf16 %v16431_v50, %v16430_v41  ;;  %1408 = vrot.lane.b32.xlu1 %v18787_v4, %s17772_s22  ;;  %24478 = vst [vmem:[#allocation26_spill] sm:$0xff] %v18806_v52  ;;  %24480 = vst [vmem:[#allocation28_spill] sm:$0xff] %v18822_v44 }
 0x2e4   : > { %v18795_v11 = vpop.permute.xlu0 %1376  ;;  %v16439_v43 = vpop.permute.xlu1 %16438 }
 0x2e5   : > { %15716 = vmatprep.subr.msk.bf16.mxu1 %vm18605_vm2, %v15714_v58  ;;  %v16441_v7 = vunpack.i.h.bf16 %v16439_v43  ;;  %v16440_v61 = vunpack.i.l.bf16 %v16439_v43 }
 0x2e6   : > { %16503 = vrot.lane.b32.xlu0 %v16497_v22, %s17775_s25  ;;  %15719 = vmatpush3.bf16.xpose.msk.msra.mxu1 %vm18605_vm2, %v15714_v58  ;;  %v18826_v22 = vadd.f32 %v18374_v18, %v18487_v60 }
 0x2e7   : > { %1472 = vrot.lane.b32.xlu1 %v18787_v4, %s17771_s21  ;;  %v15720_v50 = vpack.c.bf16 %v16441_v7, %v16440_v61  ;;  %v16512_v7 = vpack.i.bf16 %v18806_v52, %v18787_v4 }
 0x2e8   : > { %v18808_v41 = vpop.permute.xlu0 %16433  ;;  %v18810_v16 = vpop.permute.xlu1 %1380  ;;  %24481 = vst [vmem:[#allocation29_spill] sm:$0xff] %v18826_v22  ;;  %v16517_v60 = vpack.i.bf16 %v18822_v44, %v18826_v22 }
 0x2e9   : > { %24479 = vst [vmem:[#allocation27_spill] sm:$0xff] %v18808_v41  ;;  %15722 = vmatprep.subr.msk.bf16.mxu1 %vm18605_vm2, %v15720_v50 }
 0x2ea   : > { %1410 = vrot.lane.b32.xlu0 %v18806_v52, %s17772_s22 }
 0x2eb   : > { %1536 = vrot.lane.b32.xlu1 %v18787_v4, %s17773_s23 }
 0x2ec   : > { %v18818_v43 = vpop.permute.xlu0 %1382  ;;  %v18828_v58 = vpop.permute.xlu1 %1444 }
 0x2ee   : > { %1474 = vrot.lane.b32.xlu0 %v18806_v52, %s17771_s21  ;;  %15725 = vmatpush3.bf16.xpose.msk.msra.mxu1 %vm18605_vm2, %v15720_v50 }
 0x2ef   : > { %16513 = vrot.lane.b32.xlu1 %v16512_v7, %s17775_s25 }
 0x2f0   : > { %v18837_v61 = vpop.permute.xlu0 %1446  ;;  %v18839_v32 = vpop.permute.xlu1 %1508 }
 0x2f1   : > { %24482 = vst [vmem:[#allocation30_spill] sm:$0xff] %v18839_v32 }
 0x2f2   : > { %1538 = vrot.lane.b32.xlu0 %v18806_v52, %s17773_s23 }
 0x2f3   : > { %16518 = vrot.lane.b32.xlu1 %v16517_v60, %s17774_s24 }
 0x2f4   : > { %v18846_v41 = vpop.permute.xlu0 %1510  ;;  %v18848_v8 = vpop.permute.xlu1 %16443 }
 0x2f5   : > { %24483 = vst [vmem:[#allocation31_spill] sm:$0xff] %v18846_v41  ;;  %24484 = vst [vmem:[#allocation32_spill] sm:$0xff] %v18848_v8  ;;  %14487 = vmatmul.mubr.msk.f32.vlgmr.msra.gmra.mrb[8].mxu1 %vm1688_vm1, %v18499_v33 }
 0x2f6   : > { %16508 = vrot.lane.b32.xlu0 %v16512_v7, %s17774_s24  ;;  %14489 = vmatprep.mubr.msk.f32.mxu1 %vm1688_vm1, %v18522_v31 }
 0x2f7   : > { %1412 = vrot.lane.b32.xlu1 %v18826_v22, %s17772_s22 }
 0x2f8   : > { %v18857_v50 = vpop.permute.xlu0 %1386  ;;  %v18859_v52 = vpop.permute.xlu1 %1384 }
 0x2f9   : > { %14490 = vmatmul.mubr.msk.f32.gmra.mrb[10].mxu1 %vm1688_vm1, %v18519_v45 }
 0x2fa   : > { %1414 = vrot.lane.b32.xlu0 %v18822_v44, %s17772_s22  ;;  %14500 = vmatprep.mubr.msk.f32.mxu1 %vm1688_vm1, %v18552_v38  ;;  %v18886_v38 = vadd.f32 %v18491_v20, %v18374_v18 }
 0x2fb   : > { %1476 = vrot.lane.b32.xlu1 %v18826_v22, %s17771_s21 }
 0x2fc   : > { %v18869_v33 = vpop.permute.xlu0 %1450  ;;  %v18871_v31 = vpop.permute.xlu1 %1448  ;;  %24488 = vst [vmem:[#allocation36_spill] sm:$0xff] %v18886_v38 }
 0x2fd   : > { %24485 = vst [vmem:[#allocation33_spill] sm:$0xff] %v18869_v33 }
 0x2fe   : > { %1478 = vrot.lane.b32.xlu0 %v18822_v44, %s17771_s21 }
 0x2ff   : > { %1540 = vrot.lane.b32.xlu1 %v18826_v22, %s17773_s23 }
 0x300   : > { %v18877_v45 = vpop.permute.xlu0 %1514  ;;  %v18879_v7 = vpop.permute.xlu1 %1512 }
 0x301   : > { %24486 = vst [vmem:[#allocation34_spill] sm:$0xff] %v18877_v45  ;;  %24487 = vst [vmem:[#allocation35_spill] sm:$0xff] %v18879_v7 }
 0x302   : > { %1542 = vrot.lane.b32.xlu0 %v18822_v44, %s17773_s23 }
 0x303   : > { %16523 = vrot.lane.b32.xlu1 %v16517_v60, %s17775_s25 }
 0x304   : > { %v16449_v8 = vpop.permute.xlu0 %16448  ;;  %v16459_v13 = vpop.permute.xlu1 %16458 }
 0x305   : > { %v16451_v22 = vunpack.i.h.bf16 %v16449_v8  ;;  %v16450_v9 = vunpack.i.l.bf16 %v16449_v8  ;;  %v16461_v45 = vunpack.i.h.bf16 %v16459_v13  ;;  %v16460_v33 = vunpack.i.l.bf16 %v16459_v13 }
 0x306   : > { %1418 = vrot.lane.b32.xlu0 %v18886_v38, %s17772_s22  ;;  %v18914_v8 = vadd.f32 %v18501_v10, %v18374_v18 }
 0x307   : > { %v15726_v44 = vpack.c.bf16 %v16451_v22, %v16450_v9  ;;  %1416 = vrot.lane.b32.xlu1 %v18890_v19, %s17772_s22  ;;  %v15732_v20 = vpack.c.bf16 %v16461_v45, %v16460_v33  ;;  %v18918_v9 = vadd.f32 %v18374_v18, %v18505_v14  ;;  %v16527_v22 = vpack.i.bf16 %v18886_v38, %v18890_v19 }
 0x308   : > { %v18896_v60 = vpop.permute.xlu0 %16453  ;;  %v18898_v7 = vpop.permute.xlu1 %1388  ;;  %24490 = vst [vmem:[#allocation38_spill] sm:$0xff] %v18914_v8 }
 0x309   : > { %24489 = vst [vmem:[#allocation37_spill] sm:$0xff] %v18896_v60  ;;  %15728 = vmatprep.subr.msk.bf16.mxu1 %vm18605_vm2, %v15726_v44  ;;  %24491 = vst [vmem:[#allocation39_spill] sm:$0xff] %v18918_v9  ;;  %v18934_v10 = vpack.i.bf16 %v18914_v8, %v18918_v9 }
 0x30a   : > { %1482 = vrot.lane.b32.xlu0 %v18886_v38, %s17771_s21  ;;  %15731 = vmatpush3.bf16.xpose.msk.msra.mxu1 %vm18605_vm2, %v15726_v44 }
 0x30b   : > { %1480 = vrot.lane.b32.xlu1 %v18890_v19, %s17771_s21  ;;  %15734 = vmatprep.subr.msk.bf16.mxu1 %vm18605_vm2, %v15732_v20  ;;  %24495 = vst [vmem:[#allocation43_spill] sm:$0xff] %v18934_v10 }
 0x30c   : > { %v18910_v30 = vpop.permute.xlu0 %1390  ;;  %v18920_v13 = vpop.permute.xlu1 %1452 }
 0x30d   : > { %24492 = vst [vmem:[#allocation40_spill] sm:$0xff] %v18920_v13 }
 0x30e   : > { %1546 = vrot.lane.b32.xlu0 %v18886_v38, %s17773_s23 }
 0x30f   : > { %1544 = vrot.lane.b32.xlu1 %v18890_v19, %s17773_s23 }
 0x310   : > { %v18926_v44 = vpop.permute.xlu0 %1454  ;;  %v18930_v33 = vpop.permute.xlu1 %1516 }
 0x311   : > { %24493 = vst [vmem:[#allocation41_spill] sm:$0xff] %v18926_v44  ;;  %24494 = vst [vmem:[#allocation42_spill] sm:$0xff] %v18930_v33 }
 0x312   : > { %16528 = vrot.lane.b32.xlu0 %v16527_v22, %s17774_s24  ;;  %15737 = vmatpush3.bf16.xpose.msk.msra.mxu1 %vm18605_vm2, %v15732_v20 }
 0x313   : > { %16538 = vrot.lane.b32.xlu1 %v18934_v10, %s17774_s24 }
 0x314   : > { %v18941_v18 = vpop.permute.xlu0 %1518  ;;  %v18943_v14 = vpop.permute.xlu1 %1392 }
 0x315   : > { %24496 = vst [vmem:[#allocation44_spill] sm:$0xff] %v18941_v18 }
 0x316   : > { %16533 = vrot.lane.b32.xlu0 %v16527_v22, %s17775_s25 }
 0x317   : > { %1420 = vrot.lane.b32.xlu1 %v18918_v9, %s17772_s22 }
 0x318   : > { %v18948_v45 = vpop.permute.xlu0 %16463 }
 0x319   : > { %24497 = vst [vmem:[#allocation45_spill] sm:$0xff] %v18948_v45  ;;  %v18950_v60 = vpop.permute.xlu1 %1456  ;;  %14501 = vmatmul.mubr.msk.f32.vlgmr.msra.gmra.mrb[12].mxu1 %vm1688_vm1, %v18548_v51 }
 0x31a   : > { %1422 = vrot.lane.b32.xlu0 %v18914_v8, %s17772_s22  ;;  %14503 = vmatprep.mubr.msk.f32.mxu1 %vm1688_vm1, %v18568_v29  ;;  %v16557_v29 = vpack.i.bf16 %v18583_v37, %v18611_v36  ;;  %v18996_v37 = vpack.i.bf16 %v18653_v54, %v18644_v25 }
 0x31b   : > { %1484 = vrot.lane.b32.xlu1 %v18918_v9, %s17771_s21 }
 0x31c   : > { %v18960_v20 = vpop.permute.xlu0 %1394  ;;  %24503 = vst [vmem:[#allocation51_spill] sm:$0xff] %v18996_v37 }
 0x31d   : > { %v18962_v22 = vpop.permute.xlu1 %1520  ;;  %14504 = vmatmul.mubr.msk.f32.gmra.mrb[14].mxu1 %vm1688_vm1, %v18564_v34 }
 0x31e   : > { %24498 = vst [vmem:[#allocation46_spill] sm:$0xff] %v18962_v22  ;;  %1486 = vrot.lane.b32.xlu0 %v18914_v8, %s17771_s21  ;;  %14528 = vmatprep.mubr.msk.f32.mxu1 %vm1688_vm1, %v18710_v53  ;;  %v18985_v53 = vpack.i.bf16 %v18634_v49, %v18626_v39 }
 0x31f   : > { %1548 = vrot.lane.b32.xlu1 %v18918_v9, %s17773_s23 }
 0x320   : > { %v18972_v51 = vpop.permute.xlu0 %1458  ;;  %24501 = vst [vmem:[#allocation49_spill] sm:$0xff] %v18985_v53 }
 0x321   : > { %v18976_v10 = vpop.permute.xlu1 %16473 }
 0x322   : > { %24499 = vst [vmem:[#allocation47_spill] sm:$0xff] %v18976_v10  ;;  %1550 = vrot.lane.b32.xlu0 %v18914_v8, %s17773_s23  ;;  %v18992_v10 = vpack.i.bf16 %v18585_v35, %v18591_v5 }
 0x323   : > { %16558 = vrot.lane.b32.xlu1 %v16557_v29, %s17775_s25 }
 0x324   : > { %v18981_v34 = vpop.permute.xlu0 %1522  ;;  %24502 = vst [vmem:[#allocation50_spill] sm:$0xff] %v18992_v10 }
 0x325   : > { %24500 = vst [vmem:[#allocation48_spill] sm:$0xff] %v18981_v34  ;;  %v16479_v45 = vpop.permute.xlu1 %16478 }
 0x326   : > { %16543 = vrot.lane.b32.xlu0 %v16557_v29, %s17774_s24  ;;  %v16481_v9 = vunpack.i.h.bf16 %v16479_v45  ;;  %v16480_v38 = vunpack.i.l.bf16 %v16479_v45  ;;  %v19012_v45 = vpack.i.bf16 %v18662_v55, %v18655_v6  ;;  %v24550_v55 = vld [vmem:[#allocation20_spill] sm:$0xff] }
 0x327   : > { %16563 = vrot.lane.b32.xlu1 %v18985_v53, %s17774_s24  ;;  %v19006_v53 = vpack.i.bf16 %v18593_v48, %v18599_v62 }
 0x328   : > { %v16469_v8 = vpop.permute.xlu0 %16468  ;;  %24505 = vst [vmem:[#allocation53_spill] sm:$0xff] %v19012_v45  ;;  %v15744_v25 = vpack.c.bf16 %v16481_v9, %v16480_v38  ;;  %v19034_v38 = vpack.i.bf16 %v18720_v12, %v18740_v59  ;;  %v19044_v9 = vpack.i.bf16 %v18695_v17, %v18689_v47 }
 0x329   : > { %v18998_v36 = vpop.permute.xlu1 %1396  ;;  %v16471_v49 = vunpack.i.h.bf16 %v16469_v8  ;;  %v16470_v39 = vunpack.i.l.bf16 %v16469_v8  ;;  %24504 = vst [vmem:[#allocation52_spill] sm:$0xff] %v19006_v53 }
 0x32a   : > { %16548 = vrot.lane.b32.xlu0 %v18992_v10, %s17774_s24  ;;  %24507 = vst [vmem:[#allocation55_spill] sm:$0xff] %v19034_v38  ;;  %24509 = vst [vmem:[#allocation57_spill] sm:$0xff] %v19044_v9 }
 0x32b   : > { %v15738_v29 = vpack.c.bf16 %v16471_v49, %v16470_v39  ;;  %16568 = vrot.lane.b32.xlu1 %v18996_v37, %s17774_s24  ;;  %v19028_v39 = vpack.i.bf16 %v18687_v0, %v18673_v42  ;;  %v19062_v37 = vpack.i.bf16 %v18706_v26, %v18697_v27 }
 0x32c   : > { %v19008_v54 = vpop.permute.xlu0 %1398 }
 0x32d   : > { %v19014_v35 = vpop.permute.xlu1 %1460  ;;  %15740 = vmatprep.subr.msk.bf16.mxu0 %vm18605_vm2, %v15738_v29  ;;  %24506 = vst [vmem:[#allocation54_spill] sm:$0xff] %v19028_v39  ;;  %24513 = vst [vmem:[#allocation61_spill] sm:$0xff] %v19062_v37 }
 0x32e   : > { %16553 = vrot.lane.b32.xlu0 %v19006_v53, %s17774_s24  ;;  %15743 = vmatpush3.bf16.xpose.msk.msra.mxu0 %vm18605_vm2, %v15738_v29 }
 0x32f   : > { %16573 = vrot.lane.b32.xlu1 %v19012_v45, %s17774_s24  ;;  %15746 = vmatprep.subr.msk.bf16.mxu0 %vm18605_vm2, %v15744_v25  ;;  %v19050_v45 = vpack.i.bf16 %v18718_v1, %v18744_v40 }
 0x330   : > { %v19030_v49 = vpop.permute.xlu0 %1462 }
 0x331   : > { %v19036_v8 = vpop.permute.xlu1 %1524  ;;  %24511 = vst [vmem:[#allocation59_spill] sm:$0xff] %v19050_v45 }
 0x332   : > { %24508 = vst [vmem:[#allocation56_spill] sm:$0xff] %v19036_v8  ;;  %16578 = vrot.lane.b32.xlu0 %v19028_v39, %s17774_s24 }
 0x333   : > { %16593 = vrot.lane.b32.xlu1 %v19034_v38, %s17774_s24  ;;  %v19068_v38 = vpack.i.bf16 %v18726_v15, %v18756_v56  ;;  %v19104_v15 = vpack.i.bf16 %v18837_v61, %v18828_v58 }
 0x334   : > { %v19046_v29 = vpop.permute.xlu0 %1526 }
 0x335   : > { %24510 = vst [vmem:[#allocation58_spill] sm:$0xff] %v19046_v29  ;;  %v19052_v53 = vpop.permute.xlu1 %16483  ;;  %24514 = vst [vmem:[#allocation62_spill] sm:$0xff] %v19068_v38 }
 0x336   : > { %24512 = vst [vmem:[#allocation60_spill] sm:$0xff] %v19052_v53  ;;  %16583 = vrot.lane.b32.xlu0 %v19044_v9, %s17774_s24  ;;  %15749 = vmatpush3.bf16.xpose.msk.msra.mxu0 %vm18605_vm2, %v15744_v25  ;;  %v19078_v25 = vpack.i.bf16 %v18763_v28, %v18795_v11  ;;  %v19084_v9 = vpack.i.bf16 %v18818_v43, %v18810_v16  ;;  %24521 = vst [vmem:[#allocation69_spill] sm:$0xff] %v19104_v15 }
 0x337   : > { %16598 = vrot.lane.b32.xlu1 %v19050_v45, %s17774_s24 }
 0x338   : > { %v19064_v10 = vpop.permute.xlu0 %1402  ;;  %24515 = vst [vmem:[#allocation63_spill] sm:$0xff] %v19078_v25  ;;  %24517 = vst [vmem:[#allocation65_spill] sm:$0xff] %v19084_v9 }
 0x339   : > { %v19070_v39 = vpop.permute.xlu1 %1400 }
 0x33a   : > { %16588 = vrot.lane.b32.xlu0 %v19062_v37, %s17774_s24 }
 0x33b   : > { %16603 = vrot.lane.b32.xlu1 %v19068_v38, %s17774_s24  ;;  %v19098_v38 = vpack.i.bf16 %v18761_v3, %v18775_v23 }
 0x33c   : > { %v19080_v45 = vpop.permute.xlu0 %1466 }
 0x33d   : > { %24516 = vst [vmem:[#allocation64_spill] sm:$0xff] %v19080_v45  ;;  %v19086_v53 = vpop.permute.xlu1 %1464  ;;  %14515 = vmatmul.mubr.msk.f32.vlgmr.msra.gmra.mrb[32].mxu0 %vm1688_vm1, %v18622_v24  ;;  %24519 = vst [vmem:[#allocation67_spill] sm:$0xff] %v19098_v38 }
 0x33e   : > { %24518 = vst [vmem:[#allocation66_spill] sm:$0xff] %v19086_v53  ;;  %16608 = vrot.lane.b32.xlu0 %v19078_v25, %s17774_s24  ;;  %14517 = vmatprep.mubr.msk.f32.mxu0 %vm1688_vm1, %v18642_v63  ;;  %v19118_v63 = vpack.i.bf16 %v18773_v2, %v18789_v46  ;;  %v19122_v25 = vpack.i.bf16 %v18846_v41, %v18839_v32 }
 0x33f   : > { %16623 = vrot.lane.b32.xlu1 %v19084_v9, %s17774_s24  ;;  %v19136_v41 = vpack.i.bf16 %v18910_v30, %v18898_v7  ;;  %v19228_v46 = vpack.i.bf16 %v19046_v29, %v19036_v8 }
 0x340   : > { %v19100_v37 = vpop.permute.xlu0 %1530  ;;  %24523 = vst [vmem:[#allocation71_spill] sm:$0xff] %v19118_v63  ;;  %24524 = vst [vmem:[#allocation72_spill] sm:$0xff] %v19122_v25 }
 0x341   : > { %24520 = vst [vmem:[#allocation68_spill] sm:$0xff] %v19100_v37  ;;  %v19106_v24 = vpop.permute.xlu1 %1528  ;;  %14518 = vmatmul.mubr.msk.f32.gmra.mrb[34].mxu0 %vm1688_vm1, %v18638_v57  ;;  %24527 = vst [vmem:[#allocation75_spill] sm:$0xff] %v19136_v41 }
 0x342   : > { %24522 = vst [vmem:[#allocation70_spill] sm:$0xff] %v19106_v24  ;;  %16613 = vrot.lane.b32.xlu0 %v19098_v38, %s17774_s24  ;;  %14542 = vmatprep.mubr.msk.f32.mxu0 %vm1688_vm1, %v18787_v4 }
 0x343   : > { %16628 = vrot.lane.b32.xlu1 %v19104_v15, %s17774_s24  ;;  %v19130_v15 = vpack.i.bf16 %v18857_v50, %v18859_v52 }
 0x344   : > { %v16489_v9 = vpop.permute.xlu0 %16488 }
 0x345   : > { %v16499_v56 = vpop.permute.xlu1 %16498  ;;  %v16491_v57 = vunpack.i.h.bf16 %v16489_v9  ;;  %v16490_v26 = vunpack.i.l.bf16 %v16489_v9  ;;  %24525 = vst [vmem:[#allocation73_spill] sm:$0xff] %v19130_v15 }
 0x346   : > { %v16501_v27 = vunpack.i.h.bf16 %v16499_v56  ;;  %v16500_v38 = vunpack.i.l.bf16 %v16499_v56  ;;  %16618 = vrot.lane.b32.xlu0 %v19118_v63, %s17774_s24 }
 0x347   : > { %v15750_v4 = vpack.c.bf16 %v16491_v57, %v16490_v26  ;;  %16633 = vrot.lane.b32.xlu1 %v19122_v25, %s17774_s24  ;;  %v24528_v26 = vld [vmem:[#allocation33_spill] sm:$0xff]  ;;  %v24533_v25 = vld [vmem:[#allocation34_spill] sm:$0xff] }
 0x348   : > { %v19132_v2 = vpop.permute.xlu0 %16493  ;;  %v15756_v9 = vpack.c.bf16 %v16501_v27, %v16500_v38  ;;  %v19152_v27 = vpack.i.bf16 %v24528_v26, %v18871_v31  ;;  %v19158_v38 = vpack.i.bf16 %v18926_v44, %v18920_v13  ;;  %v24593_v44 = vld [vmem:[#allocation38_spill] sm:$0xff]  ;;  %v1559_v26 = vld [vmem:[%s24157_s1 + $0x38] sm:$0xff] }
 0x349   : > { %24526 = vst [vmem:[#allocation74_spill] sm:$0xff] %v19132_v2  ;;  %v19138_v32 = vpop.permute.xlu1 %1404  ;;  %15752 = vmatprep.subr.msk.bf16.mxu1 %vm18605_vm2, %v15750_v4 }
 0x34a   : > { %16638 = vrot.lane.b32.xlu0 %v19130_v15, %s17774_s24  ;;  %15755 = vmatpush3.bf16.xpose.msk.msra.mxu1 %vm18605_vm2, %v15750_v4  ;;  %24529 = vst [vmem:[#allocation76_spill] sm:$0xff] %v19152_v27  ;;  %24530 = vst [vmem:[#allocation77_spill] sm:$0xff] %v19158_v38  ;;  %v24532_v4 = vld [vmem:[#allocation35_spill] sm:$0xff]  ;;  %v19174_v15 = vpack.i.bf16 %v18941_v18, %v18930_v33  ;;  %v19192_v18 = vpack.i.bf16 %v19008_v54, %v18998_v36 }
 0x34b   : > { %16653 = vrot.lane.b32.xlu1 %v19136_v41, %s17774_s24  ;;  %15758 = vmatprep.subr.msk.bf16.mxu1 %vm18605_vm2, %v15756_v9  ;;  %v19168_v63 = vpack.i.bf16 %v24533_v25, %v24532_v4  ;;  %v24545_v4 = vld [vmem:[#allocation16_spill] sm:$0xff] }
 0x34c   : > { %v19154_v56 = vpop.permute.xlu0 %1406  ;;  %24536 = vst [vmem:[#allocation81_spill] sm:$0xff] %v19174_v15  ;;  %24540 = vst [vmem:[#allocation85_spill] sm:$0xff] %v19192_v18 }
 0x34d   : > { %v19160_v57 = vpop.permute.xlu1 %1468  ;;  %24534 = vst [vmem:[#allocation79_spill] sm:$0xff] %v19168_v63 }
 0x34e   : > { %24531 = vst [vmem:[#allocation78_spill] sm:$0xff] %v19160_v57  ;;  %16643 = vrot.lane.b32.xlu0 %v19152_v27, %s17774_s24 }
 0x34f   : > { %16658 = vrot.lane.b32.xlu1 %v19158_v38, %s17774_s24  ;;  %v19186_v38 = vpack.i.bf16 %v18960_v20, %v18943_v14 }
 0x350   : > { %v19170_v41 = vpop.permute.xlu0 %1470 }
 0x351   : > { %24535 = vst [vmem:[#allocation80_spill] sm:$0xff] %v19170_v41  ;;  %v19176_v2 = vpop.permute.xlu1 %1532  ;;  %24538 = vst [vmem:[#allocation83_spill] sm:$0xff] %v19186_v38 }
 0x352   : > { %24537 = vst [vmem:[#allocation82_spill] sm:$0xff] %v19176_v2  ;;  %16648 = vrot.lane.b32.xlu0 %v19168_v63, %s17774_s24  ;;  %15761 = vmatpush3.bf16.xpose.msk.msra.mxu1 %vm18605_vm2, %v15756_v9  ;;  %v19202_v9 = vpack.i.bf16 %v18972_v51, %v18950_v60  ;;  %v19208_v63 = vpack.i.bf16 %v19030_v49, %v19014_v35 }
 0x353   : > { %16663 = vrot.lane.b32.xlu1 %v19174_v15, %s17774_s24 }
 0x354   : > { %v19188_v27 = vpop.permute.xlu0 %1534  ;;  %24541 = vst [vmem:[#allocation86_spill] sm:$0xff] %v19202_v9  ;;  %24543 = vst [vmem:[#allocation88_spill] sm:$0xff] %v19208_v63 }
 0x355   : > { %24539 = vst [vmem:[#allocation84_spill] sm:$0xff] %v19188_v27  ;;  %v19194_v33 = vpop.permute.xlu1 %1408 }
 0x356   : > { %16668 = vrot.lane.b32.xlu0 %v19186_v38, %s17774_s24  ;;  %v24546_v38 = vld [vmem:[#allocation21_spill] sm:$0xff] }
 0x357   : > { %16683 = vrot.lane.b32.xlu1 %v19192_v18, %s17774_s24  ;;  %v19222_v18 = vpack.i.bf16 %v18981_v34, %v18962_v22  ;;  %24548 = vst [vmem:[#allocation21_spill] sm:$0xff] %v19228_v46 }
 0x358   : > { %v19204_v15 = vpop.permute.xlu0 %16503 }
 0x359   : > { %24542 = vst [vmem:[#allocation87_spill] sm:$0xff] %v19204_v15  ;;  %v19210_v25 = vpop.permute.xlu1 %1472  ;;  %14529 = vmatmul.mubr.msk.f32.vlgmr.msra.gmra.mrb[16].mxu1 %vm1688_vm1, %v24545_v4  ;;  %24547 = vst [vmem:[#allocation16_spill] sm:$0xff] %v19222_v18 }
 0x35a   : > { %24544 = vst [vmem:[#allocation89_spill] sm:$0xff] %v19210_v25  ;;  %16673 = vrot.lane.b32.xlu0 %v19202_v9, %s17774_s24  ;;  %14531 = vmatprep.mubr.msk.f32.mxu1 %vm1688_vm1, %v24546_v38  ;;  %v19242_v38 = vpack.i.bf16 %v19064_v10, %v19070_v39  ;;  %v19248_v9 = vpack.i.bf16 %v19154_v56, %v19138_v32 }
 0x35b   : > { %16688 = vrot.lane.b32.xlu1 %v19208_v63, %s17774_s24 }
 0x35c   : > { %v19224_v15 = vpop.permute.xlu0 %1410  ;;  %24551 = vst [vmem:[#allocation20_spill] sm:$0xff] %v19242_v38  ;;  %24553 = vst [vmem:[#allocation92_spill] sm:$0xff] %v19248_v9 }
 0x35d   : > { %v19230_v4 = vpop.permute.xlu1 %1536  ;;  %14532 = vmatmul.mubr.msk.f32.gmra.mrb[18].mxu1 %vm1688_vm1, %v24550_v55 }
 0x35e   : > { %24549 = vst [vmem:[#allocation90_spill] sm:$0xff] %v19230_v4  ;;  %16678 = vrot.lane.b32.xlu0 %v19222_v18, %s17774_s24  ;;  %14556 = vmatprep.mubr.msk.f32.mxu1 %vm1688_vm1, %v18890_v19  ;;  %v19258_v19 = vpack.i.bf16 %v19080_v45, %v19086_v53  ;;  %v19264_v18 = vpack.i.bf16 %v19170_v41, %v19160_v57 }
 0x35f   : > { %16693 = vrot.lane.b32.xlu1 %v19228_v46, %s17774_s24 }
 0x360   : > { %v19244_v63 = vpop.permute.xlu0 %1474  ;;  %24555 = vst [vmem:[#allocation94_spill] sm:$0xff] %v19258_v19  ;;  %24557 = vst [vmem:[#allocation96_spill] sm:$0xff] %v19264_v18 }
 0x361   : > { %24552 = vst [vmem:[#allocation91_spill] sm:$0xff] %v19244_v63  ;;  %v19250_v55 = vpop.permute.xlu1 %16513 }
 0x362   : > { %24554 = vst [vmem:[#allocation93_spill] sm:$0xff] %v19250_v55  ;;  %16698 = vrot.lane.b32.xlu0 %v19242_v38, %s17774_s24  ;;  %v19276_v38 = vpack.i.bf16 %v19188_v27, %v19176_v2 }
 0x363   : > { %16713 = vrot.lane.b32.xlu1 %v19248_v9, %s17774_s24  ;;  %v19272_v9 = vpack.i.bf16 %v19100_v37, %v19106_v24 }
 0x364   : > { %v19260_v46 = vpop.permute.xlu0 %1538  ;;  %24559 = vst [vmem:[#allocation98_spill] sm:$0xff] %v19276_v38 }
 0x365   : > { %24556 = vst [vmem:[#allocation95_spill] sm:$0xff] %v19260_v46  ;;  %v16519_v29 = vpop.permute.xlu1 %16518  ;;  %24558 = vst [vmem:[#allocation97_spill] sm:$0xff] %v19272_v9 }
 0x366   : > { %16703 = vrot.lane.b32.xlu0 %v19258_v19, %s17774_s24  ;;  %v16521_v8 = vunpack.i.h.bf16 %v16519_v29  ;;  %v16520_v34 = vunpack.i.l.bf16 %v16519_v29 }
 0x367   : > { %16718 = vrot.lane.b32.xlu1 %v19264_v18, %s17774_s24  ;;  %v19286_v18 = vpack.i.bf16 %v19224_v15, %v19194_v33 }
 0x368   : > { %v16509_v55 = vpop.permute.xlu0 %16508  ;;  %v15768_v2 = vpack.c.bf16 %v16521_v8, %v16520_v34 }
 0x369   : > { %v19278_v22 = vpop.permute.xlu1 %1412  ;;  %v16511_v6 = vunpack.i.h.bf16 %v16509_v55  ;;  %v16510_v48 = vunpack.i.l.bf16 %v16509_v55  ;;  %24560 = vst [vmem:[#allocation99_spill] sm:$0xff] %v19286_v18  ;;  %v19324_v55 = vpack.i.bf16 %v19260_v46, %v19230_v4  ;;  %v24581_v46 = vld [vmem:[#allocation6_spill] sm:$0xff] }
 0x36a   : > { %16708 = vrot.lane.b32.xlu0 %v19272_v9, %s17774_s24 }
 0x36b   : > { %v15762_v19 = vpack.c.bf16 %v16511_v6, %v16510_v48  ;;  %16723 = vrot.lane.b32.xlu1 %v19276_v38, %s17774_s24  ;;  %v19308_v48 = vpack.i.bf16 %v19244_v63, %v19210_v25  ;;  %24567 = vst [vmem:[#allocation106_spill] sm:$0xff] %v19324_v55  ;;  %v24592_v63 = vld [vmem:[#allocation39_spill] sm:$0xff] }
 0x36c   : > { %v19288_v27 = vpop.permute.xlu0 %1414 }
 0x36d   : > { %v19290_v37 = vpop.permute.xlu1 %1476  ;;  %v19294_v29 = vpack.i.bf16 %v19288_v27, %v19278_v22  ;;  %15764 = vmatprep.subr.msk.bf16.mxu0 %vm18605_vm2, %v15762_v19  ;;  %24563 = vst [vmem:[#allocation102_spill] sm:$0xff] %v19308_v48 }
 0x36e   : > { %24561 = vst [vmem:[#allocation100_spill] sm:$0xff] %v19290_v37  ;;  %16728 = vrot.lane.b32.xlu0 %v19286_v18, %s17774_s24  ;;  %15767 = vmatpush3.bf16.xpose.msk.msra.mxu0 %vm18605_vm2, %v15762_v19 }
 0x36f   : > { %24562 = vst [vmem:[#allocation101_spill] sm:$0xff] %v19294_v29  ;;  %16743 = vrot.lane.b32.xlu1 %v19294_v29, %s17774_s24  ;;  %15770 = vmatprep.subr.msk.bf16.mxu0 %vm18605_vm2, %v15768_v2 }
 0x370   : > { %v19310_v6 = vpop.permute.xlu0 %1478 }
 0x371   : > { %24564 = vst [vmem:[#allocation103_spill] sm:$0xff] %v19310_v6  ;;  %v19312_v34 = vpop.permute.xlu1 %1540  ;;  %v19316_v8 = vpack.i.bf16 %v19310_v6, %v19290_v37  ;;  %v24591_v37 = vld [vmem:[#allocation36_spill] sm:$0xff] }
 0x372   : > { %24565 = vst [vmem:[#allocation104_spill] sm:$0xff] %v19312_v34  ;;  %16733 = vrot.lane.b32.xlu0 %v19308_v48, %s17774_s24 }
 0x373   : > { %24566 = vst [vmem:[#allocation105_spill] sm:$0xff] %v19316_v8  ;;  %16748 = vrot.lane.b32.xlu1 %v19316_v8, %s17774_s24 }
 0x374   : > { %v19326_v19 = vpop.permute.xlu0 %1542 }
 0x375   : > { %24568 = vst [vmem:[#allocation107_spill] sm:$0xff] %v19326_v19  ;;  %v19328_v38 = vpop.permute.xlu1 %16523  ;;  %v19332_v9 = vpack.i.bf16 %v19326_v19, %v19312_v34  ;;  %v24579_v34 = vld [vmem:[#allocation28_spill] sm:$0xff] }
 0x376   : > { %24569 = vst [vmem:[#allocation108_spill] sm:$0xff] %v19328_v38  ;;  %16738 = vrot.lane.b32.xlu0 %v19324_v55, %s17774_s24  ;;  %15773 = vmatpush3.bf16.xpose.msk.msra.mxu0 %vm18605_vm2, %v15768_v2  ;;  %v24574_v38 = vld [vmem:[#allocation26_spill] sm:$0xff] }
 0x377   : > { %24570 = vst [vmem:[#allocation109_spill] sm:$0xff] %v19332_v9  ;;  %16753 = vrot.lane.b32.xlu1 %v19332_v9, %s17774_s24  ;;  %v24576_v9 = vld [vmem:[#allocation29_spill] sm:$0xff] }
 0x378   : > { %v19340_v8 = vpop.permute.xlu0 %1418 }
 0x379   : > { %v19342_v48 = vpop.permute.xlu1 %1416 }
 0x37a   : > { %v19346_v29 = vpack.i.bf16 %v19340_v8, %v19342_v48 }
 0x37c   : > { %24571 = vst [vmem:[#allocation110_spill] sm:$0xff] %v19346_v29  ;;  %16758 = vrot.lane.b32.xlu0 %v19346_v29, %s17774_s24  ;;  %v19350_v18 = vpop.permute.xlu0 %1482 }
 0x37d   : > { %24572 = vst [vmem:[#allocation111_spill] sm:$0xff] %v19350_v18  ;;  %v19352_v55 = vpop.permute.xlu1 %1480  ;;  %14543 = vmatmul.mubr.msk.f32.vlgmr.msra.gmra.mrb[36].mxu0 %vm1688_vm1, %v24574_v38 }
 0x37e   : > { %24573 = vst [vmem:[#allocation112_spill] sm:$0xff] %v19352_v55  ;;  %v19358_v2 = vpack.i.bf16 %v19350_v18, %v19352_v55  ;;  %14545 = vmatprep.mubr.msk.f32.mxu0 %vm1688_vm1, %v24576_v9 }
 0x380   : > { %24575 = vst [vmem:[#allocation26_spill] sm:$0xff] %v19358_v2  ;;  %16763 = vrot.lane.b32.xlu0 %v19358_v2, %s17774_s24  ;;  %v19364_v19 = vpop.permute.xlu0 %1546 }
 0x381   : > { %24577 = vst [vmem:[#allocation29_spill] sm:$0xff] %v19364_v19  ;;  %v19366_v29 = vpop.permute.xlu1 %1544  ;;  %14546 = vmatmul.mubr.msk.f32.gmra.mrb[38].mxu0 %vm1688_vm1, %v24579_v34 }
 0x382   : > { %24578 = vst [vmem:[#allocation113_spill] sm:$0xff] %v19366_v29  ;;  %v19372_v38 = vpack.i.bf16 %v19364_v19, %v19366_v29  ;;  %14570 = vmatprep.mubr.msk.f32.mxu0 %vm1688_vm1, %v24581_v46 }
 0x384   : > { %24580 = vst [vmem:[#allocation28_spill] sm:$0xff] %v19372_v38  ;;  %16768 = vrot.lane.b32.xlu0 %v19372_v38, %s17774_s24  ;;  %v16529_v9 = vpop.permute.xlu0 %16528 }
 0x385   : > { %v16539_v24 = vpop.permute.xlu1 %16538  ;;  %v16531_v2 = vunpack.i.h.bf16 %v16529_v9  ;;  %v16530_v4 = vunpack.i.l.bf16 %v16529_v9 }
 0x386   : > { %v16541_v18 = vunpack.i.h.bf16 %v16539_v24  ;;  %v16540_v55 = vunpack.i.l.bf16 %v16539_v24 }
 0x387   : > { %v15774_v41 = vpack.c.bf16 %v16531_v2, %v16530_v4 }
 0x388   : > { %v19378_v57 = vpop.permute.xlu0 %16533  ;;  %v19380_v34 = vpop.f32.mrb[0].mxu1  ;;  %v15780_v45 = vpack.c.bf16 %v16541_v18, %v16540_v55 }
 0x389   : > { %24582 = vst [vmem:[#allocation6_spill] sm:$0xff] %v19378_v57  ;;  %v19382_v19 = vpop.permute.xlu1 %1420  ;;  %v1771_v29 = vpop.f32.mrb[1].mxu1  ;;  %15776 = vmatprep.subr.msk.bf16.mxu1 %vm18605_vm2, %v15774_v41 }
 0x38a   : > { %15779 = vmatpush3.bf16.xpose.msk.msra.mxu1 %vm18605_vm2, %v15774_v41 }
 0x38b   : > { %15782 = vmatprep.subr.msk.bf16.mxu1 %vm18605_vm2, %v15780_v45 }
 0x38c   : > { %v19390_v46 = vpop.permute.xlu0 %1422  ;;  %v14463_v24 = vpop.f32.mrb[2].mxu1 }
 0x38d   : > { %v19392_v4 = vpop.permute.xlu1 %1484  ;;  %v19396_v18 = vpack.i.bf16 %v19390_v46, %v19382_v19  ;;  %v1781_v55 = vpop.f32.mrb[3].mxu1 }
 0x38e   : > { %24583 = vst [vmem:[#allocation114_spill] sm:$0xff] %v19392_v4 }
 0x38f   : > { %24584 = vst [vmem:[#allocation115_spill] sm:$0xff] %v19396_v18  ;;  %16773 = vrot.lane.b32.xlu1 %v19396_v18, %s17774_s24 }
 0x390   : > { %v19400_v2 = vpop.permute.xlu0 %1486 }
 0x391   : > { %24585 = vst [vmem:[#allocation116_spill] sm:$0xff] %v19400_v2  ;;  %v19402_v9 = vpop.permute.xlu1 %1548  ;;  %v19406_v41 = vpack.i.bf16 %v19400_v2, %v19392_v4 }
 0x392   : > { %24586 = vst [vmem:[#allocation117_spill] sm:$0xff] %v19402_v9  ;;  %15785 = vmatpush3.bf16.xpose.msk.msra.mxu1 %vm18605_vm2, %v15780_v45 }
 0x393   : > { %24587 = vst [vmem:[#allocation118_spill] sm:$0xff] %v19406_v41  ;;  %16778 = vrot.lane.b32.xlu1 %v19406_v41, %s17774_s24 }
 0x394   : > { %v19412_v38 = vpop.permute.xlu0 %1550 }
 0x395   : > { %24588 = vst [vmem:[#allocation119_spill] sm:$0xff] %v19412_v38  ;;  %v19414_v57 = vpop.permute.xlu1 %16558  ;;  %v19418_v18 = vpack.i.bf16 %v19412_v38, %v19402_v9 }
 0x396   : > { %24589 = vst [vmem:[#allocation120_spill] sm:$0xff] %v19414_v57  ;;  %v1552_v57 = vld [vmem:[%s24157_s1] sm:$0xff] }
 0x397   : > { %24590 = vst [vmem:[#allocation121_spill] sm:$0xff] %v19418_v18  ;;  %16783 = vrot.lane.b32.xlu1 %v19418_v18, %s17774_s24  ;;  %s24024_s24 = scalar_lea.vmem %s24170_s14, %s13628_s15 }
 0x398   : > { %v16544_v62 = vpop.permute.xlu0 %16543 }
 0x399   : > { %v16564_v2 = vpop.permute.xlu1 %16563  ;;  %v16546_v4 = vunpack.i.h.bf16 %v16544_v62  ;;  %v16545_v6 = vunpack.i.l.bf16 %v16544_v62  ;;  %14557 = vmatmul.mubr.msk.f32.vlgmr.msra.gmra.mrb[20].mxu1 %vm1688_vm1, %v24591_v37  ;;  %v19437_v37 = vadd.f32 %v1771_v29, %v1552_v57  ;;  %v1555_v62 = vld [vmem:[%s24157_s1 + $0x18] sm:$0xff] }
 0x39a   : > { %v16566_v45 = vunpack.i.h.bf16 %v16564_v2  ;;  %v16565_v41 = vunpack.i.l.bf16 %v16564_v2  ;;  %14559 = vmatprep.mubr.msk.f32.mxu1 %vm1688_vm1, %v24592_v63 }
 0x39b   : > { %v15786_v38 = vpack.c.bf16 %v16546_v4, %v16545_v6  ;;  %24594 = vst [vmem:[#allocation36_spill] sm:$0xff] %v19437_v37  ;;  %v19452_v6 = vadd.f32 %v14463_v24, %v1555_v62  ;;  %v5169_v57 = vsel %vm502_vm0, %v19437_v37, -inf }
 0x39c   : > { %v19429_v9 = vpop.permute.xlu0 %16548  ;;  %v15792_v18 = vpack.c.bf16 %v16566_v45, %v16565_v41 }
 0x39d   : > { %v19431_v53 = vpop.permute.xlu1 %16568  ;;  %14560 = vmatmul.mubr.msk.f32.gmra.mrb[22].mxu1 %vm1688_vm1, %v24593_v44  ;;  %15788 = vmatprep.subr.msk.bf16.mxu0 %vm18605_vm2, %v15786_v38  ;;  %24596 = vst [vmem:[#allocation38_spill] sm:$0xff] %v19452_v6  ;;  %v5178_v24 = vsel %vm502_vm0, %v19452_v6, -inf }
 0x39e   : > { %15791 = vmatpush3.bf16.xpose.msk.msra.mxu0 %vm18605_vm2, %v15786_v38  ;;  %14584 = vmatprep.mubr.msk.f32.mxu1 %vm1688_vm1, %v18673_v42  ;;  %v1554_v42 = vld [vmem:[%s24157_s1 + $0x10] sm:$0xff] }
 0x39f   : > { %15794 = vmatprep.subr.msk.bf16.mxu0 %vm18605_vm2, %v15792_v18  ;;  %v19459_v41 = vadd.f32 %v1781_v55, %v1554_v42 }
 0x3a0   : > { %v19448_v63 = vpop.permute.xlu0 %16553 }
 0x3a1   : > { %v19450_v44 = vpop.permute.xlu1 %16573  ;;  %24597 = vst [vmem:[#allocation122_spill] sm:$0xff] %v19459_v41  ;;  %v5175_v55 = vsel %vm502_vm0, %v19459_v41, -inf }
 0x3a2   : > { %24595 = vst [vmem:[#allocation39_spill] sm:$0xff] %v19450_v44 }
 0x3a3   : > { %5170 = vmax.xlane.f32.xlu0 %v5169_v57 }
 0x3a4   : > { %v16579_v29 = vpop.permute.xlu0 %16578 }
 0x3a5   : > { %v16594_v38 = vpop.permute.xlu1 %16593  ;;  %v16581_v4 = vunpack.i.h.bf16 %v16579_v29  ;;  %v16580_v2 = vunpack.i.l.bf16 %v16579_v29 }
 0x3a6   : > { %v16596_v45 = vunpack.i.h.bf16 %v16594_v38  ;;  %v16595_v13 = vunpack.i.l.bf16 %v16594_v38  ;;  %15797 = vmatpush3.bf16.xpose.msk.msra.mxu0 %vm18605_vm2, %v15792_v18  ;;  %v1557_v18 = vld [vmem:[%s24157_s1 + $0x28] sm:$0xff]  ;;  %v1556_v38 = vld [vmem:[%s24157_s1 + $0x20] sm:$0xff] }
 0x3a7   : > { %v15798_v62 = vpack.c.bf16 %v16581_v4, %v16580_v2  ;;  %5179 = vmax.xlane.f32.xlu0 %v5178_v24  ;;  %v24600_v4 = vld [vmem:[#allocation2_spill] sm:$0xff]  ;;  %v24602_v24 = vld [vmem:[#allocation8_spill] sm:$0xff] }
 0x3a8   : > { %v19465_v37 = vpop.permute.xlu0 %16583  ;;  %v15804_v44 = vpack.c.bf16 %v16596_v45, %v16595_v13 }
 0x3a9   : > { %v19467_v57 = vpop.permute.xlu1 %16598  ;;  %15800 = vmatprep.subr.msk.bf16.mxu1 %vm18605_vm2, %v15798_v62 }
 0x3aa   : > { %15803 = vmatpush3.bf16.xpose.msk.msra.mxu1 %vm18605_vm2, %v15798_v62 }
 0x3ab   : > { %5176 = vmax.xlane.f32.xlu0 %v5175_v55  ;;  %15806 = vmatprep.subr.msk.bf16.mxu1 %vm18605_vm2, %v15804_v44 }
 0x3ac   : > { %v19480_v13 = vpop.permute.xlu0 %16588  ;;  %v14474_v29 = vpop.f32.mrb[4].mxu1 }
 0x3ad   : > { %24598 = vst [vmem:[#allocation123_spill] sm:$0xff] %v19480_v13  ;;  %v19482_v42 = vpop.permute.xlu1 %16603  ;;  %14571 = vmatmul.mubr.msk.f32.vlgmr.msra.gmra.mrb[40].mxu0 %vm1688_vm1, %v24600_v4  ;;  %v19489_v2 = vadd.f32 %v14474_v29, %v1557_v18  ;;  %v1880_v45 = vpop.f32.mrb[5].mxu1  ;;  %v24604_v18 = vld [vmem:[#allocation9_spill] sm:$0xff] }
 0x3ae   : > { %24599 = vst [vmem:[#allocation124_spill] sm:$0xff] %v19482_v42  ;;  %14573 = vmatprep.mubr.msk.f32.mxu0 %vm1688_vm1, %v24602_v24  ;;  %v19493_v62 = vadd.f32 %v1880_v45, %v1556_v38  ;;  %v1553_v45 = vld [vmem:[%s24157_s1 + $0x8] sm:$0xff] }
 0x3af   : > { %24601 = vst [vmem:[#allocation2_spill] sm:$0xff] %v19489_v2  ;;  %v5184_v41 = vsel %vm502_vm0, %v19489_v2, -inf }
 0x3b0   : > { %24603 = vst [vmem:[#allocation8_spill] sm:$0xff] %v19493_v62  ;;  %v16609_v55 = vpop.permute.xlu0 %16608  ;;  %v14477_v4 = vpop.f32.mrb[6].mxu1  ;;  %5185 = vmax.xlane.f32.xlu0 %v5184_v41 }
 0x3b1   : > { %v16624_v6 = vpop.permute.xlu1 %16623  ;;  %v16611_v42 = vunpack.i.h.bf16 %v16609_v55  ;;  %v16610_v13 = vunpack.i.l.bf16 %v16609_v55  ;;  %14574 = vmatmul.mubr.msk.f32.gmra.mrb[42].mxu0 %vm1688_vm1, %v24604_v18  ;;  %v1890_v38 = vpop.f32.mrb[7].mxu1  ;;  %v19509_v2 = vadd.f32 %v14477_v4, %v1559_v26  ;;  %v5181_v18 = vsel %vm502_vm0, %v19493_v62, -inf }
 0x3b2   : > { %v16626_v29 = vunpack.i.h.bf16 %v16624_v6  ;;  %v16625_v24 = vunpack.i.l.bf16 %v16624_v6  ;;  %15809 = vmatpush3.bf16.xpose.msk.msra.mxu1 %vm18605_vm2, %v15804_v44  ;;  %14598 = vmatprep.mubr.msk.f32.mxu0 %vm1688_vm1, %v18795_v11  ;;  %v1558_v44 = vld [vmem:[%s24157_s1 + $0x30] sm:$0xff]  ;;  %v19523_v11 = vadd.f32 %v19380_v34, %v1553_v45 }
 0x3b3   : > { %v15810_v55 = vpack.c.bf16 %v16611_v42, %v16610_v13  ;;  %24605 = vst [vmem:[#allocation9_spill] sm:$0xff] %v19509_v2  ;;  %v19529_v26 = vadd.f32 %v1890_v38, %v1558_v44  ;;  %v5190_v42 = vsel %vm502_vm0, %v19509_v2, -inf }
 0x3b4   : > { %v19511_v41 = vpop.permute.xlu0 %16613  ;;  %v15816_v6 = vpack.c.bf16 %v16626_v29, %v16625_v24  ;;  %5182 = vmax.xlane.f32.xlu0 %v5181_v18  ;;  %v5172_v34 = vsel %vm502_vm0, %v19523_v11, -inf }
 0x3b5   : > { %v19518_v25 = vpop.permute.xlu1 %16628  ;;  %15812 = vmatprep.subr.msk.bf16.mxu0 %vm18605_vm2, %v15810_v55  ;;  %24606 = vst [vmem:[#allocation125_spill] sm:$0xff] %v19529_v26  ;;  %v5187_v24 = vsel %vm502_vm0, %v19529_v26, -inf }
 0x3b6   : > { %15815 = vmatpush3.bf16.xpose.msk.msra.mxu0 %vm18605_vm2, %v15810_v55 }
 0x3b7   : > { %15818 = vmatprep.subr.msk.bf16.mxu0 %vm18605_vm2, %v15816_v6 }
 0x3b8   : > { %v19531_v13 = vpop.permute.xlu0 %16618  ;;  %5191 = vmax.xlane.f32.xlu0 %v5190_v42 }
 0x3b9   : > { %v19535_v4 = vpop.permute.xlu1 %16633  ;;  %14585 = vmatmul.mubr.msk.f32.vlgmr.msra.gmra.mrb[24].mxu1 %vm1688_vm1, %v18687_v0 }
 0x3ba   : > { %14587 = vmatprep.mubr.msk.f32.mxu1 %vm1688_vm1, %v18740_v59 }
 0x3bb   : > { %5173 = vmax.xlane.f32.xlu1 %v5172_v34 }
 0x3bc   : > { %v16639_v29 = vpop.permute.xlu0 %16638  ;;  %5188 = vmax.xlane.f32.xlu0 %v5187_v24 }
 0x3bd   : > { %v16654_v38 = vpop.permute.xlu1 %16653  ;;  %v16641_v45 = vunpack.i.h.bf16 %v16639_v29  ;;  %v16640_v55 = vunpack.i.l.bf16 %v16639_v29  ;;  %14588 = vmatmul.mubr.msk.f32.gmra.mrb[26].mxu1 %vm1688_vm1, %v18720_v12 }
 0x3be   : > { %v16656_v18 = vunpack.i.h.bf16 %v16654_v38  ;;  %v16655_v0 = vunpack.i.l.bf16 %v16654_v38  ;;  %15821 = vmatpush3.bf16.xpose.msk.msra.mxu0 %vm18605_vm2, %v15816_v6  ;;  %14612 = vmatprep.mubr.msk.f32.mxu1 %vm1688_vm1, %v18859_v52  ;;  %v1561_v52 = vld [vmem:[%s24157_s1 + $0x48] sm:$0xff] }
 0x3bf   : > { %v15822_v59 = vpack.c.bf16 %v16641_v45, %v16640_v55 }
 0x3c0   : > { %v19551_v44 = vpop.permute.xlu0 %16643  ;;  %v15828_v42 = vpack.c.bf16 %v16656_v18, %v16655_v0 }
 0x3c1   : > { %v19553_v34 = vpop.permute.xlu1 %16658  ;;  %15824 = vmatprep.subr.msk.bf16.mxu1 %vm18605_vm2, %v15822_v59 }
 0x3c2   : > { %15827 = vmatpush3.bf16.xpose.msk.msra.mxu1 %vm18605_vm2, %v15822_v59 }
 0x3c3   : > { %15830 = vmatprep.subr.msk.bf16.mxu1 %vm18605_vm2, %v15828_v42 }
 0x3c4   : > { %v19561_v12 = vpop.permute.xlu0 %16648 }
 0x3c5   : > { %v19563_v6 = vpop.permute.xlu1 %16663  ;;  %14599 = vmatmul.mubr.msk.f32.vlgmr.msra.gmra.mrb[44].mxu0 %vm1688_vm1, %v18763_v28 }
 0x3c6   : > { %14601 = vmatprep.mubr.msk.f32.mxu0 %vm1688_vm1, %v18810_v16 }
 0x3c8   : > { %v16669_v29 = vpop.permute.xlu0 %16668  ;;  %v14488_v24 = vpop.f32.mrb[8].mxu1 }
 0x3c9   : > { %v16684_v38 = vpop.permute.xlu1 %16683  ;;  %v16671_v45 = vunpack.i.h.bf16 %v16669_v29  ;;  %v16670_v55 = vunpack.i.l.bf16 %v16669_v29  ;;  %v19572_v18 = vadd.f32 %v14488_v24, %v1561_v52  ;;  %v19574_v0 = vpop.f32.mrb[9].mxu1  ;;  %14602 = vmatmul.mubr.msk.f32.gmra.mrb[46].mxu0 %vm1688_vm1, %v18818_v43 }
 0x3ca   : > { %v16686_v28 = vunpack.i.h.bf16 %v16684_v38  ;;  %v16685_v59 = vunpack.i.l.bf16 %v16684_v38  ;;  %15833 = vmatpush3.bf16.xpose.msk.msra.mxu1 %vm18605_vm2, %v15828_v42  ;;  %14626 = vmatprep.mubr.msk.f32.mxu0 %vm1688_vm1, %v18943_v14 }
 0x3cb   : > { %v15834_v16 = vpack.c.bf16 %v16671_v45, %v16670_v55  ;;  %v5196_v26 = vsel %vm502_vm0, %v19572_v18, -inf }
 0x3cc   : > { %v19584_v29 = vpop.permute.xlu0 %16673  ;;  %5197 = vmax.xlane.f32.xlu1 %v5196_v26  ;;  %v19586_v52 = vpop.f32.mrb[10].mxu1  ;;  %v15840_v24 = vpack.c.bf16 %v16686_v28, %v16685_v59 }
 0x3cd   : > { %v19588_v2 = vpop.permute.xlu1 %16688  ;;  %v19590_v43 = vpop.f32.mrb[11].mxu1  ;;  %15836 = vmatprep.subr.msk.bf16.mxu0 %vm18605_vm2, %v15834_v16 }
 0x3ce   : > { %15839 = vmatpush3.bf16.xpose.msk.msra.mxu0 %vm18605_vm2, %v15834_v16 }
 0x3cf   : > { %15842 = vmatprep.subr.msk.bf16.mxu0 %vm18605_vm2, %v15840_v24 }
 0x3d0   : > { %v19598_v14 = vpop.permute.xlu0 %16678 }
 0x3d1   : > { %v19600_v42 = vpop.permute.xlu1 %16693  ;;  %14613 = vmatmul.mubr.msk.f32.vlgmr.msra.gmra.mrb[28].mxu1 %vm1688_vm1, %v18857_v50 }
 0x3d2   : > { %14615 = vmatprep.mubr.msk.f32.mxu1 %vm1688_vm1, %v18898_v7 }
 0x3d4   : > { %v16699_v26 = vpop.permute.xlu0 %16698 }
 0x3d5   : > { %v16714_v38 = vpop.permute.xlu1 %16713  ;;  %v16701_v45 = vunpack.i.h.bf16 %v16699_v26  ;;  %v16700_v55 = vunpack.i.l.bf16 %v16699_v26  ;;  %14616 = vmatmul.mubr.msk.f32.gmra.mrb[30].mxu1 %vm1688_vm1, %v18910_v30 }
 0x3d6   : > { %v16716_v28 = vunpack.i.h.bf16 %v16714_v38  ;;  %v16715_v59 = vunpack.i.l.bf16 %v16714_v38  ;;  %15845 = vmatpush3.bf16.xpose.msk.msra.mxu0 %vm18605_vm2, %v15840_v24  ;;  %14640 = vmatprep.mubr.msk.f32.mxu1 %vm1688_vm1, %v19070_v39 }
 0x3d7   : > { %v15846_v16 = vpack.c.bf16 %v16701_v45, %v16700_v55 }
 0x3d8   : > { %v19612_v50 = vpop.permute.xlu0 %16703  ;;  %v15852_v62 = vpack.c.bf16 %v16716_v28, %v16715_v59 }
 0x3d9   : > { %v19614_v7 = vpop.permute.xlu1 %16718  ;;  %15848 = vmatprep.subr.msk.bf16.mxu1 %vm18605_vm2, %v15846_v16 }
 0x3da   : > { %15851 = vmatpush3.bf16.xpose.msk.msra.mxu1 %vm18605_vm2, %v15846_v16 }
 0x3db   : > { %15854 = vmatprep.subr.msk.bf16.mxu1 %vm18605_vm2, %v15852_v62 }
 0x3dc   : > { %v19622_v30 = vpop.permute.xlu0 %16708 }
 0x3dd   : > { %v19624_v24 = vpop.permute.xlu1 %16723  ;;  %14627 = vmatmul.mubr.msk.f32.vlgmr.msra.gmra.mrb[48].mxu0 %vm1688_vm1, %v18960_v20 }
 0x3de   : > { %14629 = vmatprep.mubr.msk.f32.mxu0 %vm1688_vm1, %v18998_v36 }
 0x3e0   : > { %v16729_v39 = vpop.permute.xlu0 %16728 }
 0x3e1   : > { %v16731_v26 = vunpack.i.h.bf16 %v16729_v39  ;;  %v16730_v38 = vunpack.i.l.bf16 %v16729_v39  ;;  %v16744_v45 = vpop.permute.xlu1 %16743  ;;  %14630 = vmatmul.mubr.msk.f32.gmra.mrb[50].mxu0 %vm1688_vm1, %v19008_v54  ;;  %v16551_v54 = vunpack.i.h.bf16 %v19429_v9 }
 0x3e2   : > { %v16746_v55 = vunpack.i.h.bf16 %v16744_v45  ;;  %v16745_v28 = vunpack.i.l.bf16 %v16744_v45  ;;  %15857 = vmatpush3.bf16.xpose.msk.msra.mxu1 %vm18605_vm2, %v15852_v62  ;;  %14654 = vmatprep.mubr.msk.f32.mxu0 %vm1688_vm1, %v19194_v33  ;;  %v16550_v62 = vunpack.i.l.bf16 %v19429_v9  ;;  %v1565_v33 = vld [vmem:[%s24157_s1 + $0x68] sm:$0xff] }
 0x3e3   : > { %v15858_v59 = vpack.c.bf16 %v16731_v26, %v16730_v38  ;;  %v1564_v26 = vld [vmem:[%s24157_s1 + $0x60] sm:$0xff] }
 0x3e4   : > { %v15864_v20 = vpack.c.bf16 %v16746_v55, %v16745_v28  ;;  %v19636_v16 = vpop.permute.xlu0 %16733  ;;  %v15882_v38 = vpack.c.bf16 %v16551_v54, %v16550_v62 }
 0x3e5   : > { %15860 = vmatprep.subr.msk.bf16.mxu0 %vm18605_vm2, %v15858_v59 }
 0x3e6   : > { %15863 = vmatpush3.bf16.xpose.msk.msra.mxu0 %vm18605_vm2, %v15858_v59 }
 0x3e7   : > { %15866 = vmatprep.subr.msk.bf16.mxu0 %vm18605_vm2, %v15864_v20 }
 0x3e8   : > { %v19644_v36 = vpop.permute.xlu0 %16738 }
 0x3e9   : > { %14641 = vmatmul.mubr.msk.f32.vlgmr.msra.gmra.mrb[32].mxu1 %vm1688_vm1, %v19064_v10 }
 0x3ea   : > { %14643 = vmatprep.mubr.msk.f32.mxu1 %vm1688_vm1, %v19138_v32 }
 0x3ec   : > { %v14502_v39 = vpop.f32.mrb[12].mxu1 }
 0x3ed   : > { %v19658_v45 = vadd.f32 %v14502_v39, %v1565_v33  ;;  %v2098_v55 = vpop.f32.mrb[13].mxu1  ;;  %14644 = vmatmul.mubr.msk.f32.gmra.mrb[34].mxu1 %vm1688_vm1, %v19154_v56  ;;  %v1567_v56 = vld [vmem:[%s24157_s1 + $0x78] sm:$0xff] }
 0x3ee   : > { %v16759_v10 = vpop.permute.xlu0 %16758  ;;  %15869 = vmatpush3.bf16.xpose.msk.msra.mxu0 %vm18605_vm2, %v15864_v20  ;;  %14668 = vmatprep.mubr.msk.f32.mxu1 %vm1688_vm1, %v19342_v48  ;;  %v19666_v28 = vadd.f32 %v2098_v55, %v1564_v26  ;;  %v16571_v20 = vunpack.i.h.bf16 %v19431_v53  ;;  %v16570_v48 = vunpack.i.l.bf16 %v19431_v53  ;;  %v1566_v55 = vld [vmem:[%s24157_s1 + $0x70] sm:$0xff]  ;;  %v19694_v53 = vpop.permute.xlu1 %16748 }
 0x3ef   : > { %v16761_v32 = vunpack.i.h.bf16 %v16759_v10  ;;  %v16760_v9 = vunpack.i.l.bf16 %v16759_v10  ;;  %15884 = vmatprep.subr.msk.bf16.mxu0 %vm18605_vm2, %v15882_v38  ;;  %v5208_v59 = vsel %vm502_vm0, %v19658_v45, -inf }
 0x3f0   : > { %v14505_v54 = vpop.f32.mrb[14].mxu1  ;;  %5209 = vmax.xlane.f32.xlu0 %v5208_v59  ;;  %v5205_v26 = vsel %vm502_vm0, %v19666_v28, -inf  ;;  %v15888_v10 = vpack.c.bf16 %v16571_v20, %v16570_v48  ;;  %v16616_v59 = vunpack.i.h.bf16 %v19511_v41  ;;  %v16630_v20 = vunpack.i.l.bf16 %v19518_v25 }
 0x3f1   : > { %v15870_v62 = vpack.c.bf16 %v16761_v32, %v16760_v9  ;;  %v2108_v33 = vpop.f32.mrb[15].mxu1  ;;  %v19677_v39 = vadd.f32 %v14505_v54, %v1567_v56 }
 0x3f2   : > { %v19696_v32 = vadd.f32 %v2108_v33, %v1566_v55  ;;  %v19710_v56 = vpop.permute.xlu1 %16753 }
 0x3f3   : > { %15872 = vmatprep.subr.msk.bf16.mxu1 %vm18605_vm2, %v15870_v62  ;;  %v5214_v9 = vsel %vm502_vm0, %v19677_v39, -inf }
 0x3f4   : > { %15875 = vmatpush3.bf16.xpose.msk.msra.mxu1 %vm18605_vm2, %v15870_v62  ;;  %5206 = vmax.xlane.f32.xlu0 %v5205_v26  ;;  %v24607_v26 = vld [vmem:[#allocation3_spill] sm:$0xff] }
 0x3f5   : > { %14655 = vmatmul.mubr.msk.f32.vlgmr.msra.gmra.mrb[52].mxu0 %vm1688_vm1, %v19224_v15  ;;  %v16615_v15 = vunpack.i.l.bf16 %v19511_v41  ;;  %v16586_v41 = vunpack.i.h.bf16 %v19465_v37 }
 0x3f6   : > { %14657 = vmatprep.mubr.msk.f32.mxu0 %vm1688_vm1, %v19278_v22  ;;  %15887 = vmatpush3.bf16.xpose.msk.msra.mxu0 %vm18605_vm2, %v15882_v38  ;;  %v5211_v22 = vsel %vm502_vm0, %v19696_v32, -inf }
 0x3f7   : > { %15890 = vmatprep.subr.msk.bf16.mxu0 %vm18605_vm2, %v15888_v10  ;;  %v15906_v38 = vpack.c.bf16 %v16616_v59, %v16615_v15  ;;  %v16675_v59 = vunpack.i.l.bf16 %v19584_v29  ;;  %v16601_v15 = vunpack.i.h.bf16 %v19467_v57 }
 0x3f8   : > { %5215 = vmax.xlane.f32.xlu0 %v5214_v9  ;;  %v24608_v9 = vld [vmem:[#allocation10_spill] sm:$0xff] }
 0x3f9   : > { %14658 = vmatmul.mubr.msk.f32.gmra.mrb[54].mxu0 %vm1688_vm1, %v19288_v27  ;;  %v16585_v27 = vunpack.i.l.bf16 %v19465_v37  ;;  %v16676_v37 = vunpack.i.h.bf16 %v19584_v29 }
 0x3fa   : > { %14682 = vmatprep.mubr.msk.f32.mxu0 %vm1688_vm1, %v18591_v5  ;;  %v16631_v5 = vunpack.i.h.bf16 %v19518_v25  ;;  %v24609_v25 = vld [vmem:[#allocation11_spill] sm:$0xff] }
 0x3fb   : > { %v15894_v55 = vpack.c.bf16 %v16586_v41, %v16585_v27  ;;  %v1569_v41 = vld [vmem:[%s24157_s1 + $0x88] sm:$0xff] }
 0x3fc   : > { %5212 = vmax.xlane.f32.xlu0 %v5211_v22  ;;  %v16600_v22 = vunpack.i.l.bf16 %v19467_v57 }
 0x3fe   : > { %15893 = vmatpush3.bf16.xpose.msk.msra.mxu0 %vm18605_vm2, %v15888_v10  ;;  %v15912_v10 = vpack.c.bf16 %v16631_v5, %v16630_v20  ;;  %v15900_v27 = vpack.c.bf16 %v16601_v15, %v16600_v22  ;;  %v16646_v5 = vunpack.i.h.bf16 %v19551_v44  ;;  %v16645_v20 = vunpack.i.l.bf16 %v19551_v44 }
 0x3ff   : > { %15908 = vmatprep.subr.msk.bf16.mxu0 %vm18605_vm2, %v15906_v38  ;;  %v16706_v15 = vunpack.i.h.bf16 %v19612_v50  ;;  %v16705_v22 = vunpack.i.l.bf16 %v19612_v50 }
 0x400   : > { %v15918_v44 = vpack.c.bf16 %v16646_v5, %v16645_v20  ;;  %v1572_v20 = vld [vmem:[%s24157_s1 + $0xa0] sm:$0xff] }
 0x401   : > { %v16774_v54 = vpop.permute.xlu1 %16773  ;;  %v15942_v50 = vpack.c.bf16 %v16706_v15, %v16705_v22  ;;  %v24617_v22 = vld [vmem:[#allocation100_spill] sm:$0xff] }
 0x402   : > { %v16776_v48 = vunpack.i.h.bf16 %v16774_v54  ;;  %v16775_v62 = vunpack.i.l.bf16 %v16774_v54  ;;  %v16691_v54 = vunpack.i.h.bf16 %v19588_v2 }
 0x404   : > { %v15876_v33 = vpack.c.bf16 %v16776_v48, %v16775_v62 }
 0x405   : > { %14683 = vmatmul.mubr.msk.f32.vlgmr.msra.gmra.mrb[56].mxu0 %vm1688_vm1, %v24607_v26 }
 0x406   : > { %15878 = vmatprep.subr.msk.bf16.mxu1 %vm18605_vm2, %v15876_v33  ;;  %14685 = vmatprep.mubr.msk.f32.mxu0 %vm1688_vm1, %v24608_v9  ;;  %v16735_v9 = vunpack.i.l.bf16 %v19636_v16 }
 0x407   : > { %15911 = vmatpush3.bf16.xpose.msk.msra.mxu0 %vm18605_vm2, %v15906_v38  ;;  %15881 = vmatpush3.bf16.xpose.msk.msra.mxu1 %vm18605_vm2, %v15876_v33  ;;  %v15930_v38 = vpack.c.bf16 %v16676_v37, %v16675_v59 }
 0x408   : > { %15914 = vmatprep.subr.msk.bf16.mxu0 %vm18605_vm2, %v15912_v10  ;;  %15896 = vmatprep.subr.msk.bf16.mxu1 %vm18605_vm2, %v15894_v55 }
 0x409   : > { %14686 = vmatmul.mubr.msk.f32.gmra.mrb[58].mxu0 %vm1688_vm1, %v24609_v25 }
 0x40a   : > { %14710 = vmatprep.mubr.msk.f32.mxu0 %vm1688_vm1, %v18775_v23 }
 0x40e   : > { %14669 = vmatmul.mubr.msk.f32.vlgmr.msra.gmra.mrb[36].mxu1 %vm1688_vm1, %v19340_v8  ;;  %v1560_v8 = vld [vmem:[%s24157_s1 + $0x40] sm:$0xff] }
 0x40f   : > { %15917 = vmatpush3.bf16.xpose.msk.msra.mxu0 %vm18605_vm2, %v15912_v10  ;;  %14671 = vmatprep.mubr.msk.f32.mxu1 %vm1688_vm1, %v19382_v19  ;;  %v16690_v19 = vunpack.i.l.bf16 %v19588_v2  ;;  %v19773_v62 = vadd.f32 %v19574_v0, %v1560_v8  ;;  %v1568_v2 = vld [vmem:[%s24157_s1 + $0x80] sm:$0xff]  ;;  %v16736_v10 = vunpack.i.h.bf16 %v19636_v16  ;;  %v16750_v16 = vunpack.i.l.bf16 %v19694_v53 }
 0x410   : > { %15899 = vmatpush3.bf16.xpose.msk.msra.mxu1 %vm18605_vm2, %v15894_v55  ;;  %15932 = vmatprep.subr.msk.bf16.mxu0 %vm18605_vm2, %v15930_v38  ;;  %v14516_v23 = vpop.f32.mrb[32].mxu0  ;;  %v16660_v55 = vunpack.i.l.bf16 %v19553_v34  ;;  %v16720_v8 = vunpack.i.l.bf16 %v19614_v7 }
 0x411   : > { %v19758_v57 = vadd.f32 %v14516_v23, %v1569_v41  ;;  %15902 = vmatprep.subr.msk.bf16.mxu1 %vm18605_vm2, %v15900_v27  ;;  %v2207_v29 = vpop.f32.mrb[33].mxu0  ;;  %v15936_v26 = vpack.c.bf16 %v16691_v54, %v16690_v19  ;;  %v5193_v0 = vsel %vm502_vm0, %v19773_v62, -inf  ;;  %v16721_v23 = vunpack.i.h.bf16 %v19614_v7 }
 0x412   : > { %14672 = vmatmul.mubr.msk.f32.gmra.mrb[38].mxu1 %vm1688_vm1, %v19390_v46 }
 0x413   : > { %14696 = vmatprep.mubr.msk.f32.mxu1 %vm1688_vm1, %v18689_v47  ;;  %v5220_v48 = vsel %vm502_vm0, %v19758_v57, -inf  ;;  %v19784_v47 = vadd.f32 %v2207_v29, %v1568_v2  ;;  %v24610_v29 = vld [vmem:[#allocation89_spill] sm:$0xff]  ;;  %v16764_v2 = vpop.permute.xlu0 %16763 }
 0x414   : > { %v14519_v33 = vpop.f32.mrb[34].mxu0  ;;  %5221 = vmax.xlane.f32.xlu1 %v5220_v48  ;;  %v15948_v48 = vpack.c.bf16 %v16721_v23, %v16720_v8  ;;  %v24619_v23 = vld [vmem:[#allocation5_spill] sm:$0xff] }
 0x415   : > { %v2217_v46 = vpop.f32.mrb[35].mxu0  ;;  %v5217_v25 = vsel %vm502_vm0, %v19784_v47, -inf }
 0x416   : > { %14711 = vmatmul.mubr.msk.f32.vlgmr.msra.gmra.mrb[60].mxu0 %vm1688_vm1, %v18761_v3  ;;  %v1563_v3 = vld [vmem:[%s24157_s1 + $0x58] sm:$0xff] }
 0x417   : > { %14713 = vmatprep.mubr.msk.f32.mxu0 %vm1688_vm1, %v18828_v58  ;;  %15935 = vmatpush3.bf16.xpose.msk.msra.mxu0 %vm18605_vm2, %v15930_v38  ;;  %v16661_v58 = vunpack.i.h.bf16 %v19553_v34  ;;  %v19808_v37 = vadd.f32 %v19586_v52, %v1563_v3  ;;  %v15954_v34 = vpack.c.bf16 %v16736_v10, %v16735_v9  ;;  %v1562_v52 = vld [vmem:[%s24157_s1 + $0x50] sm:$0xff]  ;;  %v24613_v3 = vld [vmem:[#allocation39_spill] sm:$0xff]  ;;  %v1575_v10 = vld [vmem:[%s24157_s1 + $0xb8] sm:$0xff]  ;;  %v16766_v9 = vunpack.i.h.bf16 %v16764_v2 }
 0x418   : > { %15905 = vmatpush3.bf16.xpose.msk.msra.mxu1 %vm18605_vm2, %v15900_v27  ;;  %15938 = vmatprep.subr.msk.bf16.mxu0 %vm18605_vm2, %v15936_v26  ;;  %v19841_v38 = vadd.f32 %v19590_v43, %v1562_v52  ;;  %v16555_v43 = vunpack.i.l.bf16 %v19448_v63 }
 0x419   : > { %15920 = vmatprep.subr.msk.bf16.mxu1 %vm18605_vm2, %v15918_v44  ;;  %5194 = vmax.xlane.f32.xlu1 %v5193_v0  ;;  %v15924_v59 = vpack.c.bf16 %v16661_v58, %v16660_v55  ;;  %v16576_v58 = vunpack.i.h.bf16 %v24613_v3  ;;  %v16575_v55 = vunpack.i.l.bf16 %v24613_v3  ;;  %v24626_v3 = vld [vmem:[#allocation12_spill] sm:$0xff] }
 0x41a   : > { %14714 = vmatmul.mubr.msk.f32.gmra.mrb[62].mxu0 %vm1688_vm1, %v18837_v61  ;;  %v1571_v61 = vld [vmem:[%s24157_s1 + $0x98] sm:$0xff] }
 0x41b   : > { %14738 = vmatprep.mubr.msk.f32.mxu0 %vm1688_vm1, %v18950_v60  ;;  %v19821_v60 = vadd.f32 %v14519_v33, %v1571_v61  ;;  %v24611_v33 = vld [vmem:[#allocation33_spill] sm:$0xff]  ;;  %v15984_v52 = vpack.c.bf16 %v16576_v58, %v16575_v55  ;;  %v24628_v58 = vld [vmem:[#allocation124_spill] sm:$0xff] }
 0x41c   : > { %v24614_v61 = vld [vmem:[#allocation41_spill] sm:$0xff]  ;;  %v16606_v55 = vunpack.i.h.bf16 %v24628_v58 }
 0x41d   : > { %5218 = vmax.xlane.f32.xlu1 %v5217_v25  ;;  %v5226_v41 = vsel %vm502_vm0, %v19821_v60, -inf  ;;  %v16765_v25 = vunpack.i.l.bf16 %v16764_v2  ;;  %v24624_v2 = vld [vmem:[#allocation112_spill] sm:$0xff] }
 0x41f   : > { %14697 = vmatmul.mubr.msk.f32.vlgmr.msra.gmra.mrb[40].mxu1 %vm1688_vm1, %v18695_v17  ;;  %15941 = vmatpush3.bf16.xpose.msk.msra.mxu0 %vm18605_vm2, %v15936_v26  ;;  %v5202_v17 = vsel %vm502_vm0, %v19808_v37, -inf  ;;  %v15966_v15 = vpack.c.bf16 %v16766_v9, %v16765_v25  ;;  %v16681_v9 = vunpack.i.h.bf16 %v19598_v14  ;;  %v16680_v25 = vunpack.i.l.bf16 %v19598_v14 }
 0x420   : > { %14699 = vmatprep.mubr.msk.f32.mxu1 %vm1688_vm1, %v18744_v40  ;;  %15923 = vmatpush3.bf16.xpose.msk.msra.mxu1 %vm18605_vm2, %v15918_v44  ;;  %v16751_v40 = vunpack.i.h.bf16 %v19694_v53  ;;  %v1570_v53 = vld [vmem:[%s24157_s1 + $0x90] sm:$0xff] }
 0x421   : > { %15956 = vmatprep.subr.msk.bf16.mxu0 %vm18605_vm2, %v15954_v34  ;;  %15926 = vmatprep.subr.msk.bf16.mxu1 %vm18605_vm2, %v15924_v59 }
 0x422   : > { %5203 = vmax.xlane.f32.xlu1 %v5202_v17  ;;  %v15960_v27 = vpack.c.bf16 %v16751_v40, %v16750_v16  ;;  %v1574_v40 = vld [vmem:[%s24157_s1 + $0xb0] sm:$0xff]  ;;  %v24616_v16 = vld [vmem:[#allocation91_spill] sm:$0xff] }
 0x423   : > { %14700 = vmatmul.mubr.msk.f32.gmra.mrb[42].mxu1 %vm1688_vm1, %v18718_v1  ;;  %v19858_v1 = vadd.f32 %v2217_v46, %v1570_v53  ;;  %v24612_v46 = vld [vmem:[#allocation40_spill] sm:$0xff] }
 0x424   : > { %14724 = vmatprep.mubr.msk.f32.mxu1 %vm1688_vm1, %v18871_v31  ;;  %v5199_v31 = vsel %vm502_vm0, %v19841_v38, -inf }
 0x426   : > { %5227 = vmax.xlane.f32.xlu1 %v5226_v41  ;;  %14739 = vmatmul.mubr.msk.f32.vlgmr.msra.gmra.mrb[64].mxu0 %vm1688_vm1, %v18972_v51  ;;  %v16556_v51 = vunpack.i.h.bf16 %v19448_v63  ;;  %v16779_v41 = vpop.permute.xlu1 %16778 }
 0x427   : > { %14741 = vmatprep.mubr.msk.f32.mxu0 %vm1688_vm1, %v19014_v35  ;;  %15959 = vmatpush3.bf16.xpose.msk.msra.mxu0 %vm18605_vm2, %v15954_v34  ;;  %v1573_v35 = vld [vmem:[%s24157_s1 + $0xa8] sm:$0xff] }
 0x428   : > { %15929 = vmatpush3.bf16.xpose.msk.msra.mxu1 %vm18605_vm2, %v15924_v59  ;;  %15962 = vmatprep.subr.msk.bf16.mxu0 %vm18605_vm2, %v15960_v27  ;;  %v15978_v63 = vpack.c.bf16 %v16556_v51, %v16555_v43  ;;  %v24615_v59 = vld [vmem:[#allocation66_spill] sm:$0xff]  ;;  %v16781_v51 = vunpack.i.h.bf16 %v16779_v41  ;;  %v16780_v43 = vunpack.i.l.bf16 %v16779_v41 }
 0x429   : > { %15944 = vmatprep.subr.msk.bf16.mxu1 %vm18605_vm2, %v15942_v50  ;;  %v1576_v41 = vld [vmem:[%s24157_s1 + $0xc0] sm:$0xff] }
 0x42a   : > { %5200 = vmax.xlane.f32.xlu1 %v5199_v31  ;;  %14742 = vmatmul.mubr.msk.f32.gmra.mrb[66].mxu0 %vm1688_vm1, %v19030_v49  ;;  %v5223_v49 = vsel %vm502_vm0, %v19858_v1, -inf  ;;  %v16621_v31 = vunpack.i.h.bf16 %v19531_v13 }
 0x42b   : > { %14766 = vmatprep.mubr.msk.f32.mxu0 %vm1688_vm1, %v24610_v29 }
 0x42c   : > { %v14530_v54 = vpop.f32.mrb[16].mxu1 }
 0x42d   : > { %v19875_v19 = vadd.f32 %v14530_v54, %v1573_v35  ;;  %v2316_v5 = vpop.f32.mrb[17].mxu1  ;;  %v16620_v35 = vunpack.i.l.bf16 %v19531_v13  ;;  %v15972_v54 = vpack.c.bf16 %v16781_v51, %v16780_v43  ;;  %v16636_v13 = vunpack.i.h.bf16 %v19535_v4  ;;  %v24632_v51 = vld [vmem:[#allocation116_spill] sm:$0xff] }
 0x42e   : > { %5224 = vmax.xlane.f32.xlu1 %v5223_v49  ;;  %v19892_v44 = vadd.f32 %v2316_v5, %v1572_v20  ;;  %v24620_v49 = vld [vmem:[#allocation64_spill] sm:$0xff]  ;;  %v24621_v5 = vld [vmem:[#allocation78_spill] sm:$0xff]  ;;  %v16635_v20 = vunpack.i.l.bf16 %v19535_v4  ;;  %v24627_v4 = vld [vmem:[#allocation13_spill] sm:$0xff] }
 0x42f   : > { %14725 = vmatmul.mubr.msk.f32.vlgmr.msra.gmra.mrb[44].mxu1 %vm1688_vm1, %v24611_v33  ;;  %15965 = vmatpush3.bf16.xpose.msk.msra.mxu0 %vm18605_vm2, %v15960_v27  ;;  %v5232_v7 = vsel %vm502_vm0, %v19875_v19, -inf  ;;  %v16002_v29 = vpack.c.bf16 %v16621_v31, %v16620_v35  ;;  %v16651_v31 = vunpack.i.h.bf16 %v19561_v12  ;;  %v16650_v35 = vunpack.i.l.bf16 %v19561_v12  ;;  %v24634_v12 = vld [vmem:[#allocation24_spill] sm:$0xff] }
 0x430   : > { %14727 = vmatprep.mubr.msk.f32.mxu1 %vm1688_vm1, %v24612_v46  ;;  %15947 = vmatpush3.bf16.xpose.msk.msra.mxu1 %vm18605_vm2, %v15942_v50  ;;  %v14533_v26 = vpop.f32.mrb[18].mxu1  ;;  %v5229_v17 = vsel %vm502_vm0, %v19892_v44, -inf  ;;  %v24618_v50 = vld [vmem:[#allocation103_spill] sm:$0xff]  ;;  %v16008_v46 = vpack.c.bf16 %v16636_v13, %v16635_v20  ;;  %v24635_v13 = vld [vmem:[#allocation30_spill] sm:$0xff] }
 0x431   : > { %15980 = vmatprep.subr.msk.bf16.mxu0 %vm18605_vm2, %v15978_v63  ;;  %15950 = vmatprep.subr.msk.bf16.mxu1 %vm18605_vm2, %v15948_v48  ;;  %v2326_v0 = vpop.f32.mrb[19].mxu1  ;;  %v19907_v34 = vadd.f32 %v14533_v26, %v1575_v10  ;;  %v24625_v26 = vld [vmem:[#allocation4_spill] sm:$0xff]  ;;  %v16605_v10 = vunpack.i.l.bf16 %v24628_v58 }
 0x432   : > { %5233 = vmax.xlane.f32.xlu0 %v5232_v7  ;;  %v19924_v27 = vadd.f32 %v2326_v0, %v1574_v40  ;;  %v24623_v7 = vld [vmem:[#allocation80_spill] sm:$0xff]  ;;  %v24630_v40 = vld [vmem:[#allocation111_spill] sm:$0xff] }
 0x433   : > { %14728 = vmatmul.mubr.msk.f32.gmra.mrb[46].mxu1 %vm1688_vm1, %v24614_v61  ;;  %v5238_v53 = vsel %vm502_vm0, %v19907_v34, -inf  ;;  %v24629_v61 = vld [vmem:[#allocation25_spill] sm:$0xff] }
 0x434   : > { %14752 = vmatprep.mubr.msk.f32.mxu1 %vm1688_vm1, %v24615_v59  ;;  %v5235_v8 = vsel %vm502_vm0, %v19924_v27, -inf  ;;  %v1577_v59 = vld [vmem:[%s24157_s1 + $0xc8] sm:$0xff] }
 0x436   : > { %5230 = vmax.xlane.f32.xlu0 %v5229_v17  ;;  %14767 = vmatmul.mubr.msk.f32.vlgmr.msra.gmra.mrb[68].mxu0 %vm1688_vm1, %v24616_v16  ;;  %v15996_v17 = vpack.c.bf16 %v16606_v55, %v16605_v10  ;;  %v24631_v16 = vld [vmem:[#allocation114_spill] sm:$0xff]  ;;  %v24638_v10 = vld [vmem:[#allocation17_spill] sm:$0xff] }
 0x437   : > { %14769 = vmatprep.mubr.msk.f32.mxu0 %vm1688_vm1, %v24617_v22  ;;  %15983 = vmatpush3.bf16.xpose.msk.msra.mxu0 %vm18605_vm2, %v15978_v63  ;;  %v24622_v63 = vld [vmem:[#allocation123_spill] sm:$0xff] }
 0x438   : > { %15953 = vmatpush3.bf16.xpose.msk.msra.mxu1 %vm18605_vm2, %v15948_v48  ;;  %15986 = vmatprep.subr.msk.bf16.mxu0 %vm18605_vm2, %v15984_v52  ;;  %v16591_v48 = vunpack.i.h.bf16 %v24622_v63  ;;  %v16590_v33 = vunpack.i.l.bf16 %v24622_v63 }
 0x439   : > { %15968 = vmatprep.subr.msk.bf16.mxu1 %vm18605_vm2, %v15966_v15 }
 0x43a   : > { %5239 = vmax.xlane.f32.xlu0 %v5238_v53  ;;  %14770 = vmatmul.mubr.msk.f32.gmra.mrb[70].mxu0 %vm1688_vm1, %v24618_v50  ;;  %v15990_v0 = vpack.c.bf16 %v16591_v48, %v16590_v33  ;;  %v16696_v53 = vunpack.i.h.bf16 %v19600_v42  ;;  %v16695_v50 = vunpack.i.l.bf16 %v19600_v42  ;;  %v1579_v42 = vld [vmem:[%s24157_s1 + $0xd8] sm:$0xff]  ;;  %v1578_v48 = vld [vmem:[%s24157_s1 + $0xd0] sm:$0xff]  ;;  %v24636_v33 = vld [vmem:[#allocation31_spill] sm:$0xff] }
 0x43b   : > { %14794 = vmatprep.mubr.msk.f32.mxu0 %vm1688_vm1, %v24619_v23 }
 0x43e   : > { %5236 = vmax.xlane.f32.xlu0 %v5235_v8  ;;  %v24633_v8 = vld [vmem:[#allocation15_spill] sm:$0xff] }
 0x43f   : > { %14753 = vmatmul.mubr.msk.f32.vlgmr.msra.gmra.mrb[48].mxu1 %vm1688_vm1, %v24620_v49  ;;  %15989 = vmatpush3.bf16.xpose.msk.msra.mxu0 %vm18605_vm2, %v15984_v52  ;;  %v16026_v52 = vpack.c.bf16 %v16681_v9, %v16680_v25  ;;  %v16032_v49 = vpack.c.bf16 %v16696_v53, %v16695_v50  ;;  %v16756_v9 = vunpack.i.h.bf16 %v19710_v56  ;;  %v16755_v25 = vunpack.i.l.bf16 %v19710_v56  ;;  %v1581_v56 = vld [vmem:[%s24157_s1 + $0xe8] sm:$0xff] }
 0x440   : > { %14755 = vmatprep.mubr.msk.f32.mxu1 %vm1688_vm1, %v24621_v5  ;;  %15971 = vmatpush3.bf16.xpose.msk.msra.mxu1 %vm18605_vm2, %v15966_v15  ;;  %v16014_v5 = vpack.c.bf16 %v16651_v31, %v16650_v35  ;;  %v16726_v31 = vunpack.i.h.bf16 %v19624_v24  ;;  %v16725_v35 = vunpack.i.l.bf16 %v19624_v24 }
 0x441   : > { %16004 = vmatprep.subr.msk.bf16.mxu0 %vm18605_vm2, %v16002_v29  ;;  %15974 = vmatprep.subr.msk.bf16.mxu1 %vm18605_vm2, %v15972_v54 }
 0x443   : > { %14756 = vmatmul.mubr.msk.f32.gmra.mrb[50].mxu1 %vm1688_vm1, %v24623_v7  ;;  %v16666_v7 = vunpack.i.h.bf16 %v19563_v6 }
 0x444   : > { %14780 = vmatprep.mubr.msk.f32.mxu1 %vm1688_vm1, %v24624_v2  ;;  %v16665_v2 = vunpack.i.l.bf16 %v19563_v6  ;;  %v24639_v6 = vld [vmem:[#allocation23_spill] sm:$0xff] }
 0x446   : > { %14795 = vmatmul.mubr.msk.f32.vlgmr.msra.gmra.mrb[72].mxu0 %vm1688_vm1, %v24625_v26  ;;  %v16740_v26 = vunpack.i.l.bf16 %v19644_v36  ;;  %v16020_v58 = vpack.c.bf16 %v16666_v7, %v16665_v2  ;;  %v24649_v7 = vld [vmem:[#allocation14_spill] sm:$0xff] }
 0x447   : > { %14797 = vmatprep.mubr.msk.f32.mxu0 %vm1688_vm1, %v24626_v3  ;;  %16007 = vmatpush3.bf16.xpose.msk.msra.mxu0 %vm18605_vm2, %v16002_v29  ;;  %v16406_v2 = vunpack.i.h.bf16 %v24649_v7 }
 0x448   : > { %15977 = vmatpush3.bf16.xpose.msk.msra.mxu1 %vm18605_vm2, %v15972_v54  ;;  %16010 = vmatprep.subr.msk.bf16.mxu0 %vm18605_vm2, %v16008_v46 }
 0x449   : > { %15992 = vmatprep.subr.msk.bf16.mxu1 %vm18605_vm2, %v15990_v0 }
 0x44a   : > { %14798 = vmatmul.mubr.msk.f32.gmra.mrb[74].mxu0 %vm1688_vm1, %v24627_v4 }
 0x44b   : > { %14822 = vmatprep.mubr.msk.f32.mxu0 %vm1688_vm1, %v24629_v61  ;;  %v16711_v61 = vunpack.i.h.bf16 %v19622_v30 }
 0x44f   : > { %14781 = vmatmul.mubr.msk.f32.vlgmr.msra.gmra.mrb[52].mxu1 %vm1688_vm1, %v24630_v40  ;;  %16013 = vmatpush3.bf16.xpose.msk.msra.mxu0 %vm18605_vm2, %v16008_v46  ;;  %v16741_v46 = vunpack.i.h.bf16 %v19644_v36  ;;  %v16056_v40 = vpack.c.bf16 %v16756_v9, %v16755_v25 }
 0x450   : > { %14783 = vmatprep.mubr.msk.f32.mxu1 %vm1688_vm1, %v24631_v16  ;;  %15995 = vmatpush3.bf16.xpose.msk.msra.mxu1 %vm18605_vm2, %v15990_v0  ;;  %v14544_v14 = vpop.f32.mrb[36].mxu0  ;;  %v24637_v0 = vld [vmem:[#allocation46_spill] sm:$0xff]  ;;  %v24642_v16 = vld [vmem:[#allocation48_spill] sm:$0xff] }
 0x451   : > { %16028 = vmatprep.subr.msk.bf16.mxu0 %vm18605_vm2, %v16026_v52  ;;  %v19991_v15 = vadd.f32 %v14544_v14, %v1577_v59  ;;  %15998 = vmatprep.subr.msk.bf16.mxu1 %vm18605_vm2, %v15996_v17  ;;  %v2425_v22 = vpop.f32.mrb[37].mxu0  ;;  %v16050_v55 = vpack.c.bf16 %v16741_v46, %v16740_v26  ;;  %v16710_v59 = vunpack.i.l.bf16 %v19622_v30  ;;  %v24644_v30 = vld [vmem:[#allocation58_spill] sm:$0xff]  ;;  %v16405_v46 = vunpack.i.l.bf16 %v24649_v7  ;;  %v1583_v26 = vld [vmem:[%s24157_s1 + $0xf8] sm:$0xff] }
 0x452   : > { %v20006_v23 = vadd.f32 %v2425_v22, %v1576_v41  ;;  %v24643_v22 = vld [vmem:[#allocation56_spill] sm:$0xff]  ;;  %v24645_v41 = vld [vmem:[#allocation7_spill] sm:$0xff]  ;;  %v24661_v7 = vld [vmem:[#allocation113_spill] sm:$0xff] }
 0x453   : > { %14784 = vmatmul.mubr.msk.f32.gmra.mrb[54].mxu1 %vm1688_vm1, %v24632_v51  ;;  %v5244_v43 = vsel %vm502_vm0, %v19991_v15, -inf  ;;  %v16038_v14 = vpack.c.bf16 %v16711_v61, %v16710_v59  ;;  %v16396_v53 = vunpack.i.h.bf16 %v24645_v41  ;;  %v16395_v50 = vunpack.i.l.bf16 %v24645_v41  ;;  %v24646_v51 = vld [vmem:[#allocation90_spill] sm:$0xff]  ;;  %v1582_v61 = vld [vmem:[%s24157_s1 + $0xf0] sm:$0xff]  ;;  %v24653_v59 = vld [vmem:[#allocation95_spill] sm:$0xff] }
 0x454   : > { %14808 = vmatprep.mubr.msk.f32.mxu1 %vm1688_vm1, %v24633_v8  ;;  %v14547_v29 = vpop.f32.mrb[38].mxu0  ;;  %5245 = vmax.xlane.f32.xlu1 %v5244_v43  ;;  %v5241_v63 = vsel %vm502_vm0, %v20006_v23, -inf }
 0x455   : > { %v2435_v54 = vpop.f32.mrb[39].mxu0  ;;  %v20019_v20 = vadd.f32 %v14547_v29, %v1579_v42  ;;  %v1580_v42 = vld [vmem:[%s24157_s1 + $0xe0] sm:$0xff] }
 0x456   : > { %14823 = vmatmul.mubr.msk.f32.vlgmr.msra.gmra.mrb[76].mxu0 %vm1688_vm1, %v24634_v12  ;;  %v20042_v4 = vadd.f32 %v2435_v54, %v1578_v48  ;;  %v16044_v54 = vpack.c.bf16 %v16726_v31, %v16725_v35  ;;  %v16074_v12 = vpack.c.bf16 %v16396_v53, %v16395_v50  ;;  %v1585_v31 = vld [vmem:[%s24157_s1 + $0x108] sm:$0xff] }
 0x457   : > { %14825 = vmatprep.mubr.msk.f32.mxu0 %vm1688_vm1, %v24635_v13  ;;  %16031 = vmatpush3.bf16.xpose.msk.msra.mxu0 %vm18605_vm2, %v16026_v52  ;;  %v5250_v3 = vsel %vm502_vm0, %v20019_v20, -inf  ;;  %v24641_v52 = vld [vmem:[#allocation35_spill] sm:$0xff]  ;;  %v24648_v13 = vld [vmem:[#allocation42_spill] sm:$0xff] }
 0x458   : > { %16001 = vmatpush3.bf16.xpose.msk.msra.mxu1 %vm18605_vm2, %v15996_v17  ;;  %16034 = vmatprep.subr.msk.bf16.mxu0 %vm18605_vm2, %v16032_v49  ;;  %v5247_v36 = vsel %vm502_vm0, %v20042_v4, -inf  ;;  %v24640_v17 = vld [vmem:[#allocation19_spill] sm:$0xff] }
 0x459   : > { %16016 = vmatprep.subr.msk.bf16.mxu1 %vm18605_vm2, %v16014_v5  ;;  %5242 = vmax.xlane.f32.xlu1 %v5241_v63 }
 0x45a   : > { %14826 = vmatmul.mubr.msk.f32.gmra.mrb[78].mxu0 %vm1688_vm1, %v24636_v33 }
 0x45b   : > { %14850 = vmatprep.mubr.msk.f32.mxu0 %vm1688_vm1, %v24637_v0 }
 0x45d   : > { %5251 = vmax.xlane.f32.xlu1 %v5250_v3 }
 0x45f   : > { %14809 = vmatmul.mubr.msk.f32.vlgmr.msra.gmra.mrb[56].mxu1 %vm1688_vm1, %v24638_v10  ;;  %16037 = vmatpush3.bf16.xpose.msk.msra.mxu0 %vm18605_vm2, %v16032_v49  ;;  %v24647_v49 = vld [vmem:[#allocation34_spill] sm:$0xff] }
 0x460   : > { %14811 = vmatprep.mubr.msk.f32.mxu1 %vm1688_vm1, %v24639_v6  ;;  %16019 = vmatpush3.bf16.xpose.msk.msra.mxu1 %vm18605_vm2, %v16014_v5  ;;  %v16769_v5 = vpop.permute.xlu0 %16768 }
 0x461   : > { %16052 = vmatprep.subr.msk.bf16.mxu0 %vm18605_vm2, %v16050_v55  ;;  %16022 = vmatprep.subr.msk.bf16.mxu1 %vm18605_vm2, %v16020_v58  ;;  %v16771_v0 = vunpack.i.h.bf16 %v16769_v5  ;;  %v16770_v3 = vunpack.i.l.bf16 %v16769_v5 }
 0x462   : > { %5248 = vmax.xlane.f32.xlu1 %v5247_v36  ;;  %v24652_v36 = vld [vmem:[#allocation18_spill] sm:$0xff] }
 0x463   : > { %14812 = vmatmul.mubr.msk.f32.gmra.mrb[58].mxu1 %vm1688_vm1, %v24640_v17  ;;  %v16416_v9 = vunpack.i.h.bf16 %v24652_v36  ;;  %v16415_v25 = vunpack.i.l.bf16 %v24652_v36  ;;  %v16078_v17 = vpack.c.bf16 %v16406_v2, %v16405_v46  ;;  %v1587_v2 = vld [vmem:[%s24157_s1 + $0x118] sm:$0xff]  ;;  %v24663_v36 = vld [vmem:[#allocation32_spill] sm:$0xff] }
 0x464   : > { %14836 = vmatprep.mubr.msk.f32.mxu1 %vm1688_vm1, %v24641_v52  ;;  %v16062_v52 = vpack.c.bf16 %v16771_v0, %v16770_v3 }
 0x466   : > { %14851 = vmatmul.mubr.msk.f32.vlgmr.msra.gmra.mrb[80].mxu0 %vm1688_vm1, %v24642_v16  ;;  %v16784_v16 = vpop.permute.xlu1 %16783 }
 0x467   : > { %14853 = vmatprep.mubr.msk.f32.mxu0 %vm1688_vm1, %v24643_v22  ;;  %16055 = vmatpush3.bf16.xpose.msk.msra.mxu0 %vm18605_vm2, %v16050_v55  ;;  %v24651_v55 = vld [vmem:[#allocation70_spill] sm:$0xff]  ;;  %v16786_v41 = vunpack.i.h.bf16 %v16784_v16  ;;  %v16785_v53 = vunpack.i.l.bf16 %v16784_v16  ;;  %v24664_v16 = vld [vmem:[#allocation47_spill] sm:$0xff] }
 0x468   : > { %16025 = vmatpush3.bf16.xpose.msk.msra.mxu1 %vm18605_vm2, %v16020_v58  ;;  %16058 = vmatprep.subr.msk.bf16.mxu0 %vm18605_vm2, %v16056_v40  ;;  %v24650_v58 = vld [vmem:[#allocation44_spill] sm:$0xff] }
 0x469   : > { %16040 = vmatprep.subr.msk.bf16.mxu1 %vm18605_vm2, %v16038_v14  ;;  %v16068_v35 = vpack.c.bf16 %v16786_v41, %v16785_v53  ;;  %v24665_v41 = vld [vmem:[#allocation29_spill] sm:$0xff] }
 0x46a   : > { %14854 = vmatmul.mubr.msk.f32.gmra.mrb[82].mxu0 %vm1688_vm1, %v24644_v30  ;;  %v24655_v30 = vld [vmem:[#allocation107_spill] sm:$0xff] }
 0x46b   : > { %14878 = vmatprep.mubr.msk.f32.mxu0 %vm1688_vm1, %v24646_v51  ;;  %v24656_v51 = vld [vmem:[#allocation68_spill] sm:$0xff] }
 0x46c   : > { %v14558_v43 = vpop.f32.mrb[20].mxu1 }
 0x46d   : > { %v20089_v8 = vadd.f32 %v14558_v43, %v1581_v56  ;;  %v2534_v29 = vpop.f32.mrb[21].mxu1  ;;  %v20140_v56 = vpack.c.bf16 %v16416_v9, %v16415_v25  ;;  %v24657_v43 = vld [vmem:[#allocation82_spill] sm:$0xff]  ;;  %v16446_v9 = vunpack.i.h.bf16 %v24663_v36  ;;  %v16445_v25 = vunpack.i.l.bf16 %v24663_v36  ;;  %v1595_v36 = vld [vmem:[%s24157_s1 + $0x158] sm:$0xff] }
 0x46e   : > { %v20104_v48 = vadd.f32 %v2534_v29, %v1580_v42  ;;  %v1584_v42 = vld [vmem:[%s24157_s1 + $0x100] sm:$0xff] }
 0x46f   : > { %14837 = vmatmul.mubr.msk.f32.vlgmr.msra.gmra.mrb[60].mxu1 %vm1688_vm1, %v24647_v49  ;;  %16061 = vmatpush3.bf16.xpose.msk.msra.mxu0 %vm18605_vm2, %v16056_v40  ;;  %v5256_v24 = vsel %vm502_vm0, %v20089_v8, -inf  ;;  %v24654_v40 = vld [vmem:[#allocation104_spill] sm:$0xff]  ;;  %v16094_v53 = vpack.c.bf16 %v16446_v9, %v16445_v25 }
 0x470   : > { %14839 = vmatprep.mubr.msk.f32.mxu1 %vm1688_vm1, %v24648_v13  ;;  %16043 = vmatpush3.bf16.xpose.msk.msra.mxu1 %vm18605_vm2, %v16038_v14  ;;  %v14561_v63 = vpop.f32.mrb[22].mxu1  ;;  %v5253_v6 = vsel %vm502_vm0, %v20104_v48, -inf }
 0x471   : > { %16075 = vmatprep.subr.bf16.mxu0 %v16074_v12  ;;  %16046 = vmatprep.subr.msk.bf16.mxu1 %vm18605_vm2, %v16044_v54  ;;  %v2544_v33 = vpop.f32.mrb[23].mxu1  ;;  %v20117_v10 = vadd.f32 %v14561_v63, %v1583_v26  ;;  %v24660_v63 = vld [vmem:[#allocation84_spill] sm:$0xff] }
 0x472   : > { %5257 = vmax.xlane.f32.xlu0 %v5256_v24  ;;  %v20132_v14 = vadd.f32 %v2544_v33, %v1582_v61 }
 0x473   : > { %14840 = vmatmul.mubr.msk.f32.gmra.mrb[62].mxu1 %vm1688_vm1, %v24650_v58  ;;  %v5262_v22 = vsel %vm502_vm0, %v20117_v10, -inf }
 0x474   : > { %14864 = vmatprep.mubr.msk.f32.mxu1 %vm1688_vm1, %v24651_v55  ;;  %v5259_v50 = vsel %vm502_vm0, %v20132_v14, -inf  ;;  %v1586_v55 = vld [vmem:[%s24157_s1 + $0x110] sm:$0xff] }
 0x476   : > { %5254 = vmax.xlane.f32.xlu0 %v5253_v6  ;;  %14879 = vmatmul.mubr.msk.f32.vlgmr.msra.gmra.mrb[84].mxu0 %vm1688_vm1, %v24653_v59  ;;  %v1589_v6 = vld [vmem:[%s24157_s1 + $0x128] sm:$0xff] }
 0x477   : > { %14881 = vmatprep.mubr.msk.f32.mxu0 %vm1688_vm1, %v24654_v40  ;;  %16077 = vmatpush3.bf16.msra.mxu0 %v16074_v12  ;;  %v24659_v12 = vld [vmem:[#allocation27_spill] sm:$0xff]  ;;  %v1588_v40 = vld [vmem:[%s24157_s1 + $0x120] sm:$0xff] }
 0x478   : > { %16049 = vmatpush3.bf16.xpose.msk.msra.mxu1 %vm18605_vm2, %v16044_v54  ;;  %16079 = vmatprep.subr.bf16.mxu0 %v16078_v17  ;;  %v16436_v24 = vunpack.i.h.bf16 %v24659_v12  ;;  %v16435_v5 = vunpack.i.l.bf16 %v24659_v12 }
 0x479   : > { %16064 = vmatprep.subr.msk.bf16.mxu1 %vm18605_vm2, %v16062_v52 }
 0x47a   : > { %5263 = vmax.xlane.f32.xlu0 %v5262_v22  ;;  %14882 = vmatmul.mubr.msk.f32.gmra.mrb[86].mxu0 %vm1688_vm1, %v24655_v30  ;;  %v16090_v3 = vpack.c.bf16 %v16436_v24, %v16435_v5  ;;  %v16476_v22 = vunpack.i.h.bf16 %v24664_v16  ;;  %v16475_v30 = vunpack.i.l.bf16 %v24664_v16  ;;  %v1597_v16 = vld [vmem:[%s24157_s1 + $0x168] sm:$0xff] }
 0x47b   : > { %16081 = vmatpush3.bf16.msra.mxu0 %v16078_v17 }
 0x47c   : > { %16083 = vmatprep.subr.bf16.mxu0 %v20140_v56  ;;  %v20214_v12 = vpack.c.bf16 %v16476_v22, %v16475_v30 }
 0x47e   : > { %5260 = vmax.xlane.f32.xlu0 %v5259_v50  ;;  %24668 = vst [vmem:[#allocation11_spill] sm:$0xff] %v20214_v12 }
 0x47f   : > { %14865 = vmatmul.mubr.msk.f32.vlgmr.msra.gmra.mrb[64].mxu1 %vm1688_vm1, %v24656_v51 }
 0x480   : > { %14867 = vmatprep.mubr.msk.f32.mxu1 %vm1688_vm1, %v24657_v43  ;;  %16067 = vmatpush3.bf16.xpose.msk.msra.mxu1 %vm18605_vm2, %v16062_v52  ;;  %v14572_v29 = vpop.f32.mrb[40].mxu0 }
 0x481   : > { %v20157_v54 = vadd.f32 %v14572_v29, %v1585_v31  ;;  %16070 = vmatprep.subr.msk.bf16.mxu1 %vm18605_vm2, %v16068_v35  ;;  %v2643_v49 = vpop.f32.mrb[41].mxu0  ;;  %v24666_v31 = vld [vmem:[#allocation117_spill] sm:$0xff] }
 0x482   : > { %v20163_v13 = vadd.f32 %v2643_v49, %v1584_v42  ;;  %v1591_v42 = vld [vmem:[%s24157_s1 + $0x138] sm:$0xff]  ;;  %v24667_v49 = vld [vmem:[#allocation119_spill] sm:$0xff] }
 0x483   : > { %24658 = vst [vmem:[#allocation3_spill] sm:$0xff] %v20157_v54  ;;  %14868 = vmatmul.mubr.msk.f32.gmra.mrb[66].mxu1 %vm1688_vm1, %v24660_v63  ;;  %v5268_v33 = vsel %vm502_vm0, %v20157_v54, -inf  ;;  %v1590_v63 = vld [vmem:[%s24157_s1 + $0x130] sm:$0xff] }
 0x484   : > { %14892 = vmatprep.mubr.msk.f32.mxu1 %vm1688_vm1, %v24661_v7  ;;  %v14575_v46 = vpop.f32.mrb[42].mxu0  ;;  %5269 = vmax.xlane.f32.xlu1 %v5268_v33  ;;  %v5265_v58 = vsel %vm502_vm0, %v20163_v13, -inf  ;;  %v1593_v33 = vld [vmem:[%s24157_s1 + $0x148] sm:$0xff] }
 0x485   : > { %v2653_v26 = vpop.f32.mrb[43].mxu0  ;;  %v20174_v0 = vadd.f32 %v14575_v46, %v1587_v2  ;;  %v1592_v2 = vld [vmem:[%s24157_s1 + $0x140] sm:$0xff] }
 0x486   : > { %v20190_v59 = vadd.f32 %v2653_v26, %v1586_v55 }
 0x487   : > { %24662 = vst [vmem:[#allocation10_spill] sm:$0xff] %v20174_v0  ;;  %v5274_v61 = vsel %vm502_vm0, %v20174_v0, -inf }
 0x488   : > { %16073 = vmatpush3.bf16.xpose.msk.msra.mxu1 %vm18605_vm2, %v16068_v35  ;;  %5266 = vmax.xlane.f32.xlu1 %v5265_v58  ;;  %v5271_v51 = vsel %vm502_vm0, %v20190_v59, -inf }
 0x489   : > { %16091 = vmatprep.subr.bf16.mxu1 %v16090_v3 }
 0x48c   : > { %v14586_v21 = vpop.f32.mrb[24].mxu1  ;;  %5275 = vmax.xlane.f32.xlu1 %v5274_v61 }
 0x48d   : > { %v20192_v17 = vadd.f32 %v14586_v21, %v1589_v6  ;;  %v2752_v52 = vpop.f32.mrb[25].mxu1 }
 0x48e   : > { %v20207_v43 = vadd.f32 %v2752_v52, %v1588_v40  ;;  %v1594_v40 = vld [vmem:[%s24157_s1 + $0x150] sm:$0xff] }
 0x48f   : > { %14893 = vmatmul.mubr.msk.f32.vlgmr.msra.gmra.mrb[68].mxu1 %vm1688_vm1, %v24665_v41  ;;  %v5280_v50 = vsel %vm502_vm0, %v20192_v17, -inf }
 0x490   : > { %14895 = vmatprep.mubr.msk.f32.mxu1 %vm1688_vm1, %v24666_v31  ;;  %16093 = vmatpush3.bf16.msra.mxu1 %v16090_v3  ;;  %v14589_v35 = vpop.f32.mrb[26].mxu1  ;;  %v5277_v5 = vsel %vm502_vm0, %v20207_v43, -inf }
 0x491   : > { %16095 = vmatprep.subr.bf16.mxu1 %v16094_v53  ;;  %5272 = vmax.xlane.f32.xlu1 %v5271_v51  ;;  %v2762_v29 = vpop.f32.mrb[27].mxu1  ;;  %v20216_v24 = vadd.f32 %v14589_v35, %v1591_v42  ;;  %v1599_v42 = vld [vmem:[%s24157_s1 + $0x178] sm:$0xff] }
 0x492   : > { %5281 = vmax.xlane.f32.xlu0 %v5280_v50  ;;  %v20230_v46 = vadd.f32 %v2762_v29, %v1590_v63 }
 0x493   : > { %14896 = vmatmul.mubr.msk.f32.gmra.mrb[70].mxu1 %vm1688_vm1, %v24667_v49  ;;  %v5286_v3 = vsel %vm502_vm0, %v20216_v24, -inf }
 0x494   : > { %16097 = vmatpush3.bf16.msra.mxu1 %v16094_v53  ;;  %v5283_v25 = vsel %vm502_vm0, %v20230_v46, -inf  ;;  %v1596_v53 = vld [vmem:[%s24157_s1 + $0x160] sm:$0xff] }
 0x495   : > { %16107 = vmatprep.subr.bf16.mxu1 %v20214_v12 }
 0x496   : > { %5278 = vmax.xlane.f32.xlu0 %v5277_v5  ;;  %v5171_v5 = vpop.xlane.xlu0 %5170 }
 0x498   : > { %v14600_v7 = vpop.f32.mrb[44].mxu0 }
 0x499   : > { %v20232_v26 = vadd.f32 %v14600_v7, %v1593_v33  ;;  %v2861_v58 = vpop.f32.mrb[45].mxu0  ;;  %v5174_v33 = vpop.xlane.xlu1 %5173 }
 0x49a   : > { %5287 = vmax.xlane.f32.xlu0 %v5286_v3  ;;  %v20236_v55 = vadd.f32 %v2861_v58, %v1592_v2  ;;  %v1598_v3 = vld [vmem:[%s24157_s1 + $0x170] sm:$0xff]  ;;  %v5554_v58 = vsub.f32 %v19523_v11, %v5174_v33  ;;  %v24675_v11 = vld [vmem:[#allocation38_spill] sm:$0xff] }
 0x49b   : > { %24669 = vst [vmem:[#allocation89_spill] sm:$0xff] %v20232_v26  ;;  %v5292_v6 = vsel %vm502_vm0, %v20232_v26, -inf }
 0x49c   : > { %v14603_v9 = vpop.f32.mrb[46].mxu0  ;;  %5293 = vmax.xlane.f32.xlu1 %v5292_v6  ;;  %v5289_v52 = vsel %vm502_vm0, %v20236_v55, -inf  ;;  %v1601_v6 = vld [vmem:[%s24157_s1 + $0x188] sm:$0xff] }
 0x49d   : > { %v2871_v61 = vpop.f32.mrb[47].mxu0  ;;  %v20245_v21 = vadd.f32 %v14603_v9, %v1595_v36  ;;  %v5180_v36 = vpop.xlane.xlu0 %5179 }
 0x49e   : > { %5284 = vmax.xlane.f32.xlu0 %v5283_v25  ;;  %v20255_v22 = vadd.f32 %v2871_v61, %v1594_v40 }
 0x49f   : > { %24670 = vst [vmem:[#allocation33_spill] sm:$0xff] %v20245_v21  ;;  %v5298_v30 = vsel %vm502_vm0, %v20245_v21, -inf }
 0x4a0   : > { %5290 = vmax.xlane.f32.xlu1 %v5289_v52  ;;  %v5295_v51 = vsel %vm502_vm0, %v20255_v22, -inf  ;;  %v1600_v52 = vld [vmem:[%s24157_s1 + $0x180] sm:$0xff] }
 0x4a4   : > { %v14614_v41 = vpop.f32.mrb[28].mxu1  ;;  %5299 = vmax.xlane.f32.xlu1 %v5298_v30  ;;  %v5556_v30 = vsub.f32 %v24675_v11, %v5180_v36  ;;  %v1604_v11 = vld [vmem:[%s24157_s1 + $0x1a0] sm:$0xff] }
 0x4a5   : > { %v20262_v50 = vadd.f32 %v14614_v41, %v1597_v16  ;;  %v2970_v31 = vpop.f32.mrb[29].mxu1  ;;  %v5683_v41 = vmul.f32 1.442695, %v5554_v58 }
 0x4a6   : > { %v20264_v35 = vadd.f32 %v2970_v31, %v1596_v53 }
 0x4a7   : > { %v5304_v29 = vsel %vm502_vm0, %v20262_v50, -inf  ;;  %17091 = vpow2.f32 %v5683_v41 }
 0x4a8   : > { %24671 = vst [vmem:[#allocation40_spill] sm:$0xff] %v20264_v35  ;;  %v14617_v49 = vpop.f32.mrb[30].mxu1  ;;  %5296 = vmax.xlane.f32.xlu1 %v5295_v51  ;;  %5305 = vmax.xlane.f32.xlu0 %v5304_v29  ;;  %v5301_v2 = vsel %vm502_vm0, %v20264_v35, -inf  ;;  %v1603_v29 = vld [vmem:[%s24157_s1 + $0x198] sm:$0xff] }
 0x4a9   : > { %v2980_v63 = vpop.f32.mrb[31].mxu1  ;;  %v20273_v7 = vadd.f32 %v14617_v49, %v1599_v42 }
 0x4aa   : > { %v20284_v9 = vadd.f32 %v2980_v63, %v1598_v3  ;;  %v24677_v63 = vld [vmem:[#allocation36_spill] sm:$0xff] }
 0x4ab   : > { %24672 = vst [vmem:[#allocation39_spill] sm:$0xff] %v20273_v7  ;;  %v5310_v25 = vsel %vm502_vm0, %v20273_v7, -inf  ;;  %v5553_v33 = vsub.f32 %v24677_v63, %v5171_v5 }
 0x4ac   : > { %5302 = vmax.xlane.f32.xlu0 %v5301_v2  ;;  %24673 = vst [vmem:[#allocation41_spill] sm:$0xff] %v20284_v9  ;;  %v5307_v51 = vsel %vm502_vm0, %v20284_v9, -inf  ;;  %v5687_v2 = vmul.f32 1.442695, %v5556_v30 }
 0x4ad   : > { %v5681_v36 = vmul.f32 1.442695, %v5553_v33  ;;  %v1607_v33 = vld [vmem:[%s24157_s1 + $0x1b8] sm:$0xff] }
 0x4ae   : > { %17093 = vpow2.f32 %v5687_v2 }
 0x4af   : > { %17095 = vpow2.f32 %v5681_v36 }
 0x4b0   : > { %v14628_v61 = vpop.f32.mrb[48].mxu0  ;;  %5311 = vmax.xlane.f32.xlu0 %v5310_v25  ;;  %v1605_v25 = vld [vmem:[%s24157_s1 + $0x1a8] sm:$0xff] }
 0x4b1   : > { %v20291_v40 = vadd.f32 %v14628_v61, %v1601_v6  ;;  %v3079_v16 = vpop.f32.mrb[49].mxu0  ;;  %v1602_v6 = vld [vmem:[%s24157_s1 + $0x190] sm:$0xff]  ;;  %v5177_v61 = vpop.xlane.xlu0 %5176 }
 0x4b2   : > { %v20294_v53 = vadd.f32 %v3079_v16, %v1600_v52  ;;  %v20330_v63 = vpop.eup %17091 }
 0x4b3   : > { %24674 = vst [vmem:[#allocation66_spill] sm:$0xff] %v20291_v40  ;;  %v5316_v31 = vsel %vm502_vm0, %v20291_v40, -inf }
 0x4b4   : > { %24676 = vst [vmem:[#allocation91_spill] sm:$0xff] %v20294_v53  ;;  %v14631_v42 = vpop.f32.mrb[50].mxu0  ;;  %5317 = vmax.xlane.f32.xlu1 %v5316_v31  ;;  %5308 = vmax.xlane.f32.xlu0 %v5307_v51  ;;  %v5313_v58 = vsel %vm502_vm0, %v20294_v53, -inf  ;;  %v24681_v31 = vld [vmem:[#allocation122_spill] sm:$0xff] }
 0x4b5   : > { %v3089_v49 = vpop.f32.mrb[51].mxu0  ;;  %v20304_v3 = vadd.f32 %v14631_v42, %v1603_v29  ;;  %v5555_v51 = vsub.f32 %v24681_v31, %v5177_v61 }
 0x4b6   : > { %v20314_v5 = vadd.f32 %v3089_v49, %v1602_v6 }
 0x4b7   : > { %24678 = vst [vmem:[#allocation100_spill] sm:$0xff] %v20304_v3  ;;  %v5322_v52 = vsel %vm502_vm0, %v20304_v3, -inf  ;;  %v5685_v6 = vmul.f32 1.442695, %v5555_v51 }
 0x4b8   : > { %5314 = vmax.xlane.f32.xlu1 %v5313_v58  ;;  %24679 = vst [vmem:[#allocation103_spill] sm:$0xff] %v20314_v5  ;;  %v5319_v42 = vsel %vm502_vm0, %v20314_v5, -inf }
 0x4b9   : > { %17097 = vpow2.f32 %v5685_v6 }
 0x4bc   : > { %v14642_v16 = vpop.f32.mrb[32].mxu1  ;;  %5323 = vmax.xlane.f32.xlu1 %v5322_v52  ;;  %v20341_v52 = vpop.eup %17093 }
 0x4bd   : > { %v20321_v30 = vadd.f32 %v14642_v16, %v1605_v25  ;;  %v3188_v41 = vpop.f32.mrb[33].mxu1  ;;  %v5940_v25 = vsel %vm502_vm0, %v20330_v63, 0.0  ;;  %v1609_v16 = vld [vmem:[%s24157_s1 + $0x1c8] sm:$0xff]  ;;  %v5946_v31 = vsel %vm502_vm0, %v20341_v52, 0.0  ;;  %v20350_v51 = vpop.eup %17095 }
 0x4be   : > { %v20324_v29 = vadd.f32 %v3188_v41, %v1604_v11  ;;  %v5198_v11 = vpop.xlane.xlu1 %5197 }
 0x4bf   : > { %24680 = vst [vmem:[#allocation5_spill] sm:$0xff] %v20321_v30  ;;  %v5328_v49 = vsel %vm502_vm0, %v20321_v30, -inf }
 0x4c0   : > { %24682 = vst [vmem:[#allocation64_spill] sm:$0xff] %v20324_v29  ;;  %v14645_v2 = vpop.f32.mrb[34].mxu1  ;;  %5320 = vmax.xlane.f32.xlu1 %v5319_v42  ;;  %5329 = vmax.xlane.f32.xlu0 %v5328_v49  ;;  %v5325_v61 = vsel %vm502_vm0, %v20324_v29, -inf  ;;  %v1606_v42 = vld [vmem:[%s24157_s1 + $0x1b0] sm:$0xff]  ;;  %v5937_v29 = vsel %vm502_vm0, %v20350_v51, 0.0 }
 0x4c1   : > { %v3198_v58 = vpop.f32.mrb[35].mxu1  ;;  %v20335_v36 = vadd.f32 %v14645_v2, %v1607_v33  ;;  %v1608_v33 = vld [vmem:[%s24157_s1 + $0x1c0] sm:$0xff] }
 0x4c3   : > { %24683 = vst [vmem:[#allocation78_spill] sm:$0xff] %v20335_v36  ;;  %v5334_v41 = vsel %vm502_vm0, %v20335_v36, -inf  ;;  %v20360_v36 = vadd.f32 %v3198_v58, %v1606_v42 }
 0x4c4   : > { %5941 = vadd.xlane.f32.xlu1 %v5940_v25  ;;  %5326 = vmax.xlane.f32.xlu0 %v5325_v61  ;;  %v5186_v25 = vpop.xlane.xlu0 %5185  ;;  %v5222_v61 = vpop.xlane.xlu1 %5221 }
 0x4c5   : > { %24685 = vst [vmem:[#allocation80_spill] sm:$0xff] %v20360_v36  ;;  %v5331_v58 = vsel %vm502_vm0, %v20360_v36, -inf  ;;  %v5570_v21 = vsub.f32 %v19758_v57, %v5222_v61 }
 0x4c8   : > { %v14656_v49 = vpop.f32.mrb[52].mxu0  ;;  %5335 = vmax.xlane.f32.xlu0 %v5334_v41  ;;  %5947 = vadd.xlane.f32.xlu1 %v5946_v31  ;;  %v1611_v31 = vld [vmem:[%s24157_s1 + $0x1d8] sm:$0xff] }
 0x4c9   : > { %v20358_v2 = vadd.f32 %v14656_v49, %v1609_v16  ;;  %v3297_v6 = vpop.f32.mrb[53].mxu0 }
 0x4ca   : > { %v20362_v30 = vadd.f32 %v3297_v6, %v1608_v33  ;;  %v20377_v33 = vpop.eup %17097  ;;  %v5183_v6 = vpop.xlane.xlu0 %5182 }
 0x4cb   : > { %24684 = vst [vmem:[#allocation123_spill] sm:$0xff] %v20358_v2  ;;  %v5340_v41 = vsel %vm502_vm0, %v20358_v2, -inf  ;;  %v1610_v2 = vld [vmem:[%s24157_s1 + $0x1d0] sm:$0xff] }
 0x4cc   : > { %24686 = vst [vmem:[#allocation112_spill] sm:$0xff] %v20362_v30  ;;  %v14659_v3 = vpop.f32.mrb[54].mxu0  ;;  %5938 = vadd.xlane.f32.xlu0 %v5937_v29  ;;  %5341 = vmax.xlane.f32.xlu1 %v5340_v41  ;;  %v5337_v42 = vsel %vm502_vm0, %v20362_v30, -inf  ;;  %v5195_v29 = vpop.xlane.xlu1 %5194  ;;  %v5562_v30 = vsub.f32 %v19572_v18, %v5198_v11 }
 0x4cd   : > { %v3307_v16 = vpop.f32.mrb[55].mxu0  ;;  %v20371_v49 = vadd.f32 %v14659_v3, %v1611_v31  ;;  %v5943_v31 = vsel %vm502_vm0, %v20377_v33, 0.0  ;;  %v5561_v57 = vsub.f32 %v19773_v62, %v5195_v29 }
 0x4ce   : > { %v20382_v41 = vadd.f32 %v3307_v16, %v1610_v2  ;;  %v20388_v36 = vpop.xlane.xlu0 %5191  ;;  %v5699_v11 = vmul.f32 1.442695, %v5562_v30  ;;  %v5715_v30 = vmul.f32 1.442695, %v5570_v21  ;;  %v1618_v21 = vld [vmem:[%s24157_s1 + $0x210] sm:$0xff] }
 0x4cf   : > { %24687 = vst [vmem:[#allocation4_spill] sm:$0xff] %v20371_v49  ;;  %v5346_v3 = vsel %vm502_vm0, %v20371_v49, -inf }
 0x4d0   : > { %5332 = vmax.xlane.f32.xlu0 %v5331_v58  ;;  %5338 = vmax.xlane.f32.xlu1 %v5337_v42  ;;  %24688 = vst [vmem:[#allocation12_spill] sm:$0xff] %v20382_v41  ;;  %v1617_v58 = vld [vmem:[%s24157_s1 + $0x208] sm:$0xff]  ;;  %v24689_v42 = vld [vmem:[#allocation2_spill] sm:$0xff]  ;;  %v20395_v2 = vpop.xlane.xlu1 %5218  ;;  %v5343_v16 = vsel %vm502_vm0, %v20382_v41, -inf  ;;  %17099 = vpow2.f32 %v5699_v11 }
 0x4d1   : > { %v5558_v40 = vsub.f32 %v24689_v42, %v5186_v25 }
 0x4d2   : > { %v20409_v42 = vpop.xlane.xlu0 %5188 }
 0x4d3   : > { %v5691_v26 = vmul.f32 1.442695, %v5558_v40  ;;  %v24692_v40 = vld [vmem:[#allocation8_spill] sm:$0xff] }
 0x4d4   : > { %5347 = vmax.xlane.f32.xlu1 %v5346_v3  ;;  %5944 = vadd.xlane.f32.xlu0 %v5943_v31  ;;  %v1616_v3 = vld [vmem:[%s24157_s1 + $0x200] sm:$0xff]  ;;  %v5557_v61 = vsub.f32 %v24692_v40, %v5183_v6  ;;  %v5697_v6 = vmul.f32 1.442695, %v5561_v57 }
 0x4d5   : > { %17101 = vpow2.f32 %v5691_v26  ;;  %v1612_v26 = vld [vmem:[%s24157_s1 + $0x1e0] sm:$0xff] }
 0x4d6   : > { %v20423_v0 = vpop.xlane.xlu0 %5209  ;;  %17103 = vpow2.f32 %v5715_v30 }
 0x4d7   : > { %17105 = vpow2.f32 %v5697_v6 }
 0x4d8   : > { %v14684_v49 = vpop.f32.mrb[56].mxu0  ;;  %5344 = vmax.xlane.f32.xlu1 %v5343_v16  ;;  %v1619_v16 = vld [vmem:[%s24157_s1 + $0x218] sm:$0xff] }
 0x4d9   : > { %v20402_v31 = vadd.f32 %v14684_v49, %v1617_v58  ;;  %v3515_v18 = vpop.f32.mrb[57].mxu0  ;;  %v5204_v49 = vpop.xlane.xlu1 %5203 }
 0x4da   : > { %v20405_v12 = vadd.f32 %v3515_v18, %v1616_v3  ;;  %v5564_v29 = vsub.f32 %v19808_v37, %v5204_v49  ;;  %v20442_v57 = vpop.xlane.xlu0 %5206 }
 0x4db   : > { %24690 = vst [vmem:[#allocation13_spill] sm:$0xff] %v20402_v31  ;;  %v5364_v25 = vsel %vm502_vm0, %v20402_v31, -inf  ;;  %v1613_v31 = vld [vmem:[%s24157_s1 + $0x1e8] sm:$0xff] }
 0x4dc   : > { %24691 = vst [vmem:[#allocation124_spill] sm:$0xff] %v20405_v12  ;;  %v14687_v41 = vpop.f32.mrb[58].mxu0  ;;  %5365 = vmax.xlane.f32.xlu1 %v5364_v25  ;;  %v5361_v18 = vsel %vm502_vm0, %v20405_v12, -inf  ;;  %v5689_v25 = vmul.f32 1.442695, %v5557_v61 }
 0x4dd   : > { %v3525_v58 = vpop.f32.mrb[59].mxu0  ;;  %v20416_v3 = vadd.f32 %v14687_v41, %v1619_v16  ;;  %v5228_v16 = vpop.xlane.xlu1 %5227  ;;  %v5703_v37 = vmul.f32 1.442695, %v5564_v29 }
 0x4de   : > { %v20434_v40 = vadd.f32 %v3525_v58, %v1618_v21  ;;  %17107 = vpow2.f32 %v5689_v25  ;;  %v24697_v58 = vld [vmem:[#allocation9_spill] sm:$0xff] }
 0x4df   : > { %24693 = vst [vmem:[#allocation25_spill] sm:$0xff] %v20416_v3  ;;  %v5370_v12 = vsel %vm502_vm0, %v20416_v3, -inf  ;;  %v5560_v61 = vsub.f32 %v24697_v58, %v20388_v36  ;;  %17109 = vpow2.f32 %v5703_v37  ;;  %v24700_v25 = vld [vmem:[#allocation125_spill] sm:$0xff]  ;;  %v20466_v3 = vpop.xlane.xlu0 %5215 }
 0x4e0   : > { %5362 = vmax.xlane.f32.xlu1 %v5361_v18  ;;  %24695 = vst [vmem:[#allocation114_spill] sm:$0xff] %v20434_v40  ;;  %v5367_v21 = vsel %vm502_vm0, %v20434_v40, -inf }
 0x4e1   : > { %v14670_v62 = vpop.f32.mrb[36].mxu1 }
 0x4e2   : > { %v20432_v41 = vadd.f32 %v14670_v62, %v1613_v31  ;;  %v3406_v11 = vpop.f32.mrb[37].mxu1  ;;  %v5572_v31 = vsub.f32 %v19821_v60, %v5228_v16  ;;  %v1615_v60 = vld [vmem:[%s24157_s1 + $0x1f8] sm:$0xff]  ;;  %v5559_v16 = vsub.f32 %v24700_v25, %v20409_v42 }
 0x4e3   : > { %v20438_v18 = vadd.f32 %v3406_v11, %v1612_v26  ;;  %v5201_v26 = vpop.xlane.xlu1 %5200  ;;  %v5695_v11 = vmul.f32 1.442695, %v5560_v61 }
 0x4e4   : > { %24694 = vst [vmem:[#allocation111_spill] sm:$0xff] %v20432_v41  ;;  %5371 = vmax.xlane.f32.xlu1 %v5370_v12  ;;  %v5352_v7 = vsel %vm502_vm0, %v20432_v41, -inf  ;;  %v20449_v12 = vpop.eup %17099  ;;  %v5719_v36 = vmul.f32 1.442695, %v5572_v31  ;;  %v5563_v61 = vsub.f32 %v19841_v38, %v5201_v26  ;;  %v1614_v38 = vld [vmem:[%s24157_s1 + $0x1f0] sm:$0xff]  ;;  %v20488_v26 = vpop.xlane.xlu0 %5212 }
 0x4e5   : > { %24696 = vst [vmem:[#allocation116_spill] sm:$0xff] %v20438_v18  ;;  %v14673_v30 = vpop.f32.mrb[38].mxu1  ;;  %5353 = vmax.xlane.f32.xlu0 %v5352_v7  ;;  %24698 = vst [vmem:[#allocation15_spill] sm:$0xff] %v20449_v12  ;;  %v5349_v7 = vsel %vm502_vm0, %v20438_v18, -inf  ;;  %v20453_v62 = vpop.eup %17101  ;;  %v5964_v58 = vsel %vm502_vm0, %v20449_v12, 0.0 }
 0x4e6   : > { %v3416_v49 = vpop.f32.mrb[39].mxu1  ;;  %24699 = vst [vmem:[#allocation24_spill] sm:$0xff] %v20453_v62  ;;  %v20468_v40 = vadd.f32 %v14673_v30, %v1615_v60  ;;  %v5952_v37 = vsel %vm502_vm0, %v20453_v62, 0.0  ;;  %17111 = vpow2.f32 %v5719_v36  ;;  %v5701_v36 = vmul.f32 1.442695, %v5563_v61 }
 0x4e7   : > { %17113 = vpow2.f32 %v5695_v11  ;;  %v5225_v25 = vpop.xlane.xlu1 %5224 }
 0x4e8   : > { %5368 = vmax.xlane.f32.xlu1 %v5367_v21  ;;  %v20464_v21 = vpop.eup %17103  ;;  %24702 = vst [vmem:[#allocation31_spill] sm:$0xff] %v20468_v40  ;;  %v5358_v60 = vsel %vm502_vm0, %v20468_v40, -inf  ;;  %v5571_v11 = vsub.f32 %v19858_v1, %v5225_v25  ;;  %v20495_v40 = vadd.f32 %v3416_v49, %v1614_v38  ;;  %v20499_v61 = vpop.xlane.xlu0 %5233  ;;  %v1625_v49 = vld [vmem:[%s24157_s1 + $0x248] sm:$0xff] }
 0x4e9   : > { %v14712_v6 = vpop.f32.mrb[60].mxu0  ;;  %5350 = vmax.xlane.f32.xlu0 %v5349_v7  ;;  %24701 = vst [vmem:[#allocation30_spill] sm:$0xff] %v20464_v21  ;;  %v5693_v7 = vmul.f32 1.442695, %v5559_v16  ;;  %v5988_v41 = vsel %vm502_vm0, %v20464_v21, 0.0  ;;  %v20479_v30 = vpop.eup %17105 }
 0x4ea   : > { %v20458_v29 = vpop.f32.mrb[61].mxu0  ;;  %24703 = vst [vmem:[#allocation46_spill] sm:$0xff] %v20479_v30  ;;  %24706 = vst [vmem:[#allocation19_spill] sm:$0xff] %v20495_v40 }
 0x4eb   : > { %17115 = vpow2.f32 %v5693_v7 }
 0x4ec   : > { %5965 = vadd.xlane.f32.xlu1 %v5964_v58  ;;  %v20483_v58 = vpop.eup %17107  ;;  %17117 = vpow2.f32 %v5701_v36 }
 0x4ed   : > { %v20472_v31 = vpop.f32.mrb[62].mxu0  ;;  %5953 = vadd.xlane.f32.xlu0 %v5952_v37  ;;  %24704 = vst [vmem:[#allocation17_spill] sm:$0xff] %v20483_v58  ;;  %v20493_v18 = vpop.eup %17109  ;;  %v5949_v21 = vsel %vm502_vm0, %v20483_v58, 0.0 }
 0x4ee   : > { %v20475_v42 = vpop.f32.mrb[63].mxu0  ;;  %24705 = vst [vmem:[#allocation23_spill] sm:$0xff] %v20493_v18  ;;  %v5970_v7 = vsel %vm502_vm0, %v20493_v18, 0.0  ;;  %v20520_v18 = vadd.f32 %v14712_v6, %v1625_v49  ;;  %v5246_v6 = vpop.xlane.xlu1 %5245 }
 0x4f0   : > { %5989 = vadd.xlane.f32.xlu1 %v5988_v41  ;;  %v5961_v41 = vsel %vm502_vm0, %v20479_v30, 0.0  ;;  %v20505_v62 = vpop.eup %17111  ;;  %24709 = vst [vmem:[#allocation56_spill] sm:$0xff] %v20520_v18  ;;  %v5388_v49 = vsel %vm502_vm0, %v20520_v18, -inf  ;;  %v1620_v30 = vld [vmem:[%s24157_s1 + $0x220] sm:$0xff] }
 0x4f1   : > { %5359 = vmax.xlane.f32.xlu0 %v5358_v60  ;;  %v5717_v60 = vmul.f32 1.442695, %v5571_v11  ;;  %24707 = vst [vmem:[#allocation35_spill] sm:$0xff] %v20505_v62  ;;  %v20512_v38 = vpop.eup %17113  ;;  %v5994_v58 = vsel %vm502_vm0, %v20505_v62, 0.0 }
 0x4f2   : > { %v14698_v16 = vpop.f32.mrb[40].mxu1  ;;  %24708 = vst [vmem:[#allocation48_spill] sm:$0xff] %v20512_v38 }
 0x4f3   : > { %v3624_v37 = vpop.f32.mrb[41].mxu1  ;;  %17119 = vpow2.f32 %v5717_v60  ;;  %v1621_v60 = vld [vmem:[%s24157_s1 + $0x228] sm:$0xff] }
 0x4f4   : > { %5962 = vadd.xlane.f32.xlu1 %v5961_v41  ;;  %v5569_v41 = vsub.f32 %v19784_v47, %v20395_v2  ;;  %v20541_v62 = vadd.f32 %v14698_v16, %v1621_v60 }
 0x4f5   : > { %5950 = vadd.xlane.f32.xlu0 %v5949_v21  ;;  %v5355_v21 = vsel %vm502_vm0, %v20495_v40, -inf  ;;  %v5958_v40 = vsel %vm502_vm0, %v20512_v38, 0.0  ;;  %v20528_v12 = vpop.eup %17115 }
 0x4f6   : > { %v14701_v1 = vpop.f32.mrb[42].mxu1  ;;  %24710 = vst [vmem:[#allocation58_spill] sm:$0xff] %v20528_v12  ;;  %v5713_v2 = vmul.f32 1.442695, %v5569_v41  ;;  %24712 = vst [vmem:[#allocation90_spill] sm:$0xff] %v20541_v62  ;;  %v5955_v38 = vsel %vm502_vm0, %v20528_v12, 0.0  ;;  %v5578_v41 = vsub.f32 %v19991_v15, %v5246_v6  ;;  %v20562_v12 = vadd.f32 %v3624_v37, %v1620_v30 }
 0x4f7   : > { %v20501_v25 = vpop.f32.mrb[43].mxu1  ;;  %v5376_v15 = vsel %vm502_vm0, %v20541_v62, -inf  ;;  %v5565_v6 = vsub.f32 %v19666_v28, %v20442_v57 }
 0x4f8   : > { %5971 = vadd.xlane.f32.xlu1 %v5970_v7  ;;  %v20524_v7 = vpop.xlane.xlu0 %5230  ;;  %17121 = vpow2.f32 %v5713_v2  ;;  %24714 = vst [vmem:[#allocation42_spill] sm:$0xff] %v20562_v12  ;;  %v1623_v2 = vld [vmem:[%s24157_s1 + $0x238] sm:$0xff]  ;;  %v5373_v28 = vsel %vm502_vm0, %v20562_v12, -inf }
 0x4f9   : > { %v20514_v36 = vpop.f32.mrb[64].mxu0  ;;  %5356 = vmax.xlane.f32.xlu0 %v5355_v21  ;;  %v20585_v62 = vadd.f32 %v14701_v1, %v1623_v2 }
 0x4fa   : > { %v20516_v11 = vpop.f32.mrb[65].mxu0 }
 0x4fb   : > { %24716 = vst [vmem:[#allocation44_spill] sm:$0xff] %v20585_v62 }
 0x4fc   : > { %5995 = vadd.xlane.f32.xlu1 %v5994_v58  ;;  %v20539_v58 = vpop.eup %17117 }
 0x4fd   : > { %v20533_v21 = vpop.f32.mrb[66].mxu0  ;;  %5959 = vadd.xlane.f32.xlu0 %v5958_v40  ;;  %24711 = vst [vmem:[#allocation7_spill] sm:$0xff] %v20539_v58  ;;  %v20548_v40 = vpop.xlane.xlu0 %5239  ;;  %v5967_v16 = vsel %vm502_vm0, %v20539_v58, 0.0  ;;  %v5731_v58 = vmul.f32 1.442695, %v5578_v41 }
 0x4fe   : > { %v20535_v47 = vpop.f32.mrb[67].mxu0  ;;  %v20557_v60 = vpop.eup %17119 }
 0x4ff   : > { %24713 = vst [vmem:[#allocation34_spill] sm:$0xff] %v20557_v60  ;;  %v5991_v37 = vsel %vm502_vm0, %v20557_v60, 0.0  ;;  %17123 = vpow2.f32 %v5731_v58  ;;  %v5566_v60 = vsub.f32 %v19658_v45, %v20423_v0  ;;  %v1622_v45 = vld [vmem:[%s24157_s1 + $0x230] sm:$0xff] }
 0x500   : > { %5389 = vmax.xlane.f32.xlu1 %v5388_v49  ;;  %v1624_v49 = vld [vmem:[%s24157_s1 + $0x240] sm:$0xff]  ;;  %v20625_v12 = vadd.f32 %v20501_v25, %v1622_v45 }
 0x501   : > { %5956 = vadd.xlane.f32.xlu0 %v5955_v38  ;;  %v5243_v38 = vpop.xlane.xlu1 %5242  ;;  %v20574_v9 = vadd.f32 %v20458_v29, %v1624_v49  ;;  %v5705_v29 = vmul.f32 1.442695, %v5565_v6 }
 0x502   : > { %v20551_v5 = vpop.f32.mrb[44].mxu1  ;;  %v5577_v41 = vsub.f32 %v20006_v23, %v5243_v38  ;;  %v5382_v23 = vsel %vm502_vm0, %v20585_v62, -inf  ;;  %v20608_v58 = vpop.eup %17121  ;;  %24720 = vst [vmem:[#allocation104_spill] sm:$0xff] %v20625_v12 }
 0x503   : > { %v20553_v18 = vpop.f32.mrb[45].mxu1  ;;  %24715 = vst [vmem:[#allocation14_spill] sm:$0xff] %v20574_v9  ;;  %v5385_v2 = vsel %vm502_vm0, %v20574_v9, -inf  ;;  %24718 = vst [vmem:[#allocation18_spill] sm:$0xff] %v20608_v58  ;;  %17125 = vpow2.f32 %v5705_v29  ;;  %v5985_v29 = vsel %vm502_vm0, %v20608_v58, 0.0 }
 0x504   : > { %5968 = vadd.xlane.f32.xlu1 %v5967_v16  ;;  %v20580_v16 = vpop.xlane.xlu0 %5236  ;;  %v5729_v38 = vmul.f32 1.442695, %v5577_v41 }
 0x505   : > { %5377 = vmax.xlane.f32.xlu0 %v5376_v15  ;;  %v1627_v15 = vld [vmem:[%s24157_s1 + $0x258] sm:$0xff]  ;;  %v5252_v53 = vpop.xlane.xlu1 %5251 }
 0x506   : > { %v20571_v54 = vpop.f32.mrb[46].mxu1  ;;  %v20597_v1 = vadd.f32 %v20472_v31, %v1627_v15  ;;  %v5568_v31 = vsub.f32 %v19677_v39, %v20466_v3  ;;  %v1629_v39 = vld [vmem:[%s24157_s1 + $0x268] sm:$0xff]  ;;  %17127 = vpow2.f32 %v5729_v38 }
 0x507   : > { %v20576_v30 = vpop.f32.mrb[47].mxu1  ;;  %v20644_v45 = vadd.f32 %v20551_v5, %v1629_v39 }
 0x508   : > { %5992 = vadd.xlane.f32.xlu1 %v5991_v37  ;;  %24717 = vst [vmem:[#allocation70_spill] sm:$0xff] %v20597_v1  ;;  %v1626_v37 = vld [vmem:[%s24157_s1 + $0x250] sm:$0xff]  ;;  %v20604_v6 = vpop.xlane.xlu0 %5257  ;;  %v5394_v62 = vsel %vm502_vm0, %v20597_v1, -inf  ;;  %v5711_v3 = vmul.f32 1.442695, %v5568_v31  ;;  %v5379_v31 = vsel %vm502_vm0, %v20625_v12, -inf }
 0x509   : > { %v20589_v57 = vpop.f32.mrb[68].mxu0  ;;  %5374 = vmax.xlane.f32.xlu0 %v5373_v28  ;;  %v5707_v28 = vmul.f32 1.442695, %v5566_v60  ;;  %24722 = vst [vmem:[#allocation68_spill] sm:$0xff] %v20644_v45 }
 0x50a   : > { %v20592_v49 = vpop.f32.mrb[69].mxu0 }
 0x50b   : > { %17129 = vpow2.f32 %v5707_v28 }
 0x50c   : > { %5386 = vmax.xlane.f32.xlu1 %v5385_v2  ;;  %v20620_v2 = vadd.f32 %v20475_v42, %v1626_v37  ;;  %v5580_v42 = vsub.f32 %v20019_v20, %v5252_v53  ;;  %v20633_v60 = vpop.xlane.xlu0 %5254  ;;  %v20641_v37 = vpop.eup %17123  ;;  %v1628_v20 = vld [vmem:[%s24157_s1 + $0x260] sm:$0xff]  ;;  %17131 = vpow2.f32 %v5711_v3 }
 0x50d   : > { %v20613_v0 = vpop.f32.mrb[70].mxu0  ;;  %5383 = vmax.xlane.f32.xlu0 %v5382_v23  ;;  %v5249_v23 = vpop.xlane.xlu1 %5248  ;;  %24721 = vst [vmem:[#allocation107_spill] sm:$0xff] %v20641_v37  ;;  %v6012_v5 = vsel %vm502_vm0, %v20641_v37, 0.0 }
 0x50e   : > { %v20617_v15 = vpop.f32.mrb[71].mxu0  ;;  %24719 = vst [vmem:[#allocation95_spill] sm:$0xff] %v20620_v2  ;;  %v5735_v38 = vmul.f32 1.442695, %v5580_v42  ;;  %v20659_v39 = vpop.eup %17125  ;;  %v5567_v42 = vsub.f32 %v19696_v32, %v20488_v26  ;;  %v1631_v32 = vld [vmem:[%s24157_s1 + $0x278] sm:$0xff] }
 0x50f   : > { %24724 = vst [vmem:[#allocation27_spill] sm:$0xff] %v20659_v39 }
 0x510   : > { %5395 = vmax.xlane.f32.xlu1 %v5394_v62  ;;  %v5391_v62 = vsel %vm502_vm0, %v20620_v2, -inf  ;;  %v20664_v1 = vpop.xlane.xlu0 %5263  ;;  %17133 = vpow2.f32 %v5735_v38  ;;  %v5573_v2 = vsub.f32 %v19892_v44, %v20524_v7  ;;  %v5709_v44 = vmul.f32 1.442695, %v5567_v42 }
 0x511   : > { %5986 = vadd.xlane.f32.xlu0 %v5985_v29  ;;  %v20651_v53 = vpop.xlane.xlu1 %5269  ;;  %v5579_v7 = vsub.f32 %v20042_v4, %v5249_v23  ;;  %v1630_v4 = vld [vmem:[%s24157_s1 + $0x270] sm:$0xff] }
 0x512   : > { %v20635_v41 = vpop.f32.mrb[48].mxu1  ;;  %24723 = vst [vmem:[#allocation82_spill] sm:$0xff] %v20651_v53  ;;  %17135 = vpow2.f32 %v5709_v44 }
 0x513   : > { %v20637_v25 = vpop.f32.mrb[49].mxu1 }
 0x514   : > { %5392 = vmax.xlane.f32.xlu1 %v5391_v62  ;;  %v20662_v62 = vadd.f32 %v20553_v18, %v1628_v20  ;;  %v5973_v20 = vsel %vm502_vm0, %v20659_v39, 0.0  ;;  %v20692_v38 = vpop.xlane.xlu0 %5260  ;;  %v20701_v39 = vadd.f32 %v20571_v54, %v1631_v32 }
 0x515   : > { %5380 = vmax.xlane.f32.xlu0 %v5379_v31  ;;  %v5400_v31 = vsel %vm502_vm0, %v20644_v45, -inf  ;;  %v20676_v18 = vpop.xlane.xlu1 %5266 }
 0x516   : > { %v20653_v28 = vpop.f32.mrb[50].mxu1  ;;  %24725 = vst [vmem:[#allocation84_spill] sm:$0xff] %v20662_v62  ;;  %24729 = vst [vmem:[#allocation29_spill] sm:$0xff] %v20701_v39  ;;  %v5406_v44 = vsel %vm502_vm0, %v20701_v39, -inf }
 0x517   : > { %v20655_v29 = vpop.f32.mrb[51].mxu1 }
 0x518   : > { %6013 = vadd.xlane.f32.xlu1 %v6012_v5  ;;  %v20680_v5 = vpop.eup %17127 }
 0x519   : > { %v20668_v3 = vpop.f32.mrb[72].mxu0  ;;  %5401 = vmax.xlane.f32.xlu0 %v5400_v31  ;;  %24726 = vst [vmem:[#allocation113_spill] sm:$0xff] %v20680_v5  ;;  %v5397_v31 = vsel %vm502_vm0, %v20662_v62, -inf  ;;  %v20684_v45 = vpop.eup %17129  ;;  %v6009_v62 = vsel %vm502_vm0, %v20680_v5, 0.0 }
 0x51a   : > { %v20672_v12 = vpop.f32.mrb[73].mxu0  ;;  %24727 = vst [vmem:[#allocation32_spill] sm:$0xff] %v20684_v45  ;;  %v20698_v37 = vpop.eup %17131 }
 0x51b   : > { %24728 = vst [vmem:[#allocation47_spill] sm:$0xff] %v20698_v37  ;;  %v20708_v23 = vpop.xlane.xlu1 %5275  ;;  %v20718_v32 = vpop.eup %17133 }
 0x51c   : > { %5974 = vadd.xlane.f32.xlu1 %v5973_v20  ;;  %v5721_v20 = vmul.f32 1.442695, %v5573_v2  ;;  %24730 = vst [vmem:[#allocation117_spill] sm:$0xff] %v20708_v23  ;;  %v5733_v2 = vmul.f32 1.442695, %v5579_v7  ;;  %24731 = vst [vmem:[#allocation119_spill] sm:$0xff] %v20718_v32  ;;  %v20759_v23 = vpop.eup %17135 }
 0x51d   : > { %v20689_v26 = vpop.f32.mrb[74].mxu0  ;;  %5398 = vmax.xlane.f32.xlu0 %v5397_v31  ;;  %v5976_v31 = vsel %vm502_vm0, %v20684_v45, 0.0  ;;  %v1633_v45 = vld [vmem:[%s24157_s1 + $0x288] sm:$0xff]  ;;  %v1636_v7 = vld [vmem:[%s24157_s1 + $0x2a0] sm:$0xff]  ;;  %24736 = vst [vmem:[#allocation8_spill] sm:$0xff] %v20759_v23 }
 0x51e   : > { %v20694_v9 = vpop.f32.mrb[75].mxu0  ;;  %17137 = vpow2.f32 %v5721_v20  ;;  %v20736_v58 = vadd.f32 %v20514_v36, %v1633_v45  ;;  %v20745_v39 = vadd.f32 %v20637_v25, %v1636_v7 }
 0x51f   : > { %v20710_v42 = vpop.xlane.xlu0 %5281  ;;  %17139 = vpow2.f32 %v5733_v2 }
 0x520   : > { %6010 = vadd.xlane.f32.xlu1 %v6009_v62  ;;  %v5982_v62 = vsel %vm502_vm0, %v20698_v37, 0.0  ;;  %v5575_v37 = vsub.f32 %v19924_v27, %v20580_v16  ;;  %24733 = vst [vmem:[#allocation36_spill] sm:$0xff] %v20736_v58  ;;  %24734 = vst [vmem:[#allocation122_spill] sm:$0xff] %v20745_v39  ;;  %v5421_v25 = vsel %vm502_vm0, %v20745_v39, -inf  ;;  %v1632_v39 = vld [vmem:[%s24157_s1 + $0x280] sm:$0xff] }
 0x521   : > { %5977 = vadd.xlane.f32.xlu0 %v5976_v31  ;;  %v20724_v31 = vadd.f32 %v20576_v30, %v1630_v4  ;;  %v20738_v30 = vpop.xlane.xlu1 %5272 }
 0x522   : > { %v20712_v5 = vpop.f32.mrb[52].mxu1  ;;  %v5725_v16 = vmul.f32 1.442695, %v5575_v37 }
 0x523   : > { %v20714_v54 = vpop.f32.mrb[53].mxu1  ;;  %24732 = vst [vmem:[#allocation38_spill] sm:$0xff] %v20724_v31  ;;  %v5403_v2 = vsel %vm502_vm0, %v20724_v31, -inf }
 0x524   : > { %5983 = vadd.xlane.f32.xlu1 %v5982_v62  ;;  %v6018_v62 = vsel %vm502_vm0, %v20718_v32, 0.0  ;;  %v5412_v32 = vsel %vm502_vm0, %v20736_v58, -inf  ;;  %17141 = vpow2.f32 %v5725_v16  ;;  %v1641_v16 = vld [vmem:[%s24157_s1 + $0x2c8] sm:$0xff] }
 0x525   : > { %5407 = vmax.xlane.f32.xlu0 %v5406_v44  ;;  %v20747_v44 = vpop.xlane.xlu0 %5278 }
 0x526   : > { %v20731_v20 = vpop.f32.mrb[54].mxu1 }
 0x527   : > { %v20740_v4 = vpop.f32.mrb[55].mxu1 }
 0x528   : > { %6019 = vadd.xlane.f32.xlu1 %v6018_v62  ;;  %v20763_v7 = vpop.eup %17137  ;;  %v1638_v62 = vld [vmem:[%s24157_s1 + $0x2b0] sm:$0xff] }
 0x529   : > { %v20751_v27 = vpop.f32.mrb[76].mxu0  ;;  %5404 = vmax.xlane.f32.xlu0 %v5403_v2  ;;  %v20755_v45 = vpop.xlane.xlu1 %5293  ;;  %24737 = vst [vmem:[#allocation9_spill] sm:$0xff] %v20763_v7 }
 0x52a   : > { %v20753_v36 = vpop.f32.mrb[77].mxu0  ;;  %24735 = vst [vmem:[#allocation2_spill] sm:$0xff] %v20755_v45  ;;  %v20770_v37 = vpop.xlane.xlu0 %5287  ;;  %v20782_v45 = vadd.f32 %v20655_v29, %v1638_v62 }
 0x52b   : > { %v20776_v58 = vpop.eup %17139 }
 0x52c   : > { %5413 = vmax.xlane.f32.xlu1 %v5412_v32  ;;  %v5979_v32 = vsel %vm502_vm0, %v20759_v23, 0.0  ;;  %24740 = vst [vmem:[#allocation127_spill] sm:$0xff] %v20776_v58  ;;  %24741 = vst [vmem:[#allocation128_spill] sm:$0xff] %v20782_v45  ;;  %v5574_v23 = vsub.f32 %v19875_v19, %v20499_v61  ;;  %v6015_v62 = vsel %vm502_vm0, %v20776_v58, 0.0  ;;  %v5427_v19 = vsel %vm502_vm0, %v20782_v45, -inf }
 0x52d   : > { %v20768_v2 = vpop.f32.mrb[78].mxu0  ;;  %5422 = vmax.xlane.f32.xlu0 %v5421_v25  ;;  %v5997_v25 = vsel %vm502_vm0, %v20763_v7, 0.0  ;;  %v20789_v53 = vpop.xlane.xlu1 %5290  ;;  %v20806_v7 = vadd.f32 %v20589_v57, %v1641_v16  ;;  %v5582_v58 = vsub.f32 %v20089_v8, %v20604_v6  ;;  %v1643_v8 = vld [vmem:[%s24157_s1 + $0x2d8] sm:$0xff] }
 0x52e   : > { %24738 = vst [vmem:[#allocation125_spill] sm:$0xff] %v20768_v2  ;;  %v20772_v31 = vpop.f32.mrb[79].mxu0  ;;  %v20796_v2 = vadd.f32 %v20516_v11, %v1632_v39  ;;  %v5723_v61 = vmul.f32 1.442695, %v5574_v23 }
 0x52f   : > { %24739 = vst [vmem:[#allocation126_spill] sm:$0xff] %v20772_v31  ;;  %24743 = vst [vmem:[#allocation130_spill] sm:$0xff] %v20806_v7 }
 0x530   : > { %5980 = vadd.xlane.f32.xlu1 %v5979_v32  ;;  %24742 = vst [vmem:[#allocation129_spill] sm:$0xff] %v20796_v2  ;;  %v1635_v32 = vld [vmem:[%s24157_s1 + $0x298] sm:$0xff]  ;;  %v5409_v16 = vsel %vm502_vm0, %v20796_v2, -inf  ;;  %17143 = vpow2.f32 %v5723_v61  ;;  %v5739_v2 = vmul.f32 1.442695, %v5582_v58 }
 0x531   : > { %5998 = vadd.xlane.f32.xlu0 %v5997_v25  ;;  %v20808_v25 = vpop.xlane.xlu0 %5284  ;;  %v20815_v39 = vadd.f32 %v20533_v21, %v1635_v32  ;;  %v20819_v35 = vpop.xlane.xlu1 %5299  ;;  %v5436_v21 = vsel %vm502_vm0, %v20806_v7, -inf }
 0x532   : > { %v20793_v31 = vpop.f32.mrb[56].mxu1  ;;  %24745 = vst [vmem:[#allocation132_spill] sm:$0xff] %v20819_v35  ;;  %v20832_v32 = vpop.eup %17141  ;;  %v20849_v35 = vadd.f32 %v20613_v0, %v1643_v8  ;;  %17145 = vpow2.f32 %v5739_v2  ;;  %v1644_v2 = vld [vmem:[%s24157_s1 + $0x2e0] sm:$0xff] }
 0x533   : > { %v20798_v29 = vpop.f32.mrb[57].mxu1  ;;  %24744 = vst [vmem:[#allocation131_spill] sm:$0xff] %v20815_v39  ;;  %24746 = vst [vmem:[#allocation133_spill] sm:$0xff] %v20832_v32  ;;  %v5418_v7 = vsel %vm502_vm0, %v20815_v39, -inf }
 0x534   : > { %6016 = vadd.xlane.f32.xlu1 %v6015_v62  ;;  %v1634_v62 = vld [vmem:[%s24157_s1 + $0x290] sm:$0xff]  ;;  %24748 = vst [vmem:[#allocation135_spill] sm:$0xff] %v20849_v35 }
 0x535   : > { %5428 = vmax.xlane.f32.xlu0 %v5427_v19  ;;  %v20828_v23 = vpop.xlane.xlu0 %5305  ;;  %v5576_v19 = vsub.f32 %v19907_v34, %v20548_v40  ;;  %v6003_v34 = vsel %vm502_vm0, %v20832_v32, 0.0  ;;  %v20859_v40 = vpop.xlane.xlu1 %5296 }
 0x536   : > { %v20812_v11 = vpop.f32.mrb[58].mxu1 }
 0x537   : > { %v20821_v57 = vpop.f32.mrb[59].mxu1  ;;  %v5727_v61 = vmul.f32 1.442695, %v5576_v19  ;;  %v5442_v19 = vsel %vm502_vm0, %v20849_v35, -inf }
 0x538   : > { %5410 = vmax.xlane.f32.xlu1 %v5409_v16  ;;  %v20844_v16 = vadd.f32 %v20535_v47, %v1634_v62  ;;  %v1645_v47 = vld [vmem:[%s24157_s1 + $0x2e8] sm:$0xff] }
 0x539   : > { %v20837_v6 = vpop.f32.mrb[80].mxu0  ;;  %5437 = vmax.xlane.f32.xlu0 %v5436_v21  ;;  %v1637_v21 = vld [vmem:[%s24157_s1 + $0x2a8] sm:$0xff]  ;;  %v20863_v0 = vpop.xlane.xlu0 %5302  ;;  %v20875_v32 = vadd.f32 %v20712_v5, %v1645_v47  ;;  %17147 = vpow2.f32 %v5727_v61  ;;  %v20896_v47 = vadd.f32 %v20714_v54, %v1644_v2 }
 0x53a   : > { %v20841_v45 = vpop.f32.mrb[81].mxu0  ;;  %24747 = vst [vmem:[#allocation134_spill] sm:$0xff] %v20844_v16  ;;  %v20870_v8 = vadd.f32 %v20635_v41, %v1637_v21  ;;  %v5415_v39 = vsel %vm502_vm0, %v20844_v16, -inf  ;;  %v1639_v21 = vld [vmem:[%s24157_s1 + $0x2b8] sm:$0xff] }
 0x53b   : > { %24750 = vst [vmem:[#allocation137_spill] sm:$0xff] %v20875_v32  ;;  %24753 = vst [vmem:[#allocation140_spill] sm:$0xff] %v20896_v47  ;;  %v5448_v61 = vsel %vm502_vm0, %v20875_v32, -inf  ;;  %v20909_v16 = vadd.f32 %v20653_v28, %v1639_v21 }
 0x53c   : > { %5419 = vmax.xlane.f32.xlu1 %v5418_v7  ;;  %v5581_v7 = vsub.f32 %v20104_v48, %v20633_v60  ;;  %24749 = vst [vmem:[#allocation136_spill] sm:$0xff] %v20870_v8  ;;  %v5424_v5 = vsel %vm502_vm0, %v20870_v8, -inf  ;;  %v5584_v8 = vsub.f32 %v20117_v10, %v20664_v1 }
 0x53d   : > { %v20861_v58 = vpop.f32.mrb[82].mxu0  ;;  %6004 = vadd.xlane.f32.xlu0 %v6003_v34  ;;  %v20898_v35 = vpop.xlane.xlu0 %5311  ;;  %24754 = vst [vmem:[#allocation141_spill] sm:$0xff] %v20909_v16 }
 0x53e   : > { %v20865_v62 = vpop.f32.mrb[83].mxu0  ;;  %v5737_v60 = vmul.f32 1.442695, %v5581_v7  ;;  %v5743_v21 = vmul.f32 1.442695, %v5584_v8 }
 0x540   : > { %5416 = vmax.xlane.f32.xlu1 %v5415_v39  ;;  %v20890_v39 = vpop.eup %17143  ;;  %17149 = vpow2.f32 %v5737_v60  ;;  %v1647_v60 = vld [vmem:[%s24157_s1 + $0x2f8] sm:$0xff] }
 0x541   : > { %v20882_v34 = vpop.xlane.xlu1 %5317  ;;  %5443 = vmax.xlane.f32.xlu0 %v5442_v19  ;;  %24752 = vst [vmem:[#allocation139_spill] sm:$0xff] %v20890_v39  ;;  %v6000_v2 = vsel %vm502_vm0, %v20890_v39, 0.0  ;;  %v20917_v32 = vpop.eup %17145  ;;  %17151 = vpow2.f32 %v5743_v21  ;;  %v1646_v21 = vld [vmem:[%s24157_s1 + $0x2f0] sm:$0xff] }
 0x542   : > { %24751 = vst [vmem:[#allocation138_spill] sm:$0xff] %v20882_v34  ;;  %v20884_v48 = vpop.f32.mrb[60].mxu1  ;;  %24755 = vst [vmem:[#allocation142_spill] sm:$0xff] %v20917_v32  ;;  %v20926_v1 = vpop.xlane.xlu0 %5308 }
 0x543   : > { %v20886_v41 = vpop.f32.mrb[61].mxu1  ;;  %v20934_v39 = vpop.eup %17147 }
 0x544   : > { %5425 = vmax.xlane.f32.xlu1 %v5424_v5  ;;  %v5445_v5 = vsel %vm502_vm0, %v20896_v47, -inf  ;;  %v5430_v47 = vsel %vm502_vm0, %v20909_v16, -inf  ;;  %24759 = vst [vmem:[#allocation146_spill] sm:$0xff] %v20934_v39 }
 0x545   : > { %v20902_v7 = vpop.xlane.xlu1 %5314  ;;  %5449 = vmax.xlane.f32.xlu0 %v5448_v61 }
 0x546   : > { %v20904_v19 = vpop.f32.mrb[62].mxu1 }
 0x547   : > { %v20911_v54 = vpop.f32.mrb[63].mxu1 }
 0x548   : > { %6001 = vadd.xlane.f32.xlu1 %v6000_v2  ;;  %v5583_v2 = vsub.f32 %v20132_v14, %v20692_v38 }
 0x549   : > { %v20922_v61 = vpop.f32.mrb[84].mxu0  ;;  %v20924_v10 = vpop.xlane.xlu1 %5323  ;;  %5446 = vmax.xlane.f32.xlu0 %v5445_v5  ;;  %v6024_v5 = vsel %vm502_vm0, %v20917_v32, 0.0  ;;  %v20984_v32 = vadd.f32 %v20740_v4, %v1646_v21 }
 0x54a   : > { %24756 = vst [vmem:[#allocation143_spill] sm:$0xff] %v20922_v61  ;;  %24757 = vst [vmem:[#allocation144_spill] sm:$0xff] %v20924_v10  ;;  %v20928_v28 = vpop.f32.mrb[85].mxu0  ;;  %v1640_v61 = vld [vmem:[%s24157_s1 + $0x2c0] sm:$0xff]  ;;  %v20940_v10 = vadd.f32 %v20731_v20, %v1647_v60  ;;  %v5741_v34 = vmul.f32 1.442695, %v5583_v2 }
 0x54b   : > { %24758 = vst [vmem:[#allocation145_spill] sm:$0xff] %v20928_v28  ;;  %v20953_v16 = vadd.f32 %v20592_v49, %v1640_v61  ;;  %v6006_v20 = vsel %vm502_vm0, %v20934_v39, 0.0  ;;  %v5585_v61 = vsub.f32 %v20163_v13, %v20676_v18  ;;  %24766 = vst [vmem:[#allocation153_spill] sm:$0xff] %v20984_v32  ;;  %v5587_v39 = vsub.f32 %v20190_v59, %v20738_v30 }
 0x54c   : > { %24760 = vst [vmem:[#allocation147_spill] sm:$0xff] %v20940_v10  ;;  %5431 = vmax.xlane.f32.xlu1 %v5430_v47  ;;  %v1642_v47 = vld [vmem:[%s24157_s1 + $0x2d0] sm:$0xff]  ;;  %v5454_v60 = vsel %vm502_vm0, %v20940_v10, -inf  ;;  %17153 = vpow2.f32 %v5741_v34  ;;  %v5451_v21 = vsel %vm502_vm0, %v20984_v32, -inf  ;;  %v5590_v59 = vsub.f32 %v20192_v17, %v20710_v42  ;;  %v1651_v32 = vld [vmem:[%s24157_s1 + $0x318] sm:$0xff]  ;;  %v1652_v17 = vld [vmem:[%s24157_s1 + $0x320] sm:$0xff] }
 0x54d   : > { %v20944_v8 = vpop.f32.mrb[86].mxu0  ;;  %v20946_v28 = vpop.xlane.xlu1 %5320  ;;  %6025 = vadd.xlane.f32.xlu0 %v6024_v5  ;;  %24764 = vst [vmem:[#allocation151_spill] sm:$0xff] %v20953_v16 }
 0x54e   : > { %24761 = vst [vmem:[#allocation148_spill] sm:$0xff] %v20944_v8  ;;  %v20948_v14 = vpop.f32.mrb[87].mxu0  ;;  %v20950_v38 = vpop.xlane.xlu0 %5329  ;;  %v5755_v42 = vmul.f32 1.442695, %v5590_v59 }
 0x54f   : > { %24762 = vst [vmem:[#allocation149_spill] sm:$0xff] %v20948_v14  ;;  %24763 = vst [vmem:[#allocation150_spill] sm:$0xff] %v20950_v38  ;;  %v20962_v5 = vpop.eup %17149  ;;  %v5433_v14 = vsel %vm502_vm0, %v20953_v16, -inf }
 0x550   : > { %6007 = vadd.xlane.f32.xlu1 %v6006_v20  ;;  %v20974_v20 = vadd.f32 %v20617_v15, %v1642_v47  ;;  %v6021_v13 = vsel %vm502_vm0, %v20962_v5, 0.0  ;;  %v5745_v15 = vmul.f32 1.442695, %v5585_v61  ;;  %v21006_v61 = vpop.eup %17151 }
 0x551   : > { %v5942_v49 = vpop.xlane.xlu1 %5941  ;;  %5455 = vmax.xlane.f32.xlu0 %v5454_v60  ;;  %v1649_v60 = vld [vmem:[%s24157_s1 + $0x308] sm:$0xff] }
 0x552   : > { %v20969_v2 = vpop.f32.mrb[64].mxu1  ;;  %v20971_v8 = vpop.xlane.xlu0 %5326  ;;  %24765 = vst [vmem:[#allocation152_spill] sm:$0xff] %v20974_v20  ;;  %v20993_v16 = vadd.f32 %v20668_v3, %v1649_v60  ;;  %v5439_v4 = vsel %vm502_vm0, %v20974_v20, -inf  ;;  %17155 = vpow2.f32 %v5745_v15  ;;  %v6030_v15 = vsel %vm502_vm0, %v21006_v61, 0.0 }
 0x553   : > { %v20976_v10 = vpop.f32.mrb[65].mxu1  ;;  %17157 = vrcp.f32 %v5942_v49  ;;  %v21032_v49 = vadd.f32 %v20689_v26, %v1651_v32 }
 0x554   : > { %5434 = vmax.xlane.f32.xlu1 %v5433_v14  ;;  %24767 = vst [vmem:[#allocation154_spill] sm:$0xff] %v20993_v16  ;;  %v1648_v14 = vld [vmem:[%s24157_s1 + $0x300] sm:$0xff] }
 0x555   : > { %v5948_v18 = vpop.xlane.xlu1 %5947  ;;  %6022 = vadd.xlane.f32.xlu0 %v6021_v13  ;;  %v21013_v60 = vadd.f32 %v20672_v12, %v1648_v14  ;;  %v5749_v13 = vmul.f32 1.442695, %v5587_v39  ;;  %24769 = vst [vmem:[#allocation156_spill] sm:$0xff] %v21032_v49  ;;  %v1650_v14 = vld [vmem:[%s24157_s1 + $0x310] sm:$0xff] }
 0x556   : > { %v20988_v34 = vpop.f32.mrb[66].mxu1  ;;  %v20990_v47 = vpop.xlane.xlu0 %5335  ;;  %v21049_v32 = vadd.f32 %v20694_v9, %v1650_v14  ;;  %v1653_v9 = vld [vmem:[%s24157_s1 + $0x328] sm:$0xff] }
 0x557   : > { %v20997_v38 = vpop.f32.mrb[67].mxu1  ;;  %24768 = vst [vmem:[#allocation155_spill] sm:$0xff] %v21013_v60 }
 0x558   : > { %5440 = vmax.xlane.f32.xlu1 %v5439_v4  ;;  %v5460_v4 = vsel %vm502_vm0, %v20993_v16, -inf  ;;  %v21042_v16 = vadd.f32 %v20798_v29, %v1652_v17  ;;  %24771 = vst [vmem:[#allocation158_spill] sm:$0xff] %v21049_v32  ;;  %v5466_v17 = vsel %vm502_vm0, %v21032_v49, -inf  ;;  %v5591_v49 = vsub.f32 %v20230_v46, %v20808_v25 }
 0x559   : > { %v21008_v3 = vpop.xlane.xlu1 %5341  ;;  %5452 = vmax.xlane.f32.xlu0 %v5451_v21  ;;  %v21022_v21 = vpop.eup %17153 }
 0x55a   : > { %v5939_v30 = vpop.xlane.xlu0 %5938  ;;  %24770 = vst [vmem:[#allocation157_spill] sm:$0xff] %v21042_v16  ;;  %v6027_v59 = vsel %vm502_vm0, %v21022_v21, 0.0 }
 0x55b   : > { %17159 = vrcp.f32 %v5939_v30  ;;  %v5589_v30 = vsub.f32 %v20207_v43, %v20747_v44 }
 0x55c   : > { %5461 = vmax.xlane.f32.xlu1 %v5460_v4  ;;  %17161 = vpow2.f32 %v5749_v13  ;;  %v5457_v4 = vsel %vm502_vm0, %v21013_v60, -inf }
 0x55d   : > { %v21027_v12 = vpop.xlane.xlu1 %5338  ;;  %6031 = vadd.xlane.f32.xlu0 %v6030_v15  ;;  %17163 = vpow2.f32 %v5755_v42  ;;  %v5753_v44 = vmul.f32 1.442695, %v5589_v30  ;;  %v5592_v15 = vsub.f32 %v20216_v24, %v20770_v37  ;;  %v5469_v42 = vsel %vm502_vm0, %v21042_v16, -inf  ;;  %v24772_v30 = vld [vmem:[#allocation22_spill] sm:$0xff] }
 0x55e   : > { %v21029_v39 = vpop.xlane.xlu0 %5332  ;;  %17165 = vrcp.f32 %v5948_v18  ;;  %v16426_v24 = vunpack.i.h.bf16 %v24772_v30  ;;  %v16425_v37 = vunpack.i.l.bf16 %v24772_v30  ;;  %v21077_v16 = vadd.f32 %v20793_v31, %v1653_v9 }
 0x560   : > { %5458 = vmax.xlane.f32.xlu1 %v5457_v4  ;;  %v21059_v4 = vpop.eup %17155  ;;  %24774 = vst [vmem:[#allocation159_spill] sm:$0xff] %v21077_v16 }
 0x561   : > { %v21046_v26 = vpop.xlane.xlu1 %5347  ;;  %6028 = vadd.xlane.f32.xlu0 %v6027_v59  ;;  %v17158_v14 = vpop.eup %17157  ;;  %v6033_v25 = vsel %vm502_vm0, %v21059_v4, 0.0 }
 0x562   : > { %v21051_v13 = vpop.f32.mrb[68].mxu1  ;;  %v5945_v43 = vpop.xlane.xlu0 %5944  ;;  %v6450_v46 = vmul.f32 %v17158_v14, %v20330_v63  ;;  %v5593_v63 = vsub.f32 %v20236_v55, %v20789_v53 }
 0x563   : > { %v21055_v29 = vpop.f32.mrb[69].mxu1  ;;  %17167 = vrcp.f32 %v5945_v43  ;;  %v5463_v43 = vsel %vm502_vm0, %v21049_v32, -inf }
 0x564   : > { %5467 = vmax.xlane.f32.xlu1 %v5466_v17  ;;  %17169 = vpow2.f32 %v5753_v44  ;;  %v5759_v17 = vmul.f32 1.442695, %v5592_v15  ;;  %v16086_v44 = vpack.c.bf16 %v16426_v24, %v16425_v37  ;;  %v24776_v15 = vld [vmem:[#allocation37_spill] sm:$0xff] }
 0x565   : > { %v21068_v18 = vpop.xlane.xlu1 %5344  ;;  %5470 = vmax.xlane.f32.xlu0 %v5469_v42  ;;  %v17160_v59 = vpop.eup %17159  ;;  %v1655_v42 = vld [vmem:[%s24157_s1 + $0x338] sm:$0xff]  ;;  %v16455_v9 = vunpack.i.l.bf16 %v24776_v15 }
 0x566   : > { %v21072_v60 = vpop.f32.mrb[70].mxu1  ;;  %v6449_v30 = vmul.f32 %v17160_v59, %v20350_v51  ;;  %v21088_v32 = vpop.eup %17161  ;;  %v16456_v51 = vunpack.i.h.bf16 %v24776_v15  ;;  %v5757_v59 = vmul.f32 1.442695, %v5591_v49  ;;  %17171 = vpow2.f32 %v5759_v17  ;;  %v1654_v49 = vld [vmem:[%s24157_s1 + $0x330] sm:$0xff] }
 0x567   : > { %24773 = vst [vmem:[#allocation22_spill] sm:$0xff] %v21072_v60  ;;  %v21079_v20 = vpop.f32.mrb[71].mxu1  ;;  %v21099_v14 = vadd.f32 %v20812_v11, %v1655_v42  ;;  %v21104_v24 = vpop.eup %17163  ;;  %v6039_v55 = vsel %vm502_vm0, %v21088_v32, 0.0  ;;  %v5595_v42 = vsub.f32 %v20255_v22, %v20859_v40  ;;  %v24805_v60 = vld [vmem:[#allocation10_spill] sm:$0xff] }
 0x568   : > { %24775 = vst [vmem:[#allocation160_spill] sm:$0xff] %v21079_v20  ;;  %5464 = vmax.xlane.f32.xlu1 %v5463_v43  ;;  %14906 = vmatprep.mubr.msk.f32.mxu0 %vm502_vm0, %v6449_v30  ;;  %v5472_v43 = vsel %vm502_vm0, %v21077_v16, -inf  ;;  %v17166_v53 = vpop.eup %17165  ;;  %17173 = vpow2.f32 %v5757_v59  ;;  %v21113_v17 = vpack.c.bf16 %v16456_v51, %v16455_v9  ;;  %v1657_v30 = vld [vmem:[%s24157_s1 + $0x348] sm:$0xff]  ;;  %v6048_v9 = vsel %vm502_vm0, %v21104_v24, 0.0  ;;  %v24801_v16 = vld [vmem:[#allocation45_spill] sm:$0xff] }
 0x569   : > { %v21091_v31 = vpop.xlane.xlu1 %5365  ;;  %6034 = vadd.xlane.f32.xlu0 %v6033_v25  ;;  %14907 = vmatmul.mubr.msk.f32.vlgmr.msra.gmra.mrb[88].mxu0 %vm502_vm0, %v6450_v46  ;;  %24777 = vst [vmem:[#allocation37_spill] sm:$0xff] %v21099_v14  ;;  %v21121_v46 = vadd.f32 %v20821_v57, %v1654_v49  ;;  %v5478_v15 = vsel %vm502_vm0, %v21099_v14, -inf  ;;  %v6452_v51 = vmul.f32 %v17166_v53, %v20341_v52  ;;  %v1656_v52 = vld [vmem:[%s24157_s1 + $0x340] sm:$0xff]  ;;  %v5765_v40 = vmul.f32 1.442695, %v5595_v42  ;;  %v1659_v42 = vld [vmem:[%s24157_s1 + $0x358] sm:$0xff] }
 0x56a   : > { %16085 = vmatpush3.bf16.msra.mxu0 %v20140_v56  ;;  %v5761_v56 = vmul.f32 1.442695, %v5593_v63  ;;  %v24806_v20 = vld [vmem:[#allocation15_spill] sm:$0xff] }
 0x56b   : > { %16087 = vmatprep.subr.bf16.mxu0 %v16086_v44  ;;  %24778 = vst [vmem:[#allocation161_spill] sm:$0xff] %v21121_v46  ;;  %v5475_v63 = vsel %vm502_vm0, %v21121_v46, -inf }
 0x56c   : > { %5473 = vmax.xlane.f32.xlu1 %v5472_v43  ;;  %17175 = vpow2.f32 %v5761_v56 }
 0x56d   : > { %v21111_v37 = vpop.xlane.xlu1 %5362  ;;  %6040 = vadd.xlane.f32.xlu0 %v6039_v55  ;;  %v17168_v11 = vpop.eup %17167  ;;  %v21155_v55 = vadd.f32 %v20753_v36, %v1656_v52  ;;  %17177 = vpow2.f32 %v5765_v40 }
 0x56e   : > { %16089 = vmatpush3.bf16.msra.mxu0 %v16086_v44  ;;  %v6451_v25 = vmul.f32 %v17168_v11, %v20377_v33  ;;  %v21130_v59 = vpop.eup %17169  ;;  %v21136_v33 = vadd.f32 %v20751_v27, %v1657_v30  ;;  %v5598_v44 = vsub.f32 %v20262_v50, %v20828_v23  ;;  %v24782_v50 = vld [vmem:[#allocation40_spill] sm:$0xff] }
 0x56f   : > { %16099 = vmatprep.subr.bf16.mxu0 %v21113_v17  ;;  %v6045_v27 = vsel %vm502_vm0, %v21130_v59, 0.0  ;;  %24781 = vst [vmem:[#allocation164_spill] sm:$0xff] %v21155_v55  ;;  %v5597_v23 = vsub.f32 %v24782_v50, %v20863_v0  ;;  %v24785_v0 = vld [vmem:[#allocation125_spill] sm:$0xff] }
 0x570   : > { %5479 = vmax.xlane.f32.xlu1 %v5478_v15  ;;  %14909 = vmatprep.mubr.msk.f32.mxu0 %vm502_vm0, %v6451_v25  ;;  %24779 = vst [vmem:[#allocation162_spill] sm:$0xff] %v21136_v33  ;;  %v21150_v43 = vpop.eup %17171  ;;  %v5771_v11 = vmul.f32 1.442695, %v5598_v44  ;;  %v5484_v56 = vsel %vm502_vm0, %v21136_v33, -inf  ;;  %v24784_v25 = vld [vmem:[#allocation91_spill] sm:$0xff]  ;;  %v21173_v52 = vadd.f32 %v24785_v0, %v1659_v42  ;;  %v5481_v44 = vsel %vm502_vm0, %v21155_v55, -inf }
 0x571   : > { %v21133_v22 = vpop.xlane.xlu1 %5371  ;;  %6049 = vadd.xlane.f32.xlu0 %v6048_v9  ;;  %14910 = vmatmul.mubr.msk.f32.gmra.mrb[90].mxu0 %vm502_vm0, %v6452_v51  ;;  %24780 = vst [vmem:[#allocation163_spill] sm:$0xff] %v21150_v43  ;;  %v5601_v36 = vsub.f32 %v24784_v25, %v20902_v7  ;;  %v6054_v15 = vsel %vm502_vm0, %v21150_v43, 0.0  ;;  %v5769_v40 = vmul.f32 1.442695, %v5597_v23 }
 0x572   : > { %v21139_v57 = vpop.xlane.xlu0 %5353  ;;  %v21163_v30 = vpop.eup %17173  ;;  %24786 = vst [vmem:[#allocation91_spill] sm:$0xff] %v21173_v52  ;;  %17179 = vpow2.f32 %v5771_v11  ;;  %v24787_v11 = vld [vmem:[#allocation126_spill] sm:$0xff]  ;;  %v5490_v25 = vsel %vm502_vm0, %v21173_v52, -inf }
 0x573   : > { %24783 = vst [vmem:[#allocation40_spill] sm:$0xff] %v21163_v30  ;;  %v5777_v7 = vmul.f32 1.442695, %v5601_v36  ;;  %17181 = vpow2.f32 %v5769_v40  ;;  %v1661_v36 = vld [vmem:[%s24157_s1 + $0x368] sm:$0xff]  ;;  %v24791_v40 = vld [vmem:[#allocation82_spill] sm:$0xff] }
 0x574   : > { %5476 = vmax.xlane.f32.xlu1 %v5475_v63  ;;  %v1658_v63 = vld [vmem:[%s24157_s1 + $0x350] sm:$0xff]  ;;  %v21205_v33 = vadd.f32 %v20884_v48, %v1661_v36 }
 0x575   : > { %v21152_v49 = vpop.xlane.xlu1 %5368  ;;  %6046 = vadd.xlane.f32.xlu0 %v6045_v27  ;;  %v6051_v27 = vsel %vm502_vm0, %v21163_v30, 0.0  ;;  %v21189_v23 = vadd.f32 %v24787_v11, %v1658_v63  ;;  %17183 = vpow2.f32 %v5777_v7  ;;  %v24792_v11 = vld [vmem:[#allocation3_spill] sm:$0xff] }
 0x576   : > { %v21157_v53 = vpop.xlane.xlu0 %5350  ;;  %v21182_v50 = vpop.eup %17175  ;;  %v5586_v52 = vsub.f32 %v24792_v11, %v24791_v40  ;;  %v5496_v40 = vsel %vm502_vm0, %v21205_v33, -inf  ;;  %v1663_v11 = vld [vmem:[%s24157_s1 + $0x378] sm:$0xff] }
 0x577   : > { %24788 = vst [vmem:[#allocation125_spill] sm:$0xff] %v21189_v23 }
 0x578   : > { %5485 = vmax.xlane.f32.xlu1 %v5484_v56 }
 0x579   : > { %v5966_v51 = vpop.xlane.xlu1 %5965  ;;  %6055 = vadd.xlane.f32.xlu0 %v6054_v15  ;;  %v24789_v15 = vld [vmem:[#allocation41_spill] sm:$0xff] }
 0x57a   : > { %v5954_v9 = vpop.xlane.xlu0 %5953  ;;  %v5599_v0 = vsub.f32 %v24789_v15, %v20926_v1  ;;  %17185 = vrcp.f32 %v5966_v51  ;;  %24793 = vst [vmem:[#allocation41_spill] sm:$0xff] %v21205_v33  ;;  %v5487_v1 = vsel %vm502_vm0, %v21189_v23, -inf  ;;  %v24794_v51 = vld [vmem:[#allocation103_spill] sm:$0xff]  ;;  %v21240_v33 = vadd.f32 %v20904_v19, %v1663_v11 }
 0x57b   : > { %v5603_v15 = vsub.f32 %v24794_v51, %v20946_v28  ;;  %v24797_v28 = vld [vmem:[#allocation39_spill] sm:$0xff]  ;;  %v16466_v19 = vunpack.i.h.bf16 %v24801_v16 }
 0x57c   : > { %5482 = vmax.xlane.f32.xlu1 %v5481_v44  ;;  %v6057_v44 = vsel %vm502_vm0, %v21182_v50, 0.0  ;;  %v5773_v7 = vmul.f32 1.442695, %v5599_v0  ;;  %24800 = vst [vmem:[#allocation39_spill] sm:$0xff] %v21240_v33 }
 0x57d   : > { %v21184_v56 = vpop.xlane.xlu1 %5989  ;;  %6052 = vadd.xlane.f32.xlu0 %v6051_v27  ;;  %v21200_v27 = vpop.eup %17177 }
 0x57e   : > { %v21186_v42 = vpop.xlane.xlu0 %5359  ;;  %24790 = vst [vmem:[#allocation126_spill] sm:$0xff] %v21200_v27 }
 0x580   : > { %5491 = vmax.xlane.f32.xlu1 %v5490_v25  ;;  %v1660_v25 = vld [vmem:[%s24157_s1 + $0x360] sm:$0xff] }
 0x581   : > { %v5963_v63 = vpop.xlane.xlu1 %5962  ;;  %6058 = vadd.xlane.f32.xlu0 %v6057_v44  ;;  %v6063_v44 = vsel %vm502_vm0, %v21200_v27, 0.0  ;;  %v21221_v0 = vadd.f32 %v20886_v41, %v1660_v25 }
 0x582   : > { %17187 = vrcp.f32 %v5963_v63  ;;  %v5951_v55 = vpop.xlane.xlu0 %5950  ;;  %v21216_v63 = vpop.eup %17179 }
 0x583   : > { %17189 = vrcp.f32 %v5954_v9  ;;  %24795 = vst [vmem:[#allocation82_spill] sm:$0xff] %v21216_v63  ;;  %v5747_v9 = vmul.f32 1.442695, %v5586_v52  ;;  %24796 = vst [vmem:[#allocation3_spill] sm:$0xff] %v21221_v0  ;;  %v6072_v52 = vsel %vm502_vm0, %v21216_v63, 0.0  ;;  %v21232_v51 = vpop.eup %17181 }
 0x584   : > { %17191 = vrcp.f32 %v5951_v55  ;;  %5488 = vmax.xlane.f32.xlu1 %v5487_v1  ;;  %v5600_v55 = vsub.f32 %v24797_v28, %v20898_v35  ;;  %v5781_v1 = vmul.f32 1.442695, %v5603_v15  ;;  %24798 = vst [vmem:[#allocation103_spill] sm:$0xff] %v21232_v51  ;;  %v21236_v25 = vpop.eup %17183  ;;  %v5493_v15 = vsel %vm502_vm0, %v21221_v0, -inf  ;;  %v24803_v0 = vld [vmem:[#allocation46_spill] sm:$0xff] }
 0x585   : > { %v5972_v48 = vpop.xlane.xlu1 %5971  ;;  %6064 = vadd.xlane.f32.xlu0 %v6063_v44  ;;  %17193 = vpow2.f32 %v5773_v7  ;;  %v17186_v35 = vpop.eup %17185  ;;  %v24799_v7 = vld [vmem:[#allocation60_spill] sm:$0xff] }
 0x586   : > { %v21218_v36 = vpop.xlane.xlu0 %5356  ;;  %17195 = vpow2.f32 %v5747_v9  ;;  %v16486_v28 = vunpack.i.h.bf16 %v24799_v7  ;;  %v16485_v23 = vunpack.i.l.bf16 %v24799_v7  ;;  %v5775_v46 = vmul.f32 1.442695, %v5600_v55  ;;  %v24804_v7 = vld [vmem:[#allocation117_spill] sm:$0xff] }
 0x587   : > { %17197 = vpow2.f32 %v5781_v1  ;;  %v6069_v9 = vsel %vm502_vm0, %v21232_v51, 0.0  ;;  %v16465_v55 = vunpack.i.l.bf16 %v24801_v16  ;;  %v5588_v43 = vsub.f32 %v24805_v60, %v24804_v7  ;;  %v24810_v60 = vld [vmem:[#allocation24_spill] sm:$0xff] }
 0x588   : > { %5497 = vmax.xlane.f32.xlu1 %v5496_v40  ;;  %v6458_v1 = vmul.f32 %v17186_v35, %v24806_v20  ;;  %v16110_v20 = vpack.c.bf16 %v16486_v28, %v16485_v23  ;;  %v6081_v35 = vsel %vm502_vm0, %v21236_v25, 0.0  ;;  %v24813_v23 = vld [vmem:[#allocation74_spill] sm:$0xff] }
 0x589   : > { %v21234_v41 = vpop.xlane.xlu1 %5995  ;;  %6073 = vadd.xlane.f32.xlu0 %v6072_v52  ;;  %v1662_v52 = vld [vmem:[%s24157_s1 + $0x370] sm:$0xff]  ;;  %v16496_v28 = vunpack.i.h.bf16 %v24813_v23 }
 0x58a   : > { %v5960_v44 = vpop.xlane.xlu0 %5959  ;;  %v21259_v51 = vadd.f32 %v20911_v54, %v1662_v52  ;;  %v5751_v52 = vmul.f32 1.442695, %v5588_v43  ;;  %v1665_v43 = vld [vmem:[%s24157_s1 + $0x388] sm:$0xff] }
 0x58b   : > { %17199 = vrcp.f32 %v5960_v44  ;;  %v24811_v44 = vld [vmem:[#allocation11_spill] sm:$0xff] }
 0x58c   : > { %v17188_v40 = vpop.eup %17187  ;;  %5494 = vmax.xlane.f32.xlu1 %v5493_v15  ;;  %24807 = vst [vmem:[#allocation45_spill] sm:$0xff] %v21259_v51  ;;  %v5499_v7 = vsel %vm502_vm0, %v21259_v51, -inf }
 0x58d   : > { %v17190_v14 = vpop.eup %17189  ;;  %v21251_v11 = vpop.xlane.xlu1 %5389  ;;  %6070 = vadd.xlane.f32.xlu0 %v6069_v9  ;;  %v6457_v63 = vmul.f32 %v17188_v40, %v24803_v0  ;;  %v5502_v9 = vsel %vm502_vm0, %v21240_v33, -inf  ;;  %v24808_v0 = vld [vmem:[#allocation17_spill] sm:$0xff] }
 0x58e   : > { %24802 = vst [vmem:[#allocation60_spill] sm:$0xff] %v21251_v11  ;;  %v17192_v27 = vpop.eup %17191  ;;  %v5957_v15 = vpop.xlane.xlu0 %5956  ;;  %v24809_v11 = vld [vmem:[#allocation93_spill] sm:$0xff]  ;;  %v6454_v54 = vmul.f32 %v17190_v14, %v24810_v60  ;;  %v16495_v14 = vunpack.i.l.bf16 %v24813_v23  ;;  %v24819_v23 = vld [vmem:[#allocation48_spill] sm:$0xff] }
 0x58f   : > { %17201 = vrcp.f32 %v5957_v15  ;;  %14934 = vmatprep.mubr.msk.f32.mxu1 %vm502_vm0, %v6457_v63  ;;  %v6453_v40 = vmul.f32 %v17192_v27, %v24808_v0  ;;  %v16516_v16 = vunpack.i.h.bf16 %v24809_v11  ;;  %v16515_v30 = vunpack.i.l.bf16 %v24809_v11  ;;  %v21273_v27 = vpop.eup %17193 }
 0x590   : > { %17203 = vpow2.f32 %v5775_v46  ;;  %14935 = vmatmul.mubr.msk.f32.vlgmr.msra.gmra.mrb[72].mxu1 %vm502_vm0, %v6458_v1  ;;  %5503 = vmax.xlane.f32.xlu1 %v5502_v9  ;;  %24812 = vst [vmem:[#allocation46_spill] sm:$0xff] %v21273_v27  ;;  %v16102_v46 = vpack.c.bf16 %v16466_v19, %v16465_v55  ;;  %v21282_v1 = vpop.eup %17195  ;;  %v6075_v55 = vsel %vm502_vm0, %v21273_v27, 0.0  ;;  %v21298_v0 = vadd.f32 %v20837_v6, %v1665_v43 }
 0x591   : > { %16109 = vmatpush3.bf16.msra.mxu1 %v24811_v44  ;;  %14920 = vmatprep.mubr.msk.f32.mxu0 %vm502_vm0, %v6453_v40  ;;  %v5969_v63 = vpop.xlane.xlu1 %5968  ;;  %17205 = vrcp.f32 %v5972_v48  ;;  %v21288_v48 = vpack.c.bf16 %v16516_v16, %v16515_v30  ;;  %v21292_v15 = vpop.eup %17197  ;;  %v6036_v30 = vsel %vm502_vm0, %v21282_v1, 0.0  ;;  %v1664_v16 = vld [vmem:[%s24157_s1 + $0x380] sm:$0xff] }
 0x592   : > { %16111 = vmatprep.subr.bf16.mxu1 %v16110_v20  ;;  %6082 = vadd.xlane.f32.xlu0 %v6081_v35  ;;  %v21275_v11 = vpop.xlane.xlu0 %5377  ;;  %17207 = vrcp.f32 %v5969_v63  ;;  %24814 = vst [vmem:[#allocation117_spill] sm:$0xff] %v21292_v15  ;;  %24815 = vst [vmem:[#allocation10_spill] sm:$0xff] %v21298_v0  ;;  %v6087_v6 = vsel %vm502_vm0, %v21292_v15, 0.0  ;;  %v24817_v63 = vld [vmem:[#allocation58_spill] sm:$0xff] }
 0x593   : > { %14921 = vmatmul.mubr.msk.f32.vlgmr.msra.gmra.mrb[92].mxu0 %vm502_vm0, %v6454_v54  ;;  %17209 = vpow2.f32 %v5751_v52  ;;  %v21318_v52 = vadd.f32 %v20841_v45, %v1664_v16 }
 0x594   : > { %16101 = vmatpush3.bf16.msra.mxu0 %v21113_v17  ;;  %5500 = vmax.xlane.f32.xlu1 %v5499_v7  ;;  %v21300_v17 = vpack.c.bf16 %v16496_v28, %v16495_v14  ;;  %17211 = vrcp.f32 %v21184_v56  ;;  %v24822_v56 = vld [vmem:[#allocation2_spill] sm:$0xff] }
 0x595   : > { %16103 = vmatprep.subr.bf16.mxu0 %v16102_v46  ;;  %16113 = vmatpush3.bf16.msra.mxu1 %v16110_v20  ;;  %v5993_v19 = vpop.xlane.xlu1 %5992  ;;  %v17200_v40 = vpop.eup %17199  ;;  %24818 = vst [vmem:[#allocation17_spill] sm:$0xff] %v21318_v52 }
 0x596   : > { %16123 = vmatprep.subr.bf16.mxu1 %v21288_v48  ;;  %6076 = vadd.xlane.f32.xlu0 %v6075_v55  ;;  %v21295_v9 = vpop.xlane.xlu0 %5374  ;;  %v6456_v28 = vmul.f32 %v17200_v40, %v24819_v23  ;;  %17213 = vrcp.f32 %v5993_v19  ;;  %v24821_v40 = vld [vmem:[#allocation23_spill] sm:$0xff] }
 0x598   : > { %16105 = vmatpush3.bf16.msra.mxu0 %v16102_v46  ;;  %6037 = vadd.xlane.f32.xlu1 %v6036_v30  ;;  %v5508_v46 = vsel %vm502_vm0, %v21298_v0, -inf  ;;  %v24820_v30 = vld [vmem:[#allocation7_spill] sm:$0xff]  ;;  %v24829_v0 = vld [vmem:[#allocation108_spill] sm:$0xff] }
 0x599   : > { %v17202_v20 = vpop.eup %17201  ;;  %16115 = vmatprep.subr.bf16.mxu0 %v21300_v17  ;;  %v21308_v60 = vpop.xlane.xlu1 %5386 }
 0x59a   : > { %v21312_v54 = vpop.eup %17203  ;;  %6088 = vadd.xlane.f32.xlu0 %v6087_v6  ;;  %v21314_v44 = vpop.xlane.xlu0 %5383  ;;  %v6455_v35 = vmul.f32 %v17202_v20, %v24817_v63  ;;  %v5505_v6 = vsel %vm502_vm0, %v21318_v52, -inf }
 0x59b   : > { %24816 = vst [vmem:[#allocation15_spill] sm:$0xff] %v21312_v54  ;;  %v17206_v14 = vpop.eup %17205  ;;  %v6078_v55 = vsel %vm502_vm0, %v21312_v54, 0.0  ;;  %v24834_v54 = vld [vmem:[#allocation30_spill] sm:$0xff] }
 0x59c   : > { %5509 = vmax.xlane.f32.xlu1 %v5508_v46  ;;  %14923 = vmatprep.mubr.msk.f32.mxu0 %vm502_vm0, %v6455_v35  ;;  %v17208_v7 = vpop.eup %17207  ;;  %v6460_v20 = vmul.f32 %v17206_v14, %v24821_v40  ;;  %v1667_v35 = vld [vmem:[%s24157_s1 + $0x398] sm:$0xff] }
 0x59d   : > { %v21324_v43 = vpop.xlane.xlu1 %5395  ;;  %14924 = vmatmul.mubr.msk.f32.gmra.mrb[94].mxu0 %vm502_vm0, %v6456_v28  ;;  %v6459_v16 = vmul.f32 %v17208_v7, %v24820_v30  ;;  %v21334_v63 = vpop.eup %17209  ;;  %v24823_v46 = vld [vmem:[#allocation89_spill] sm:$0xff]  ;;  %v21348_v14 = vadd.f32 %v20861_v58, %v1667_v35 }
 0x59e   : > { %6079 = vadd.xlane.f32.xlu0 %v6078_v55  ;;  %v5987_v45 = vpop.xlane.xlu0 %5986  ;;  %v5594_v23 = vsub.f32 %v24823_v46, %v24822_v56  ;;  %v6042_v7 = vsel %vm502_vm0, %v21334_v63, 0.0  ;;  %v1666_v55 = vld [vmem:[%s24157_s1 + $0x390] sm:$0xff]  ;;  %v24826_v40 = vld [vmem:[#allocation33_spill] sm:$0xff]  ;;  %v17212_v35 = vpop.eup %17211  ;;  %v1669_v56 = vld [vmem:[%s24157_s1 + $0x3a8] sm:$0xff] }
 0x59f   : > { %17215 = vrcp.f32 %v5987_v45  ;;  %14937 = vmatprep.mubr.msk.f32.mxu1 %vm502_vm0, %v6459_v16  ;;  %24824 = vst [vmem:[#allocation93_spill] sm:$0xff] %v21348_v14  ;;  %v24825_v16 = vld [vmem:[#allocation132_spill] sm:$0xff]  ;;  %v21361_v58 = vadd.f32 %v20865_v62, %v1666_v55  ;;  %v24830_v55 = vld [vmem:[#allocation138_spill] sm:$0xff]  ;;  %v21375_v51 = vadd.f32 %v20969_v2, %v1669_v56  ;;  %v6466_v27 = vmul.f32 %v17212_v35, %v24834_v54 }
 0x5a0   : > { %5506 = vmax.xlane.f32.xlu1 %v5505_v6  ;;  %14938 = vmatmul.mubr.msk.f32.gmra.mrb[74].mxu1 %vm502_vm0, %v6460_v20  ;;  %17217 = vrcp.f32 %v21234_v41  ;;  %v5763_v45 = vmul.f32 1.442695, %v5594_v23  ;;  %v5596_v20 = vsub.f32 %v24826_v40, %v24825_v16  ;;  %v5514_v41 = vsel %vm502_vm0, %v21348_v14, -inf  ;;  %v17214_v46 = vpop.eup %17213  ;;  %v24831_v14 = vld [vmem:[#allocation66_spill] sm:$0xff]  ;;  %v24836_v56 = vld [vmem:[#allocation120_spill] sm:$0xff] }
 0x5a1   : > { %v21343_v19 = vpop.xlane.xlu1 %5392  ;;  %24828 = vst [vmem:[#allocation11_spill] sm:$0xff] %v21361_v58  ;;  %v16526_v16 = vunpack.i.h.bf16 %v24829_v0  ;;  %v16525_v40 = vunpack.i.l.bf16 %v24829_v0  ;;  %v5602_v52 = vsub.f32 %v24831_v14, %v24830_v55  ;;  %24832 = vst [vmem:[#allocation74_spill] sm:$0xff] %v21375_v51  ;;  %v1668_v0 = vld [vmem:[%s24157_s1 + $0x3a0] sm:$0xff]  ;;  %v16560_v55 = vunpack.i.l.bf16 %v24836_v56 }
 0x5a2   : > { %v21345_v28 = vpop.xlane.xlu0 %5380  ;;  %17219 = vpow2.f32 %v5763_v45  ;;  %v5767_v33 = vmul.f32 1.442695, %v5596_v20  ;;  %v24833_v45 = vld [vmem:[#allocation18_spill] sm:$0xff] }
 0x5a3   : > { %v24835_v20 = vld [vmem:[#allocation34_spill] sm:$0xff]  ;;  %v16126_v54 = vpack.c.bf16 %v16526_v16, %v16525_v40 }
 0x5a4   : > { %6043 = vadd.xlane.f32.xlu1 %v6042_v7  ;;  %v6467_v2 = vmul.f32 %v17214_v46, %v24835_v20  ;;  %v24838_v46 = vld [vmem:[#allocation35_spill] sm:$0xff] }
 0x5a5   : > { %v6014_v30 = vpop.xlane.xlu1 %6013  ;;  %v24843_v20 = vld [vmem:[#allocation27_spill] sm:$0xff] }
 0x5a6   : > { %v21358_v6 = vpop.xlane.xlu0 %5401 }
 0x5a7   : > { %24827 = vst [vmem:[#allocation24_spill] sm:$0xff] %v21358_v6 }
 0x5a8   : > { %5515 = vmax.xlane.f32.xlu1 %v5514_v41  ;;  %v5511_v41 = vsel %vm502_vm0, %v21361_v58, -inf }
 0x5a9   : > { %v5975_v23 = vpop.xlane.xlu1 %5974  ;;  %v17216_v7 = vpop.eup %17215 }
 0x5aa   : > { %17221 = vrcp.f32 %v5975_v23  ;;  %v21370_v62 = vpop.xlane.xlu0 %5398  ;;  %v6465_v15 = vmul.f32 %v17216_v7, %v24833_v45  ;;  %v17218_v6 = vpop.eup %17217  ;;  %v16561_v23 = vunpack.i.h.bf16 %v24836_v56  ;;  %v5779_v7 = vmul.f32 1.442695, %v5602_v52  ;;  %v24841_v45 = vld [vmem:[#allocation144_spill] sm:$0xff] }
 0x5ab   : > { %17223 = vrcp.f32 %v6014_v30  ;;  %v21394_v30 = vadd.f32 %v20976_v10, %v1668_v0  ;;  %v24840_v10 = vld [vmem:[#allocation43_spill] sm:$0xff] }
 0x5ac   : > { %5512 = vmax.xlane.f32.xlu1 %v5511_v41  ;;  %14962 = vmatprep.mubr.msk.f32.mxu1 %vm502_vm0, %v6465_v15  ;;  %v5520_v15 = vsel %vm502_vm0, %v21375_v51, -inf  ;;  %v6468_v41 = vmul.f32 %v17218_v6, %v24838_v46  ;;  %v24842_v6 = vld [vmem:[#allocation100_spill] sm:$0xff] }
 0x5ad   : > { %v6011_v14 = vpop.xlane.xlu1 %6010  ;;  %14963 = vmatmul.mubr.msk.f32.vlgmr.msra.gmra.mrb[76].mxu1 %vm502_vm0, %v6466_v27  ;;  %24837 = vst [vmem:[#allocation58_spill] sm:$0xff] %v21394_v30  ;;  %v5517_v40 = vsel %vm502_vm0, %v21394_v30, -inf  ;;  %v5604_v0 = vsub.f32 %v24842_v6, %v24841_v45  ;;  %v24847_v6 = vld [vmem:[#allocation107_spill] sm:$0xff]  ;;  %v24849_v51 = vld [vmem:[#allocation32_spill] sm:$0xff]  ;;  %v24850_v30 = vld [vmem:[#allocation6_spill] sm:$0xff] }
 0x5ae   : > { %17225 = vrcp.f32 %v6011_v14  ;;  %v5978_v35 = vpop.xlane.xlu0 %5977  ;;  %16125 = vmatpush3.bf16.msra.mxu1 %v21288_v48  ;;  %14965 = vmatprep.mubr.msk.f32.mxu1 %vm502_vm0, %v6467_v2  ;;  %v21400_v48 = vpop.eup %17219 }
 0x5af   : > { %17227 = vpow2.f32 %v5767_v33  ;;  %16127 = vmatprep.subr.bf16.mxu1 %v16126_v54  ;;  %v16138_v33 = vpack.c.bf16 %v16561_v23, %v16560_v55 }
 0x5b0   : > { %17229 = vrcp.f32 %v5978_v35  ;;  %5521 = vmax.xlane.f32.xlu1 %v5520_v15  ;;  %v6060_v15 = vsel %vm502_vm0, %v21400_v48, 0.0 }
 0x5b1   : > { %v5984_v27 = vpop.xlane.xlu1 %5983  ;;  %14966 = vmatmul.mubr.msk.f32.gmra.mrb[78].mxu1 %vm502_vm0, %v6468_v41  ;;  %17231 = vpow2.f32 %v5779_v7  ;;  %v5783_v41 = vmul.f32 1.442695, %v5604_v0 }
 0x5b2   : > { %v21398_v52 = vpop.xlane.xlu0 %5407  ;;  %16129 = vmatpush3.bf16.msra.mxu1 %v16126_v54  ;;  %v24845_v54 = vld [vmem:[#allocation87_spill] sm:$0xff] }
 0x5b3   : > { %24839 = vst [vmem:[#allocation48_spill] sm:$0xff] %v21398_v52  ;;  %16139 = vmatprep.subr.bf16.mxu1 %v16138_v33  ;;  %v16506_v35 = vunpack.i.h.bf16 %v24845_v54  ;;  %v16505_v7 = vunpack.i.l.bf16 %v24845_v54  ;;  %17233 = vpow2.f32 %v5783_v41 }
 0x5b4   : > { %v17222_v16 = vpop.eup %17221  ;;  %16788 = vrot.lane.b32.xlu0 %v24840_v10, %s17775_s25  ;;  %5518 = vmax.xlane.f32.xlu1 %v5517_v40  ;;  %17235 = vrcp.f32 %v5984_v27  ;;  %v24853_v27 = vld [vmem:[#allocation112_spill] sm:$0xff] }
 0x5b5   : > { %v6020_v14 = vpop.xlane.xlu1 %6019  ;;  %v6461_v2 = vmul.f32 %v17222_v16, %v24843_v20  ;;  %v17224_v23 = vpop.eup %17223  ;;  %v24846_v16 = vld [vmem:[#allocation113_spill] sm:$0xff]  ;;  %v16118_v0 = vpack.c.bf16 %v16506_v35, %v16505_v7  ;;  %v5609_v41 = vsub.f32 %v24853_v27, %v21027_v12 }
 0x5b6   : > { %v21409_v56 = vpop.xlane.xlu0 %5404  ;;  %v6474_v20 = vmul.f32 %v17224_v23, %v24847_v6  ;;  %v24851_v23 = vld [vmem:[#allocation64_spill] sm:$0xff]  ;;  %17237 = vrcp.f32 %v6020_v14  ;;  %v24856_v6 = vld [vmem:[#allocation150_spill] sm:$0xff] }
 0x5b7   : > { %24844 = vst [vmem:[#allocation7_spill] sm:$0xff] %v21409_v56  ;;  %14948 = vmatprep.mubr.msk.f32.mxu0 %vm502_vm0, %v6461_v2  ;;  %v16536_v56 = vunpack.i.h.bf16 %v24850_v30 }
 0x5b8   : > { %v17226_v55 = vpop.eup %17225  ;;  %6061 = vadd.xlane.f32.xlu1 %v6060_v15 }
 0x5b9   : > { %v21416_v46 = vpop.eup %17227  ;;  %v21418_v10 = vpop.xlane.xlu1 %5413  ;;  %v6473_v40 = vmul.f32 %v17226_v55, %v24846_v16  ;;  %v16535_v55 = vunpack.i.l.bf16 %v24850_v30  ;;  %v5605_v16 = vsub.f32 %v24851_v23, %v20971_v8 }
 0x5ba   : > { %v17230_v45 = vpop.eup %17229  ;;  %v21422_v2 = vpop.xlane.xlu0 %5422  ;;  %v6066_v54 = vsel %vm502_vm0, %v21416_v46, 0.0 }
 0x5bb   : > { %24848 = vst [vmem:[#allocation23_spill] sm:$0xff] %v21422_v2  ;;  %v6462_v58 = vmul.f32 %v17230_v45, %v24849_v51  ;;  %14990 = vmatprep.mubr.msk.f32.mxu1 %vm502_vm0, %v6473_v40  ;;  %v21429_v15 = vpop.eup %17231  ;;  %v1670_v51 = vld [vmem:[%s24157_s1 + $0x3b0] sm:$0xff]  ;;  %v5785_v7 = vmul.f32 1.442695, %v5605_v16 }
 0x5bc   : > { %14991 = vmatmul.mubr.msk.f32.vlgmr.msra.gmra.mrb[80].mxu1 %vm502_vm0, %v6474_v20  ;;  %6067 = vadd.xlane.f32.xlu1 %v6066_v54  ;;  %v21441_v30 = vadd.f32 %v20997_v38, %v1670_v51  ;;  %v6084_v8 = vsel %vm502_vm0, %v21429_v15, 0.0  ;;  %v24857_v20 = vld [vmem:[#allocation5_spill] sm:$0xff]  ;;  %v5793_v54 = vmul.f32 1.442695, %v5609_v41 }
 0x5bd   : > { %14949 = vmatmul.mubr.msk.f32.vlgmr.msra.gmra.mrb[96].mxu0 %vm502_vm0, %v6462_v58  ;;  %v5981_v40 = vpop.xlane.xlu1 %5980  ;;  %16141 = vmatpush3.bf16.msra.mxu1 %v16138_v33  ;;  %v1671_v58 = vld [vmem:[%s24157_s1 + $0x3b8] sm:$0xff]  ;;  %v21450_v33 = vpack.c.bf16 %v16536_v56, %v16535_v55  ;;  %v5606_v12 = vsub.f32 %v24857_v20, %v24856_v6  ;;  %v21466_v55 = vpop.eup %17233 }
 0x5be   : > { %16117 = vmatpush3.bf16.msra.mxu0 %v21300_v17  ;;  %v5999_v35 = vpop.xlane.xlu0 %5998  ;;  %24852 = vst [vmem:[#allocation2_spill] sm:$0xff] %v21441_v30  ;;  %17239 = vrcp.f32 %v5981_v40  ;;  %v21456_v14 = vadd.f32 %v20988_v34, %v1671_v58  ;;  %v5523_v45 = vsel %vm502_vm0, %v21441_v30, -inf  ;;  %v17236_v23 = vpop.eup %17235  ;;  %v24860_v58 = vld [vmem:[#allocation8_spill] sm:$0xff]  ;;  %v24862_v20 = vld [vmem:[#allocation9_spill] sm:$0xff] }
 0x5bf   : > { %16119 = vmatprep.subr.bf16.mxu0 %v16118_v0  ;;  %17241 = vrcp.f32 %v5999_v35  ;;  %v5787_v51 = vmul.f32 1.442695, %v5606_v12 }
 0x5c0   : > { %6085 = vadd.xlane.f32.xlu1 %v6084_v8  ;;  %24855 = vst [vmem:[#allocation132_spill] sm:$0xff] %v21456_v14  ;;  %v5526_v34 = vsel %vm502_vm0, %v21456_v14, -inf  ;;  %v17238_v16 = vpop.eup %17237 }
 0x5c1   : > { %v6017_v17 = vpop.xlane.xlu1 %6016 }
 0x5c2   : > { %16121 = vmatpush3.bf16.msra.mxu0 %v16118_v0  ;;  %17243 = vrcp.f32 %v6017_v17  ;;  %v21452_v38 = vpop.xlane.xlu0 %5428  ;;  %v6090_v17 = vsel %vm502_vm0, %v21466_v55, 0.0 }
 0x5c3   : > { %24854 = vst [vmem:[#allocation89_spill] sm:$0xff] %v21452_v38  ;;  %16131 = vmatprep.subr.bf16.mxu0 %v21450_v33  ;;  %17245 = vpow2.f32 %v5785_v7 }
 0x5c4   : > { %5524 = vmax.xlane.f32.xlu1 %v5523_v45  ;;  %17247 = vpow2.f32 %v5793_v54  ;;  %v24861_v45 = vld [vmem:[#allocation47_spill] sm:$0xff] }
 0x5c5   : > { %v21462_v56 = vpop.xlane.xlu1 %5410  ;;  %v6464_v6 = vmul.f32 %v17236_v23, %v24861_v45  ;;  %17249 = vpow2.f32 %v5787_v51  ;;  %v24863_v54 = vld [vmem:[#allocation127_spill] sm:$0xff] }
 0x5c6   : > { %v21464_v0 = vpop.xlane.xlu0 %5437 }
 0x5c7   : > { %24858 = vst [vmem:[#allocation33_spill] sm:$0xff] %v21464_v0  ;;  %v24880_v0 = vld [vmem:[#allocation146_spill] sm:$0xff] }
 0x5c8   : > { %5527 = vmax.xlane.f32.xlu1 %v5526_v34  ;;  %v17240_v35 = vpop.eup %17239 }
 0x5c9   : > { %v21470_v40 = vpop.xlane.xlu1 %5419  ;;  %v17242_v7 = vpop.eup %17241  ;;  %v6463_v27 = vmul.f32 %v17240_v35, %v24860_v58  ;;  %v24865_v35 = vld [vmem:[#allocation119_spill] sm:$0xff] }
 0x5ca   : > { %24859 = vst [vmem:[#allocation108_spill] sm:$0xff] %v21470_v40  ;;  %v6005_v8 = vpop.xlane.xlu0 %6004  ;;  %v6469_v30 = vmul.f32 %v17242_v7, %v24862_v20  ;;  %v6476_v58 = vmul.f32 %v17238_v16, %v24865_v35 }
 0x5cb   : > { %14951 = vmatprep.mubr.msk.f32.mxu0 %vm502_vm0, %v6463_v27  ;;  %17251 = vrcp.f32 %v6005_v8 }
 0x5cc   : > { %v17244_v41 = vpop.eup %17243  ;;  %6091 = vadd.xlane.f32.xlu1 %v6090_v17  ;;  %14952 = vmatmul.mubr.msk.f32.gmra.mrb[98].mxu0 %vm502_vm0, %v6464_v6 }
 0x5cd   : > { %v21478_v12 = vpop.xlane.xlu1 %5416  ;;  %v6475_v34 = vmul.f32 %v17244_v41, %v24863_v54  ;;  %v21485_v38 = vpop.eup %17245  ;;  %14976 = vmatprep.mubr.msk.f32.mxu0 %vm502_vm0, %v6469_v30 }
 0x5ce   : > { %v21482_v14 = vpop.xlane.xlu0 %5443  ;;  %v6093_v51 = vsel %vm502_vm0, %v21485_v38, 0.0  ;;  %v21496_v27 = vpop.eup %17247 }
 0x5cf   : > { %24864 = vst [vmem:[#allocation138_spill] sm:$0xff] %v21482_v14  ;;  %14993 = vmatprep.mubr.msk.f32.mxu1 %vm502_vm0, %v6475_v34  ;;  %24868 = vst [vmem:[#allocation30_spill] sm:$0xff] %v21496_v27  ;;  %v6105_v16 = vsel %vm502_vm0, %v21496_v27, 0.0  ;;  %v21502_v30 = vpop.eup %17249  ;;  %v24872_v34 = vld [vmem:[#allocation49_spill] sm:$0xff] }
 0x5d0   : > { %14994 = vmatmul.mubr.msk.f32.gmra.mrb[82].mxu1 %vm502_vm0, %v6476_v58  ;;  %24870 = vst [vmem:[#allocation120_spill] sm:$0xff] %v21502_v30  ;;  %v6096_v6 = vsel %vm502_vm0, %v21502_v30, 0.0 }
 0x5d1   : > { %v21490_v23 = vpop.xlane.xlu1 %5425 }
 0x5d2   : > { %24866 = vst [vmem:[#allocation66_spill] sm:$0xff] %v21490_v23  ;;  %v21494_v7 = vpop.xlane.xlu0 %5449  ;;  %v24913_v23 = vld [vmem:[#allocation4_spill] sm:$0xff] }
 0x5d3   : > { %24867 = vst [vmem:[#allocation18_spill] sm:$0xff] %v21494_v7  ;;  %6094 = vadd.xlane.f32.xlu0 %v6093_v51  ;;  %v24876_v7 = vld [vmem:[#allocation133_spill] sm:$0xff] }
 0x5d5   : > { %v6002_v41 = vpop.xlane.xlu1 %6001  ;;  %v17252_v58 = vpop.eup %17251 }
 0x5d6   : > { %v21500_v17 = vpop.xlane.xlu0 %5446  ;;  %17253 = vrcp.f32 %v6002_v41  ;;  %v6471_v14 = vmul.f32 %v17252_v58, %v24876_v7 }
 0x5d7   : > { %24869 = vst [vmem:[#allocation34_spill] sm:$0xff] %v21500_v17  ;;  %6106 = vadd.xlane.f32.xlu0 %v6105_v16  ;;  %v24875_v16 = vld [vmem:[#allocation139_spill] sm:$0xff] }
 0x5d9   : > { %v21504_v45 = vpop.xlane.xlu1 %5431 }
 0x5da   : > { %24871 = vst [vmem:[#allocation35_spill] sm:$0xff] %v21504_v45  ;;  %v21508_v20 = vpop.xlane.xlu0 %6025 }
 0x5db   : > { %6097 = vadd.xlane.f32.xlu0 %v6096_v6 }
 0x5dd   : > { %v6008_v54 = vpop.xlane.xlu1 %6007  ;;  %16793 = vrot.lane.b32.xlu1 %v24872_v34, %s17775_s25 }
 0x5de   : > { %v21512_v35 = vpop.xlane.xlu0 %5455  ;;  %17255 = vrcp.f32 %v6008_v54 }
 0x5df   : > { %24873 = vst [vmem:[#allocation43_spill] sm:$0xff] %v21512_v35 }
 0x5e0   : > { %v17254_v8 = vpop.eup %17253 }
 0x5e1   : > { %v21514_v51 = vpop.xlane.xlu1 %5434  ;;  %v6470_v17 = vmul.f32 %v17254_v8, %v24875_v16 }
 0x5e2   : > { %24874 = vst [vmem:[#allocation144_spill] sm:$0xff] %v21514_v51  ;;  %v6023_v41 = vpop.xlane.xlu0 %6022 }
 0x5e3   : > { %17257 = vrcp.f32 %v6023_v41  ;;  %14977 = vmatmul.mubr.msk.f32.vlgmr.msra.gmra.mrb[100].mxu0 %vm502_vm0, %v6470_v17 }
 0x5e4   : > { %16133 = vmatpush3.bf16.msra.mxu0 %v21450_v33  ;;  %14979 = vmatprep.mubr.msk.f32.mxu0 %vm502_vm0, %v6471_v14  ;;  %v24882_v14 = vld [vmem:[#allocation54_spill] sm:$0xff] }
 0x5e5   : > { %v21519_v6 = vpop.xlane.xlu1 %5440 }
 0x5e6   : > { %24877 = vst [vmem:[#allocation100_spill] sm:$0xff] %v21519_v6  ;;  %v21523_v34 = vpop.xlane.xlu0 %5452  ;;  %v24893_v6 = vld [vmem:[#allocation143_spill] sm:$0xff] }
 0x5e7   : > { %24878 = vst [vmem:[#allocation27_spill] sm:$0xff] %v21523_v34 }
 0x5e8   : > { %v17256_v54 = vpop.eup %17255 }
 0x5e9   : > { %v21525_v35 = vpop.xlane.xlu1 %5461  ;;  %v6472_v8 = vmul.f32 %v17256_v54, %v24880_v0  ;;  %v24885_v0 = vld [vmem:[#allocation123_spill] sm:$0xff] }
 0x5ea   : > { %24879 = vst [vmem:[#allocation87_spill] sm:$0xff] %v21525_v35  ;;  %v21527_v45 = vpop.xlane.xlu0 %6031  ;;  %v5610_v54 = vsub.f32 %v24885_v0, %v21008_v3 }
 0x5eb   : > { %14980 = vmatmul.mubr.msk.f32.gmra.mrb[102].mxu0 %vm502_vm0, %v6472_v8 }
 0x5ec   : > { %v5795_v35 = vmul.f32 1.442695, %v5610_v54  ;;  %v24892_v54 = vld [vmem:[#allocation12_spill] sm:$0xff] }
 0x5ed   : > { %v21531_v7 = vpop.xlane.xlu1 %5458  ;;  %v17258_v17 = vpop.eup %17257 }
 0x5ee   : > { %24881 = vst [vmem:[#allocation113_spill] sm:$0xff] %v21531_v7  ;;  %v21533_v58 = vpop.xlane.xlu0 %6028  ;;  %v6477_v33 = vmul.f32 %v17258_v17, %v20962_v5  ;;  %v1672_v5 = vld [vmem:[%s24157_s1 + $0x3c0] sm:$0xff]  ;;  %v24888_v17 = vld [vmem:[#allocation80_spill] sm:$0xff] }
 0x5f0   : > { %15004 = vmatprep.mubr.msk.f32.mxu0 %vm502_vm0, %v6477_v33  ;;  %v5607_v33 = vsub.f32 %v24888_v17, %v21029_v39  ;;  %v24896_v17 = vld [vmem:[#allocation78_spill] sm:$0xff] }
 0x5f1   : > { %16798 = vrot.lane.b32.xlu0 %v24882_v14, %s17775_s25  ;;  %v21539_v41 = vpop.xlane.xlu1 %5467 }
 0x5f2   : > { %24883 = vst [vmem:[#allocation107_spill] sm:$0xff] %v21539_v41  ;;  %v21541_v16 = vpop.xlane.xlu0 %5470  ;;  %v5789_v0 = vmul.f32 1.442695, %v5607_v33 }
 0x5f3   : > { %24884 = vst [vmem:[#allocation32_spill] sm:$0xff] %v21541_v16  ;;  %v24889_v16 = vld [vmem:[#allocation145_spill] sm:$0xff] }
 0x5f4   : > { %v21557_v41 = vadd.f32 %v24889_v16, %v1672_v5 }
 0x5f5   : > { %v21545_v8 = vpop.xlane.xlu1 %5464 }
 0x5f6   : > { %24886 = vst [vmem:[#allocation6_spill] sm:$0xff] %v21545_v8  ;;  %v6035_v34 = vpop.xlane.xlu0 %6034  ;;  %24890 = vst [vmem:[#allocation112_spill] sm:$0xff] %v21557_v41 }
 0x5f7   : > { %17259 = vrcp.f32 %v6035_v34  ;;  %v1673_v34 = vld [vmem:[%s24157_s1 + $0x3c8] sm:$0xff] }
 0x5f8   : > { %17261 = vpow2.f32 %v5795_v35  ;;  %v21569_v39 = vadd.f32 %v24893_v6, %v1673_v34  ;;  %v5529_v35 = vsel %vm502_vm0, %v21557_v41, -inf }
 0x5f9   : > { %v21547_v7 = vpop.xlane.xlu1 %5473  ;;  %17263 = vpow2.f32 %v5789_v0 }
 0x5fa   : > { %24887 = vst [vmem:[#allocation64_spill] sm:$0xff] %v21547_v7  ;;  %v21554_v14 = vpop.xlane.xlu0 %6040  ;;  %v5611_v7 = vsub.f32 %v24892_v54, %v21068_v18  ;;  %24894 = vst [vmem:[#allocation5_spill] sm:$0xff] %v21569_v39  ;;  %v5532_v6 = vsel %vm502_vm0, %v21569_v39, -inf }
 0x5fc   : > { %v5797_v2 = vmul.f32 1.442695, %v5611_v7 }
 0x5fd   : > { %v21559_v3 = vpop.xlane.xlu1 %5479 }
 0x5fe   : > { %24891 = vst [vmem:[#allocation150_spill] sm:$0xff] %v21559_v3  ;;  %v21566_v8 = vpop.xlane.xlu0 %6049  ;;  %v5608_v3 = vsub.f32 %v24896_v17, %v20990_v47  ;;  %17265 = vpow2.f32 %v5797_v2 }
 0x600   : > { %v5791_v41 = vmul.f32 1.442695, %v5608_v3 }
 0x601   : > { %v21573_v16 = vpop.xlane.xlu1 %5476  ;;  %v17260_v5 = vpop.eup %17259  ;;  %5530 = vmax.xlane.f32.xlu1 %v5529_v35 }
 0x602   : > { %24895 = vst [vmem:[#allocation8_spill] sm:$0xff] %v21573_v16  ;;  %v6047_v33 = vpop.xlane.xlu0 %6046  ;;  %v6481_v18 = vmul.f32 %v17260_v5, %v21059_v4  ;;  %v21583_v54 = vpop.eup %17261  ;;  %17267 = vpow2.f32 %v5791_v41 }
 0x603   : > { %24898 = vst [vmem:[#allocation9_spill] sm:$0xff] %v21583_v54  ;;  %v6108_v47 = vsel %vm502_vm0, %v21583_v54, 0.0  ;;  %v21593_v0 = vpop.eup %17263  ;;  %17269 = vrcp.f32 %v21508_v20  ;;  %v5612_v20 = vsub.f32 %v24913_v23, %v21046_v26 }
 0x604   : > { %15018 = vmatprep.mubr.msk.f32.mxu1 %vm502_vm0, %v6481_v18  ;;  %24900 = vst [vmem:[#allocation119_spill] sm:$0xff] %v21593_v0  ;;  %v6099_v2 = vsel %vm502_vm0, %v21593_v0, 0.0  ;;  %17271 = vrcp.f32 %v21533_v58 }
 0x605   : > { %v21581_v34 = vpop.xlane.xlu1 %5485  ;;  %5533 = vmax.xlane.f32.xlu1 %v5532_v6  ;;  %17273 = vrcp.f32 %v21527_v45  ;;  %v5799_v52 = vmul.f32 1.442695, %v5612_v20 }
 0x606   : > { %24897 = vst [vmem:[#allocation47_spill] sm:$0xff] %v21581_v34  ;;  %v21585_v16 = vpop.xlane.xlu0 %6055  ;;  %17275 = vrcp.f32 %v6047_v33  ;;  %v24915_v33 = vld [vmem:[#allocation142_spill] sm:$0xff] }
 0x607   : > { %17277 = vpow2.f32 %v5799_v52 }
 0x608   : > { %v21601_v3 = vpop.eup %17265 }
 0x609   : > { %v21589_v7 = vpop.xlane.xlu1 %5482  ;;  %6109 = vadd.xlane.f32.xlu1 %v6108_v47  ;;  %24902 = vst [vmem:[#allocation139_spill] sm:$0xff] %v21601_v3  ;;  %v6111_v41 = vsel %vm502_vm0, %v21601_v3, 0.0 }
 0x60a   : > { %24899 = vst [vmem:[#allocation127_spill] sm:$0xff] %v21589_v7  ;;  %v21591_v4 = vpop.xlane.xlu0 %6052 }
 0x60c   : > { %v21609_v6 = vpop.eup %17267 }
 0x60d   : > { %v21595_v35 = vpop.xlane.xlu1 %5491  ;;  %24904 = vst [vmem:[#allocation146_spill] sm:$0xff] %v21609_v6  ;;  %v17270_v58 = vpop.eup %17269 }
 0x60e   : > { %24901 = vst [vmem:[#allocation49_spill] sm:$0xff] %v21595_v35  ;;  %v21597_v5 = vpop.xlane.xlu0 %6058  ;;  %v6102_v35 = vsel %vm502_vm0, %v21609_v6, 0.0  ;;  %v17272_v40 = vpop.eup %17271 }
 0x60f   : > { %v17274_v27 = vpop.eup %17273  ;;  %v6479_v23 = vmul.f32 %v17272_v40, %v21022_v21 }
 0x610   : > { %6100 = vadd.xlane.f32.xlu0 %v6099_v2 }
 0x611   : > { %v21603_v17 = vpop.xlane.xlu1 %5488 }
 0x612   : > { %24903 = vst [vmem:[#allocation133_spill] sm:$0xff] %v21603_v17  ;;  %v21605_v18 = vpop.xlane.xlu0 %6064  ;;  %v24907_v17 = vld [vmem:[#allocation63_spill] sm:$0xff] }
 0x614   : > { %6112 = vadd.xlane.f32.xlu0 %v6111_v41 }
 0x615   : > { %v21611_v47 = vpop.xlane.xlu1 %5497 }
 0x616   : > { %24905 = vst [vmem:[#allocation54_spill] sm:$0xff] %v21611_v47  ;;  %v21613_v39 = vpop.xlane.xlu0 %6073 }
 0x618   : > { %6103 = vadd.xlane.f32.xlu0 %v6102_v35 }
 0x619   : > { %v21617_v7 = vpop.xlane.xlu1 %5494 }
 0x61a   : > { %24906 = vst [vmem:[#allocation123_spill] sm:$0xff] %v21617_v7  ;;  %v21619_v2 = vpop.xlane.xlu0 %6070  ;;  %16803 = vrot.lane.b32.xlu1 %v24907_v17, %s17775_s25 }
 0x61d   : > { %v21623_v34 = vpop.xlane.xlu1 %5503 }
 0x61e   : > { %24908 = vst [vmem:[#allocation80_spill] sm:$0xff] %v21623_v34  ;;  %v24912_v34 = vld [vmem:[#allocation55_spill] sm:$0xff] }
 0x61f   : > { %v21625_v3 = vpop.xlane.xlu0 %6082 }
 0x621   : > { %v21627_v41 = vpop.xlane.xlu1 %5500 }
 0x622   : > { %24909 = vst [vmem:[#allocation145_spill] sm:$0xff] %v21627_v41 }
 0x623   : > { %v21629_v47 = vpop.xlane.xlu0 %6076 }
 0x625   : > { %v21631_v54 = vpop.xlane.xlu1 %6037 }
 0x627   : > { %v21633_v0 = vpop.xlane.xlu0 %6088 }
 0x629   : > { %v21636_v35 = vpop.xlane.xlu1 %5509 }
 0x62a   : > { %24910 = vst [vmem:[#allocation12_spill] sm:$0xff] %v21636_v35 }
 0x62b   : > { %v21639_v7 = vpop.xlane.xlu0 %6079 }
 0x62d   : > { %v21642_v17 = vpop.xlane.xlu1 %5506 }
 0x62e   : > { %24911 = vst [vmem:[#allocation143_spill] sm:$0xff] %v21642_v17  ;;  %16808 = vrot.lane.b32.xlu0 %v24912_v34, %s17775_s25  ;;  %v6478_v17 = vmul.f32 %v17270_v58, %v24915_v33  ;;  %v1674_v34 = vld [vmem:[%s24157_s1 + $0x3d0] sm:$0xff]  ;;  %v6480_v58 = vmul.f32 %v17274_v27, %v21006_v61  ;;  %v1675_v33 = vld [vmem:[%s24157_s1 + $0x3d8] sm:$0xff] }
 0x62f   : > { %v16789_v41 = vpop.permute.xlu0 %16788 }
 0x630   : > { %v16791_v6 = vunpack.i.h.bf16 %v16789_v41  ;;  %v16790_v30 = vunpack.i.l.bf16 %v16789_v41  ;;  %v24916_v41 = vld [vmem:[#allocation116_spill] sm:$0xff] }
 0x631   : > { %v21648_v51 = vpop.xlane.xlu1 %6043  ;;  %v5613_v26 = vsub.f32 %v24916_v41, %v21157_v53  ;;  %v24919_v53 = vld [vmem:[#allocation124_spill] sm:$0xff] }
 0x632   : > { %v16134_v35 = vpack.c.bf16 %v16791_v6, %v16790_v30  ;;  %v17276_v30 = vpop.eup %17275  ;;  %v5617_v21 = vsub.f32 %v24919_v53, %v21111_v37  ;;  %v24922_v41 = vld [vmem:[#allocation148_spill] sm:$0xff] }
 0x633   : > { %v5801_v40 = vmul.f32 1.442695, %v5613_v26  ;;  %v21680_v61 = vadd.f32 %v24922_v41, %v1675_v33  ;;  %v24925_v26 = vld [vmem:[#allocation111_spill] sm:$0xff] }
 0x634   : > { %16135 = vmatprep.subr.bf16.mxu0 %v16134_v35  ;;  %v5809_v37 = vmul.f32 1.442695, %v5617_v21 }
 0x635   : > { %16137 = vmatpush3.bf16.msra.mxu0 %v16134_v35  ;;  %v21650_v45 = vpop.xlane.xlu1 %5515  ;;  %v24917_v35 = vld [vmem:[#allocation149_spill] sm:$0xff]  ;;  %24923 = vst [vmem:[#allocation142_spill] sm:$0xff] %v21680_v61  ;;  %17279 = vpow2.f32 %v5801_v40 }
 0x636   : > { %24914 = vst [vmem:[#allocation78_spill] sm:$0xff] %v21650_v45  ;;  %v21664_v20 = vadd.f32 %v24917_v35, %v1674_v34  ;;  %v5538_v35 = vsel %vm502_vm0, %v21680_v61, -inf  ;;  %17281 = vpow2.f32 %v5809_v37 }
 0x638   : > { %15005 = vmatmul.mubr.msk.f32.vlgmr.msra.gmra.mrb[104].mxu0 %vm502_vm0, %v6478_v17  ;;  %24918 = vst [vmem:[#allocation63_spill] sm:$0xff] %v21664_v20  ;;  %v6485_v17 = vmul.f32 %v17276_v30, %v21130_v59  ;;  %v5614_v59 = vsub.f32 %v24925_v26, %v21139_v57 }
 0x639   : > { %15007 = vmatprep.mubr.msk.f32.mxu0 %vm502_vm0, %v6479_v23  ;;  %v21661_v6 = vpop.xlane.xlu1 %5512  ;;  %v5535_v23 = vsel %vm502_vm0, %v21664_v20, -inf }
 0x63a   : > { %v5803_v33 = vmul.f32 1.442695, %v5614_v59 }
 0x63c   : > { %15008 = vmatmul.mubr.msk.f32.gmra.mrb[106].mxu0 %vm502_vm0, %v6480_v58  ;;  %v21674_v52 = vpop.f32.mrb[88].mxu0  ;;  %v21692_v58 = vpop.eup %17277  ;;  %17283 = vpow2.f32 %v5803_v33 }
 0x63d   : > { %24920 = vst [vmem:[#allocation55_spill] sm:$0xff] %v21674_v52  ;;  %15032 = vmatprep.mubr.msk.f32.mxu0 %vm502_vm0, %v6485_v17  ;;  %v21677_v34 = vpop.xlane.xlu1 %5521  ;;  %v21682_v27 = vpop.f32.mrb[89].mxu0  ;;  %v6114_v57 = vsel %vm502_vm0, %v21692_v58, 0.0  ;;  %17285 = vrcp.f32 %v21631_v54 }
 0x63e   : > { %24921 = vst [vmem:[#allocation4_spill] sm:$0xff] %v21677_v34  ;;  %24924 = vst [vmem:[#allocation116_spill] sm:$0xff] %v21682_v27  ;;  %5536 = vmax.xlane.f32.xlu1 %v5535_v23  ;;  %17287 = vrcp.f32 %v21554_v14 }
 0x63f   : > { %v21702_v40 = vpop.eup %17279  ;;  %17289 = vrcp.f32 %v21648_v51 }
 0x640   : > { %v6117_v23 = vsel %vm502_vm0, %v21702_v40, 0.0  ;;  %v21708_v37 = vpop.eup %17281  ;;  %17291 = vrcp.f32 %v21597_v5 }
 0x641   : > { %v21688_v30 = vpop.xlane.xlu1 %5518  ;;  %v6129_v59 = vsel %vm502_vm0, %v21708_v37, 0.0 }
 0x642   : > { %5539 = vmax.xlane.f32.xlu1 %v5538_v35 }
 0x644   : > { %v21694_v53 = vpop.f32.mrb[90].mxu0 }
 0x645   : > { %24926 = vst [vmem:[#allocation149_spill] sm:$0xff] %v21694_v53  ;;  %v21696_v17 = vpop.f32.mrb[91].mxu0  ;;  %v21698_v21 = vpop.xlane.xlu1 %6061 }
 0x646   : > { %24927 = vst [vmem:[#allocation124_spill] sm:$0xff] %v21696_v17  ;;  %6115 = vadd.xlane.f32.xlu1 %v6114_v57  ;;  %v21714_v35 = vpop.eup %17283 }
 0x647   : > { %v6120_v57 = vsel %vm502_vm0, %v21714_v35, 0.0  ;;  %v17286_v61 = vpop.eup %17285 }
 0x648   : > { %v6482_v51 = vmul.f32 %v17286_v61, %v21282_v1  ;;  %v24935_v1 = vld [vmem:[#allocation73_spill] sm:$0xff] }
 0x649   : > { %v21704_v41 = vpop.xlane.xlu1 %6067 }
 0x64d   : > { %6118 = vadd.xlane.f32.xlu0 %v6117_v23  ;;  %v21710_v26 = vpop.xlane.xlu1 %6085  ;;  %v24930_v23 = vld [vmem:[#allocation65_spill] sm:$0xff] }
 0x651   : > { %6130 = vadd.xlane.f32.xlu0 %v6129_v59  ;;  %v21716_v33 = vpop.xlane.xlu1 %5524 }
 0x652   : > { %24928 = vst [vmem:[#allocation148_spill] sm:$0xff] %v21716_v33  ;;  %v17288_v33 = vpop.eup %17287 }
 0x653   : > { %v17290_v34 = vpop.eup %17289 }
 0x655   : > { %6121 = vadd.xlane.f32.xlu0 %v6120_v57  ;;  %v21720_v53 = vpop.xlane.xlu1 %5527 }
 0x656   : > { %24929 = vst [vmem:[#allocation111_spill] sm:$0xff] %v21720_v53  ;;  %v17292_v53 = vpop.eup %17291 }
 0x657   : > { %16813 = vrot.lane.b32.xlu1 %v24930_v23, %s17775_s25 }
 0x659   : > { %v21726_v17 = vpop.xlane.xlu1 %6091 }
 0x65d   : > { %v16794_v59 = vpop.permute.xlu1 %16793 }
 0x65e   : > { %v16796_v52 = vunpack.i.h.bf16 %v16794_v59  ;;  %v16795_v27 = vunpack.i.l.bf16 %v16794_v59  ;;  %v6483_v59 = vmul.f32 %v17288_v33, %v21088_v32 }
 0x660   : > { %v21730_v20 = vpop.xlane.xlu0 %6094  ;;  %v16142_v57 = vpack.c.bf16 %v16796_v52, %v16795_v27  ;;  %v6484_v27 = vmul.f32 %v17290_v34, %v21334_v63  ;;  %v1676_v34 = vld [vmem:[%s24157_s1 + $0x3e0] sm:$0xff] }
 0x662   : > { %16143 = vmatprep.subr.bf16.mxu1 %v16142_v57 }
 0x663   : > { %v21732_v54 = vpop.f32.mrb[72].mxu1  ;;  %16145 = vmatpush3.bf16.msra.mxu1 %v16142_v57  ;;  %v6489_v57 = vmul.f32 %v17292_v53, %v21182_v50  ;;  %v24939_v53 = vld [vmem:[#allocation19_spill] sm:$0xff] }
 0x664   : > { %24931 = vst [vmem:[#allocation65_spill] sm:$0xff] %v21732_v54  ;;  %v21734_v23 = vpop.xlane.xlu0 %6106  ;;  %v21736_v14 = vpop.f32.mrb[73].mxu1 }
 0x665   : > { %24932 = vst [vmem:[#allocation165_spill] sm:$0xff] %v21736_v14 }
 0x666   : > { %v21739_v5 = vpop.f32.mrb[92].mxu0  ;;  %15019 = vmatmul.mubr.msk.f32.vlgmr.msra.gmra.mrb[84].mxu1 %vm502_vm0, %v6482_v51  ;;  %v24936_v51 = vld [vmem:[#allocation13_spill] sm:$0xff] }
 0x667   : > { %24933 = vst [vmem:[#allocation166_spill] sm:$0xff] %v21739_v5  ;;  %v21742_v45 = vpop.f32.mrb[93].mxu0  ;;  %15021 = vmatprep.mubr.msk.f32.mxu1 %vm502_vm0, %v6483_v59  ;;  %v5618_v54 = vsub.f32 %v24936_v51, %v21091_v31  ;;  %v21770_v31 = vadd.f32 %v21055_v29, %v1676_v34 }
 0x668   : > { %24934 = vst [vmem:[#allocation167_spill] sm:$0xff] %v21742_v45  ;;  %v21746_v52 = vpop.xlane.xlu0 %6097 }
 0x669   : > { %v5811_v50 = vmul.f32 1.442695, %v5618_v54  ;;  %24942 = vst [vmem:[#allocation169_spill] sm:$0xff] %v21770_v31  ;;  %v1677_v54 = vld [vmem:[%s24157_s1 + $0x3e8] sm:$0xff] }
 0x66a   : > { %15022 = vmatmul.mubr.msk.f32.gmra.mrb[86].mxu1 %vm502_vm0, %v6484_v27  ;;  %v5615_v27 = vsub.f32 %v24939_v53, %v21218_v36  ;;  %v21778_v51 = vadd.f32 %v21051_v13, %v1677_v54  ;;  %v5541_v36 = vsel %vm502_vm0, %v21770_v31, -inf }
 0x66b   : > { %16818 = vrot.lane.b32.xlu0 %v24935_v1, %s17775_s25  ;;  %15046 = vmatprep.mubr.msk.f32.mxu1 %vm502_vm0, %v6489_v57  ;;  %17293 = vpow2.f32 %v5811_v50  ;;  %v24945_v50 = vld [vmem:[#allocation31_spill] sm:$0xff] }
 0x66c   : > { %v16799_v32 = vpop.permute.xlu0 %16798  ;;  %v5616_v53 = vsub.f32 %v24945_v50, %v21186_v42  ;;  %v5544_v29 = vsel %vm502_vm0, %v21778_v51, -inf }
 0x66d   : > { %v16801_v61 = vunpack.i.h.bf16 %v16799_v32  ;;  %v16800_v33 = vunpack.i.l.bf16 %v16799_v32  ;;  %v24943_v32 = vld [vmem:[#allocation114_spill] sm:$0xff] }
 0x66e   : > { %24944 = vst [vmem:[#allocation114_spill] sm:$0xff] %v21778_v51 }
 0x66f   : > { %v16146_v59 = vpack.c.bf16 %v16801_v61, %v16800_v33  ;;  %v5619_v61 = vsub.f32 %v24943_v32, %v21152_v49  ;;  %v5805_v33 = vmul.f32 1.442695, %v5615_v27  ;;  %v5807_v49 = vmul.f32 1.442695, %v5616_v53 }
 0x670   : > { %v21756_v14 = vpop.f32.mrb[94].mxu0 }
 0x671   : > { %24937 = vst [vmem:[#allocation73_spill] sm:$0xff] %v21756_v14  ;;  %16147 = vmatprep.subr.bf16.mxu0 %v16146_v59  ;;  %v21758_v63 = vpop.f32.mrb[95].mxu0  ;;  %17295 = vpow2.f32 %v5805_v33 }
 0x672   : > { %24938 = vst [vmem:[#allocation13_spill] sm:$0xff] %v21758_v63  ;;  %16149 = vmatpush3.bf16.msra.mxu0 %v16146_v59  ;;  %v5813_v59 = vmul.f32 1.442695, %v5619_v61 }
 0x673   : > { %v21765_v57 = vpop.f32.mrb[74].mxu1 }
 0x674   : > { %24940 = vst [vmem:[#allocation19_spill] sm:$0xff] %v21765_v57  ;;  %v21767_v1 = vpop.f32.mrb[75].mxu1  ;;  %17297 = vpow2.f32 %v5813_v59 }
 0x675   : > { %24941 = vst [vmem:[#allocation168_spill] sm:$0xff] %v21767_v1  ;;  %v21786_v34 = vpop.eup %17293  ;;  %17299 = vpow2.f32 %v5807_v49 }
 0x676   : > { %v6132_v54 = vsel %vm502_vm0, %v21786_v34, 0.0  ;;  %17301 = vrcp.f32 %v21566_v8  ;;  %v24962_v8 = vld [vmem:[#allocation25_spill] sm:$0xff] }
 0x677   : > { %17303 = vrcp.f32 %v21591_v4 }
 0x678   : > { %17305 = vrcp.f32 %v21585_v16 }
 0x679   : > { %17307 = vrcp.f32 %v21619_v2  ;;  %v1678_v2 = vld [vmem:[%s24157_s1 + $0x3f0] sm:$0xff] }
 0x67b   : > { %5542 = vmax.xlane.f32.xlu1 %v5541_v36  ;;  %v21796_v32 = vpop.eup %17295 }
 0x67c   : > { %v6123_v33 = vsel %vm502_vm0, %v21796_v32, 0.0 }
 0x67e   : > { %v21802_v36 = vpop.eup %17297 }
 0x67f   : > { %5545 = vmax.xlane.f32.xlu1 %v5544_v29  ;;  %v6135_v59 = vsel %vm502_vm0, %v21802_v36, 0.0  ;;  %v21806_v50 = vpop.eup %17299 }
 0x680   : > { %v21788_v27 = vpop.f32.mrb[76].mxu1  ;;  %v17302_v63 = vpop.eup %17301 }
 0x681   : > { %24946 = vst [vmem:[#allocation31_spill] sm:$0xff] %v21788_v27  ;;  %v21790_v13 = vpop.f32.mrb[77].mxu1  ;;  %v24956_v27 = vld [vmem:[#allocation83_spill] sm:$0xff]  ;;  %v17304_v4 = vpop.eup %17303  ;;  %v6486_v5 = vmul.f32 %v17302_v63, %v21104_v24 }
 0x682   : > { %24947 = vst [vmem:[#allocation170_spill] sm:$0xff] %v21790_v13  ;;  %v17306_v16 = vpop.eup %17305  ;;  %v24967_v24 = vld [vmem:[#allocation163_spill] sm:$0xff] }
 0x683   : > { %6133 = vadd.xlane.f32.xlu1 %v6132_v54  ;;  %v6488_v63 = vmul.f32 %v17306_v16, %v24967_v24 }
 0x684   : > { %v21794_v42 = vpop.f32.mrb[78].mxu1 }
 0x685   : > { %24948 = vst [vmem:[#allocation171_spill] sm:$0xff] %v21794_v42  ;;  %v21798_v61 = vpop.f32.mrb[79].mxu1 }
 0x686   : > { %24949 = vst [vmem:[#allocation172_spill] sm:$0xff] %v21798_v61  ;;  %v6126_v61 = vsel %vm502_vm0, %v21806_v50, 0.0 }
 0x68a   : > { %6124 = vadd.xlane.f32.xlu0 %v6123_v33 }
 0x68e   : > { %6136 = vadd.xlane.f32.xlu0 %v6135_v59  ;;  %v21808_v53 = vpop.xlane.xlu1 %5530 }
 0x68f   : > { %24950 = vst [vmem:[#allocation173_spill] sm:$0xff] %v21808_v53  ;;  %v21810_v29 = vpop.f32.mrb[80].mxu1  ;;  %v17308_v53 = vpop.eup %17307 }
 0x690   : > { %24951 = vst [vmem:[#allocation174_spill] sm:$0xff] %v21810_v29  ;;  %v21812_v49 = vpop.f32.mrb[96].mxu0  ;;  %v21814_v54 = vpop.f32.mrb[81].mxu1 }
 0x691   : > { %24952 = vst [vmem:[#allocation175_spill] sm:$0xff] %v21812_v49  ;;  %24953 = vst [vmem:[#allocation176_spill] sm:$0xff] %v21814_v54  ;;  %v21816_v42 = vpop.f32.mrb[97].mxu0 }
 0x692   : > { %24954 = vst [vmem:[#allocation177_spill] sm:$0xff] %v21816_v42  ;;  %6127 = vadd.xlane.f32.xlu0 %v6126_v61  ;;  %v21820_v33 = vpop.xlane.xlu1 %5533 }
 0x693   : > { %24955 = vst [vmem:[#allocation178_spill] sm:$0xff] %v21820_v33 }
 0x694   : > { %16823 = vrot.lane.b32.xlu1 %v24956_v27, %s17775_s25 }
 0x696   : > { %v21824_v59 = vpop.xlane.xlu1 %6109 }
 0x69a   : > { %v16804_v13 = vpop.permute.xlu1 %16803 }
 0x69b   : > { %v16806_v57 = vunpack.i.h.bf16 %v16804_v13  ;;  %v16805_v29 = vunpack.i.l.bf16 %v16804_v13 }
 0x69d   : > { %v21826_v1 = vpop.xlane.xlu0 %6100  ;;  %v16154_v49 = vpack.c.bf16 %v16806_v57, %v16805_v29  ;;  %v24961_v57 = vld [vmem:[#allocation75_spill] sm:$0xff] }
 0x69f   : > { %16155 = vmatprep.subr.bf16.mxu1 %v16154_v49  ;;  %v21828_v54 = vpop.f32.mrb[98].mxu0 }
 0x6a0   : > { %24957 = vst [vmem:[#allocation83_spill] sm:$0xff] %v21828_v54  ;;  %16157 = vmatpush3.bf16.msra.mxu1 %v16154_v49  ;;  %v21832_v61 = vpop.f32.mrb[99].mxu0 }
 0x6a1   : > { %v21830_v42 = vpop.xlane.xlu0 %6112  ;;  %24958 = vst [vmem:[#allocation179_spill] sm:$0xff] %v21832_v61  ;;  %v5620_v61 = vsub.f32 %v24962_v8, %v21133_v22  ;;  %v24965_v22 = vld [vmem:[#allocation160_spill] sm:$0xff]  ;;  %v24969_v8 = vld [vmem:[#allocation103_spill] sm:$0xff] }
 0x6a3   : > { %v21835_v14 = vpop.f32.mrb[82].mxu1 }
 0x6a4   : > { %24959 = vst [vmem:[#allocation180_spill] sm:$0xff] %v21835_v14  ;;  %v21838_v27 = vpop.f32.mrb[83].mxu1 }
 0x6a5   : > { %24960 = vst [vmem:[#allocation181_spill] sm:$0xff] %v21838_v27  ;;  %v21840_v13 = vpop.xlane.xlu0 %6103  ;;  %v5815_v27 = vmul.f32 1.442695, %v5620_v61  ;;  %v24968_v61 = vld [vmem:[#allocation90_spill] sm:$0xff] }
 0x6a7   : > { %17309 = vpow2.f32 %v5815_v27 }
 0x6a8   : > { %16828 = vrot.lane.b32.xlu0 %v24961_v57, %s17775_s25  ;;  %v24963_v57 = vld [vmem:[#allocation14_spill] sm:$0xff] }
 0x6a9   : > { %v16809_v29 = vpop.permute.xlu0 %16808  ;;  %v5625_v45 = vsub.f32 %v24963_v57, %v21308_v60  ;;  %v5622_v60 = vsub.f32 %v24968_v61, %v21275_v11 }
 0x6aa   : > { %v16811_v49 = vunpack.i.h.bf16 %v16809_v29  ;;  %v16810_v54 = vunpack.i.l.bf16 %v16809_v29  ;;  %v24964_v29 = vld [vmem:[#allocation40_spill] sm:$0xff] }
 0x6ab   : > { %v6487_v31 = vmul.f32 %v17304_v4, %v24964_v29  ;;  %v6493_v4 = vmul.f32 %v17308_v53, %v24969_v8  ;;  %v24978_v8 = vld [vmem:[#allocation85_spill] sm:$0xff] }
 0x6ac   : > { %v16150_v14 = vpack.c.bf16 %v16811_v49, %v16810_v54  ;;  %v1679_v54 = vld [vmem:[%s24157_s1 + $0x3f8] sm:$0xff]  ;;  %v5825_v49 = vmul.f32 1.442695, %v5625_v45 }
 0x6ae   : > { %16151 = vmatprep.subr.bf16.mxu0 %v16150_v14  ;;  %17311 = vpow2.f32 %v5825_v49 }
 0x6af   : > { %16153 = vmatpush3.bf16.msra.mxu0 %v16150_v14  ;;  %v21858_v14 = vadd.f32 %v24965_v22, %v1678_v2  ;;  %v5819_v2 = vmul.f32 1.442695, %v5622_v60 }
 0x6b1   : > { %24966 = vst [vmem:[#allocation75_spill] sm:$0xff] %v21858_v14  ;;  %v5547_v16 = vsel %vm502_vm0, %v21858_v14, -inf  ;;  %v21880_v45 = vpop.eup %17309  ;;  %17313 = vpow2.f32 %v5819_v2 }
 0x6b2   : > { %15033 = vmatmul.mubr.msk.f32.vlgmr.msra.gmra.mrb[108].mxu0 %vm502_vm0, %v6486_v5  ;;  %v24970_v5 = vld [vmem:[#allocation22_spill] sm:$0xff]  ;;  %v6138_v22 = vsel %vm502_vm0, %v21880_v45, 0.0  ;;  %17315 = vrcp.f32 %v21698_v21 }
 0x6b3   : > { %15035 = vmatprep.mubr.msk.f32.mxu0 %vm502_vm0, %v6487_v31  ;;  %v21870_v31 = vadd.f32 %v24970_v5, %v1679_v54  ;;  %17317 = vrcp.f32 %v21605_v18 }
 0x6b4   : > { %17319 = vrcp.f32 %v21704_v41 }
 0x6b5   : > { %24971 = vst [vmem:[#allocation25_spill] sm:$0xff] %v21870_v31  ;;  %v5550_v11 = vsel %vm502_vm0, %v21870_v31, -inf  ;;  %17321 = vrcp.f32 %v21625_v3 }
 0x6b6   : > { %15036 = vmatmul.mubr.msk.f32.gmra.mrb[110].mxu0 %vm502_vm0, %v6488_v63  ;;  %v21872_v27 = vpop.f32.mrb[100].mxu0 }
 0x6b7   : > { %15060 = vmatprep.mubr.msk.f32.mxu0 %vm502_vm0, %v6493_v4  ;;  %24972 = vst [vmem:[#allocation14_spill] sm:$0xff] %v21872_v27  ;;  %v21876_v57 = vpop.f32.mrb[101].mxu0 }
 0x6b8   : > { %24973 = vst [vmem:[#allocation40_spill] sm:$0xff] %v21876_v57  ;;  %5548 = vmax.xlane.f32.xlu1 %v5547_v16  ;;  %v21888_v24 = vpop.eup %17311 }
 0x6b9   : > { %v6153_v63 = vsel %vm502_vm0, %v21888_v24, 0.0 }
 0x6bb   : > { %v21892_v54 = vpop.eup %17313 }
 0x6bc   : > { %5551 = vmax.xlane.f32.xlu1 %v5550_v11  ;;  %v6144_v61 = vsel %vm502_vm0, %v21892_v54, 0.0 }
 0x6be   : > { %v21882_v53 = vpop.f32.mrb[102].mxu0 }
 0x6bf   : > { %24974 = vst [vmem:[#allocation160_spill] sm:$0xff] %v21882_v53  ;;  %v21884_v29 = vpop.f32.mrb[103].mxu0  ;;  %v24979_v53 = vld [vmem:[#allocation42_spill] sm:$0xff] }
 0x6c0   : > { %24975 = vst [vmem:[#allocation163_spill] sm:$0xff] %v21884_v29  ;;  %6139 = vadd.xlane.f32.xlu1 %v6138_v22  ;;  %v5621_v41 = vsub.f32 %v24979_v53, %v21295_v9  ;;  %v24980_v29 = vld [vmem:[#allocation126_spill] sm:$0xff] }
 0x6c2   : > { %v5817_v57 = vmul.f32 1.442695, %v5621_v41 }
 0x6c4   : > { %17323 = vpow2.f32 %v5817_v57 }
 0x6c7   : > { %6154 = vadd.xlane.f32.xlu0 %v6153_v63  ;;  %v17316_v63 = vpop.eup %17315 }
 0x6c8   : > { %v6490_v18 = vmul.f32 %v17316_v63, %v21400_v48  ;;  %v24983_v48 = vld [vmem:[#allocation56_spill] sm:$0xff] }
 0x6cb   : > { %6145 = vadd.xlane.f32.xlu0 %v6144_v61  ;;  %v21896_v60 = vpop.xlane.xlu1 %5536  ;;  %v17318_v61 = vpop.eup %17317 }
 0x6cc   : > { %24976 = vst [vmem:[#allocation90_spill] sm:$0xff] %v21896_v60  ;;  %v6491_v3 = vmul.f32 %v17318_v61, %v24980_v29 }
 0x6cf   : > { %v21898_v49 = vpop.xlane.xlu1 %5539 }
 0x6d0   : > { %24977 = vst [vmem:[#allocation103_spill] sm:$0xff] %v21898_v49 }
 0x6d1   : > { %16833 = vrot.lane.b32.xlu1 %v24978_v8, %s17775_s25  ;;  %v17320_v8 = vpop.eup %17319 }
 0x6d2   : > { %v17322_v27 = vpop.eup %17321 }
 0x6d3   : > { %v21904_v4 = vpop.xlane.xlu1 %6115  ;;  %v6497_v9 = vmul.f32 %v17322_v27, %v21236_v25  ;;  %v21932_v27 = vpop.eup %17323 }
 0x6d7   : > { %v16814_v5 = vpop.permute.xlu1 %16813 }
 0x6d8   : > { %v16816_v16 = vunpack.i.h.bf16 %v16814_v5  ;;  %v16815_v2 = vunpack.i.l.bf16 %v16814_v5  ;;  %v24981_v5 = vld [vmem:[#allocation20_spill] sm:$0xff] }
 0x6da   : > { %v21908_v11 = vpop.xlane.xlu0 %6118  ;;  %v16158_v22 = vpack.c.bf16 %v16816_v16, %v16815_v2  ;;  %v6492_v2 = vmul.f32 %v17320_v8, %v21416_v46  ;;  %v24985_v46 = vld [vmem:[#allocation44_spill] sm:$0xff] }
 0x6db   : > { %v5624_v8 = vsub.f32 %v24985_v46, %v21314_v44 }
 0x6dc   : > { %16159 = vmatprep.subr.bf16.mxu1 %v16158_v22 }
 0x6dd   : > { %16161 = vmatpush3.bf16.msra.mxu1 %v16158_v22  ;;  %v24982_v22 = vld [vmem:[#allocation60_spill] sm:$0xff]  ;;  %v5823_v41 = vmul.f32 1.442695, %v5624_v8 }
 0x6de   : > { %v21910_v21 = vpop.xlane.xlu0 %6130  ;;  %v5626_v63 = vsub.f32 %v24983_v48, %v24982_v22 }
 0x6e0   : > { %15047 = vmatmul.mubr.msk.f32.vlgmr.msra.gmra.mrb[88].mxu1 %vm502_vm0, %v6490_v18  ;;  %v5827_v18 = vmul.f32 1.442695, %v5626_v63 }
 0x6e1   : > { %16838 = vrot.lane.b32.xlu0 %v24981_v5, %s17775_s25  ;;  %15049 = vmatprep.mubr.msk.f32.mxu1 %vm502_vm0, %v6491_v3  ;;  %v24984_v5 = vld [vmem:[#allocation95_spill] sm:$0xff] }
 0x6e2   : > { %v21920_v16 = vpop.xlane.xlu0 %6121  ;;  %v5627_v14 = vsub.f32 %v24984_v5, %v21343_v19  ;;  %17325 = vpow2.f32 %v5827_v18 }
 0x6e4   : > { %15050 = vmatmul.mubr.msk.f32.gmra.mrb[90].mxu1 %vm502_vm0, %v6492_v2  ;;  %v5829_v25 = vmul.f32 1.442695, %v5627_v14  ;;  %v6141_v2 = vsel %vm502_vm0, %v21932_v27, 0.0 }
 0x6e5   : > { %15074 = vmatprep.mubr.msk.f32.mxu1 %vm502_vm0, %v6497_v9  ;;  %v24987_v9 = vld [vmem:[#allocation99_spill] sm:$0xff] }
 0x6e6   : > { %v16819_v53 = vpop.permute.xlu0 %16818  ;;  %17327 = vpow2.f32 %v5829_v25 }
 0x6e7   : > { %v16821_v29 = vunpack.i.h.bf16 %v16819_v53  ;;  %v16820_v61 = vunpack.i.l.bf16 %v16819_v53  ;;  %17329 = vpow2.f32 %v5823_v41 }
 0x6e8   : > { %17331 = vrcp.f32 %v21613_v39  ;;  %v24997_v39 = vld [vmem:[#allocation24_spill] sm:$0xff] }
 0x6e9   : > { %v16162_v3 = vpack.c.bf16 %v16821_v29, %v16820_v61  ;;  %17333 = vrcp.f32 %v21629_v47 }
 0x6eb   : > { %16163 = vmatprep.subr.bf16.mxu0 %v16162_v3 }
 0x6ec   : > { %16165 = vmatpush3.bf16.msra.mxu0 %v16162_v3  ;;  %v21936_v22 = vpop.eup %17325 }
 0x6ed   : > { %v6156_v19 = vsel %vm502_vm0, %v21936_v22, 0.0 }
 0x6f0   : > { %v21940_v57 = vpop.eup %17327 }
 0x6f1   : > { %v6159_v44 = vsel %vm502_vm0, %v21940_v57, 0.0  ;;  %v21944_v14 = vpop.eup %17329 }
 0x6f2   : > { %v6150_v48 = vsel %vm502_vm0, %v21944_v14, 0.0 }
 0x6f5   : > { %6142 = vadd.xlane.f32.xlu1 %v6141_v2  ;;  %v24993_v2 = vld [vmem:[#allocation104_spill] sm:$0xff] }
 0x6f9   : > { %6157 = vadd.xlane.f32.xlu1 %v6156_v19  ;;  %v5623_v19 = vsub.f32 %v24993_v2, %v21345_v28 }
 0x700   : > { %6160 = vadd.xlane.f32.xlu0 %v6159_v44 }
 0x704   : > { %6151 = vadd.xlane.f32.xlu0 %v6150_v48  ;;  %v24994_v48 = vld [vmem:[#allocation92_spill] sm:$0xff] }
 0x708   : > { %v21948_v63 = vpop.xlane.xlu1 %5542 }
 0x709   : > { %24986 = vst [vmem:[#allocation22_spill] sm:$0xff] %v21948_v63 }
 0x70a   : > { %16843 = vrot.lane.b32.xlu1 %v24987_v9, %s17775_s25 }
 0x70b   : > { %v21952_v53 = vpop.f32.mrb[104].mxu0 }
 0x70c   : > { %24988 = vst [vmem:[#allocation85_spill] sm:$0xff] %v21952_v53  ;;  %v21954_v29 = vpop.f32.mrb[105].mxu0  ;;  %v21956_v61 = vpop.xlane.xlu1 %5545 }
 0x70d   : > { %24989 = vst [vmem:[#allocation42_spill] sm:$0xff] %v21954_v29  ;;  %24990 = vst [vmem:[#allocation126_spill] sm:$0xff] %v21956_v61 }
 0x70f   : > { %v21958_v18 = vpop.f32.mrb[106].mxu0 }
 0x710   : > { %24991 = vst [vmem:[#allocation20_spill] sm:$0xff] %v21958_v18  ;;  %v21960_v3 = vpop.f32.mrb[107].mxu0  ;;  %v21962_v5 = vpop.xlane.xlu1 %6133  ;;  %v5821_v18 = vmul.f32 1.442695, %v5623_v19 }
 0x711   : > { %24992 = vst [vmem:[#allocation60_spill] sm:$0xff] %v21960_v3  ;;  %v24995_v3 = vld [vmem:[#allocation70_spill] sm:$0xff] }
 0x712   : > { %v5628_v53 = vsub.f32 %v24995_v3, %v21324_v43  ;;  %17335 = vpow2.f32 %v5821_v18  ;;  %v17332_v3 = vpop.eup %17331 }
 0x713   : > { %17337 = vrcp.f32 %v21639_v7  ;;  %v17334_v63 = vpop.eup %17333  ;;  %v24999_v7 = vld [vmem:[#allocation82_spill] sm:$0xff] }
 0x714   : > { %v16824_v46 = vpop.permute.xlu1 %16823  ;;  %v5831_v28 = vmul.f32 1.442695, %v5628_v53  ;;  %17339 = vrcp.f32 %v21730_v20  ;;  %v6494_v20 = vmul.f32 %v17332_v3, %v24999_v7 }
 0x715   : > { %v16826_v8 = vunpack.i.h.bf16 %v16824_v46  ;;  %v16825_v25 = vunpack.i.l.bf16 %v16824_v46 }
 0x716   : > { %17341 = vpow2.f32 %v5831_v28 }
 0x717   : > { %v21964_v41 = vpop.xlane.xlu0 %6124  ;;  %v16170_v44 = vpack.c.bf16 %v16826_v8, %v16825_v25  ;;  %v24996_v8 = vld [vmem:[#allocation129_spill] sm:$0xff] }
 0x718   : > { %v5633_v25 = vsub.f32 %v24996_v8, %v21462_v56  ;;  %v25000_v56 = vld [vmem:[#allocation46_spill] sm:$0xff] }
 0x719   : > { %16171 = vmatprep.subr.bf16.mxu1 %v16170_v44  ;;  %v6495_v8 = vmul.f32 %v17334_v63, %v25000_v56 }
 0x71a   : > { %16848 = vrot.lane.b32.xlu0 %v24994_v48, %s17775_s25  ;;  %16173 = vmatpush3.bf16.msra.mxu1 %v16170_v44  ;;  %v24998_v48 = vld [vmem:[#allocation68_spill] sm:$0xff]  ;;  %v5841_v29 = vmul.f32 1.442695, %v5633_v25  ;;  %v25001_v25 = vld [vmem:[#allocation15_spill] sm:$0xff] }
 0x71b   : > { %v21970_v9 = vpop.xlane.xlu0 %6136  ;;  %v5630_v47 = vsub.f32 %v24998_v48, %v24997_v39 }
 0x71c   : > { %v21984_v53 = vpop.eup %17335  ;;  %17343 = vpow2.f32 %v5841_v29 }
 0x71d   : > { %v17338_v18 = vpop.eup %17337  ;;  %v5835_v31 = vmul.f32 1.442695, %v5630_v47  ;;  %v6147_v28 = vsel %vm502_vm0, %v21984_v53, 0.0 }
 0x71f   : > { %v21976_v46 = vpop.xlane.xlu0 %6127  ;;  %17345 = vpow2.f32 %v5835_v31 }
 0x720   : > { %17347 = vrcp.f32 %v21710_v26 }
 0x721   : > { %17349 = vrcp.f32 %v21633_v0 }
 0x722   : > { %17351 = vrcp.f32 %v21726_v17 }
 0x723   : > { %v16829_v2 = vpop.permute.xlu0 %16828  ;;  %17353 = vrcp.f32 %v21734_v23 }
 0x724   : > { %v16831_v19 = vunpack.i.h.bf16 %v16829_v2  ;;  %v16830_v44 = vunpack.i.l.bf16 %v16829_v2  ;;  %v17340_v2 = vpop.eup %17339 }
 0x726   : > { %v16166_v43 = vpack.c.bf16 %v16831_v19, %v16830_v44  ;;  %v6496_v19 = vmul.f32 %v17338_v18, %v25001_v25  ;;  %v21993_v44 = vpop.eup %17341 }
 0x727   : > { %v6162_v63 = vsel %vm502_vm0, %v21993_v44, 0.0  ;;  %v22000_v29 = vpop.eup %17343 }
 0x728   : > { %16167 = vmatprep.subr.bf16.mxu0 %v16166_v43  ;;  %v6177_v3 = vsel %vm502_vm0, %v22000_v29, 0.0 }
 0x729   : > { %16169 = vmatpush3.bf16.msra.mxu0 %v16166_v43  ;;  %v6501_v43 = vmul.f32 %v17340_v2, %v21485_v38  ;;  %v22004_v39 = vpop.eup %17345  ;;  %v25009_v2 = vld [vmem:[#allocation84_spill] sm:$0xff] }
 0x72a   : > { %v6168_v38 = vsel %vm502_vm0, %v22004_v39, 0.0 }
 0x72c   : > { %15061 = vmatmul.mubr.msk.f32.vlgmr.msra.gmra.mrb[112].mxu0 %vm502_vm0, %v6494_v20  ;;  %v25006_v20 = vld [vmem:[#allocation101_spill] sm:$0xff] }
 0x72d   : > { %15063 = vmatprep.mubr.msk.f32.mxu0 %vm502_vm0, %v6495_v8 }
 0x72e   : > { %6148 = vadd.xlane.f32.xlu1 %v6147_v28  ;;  %v5629_v28 = vsub.f32 %v25009_v2, %v21370_v62 }
 0x730   : > { %15064 = vmatmul.mubr.msk.f32.gmra.mrb[114].mxu0 %vm502_vm0, %v6496_v19  ;;  %v5833_v0 = vmul.f32 1.442695, %v5629_v28  ;;  %v25013_v28 = vld [vmem:[#allocation134_spill] sm:$0xff] }
 0x731   : > { %15088 = vmatprep.mubr.msk.f32.mxu0 %vm502_vm0, %v6501_v43 }
 0x732   : > { %6163 = vadd.xlane.f32.xlu1 %v6162_v63  ;;  %v25010_v63 = vld [vmem:[#allocation110_spill] sm:$0xff]  ;;  %17355 = vpow2.f32 %v5833_v0  ;;  %v25016_v0 = vld [vmem:[#allocation29_spill] sm:$0xff] }
 0x739   : > { %6178 = vadd.xlane.f32.xlu0 %v6177_v3  ;;  %v22006_v31 = vpop.f32.mrb[84].mxu1 }
 0x73a   : > { %25002 = vst [vmem:[#allocation56_spill] sm:$0xff] %v22006_v31  ;;  %v22008_v48 = vpop.f32.mrb[85].mxu1 }
 0x73b   : > { %25003 = vst [vmem:[#allocation95_spill] sm:$0xff] %v22008_v48  ;;  %v25026_v48 = vld [vmem:[#allocation131_spill] sm:$0xff] }
 0x73d   : > { %6169 = vadd.xlane.f32.xlu0 %v6168_v38  ;;  %v22012_v47 = vpop.f32.mrb[86].mxu1  ;;  %v17348_v38 = vpop.eup %17347 }
 0x73e   : > { %25004 = vst [vmem:[#allocation44_spill] sm:$0xff] %v22012_v47  ;;  %v22014_v7 = vpop.f32.mrb[87].mxu1  ;;  %v17350_v17 = vpop.eup %17349  ;;  %v6498_v62 = vmul.f32 %v17348_v38, %v21429_v15  ;;  %v25014_v15 = vld [vmem:[#allocation30_spill] sm:$0xff] }
 0x73f   : > { %25005 = vst [vmem:[#allocation99_spill] sm:$0xff] %v22014_v7  ;;  %v17352_v2 = vpop.eup %17351  ;;  %v25012_v7 = vld [vmem:[#allocation117_spill] sm:$0xff] }
 0x740   : > { %v17354_v31 = vpop.eup %17353 }
 0x741   : > { %v6505_v38 = vmul.f32 %v17354_v31, %v25014_v15 }
 0x743   : > { %16853 = vrot.lane.b32.xlu1 %v25006_v20, %s17775_s25  ;;  %v25011_v20 = vld [vmem:[#allocation36_spill] sm:$0xff] }
 0x744   : > { %v5634_v47 = vsub.f32 %v25011_v20, %v21418_v10  ;;  %v6500_v20 = vmul.f32 %v17352_v2, %v21466_v55 }
 0x745   : > { %v22018_v18 = vpop.xlane.xlu1 %5548 }
 0x746   : > { %25007 = vst [vmem:[#allocation104_spill] sm:$0xff] %v22018_v18 }
 0x749   : > { %v22020_v56 = vpop.xlane.xlu1 %5551 }
 0x74a   : > { %25008 = vst [vmem:[#allocation92_spill] sm:$0xff] %v22020_v56 }
 0x74d   : > { %v22024_v8 = vpop.xlane.xlu1 %6139 }
 0x751   : > { %v16834_v25 = vpop.permute.xlu1 %16833 }
 0x752   : > { %v16836_v19 = vunpack.i.h.bf16 %v16834_v25  ;;  %v16835_v43 = vunpack.i.l.bf16 %v16834_v25  ;;  %v5843_v25 = vmul.f32 1.442695, %v5634_v47 }
 0x753   : > { %16858 = vrot.lane.b32.xlu0 %v25010_v63, %s17775_s25  ;;  %v6499_v63 = vmul.f32 %v17350_v17, %v25012_v7  ;;  %v25015_v7 = vld [vmem:[#allocation48_spill] sm:$0xff] }
 0x754   : > { %v22032_v3 = vpop.xlane.xlu0 %6154  ;;  %v16174_v26 = vpack.c.bf16 %v16836_v19, %v16835_v43  ;;  %v5635_v19 = vsub.f32 %v25013_v28, %v21478_v12  ;;  %17357 = vpow2.f32 %v5843_v25  ;;  %v5632_v17 = vsub.f32 %v25016_v0, %v25015_v7  ;;  %v22050_v12 = vpop.eup %17355  ;;  %v25021_v7 = vld [vmem:[#allocation7_spill] sm:$0xff]  ;;  %v25022_v0 = vld [vmem:[#allocation38_spill] sm:$0xff] }
 0x755   : > { %v6165_v55 = vsel %vm502_vm0, %v22050_v12, 0.0 }
 0x756   : > { %16175 = vmatprep.subr.bf16.mxu1 %v16174_v26 }
 0x757   : > { %16177 = vmatpush3.bf16.msra.mxu1 %v16174_v26 }
 0x758   : > { %v22036_v23 = vpop.xlane.xlu0 %6145 }
 0x75a   : > { %15075 = vmatmul.mubr.msk.f32.vlgmr.msra.gmra.mrb[92].mxu1 %vm502_vm0, %v6498_v62  ;;  %v5845_v62 = vmul.f32 1.442695, %v5635_v19 }
 0x75b   : > { %15077 = vmatprep.mubr.msk.f32.mxu1 %vm502_vm0, %v6499_v63  ;;  %v5839_v63 = vmul.f32 1.442695, %v5632_v17  ;;  %v5631_v17 = vsub.f32 %v25022_v0, %v25021_v7 }
 0x75c   : > { %v16839_v10 = vpop.permute.xlu0 %16838  ;;  %17359 = vpow2.f32 %v5845_v62 }
 0x75d   : > { %v16841_v43 = vunpack.i.h.bf16 %v16839_v10  ;;  %v16840_v26 = vunpack.i.l.bf16 %v16839_v10  ;;  %17361 = vpow2.f32 %v5839_v63 }
 0x75e   : > { %15078 = vmatmul.mubr.msk.f32.gmra.mrb[94].mxu1 %vm502_vm0, %v6500_v20  ;;  %v22054_v2 = vpop.eup %17357  ;;  %17363 = vrcp.f32 %v21746_v52 }
 0x75f   : > { %v16178_v47 = vpack.c.bf16 %v16841_v43, %v16840_v26  ;;  %15102 = vmatprep.mubr.msk.f32.mxu1 %vm502_vm0, %v6505_v38  ;;  %v6180_v31 = vsel %vm502_vm0, %v22054_v2, 0.0  ;;  %v25017_v43 = vld [vmem:[#allocation50_spill] sm:$0xff]  ;;  %17365 = vrcp.f32 %v21826_v1 }
 0x760   : > { %v25029_v1 = vld [vmem:[#allocation66_spill] sm:$0xff] }
 0x761   : > { %16179 = vmatprep.subr.bf16.mxu0 %v16178_v47 }
 0x762   : > { %16181 = vmatpush3.bf16.msra.mxu0 %v16178_v47 }
 0x766   : > { %v22058_v25 = vpop.eup %17359 }
 0x767   : > { %6166 = vadd.xlane.f32.xlu1 %v6165_v55  ;;  %v6183_v28 = vsel %vm502_vm0, %v22058_v25, 0.0  ;;  %v22062_v19 = vpop.eup %17361 }
 0x768   : > { %v6174_v10 = vsel %vm502_vm0, %v22062_v19, 0.0 }
 0x76b   : > { %6181 = vadd.xlane.f32.xlu1 %v6180_v31 }
 0x772   : > { %6184 = vadd.xlane.f32.xlu0 %v6183_v28  ;;  %v25024_v28 = vld [vmem:[#allocation115_spill] sm:$0xff] }
 0x776   : > { %6175 = vadd.xlane.f32.xlu0 %v6174_v10 }
 0x77c   : > { %16863 = vrot.lane.b32.xlu1 %v25017_v43, %s17775_s25  ;;  %v5837_v43 = vmul.f32 1.442695, %v5631_v17  ;;  %v25028_v17 = vld [vmem:[#allocation151_spill] sm:$0xff] }
 0x77e   : > { %17367 = vpow2.f32 %v5837_v43 }
 0x77f   : > { %17369 = vrcp.f32 %v21840_v13  ;;  %v25031_v13 = vld [vmem:[#allocation120_spill] sm:$0xff] }
 0x780   : > { %17371 = vrcp.f32 %v21908_v11 }
 0x782   : > { %v22068_v26 = vpop.xlane.xlu1 %6142 }
 0x785   : > { %v22070_v20 = vpop.f32.mrb[108].mxu0 }
 0x786   : > { %25018 = vst [vmem:[#allocation70_spill] sm:$0xff] %v22070_v20  ;;  %v22072_v15 = vpop.f32.mrb[109].mxu0  ;;  %v22074_v38 = vpop.xlane.xlu1 %6157 }
 0x787   : > { %25019 = vst [vmem:[#allocation129_spill] sm:$0xff] %v22072_v15  ;;  %v25025_v15 = vld [vmem:[#allocation108_spill] sm:$0xff] }
 0x788   : > { %v5636_v18 = vsub.f32 %v25026_v48, %v25025_v15  ;;  %v17364_v15 = vpop.eup %17363 }
 0x789   : > { %v22076_v47 = vpop.f32.mrb[110].mxu0  ;;  %v17366_v56 = vpop.eup %17365  ;;  %v6502_v11 = vmul.f32 %v17364_v15, %v25031_v13 }
 0x78a   : > { %25020 = vst [vmem:[#allocation24_spill] sm:$0xff] %v22076_v47  ;;  %v22080_v62 = vpop.f32.mrb[111].mxu0  ;;  %v16844_v63 = vpop.permute.xlu1 %16843  ;;  %v5847_v0 = vmul.f32 1.442695, %v5636_v18  ;;  %v25030_v47 = vld [vmem:[#allocation136_spill] sm:$0xff] }
 0x78b   : > { %25023 = vst [vmem:[#allocation68_spill] sm:$0xff] %v22080_v62  ;;  %v16846_v55 = vunpack.i.h.bf16 %v16844_v63  ;;  %v16845_v31 = vunpack.i.l.bf16 %v16844_v63  ;;  %v25027_v63 = vld [vmem:[#allocation144_spill] sm:$0xff]  ;;  %v22098_v18 = vpop.eup %17367 }
 0x78c   : > { %16868 = vrot.lane.b32.xlu0 %v25024_v28, %s17775_s25  ;;  %17373 = vpow2.f32 %v5847_v0  ;;  %v17370_v43 = vpop.eup %17369  ;;  %v25033_v0 = vld [vmem:[#allocation146_spill] sm:$0xff] }
 0x78d   : > { %v22084_v10 = vpop.xlane.xlu0 %6160  ;;  %v16186_v20 = vpack.c.bf16 %v16846_v55, %v16845_v31  ;;  %v5641_v55 = vsub.f32 %v25028_v17, %v25027_v63  ;;  %v25032_v63 = vld [vmem:[#allocation119_spill] sm:$0xff] }
 0x78e   : > { %v6503_v17 = vmul.f32 %v17366_v56, %v25032_v63 }
 0x78f   : > { %16187 = vmatprep.subr.bf16.mxu1 %v16186_v20  ;;  %v5857_v62 = vmul.f32 1.442695, %v5641_v55  ;;  %v6504_v55 = vmul.f32 %v17370_v43, %v25033_v0 }
 0x790   : > { %16189 = vmatpush3.bf16.msra.mxu1 %v16186_v20  ;;  %v5638_v20 = vsub.f32 %v25030_v47, %v25029_v1  ;;  %v6171_v47 = vsel %vm502_vm0, %v22098_v18, 0.0 }
 0x791   : > { %v22090_v7 = vpop.xlane.xlu0 %6151  ;;  %17375 = vpow2.f32 %v5857_v62 }
 0x792   : > { %v5851_v60 = vmul.f32 1.442695, %v5638_v20  ;;  %v25036_v20 = vld [vmem:[#allocation51_spill] sm:$0xff] }
 0x794   : > { %17377 = vpow2.f32 %v5851_v60 }
 0x795   : > { %v16849_v31 = vpop.permute.xlu0 %16848  ;;  %17379 = vrcp.f32 %v21824_v59 }
 0x796   : > { %v16851_v28 = vunpack.i.h.bf16 %v16849_v31  ;;  %v16850_v48 = vunpack.i.l.bf16 %v16849_v31  ;;  %v17372_v31 = vpop.eup %17371  ;;  %17381 = vrcp.f32 %v21830_v42 }
 0x797   : > { %17383 = vrcp.f32 %v21904_v4 }
 0x798   : > { %v16182_v52 = vpack.c.bf16 %v16851_v28, %v16850_v48  ;;  %v22107_v28 = vpop.eup %17373  ;;  %v6509_v48 = vmul.f32 %v17372_v31, %v21702_v40  ;;  %17385 = vrcp.f32 %v21910_v21  ;;  %v25040_v31 = vld [vmem:[#allocation122_spill] sm:$0xff] }
 0x799   : > { %v6186_v56 = vsel %vm502_vm0, %v22107_v28, 0.0 }
 0x79a   : > { %16183 = vmatprep.subr.bf16.mxu0 %v16182_v52 }
 0x79b   : > { %16185 = vmatpush3.bf16.msra.mxu0 %v16182_v52  ;;  %v22114_v62 = vpop.eup %17375 }
 0x79c   : > { %v6201_v52 = vsel %vm502_vm0, %v22114_v62, 0.0 }
 0x79e   : > { %15089 = vmatmul.mubr.msk.f32.vlgmr.msra.gmra.mrb[116].mxu0 %vm502_vm0, %v6502_v11  ;;  %v22118_v15 = vpop.eup %17377 }
 0x79f   : > { %15091 = vmatprep.mubr.msk.f32.mxu0 %vm502_vm0, %v6503_v17  ;;  %v6192_v60 = vsel %vm502_vm0, %v22118_v15, 0.0  ;;  %v25039_v17 = vld [vmem:[#allocation23_spill] sm:$0xff] }
 0x7a0   : > { %6172 = vadd.xlane.f32.xlu1 %v6171_v47  ;;  %v5637_v47 = vsub.f32 %v25040_v31, %v25039_v17  ;;  %v25044_v17 = vld [vmem:[#allocation9_spill] sm:$0xff] }
 0x7a2   : > { %15092 = vmatmul.mubr.msk.f32.gmra.mrb[118].mxu0 %vm502_vm0, %v6504_v55  ;;  %v5849_v42 = vmul.f32 1.442695, %v5637_v47  ;;  %v25047_v47 = vld [vmem:[#allocation152_spill] sm:$0xff] }
 0x7a3   : > { %15116 = vmatprep.mubr.msk.f32.mxu0 %vm502_vm0, %v6509_v48 }
 0x7a4   : > { %6187 = vadd.xlane.f32.xlu1 %v6186_v56  ;;  %v25041_v56 = vld [vmem:[#allocation57_spill] sm:$0xff]  ;;  %17387 = vpow2.f32 %v5849_v42 }
 0x7a5   : > { %v25049_v42 = vld [vmem:[#allocation141_spill] sm:$0xff] }
 0x7ab   : > { %6202 = vadd.xlane.f32.xlu0 %v6201_v52 }
 0x7af   : > { %6193 = vadd.xlane.f32.xlu0 %v6192_v60  ;;  %v17380_v60 = vpop.eup %17379 }
 0x7b0   : > { %v17382_v4 = vpop.eup %17381  ;;  %v6506_v31 = vmul.f32 %v17380_v60, %v25044_v17 }
 0x7b3   : > { %v22122_v40 = vpop.f32.mrb[88].mxu1 }
 0x7b4   : > { %25034 = vst [vmem:[#allocation82_spill] sm:$0xff] %v22122_v40  ;;  %v22124_v1 = vpop.f32.mrb[89].mxu1  ;;  %v17384_v40 = vpop.eup %17383 }
 0x7b5   : > { %25035 = vst [vmem:[#allocation46_spill] sm:$0xff] %v22124_v1  ;;  %16873 = vrot.lane.b32.xlu1 %v25036_v20, %s17775_s25  ;;  %v25042_v20 = vld [vmem:[#allocation33_spill] sm:$0xff]  ;;  %v25045_v1 = vld [vmem:[#allocation139_spill] sm:$0xff]  ;;  %v17386_v51 = vpop.eup %17385  ;;  %v6508_v61 = vmul.f32 %v17384_v40, %v21692_v58 }
 0x7b6   : > { %v6513_v60 = vmul.f32 %v17386_v51, %v21708_v37 }
 0x7b7   : > { %v22128_v13 = vpop.f32.mrb[90].mxu1 }
 0x7b8   : > { %25037 = vst [vmem:[#allocation15_spill] sm:$0xff] %v22128_v13  ;;  %v22130_v11 = vpop.f32.mrb[91].mxu1  ;;  %v25043_v13 = vld [vmem:[#allocation130_spill] sm:$0xff] }
 0x7b9   : > { %25038 = vst [vmem:[#allocation101_spill] sm:$0xff] %v22130_v11  ;;  %v5642_v11 = vsub.f32 %v25043_v13, %v25042_v20 }
 0x7bb   : > { %v22132_v43 = vpop.xlane.xlu1 %6148 }
 0x7bf   : > { %v22136_v63 = vpop.xlane.xlu1 %6163 }
 0x7c3   : > { %v16854_v0 = vpop.permute.xlu1 %16853 }
 0x7c4   : > { %v16856_v55 = vunpack.i.h.bf16 %v16854_v0  ;;  %v16855_v48 = vunpack.i.l.bf16 %v16854_v0  ;;  %v5859_v0 = vmul.f32 1.442695, %v5642_v11 }
 0x7c5   : > { %16878 = vrot.lane.b32.xlu0 %v25041_v56, %s17775_s25  ;;  %v6507_v56 = vmul.f32 %v17382_v4, %v25045_v1  ;;  %v25048_v1 = vld [vmem:[#allocation35_spill] sm:$0xff] }
 0x7c6   : > { %v22144_v52 = vpop.xlane.xlu0 %6178  ;;  %v16190_v59 = vpack.c.bf16 %v16856_v55, %v16855_v48  ;;  %v25046_v55 = vld [vmem:[#allocation100_spill] sm:$0xff]  ;;  %17389 = vpow2.f32 %v5859_v0  ;;  %v5640_v4 = vsub.f32 %v25049_v42, %v25048_v1 }
 0x7c7   : > { %v5643_v48 = vsub.f32 %v25047_v47, %v25046_v55  ;;  %v25050_v47 = vld [vmem:[#allocation67_spill] sm:$0xff] }
 0x7c8   : > { %16191 = vmatprep.subr.bf16.mxu1 %v16190_v59 }
 0x7c9   : > { %16193 = vmatpush3.bf16.msra.mxu1 %v16190_v59  ;;  %v5861_v17 = vmul.f32 1.442695, %v5643_v48 }
 0x7ca   : > { %v22148_v21 = vpop.xlane.xlu0 %6169 }
 0x7cb   : > { %17391 = vpow2.f32 %v5861_v17 }
 0x7cc   : > { %15103 = vmatmul.mubr.msk.f32.vlgmr.msra.gmra.mrb[96].mxu1 %vm502_vm0, %v6506_v31  ;;  %v22162_v31 = vpop.eup %17387 }
 0x7cd   : > { %15105 = vmatprep.mubr.msk.f32.mxu1 %vm502_vm0, %v6507_v56  ;;  %v5855_v56 = vmul.f32 1.442695, %v5640_v4  ;;  %v6189_v58 = vsel %vm502_vm0, %v22162_v31, 0.0  ;;  %v25053_v4 = vld [vmem:[#allocation59_spill] sm:$0xff] }
 0x7ce   : > { %v16859_v13 = vpop.permute.xlu0 %16858 }
 0x7cf   : > { %v16861_v20 = vunpack.i.h.bf16 %v16859_v13  ;;  %v16860_v59 = vunpack.i.l.bf16 %v16859_v13  ;;  %17393 = vpow2.f32 %v5855_v56 }
 0x7d0   : > { %15106 = vmatmul.mubr.msk.f32.gmra.mrb[98].mxu1 %vm502_vm0, %v6508_v61  ;;  %v22166_v40 = vpop.eup %17389  ;;  %17395 = vrcp.f32 %v21920_v16 }
 0x7d1   : > { %v16194_v11 = vpack.c.bf16 %v16861_v20, %v16860_v59  ;;  %15130 = vmatprep.mubr.msk.f32.mxu1 %vm502_vm0, %v6513_v60  ;;  %v6204_v37 = vsel %vm502_vm0, %v22166_v40, 0.0  ;;  %v25051_v20 = vld [vmem:[#allocation89_spill] sm:$0xff]  ;;  %v25052_v59 = vld [vmem:[#allocation128_spill] sm:$0xff]  ;;  %17397 = vrcp.f32 %v21964_v41 }
 0x7d2   : > { %v5639_v60 = vsub.f32 %v25052_v59, %v25051_v20 }
 0x7d3   : > { %16195 = vmatprep.subr.bf16.mxu0 %v16194_v11 }
 0x7d4   : > { %16197 = vmatpush3.bf16.msra.mxu0 %v16194_v11 }
 0x7d5   : > { %v22170_v51 = vpop.eup %17391 }
 0x7d6   : > { %v6207_v61 = vsel %vm502_vm0, %v22170_v51, 0.0 }
 0x7d9   : > { %6190 = vadd.xlane.f32.xlu1 %v6189_v58  ;;  %v22174_v0 = vpop.eup %17393  ;;  %v5853_v58 = vmul.f32 1.442695, %v5639_v60 }
 0x7da   : > { %v6198_v55 = vsel %vm502_vm0, %v22174_v0, 0.0 }
 0x7db   : > { %17399 = vpow2.f32 %v5853_v58 }
 0x7dc   : > { %17401 = vrcp.f32 %v21976_v46 }
 0x7dd   : > { %6205 = vadd.xlane.f32.xlu1 %v6204_v37  ;;  %17403 = vrcp.f32 %v22068_v26 }
 0x7e4   : > { %6208 = vadd.xlane.f32.xlu0 %v6207_v61 }
 0x7e8   : > { %6199 = vadd.xlane.f32.xlu0 %v6198_v55  ;;  %v25056_v55 = vld [vmem:[#allocation138_spill] sm:$0xff] }
 0x7ee   : > { %16883 = vrot.lane.b32.xlu1 %v25050_v47, %s17775_s25  ;;  %v25057_v47 = vld [vmem:[#allocation135_spill] sm:$0xff] }
 0x7ef   : > { %v5644_v49 = vsub.f32 %v25057_v47, %v25056_v55  ;;  %v17396_v47 = vpop.eup %17395 }
 0x7f0   : > { %v17398_v33 = vpop.eup %17397  ;;  %v6510_v46 = vmul.f32 %v17396_v47, %v21714_v35 }
 0x7f1   : > { %v5863_v60 = vmul.f32 1.442695, %v5644_v49  ;;  %v22210_v49 = vpop.eup %17399 }
 0x7f2   : > { %v17402_v26 = vpop.eup %17401 }
 0x7f3   : > { %17405 = vpow2.f32 %v5863_v60 }
 0x7f4   : > { %v22180_v48 = vpop.xlane.xlu1 %6166 }
 0x7f8   : > { %v22182_v13 = vpop.xlane.xlu1 %6181 }
 0x7fc   : > { %v16864_v11 = vpop.permute.xlu1 %16863 }
 0x7fd   : > { %v16866_v1 = vunpack.i.h.bf16 %v16864_v11  ;;  %v16865_v42 = vunpack.i.l.bf16 %v16864_v11 }
 0x7fe   : > { %16888 = vrot.lane.b32.xlu0 %v25053_v4, %s17775_s25 }
 0x7ff   : > { %v22188_v17 = vpop.xlane.xlu0 %6184  ;;  %v22190_v56 = vpop.f32.mrb[112].mxu0  ;;  %v16202_v61 = vpack.c.bf16 %v16866_v1, %v16865_v42  ;;  %v25060_v1 = vld [vmem:[#allocation113_spill] sm:$0xff]  ;;  %v25061_v42 = vld [vmem:[#allocation155_spill] sm:$0xff] }
 0x800   : > { %25054 = vst [vmem:[#allocation84_spill] sm:$0xff] %v22190_v56  ;;  %v22192_v37 = vpop.f32.mrb[113].mxu0  ;;  %v5649_v4 = vsub.f32 %v25061_v42, %v25060_v1  ;;  %v25062_v56 = vld [vmem:[#allocation18_spill] sm:$0xff]  ;;  %v6511_v1 = vmul.f32 %v17398_v33, %v21796_v32  ;;  %v17404_v42 = vpop.eup %17403 }
 0x801   : > { %25055 = vst [vmem:[#allocation110_spill] sm:$0xff] %v22192_v37  ;;  %16203 = vmatprep.subr.bf16.mxu1 %v16202_v61  ;;  %v25063_v37 = vld [vmem:[#allocation137_spill] sm:$0xff]  ;;  %v22219_v60 = vpop.eup %17405  ;;  %v6517_v35 = vmul.f32 %v17404_v42, %v21932_v27 }
 0x802   : > { %16205 = vmatpush3.bf16.msra.mxu1 %v16202_v61  ;;  %v5873_v58 = vmul.f32 1.442695, %v5649_v4  ;;  %v6210_v32 = vsel %vm502_vm0, %v22219_v60, 0.0  ;;  %v25064_v27 = vld [vmem:[#allocation69_spill] sm:$0xff] }
 0x803   : > { %v22198_v20 = vpop.xlane.xlu0 %6175  ;;  %v22200_v59 = vpop.f32.mrb[114].mxu0 }
 0x804   : > { %25058 = vst [vmem:[#allocation36_spill] sm:$0xff] %v22200_v59  ;;  %v22202_v11 = vpop.f32.mrb[115].mxu0  ;;  %v5646_v59 = vsub.f32 %v25063_v37, %v25062_v56  ;;  %17407 = vpow2.f32 %v5873_v58  ;;  %v6195_v56 = vsel %vm502_vm0, %v22210_v49, 0.0  ;;  %v6512_v37 = vmul.f32 %v17402_v26, %v21806_v50  ;;  %v25068_v58 = vld [vmem:[#allocation34_spill] sm:$0xff] }
 0x805   : > { %25059 = vst [vmem:[#allocation117_spill] sm:$0xff] %v22202_v11 }
 0x806   : > { %v5867_v11 = vmul.f32 1.442695, %v5646_v59 }
 0x807   : > { %v16869_v16 = vpop.permute.xlu0 %16868 }
 0x808   : > { %v16871_v55 = vunpack.i.h.bf16 %v16869_v16  ;;  %v16870_v41 = vunpack.i.l.bf16 %v16869_v16  ;;  %17409 = vpow2.f32 %v5867_v11 }
 0x809   : > { %17411 = vrcp.f32 %v21962_v5  ;;  %v25070_v5 = vld [vmem:[#allocation76_spill] sm:$0xff] }
 0x80a   : > { %v16198_v61 = vpack.c.bf16 %v16871_v55, %v16870_v41  ;;  %17413 = vrcp.f32 %v21970_v9 }
 0x80b   : > { %17415 = vrcp.f32 %v22024_v8 }
 0x80c   : > { %16199 = vmatprep.subr.bf16.mxu0 %v16198_v61  ;;  %17417 = vrcp.f32 %v22032_v3 }
 0x80d   : > { %16201 = vmatpush3.bf16.msra.mxu0 %v16198_v61 }
 0x80e   : > { %v22226_v33 = vpop.eup %17407 }
 0x80f   : > { %v6225_v59 = vsel %vm502_vm0, %v22226_v33, 0.0 }
 0x810   : > { %15117 = vmatmul.mubr.msk.f32.vlgmr.msra.gmra.mrb[120].mxu0 %vm502_vm0, %v6510_v46  ;;  %v25069_v46 = vld [vmem:[#allocation140_spill] sm:$0xff] }
 0x811   : > { %15119 = vmatprep.mubr.msk.f32.mxu0 %vm502_vm0, %v6511_v1  ;;  %v5645_v26 = vsub.f32 %v25069_v46, %v25068_v58 }
 0x812   : > { %6196 = vadd.xlane.f32.xlu1 %v6195_v56  ;;  %v22230_v50 = vpop.eup %17409 }
 0x813   : > { %v6216_v11 = vsel %vm502_vm0, %v22230_v50, 0.0 }
 0x814   : > { %15120 = vmatmul.mubr.msk.f32.gmra.mrb[122].mxu0 %vm502_vm0, %v6512_v37 }
 0x815   : > { %15144 = vmatprep.mubr.msk.f32.mxu0 %vm502_vm0, %v6517_v35  ;;  %v17412_v35 = vpop.eup %17411 }
 0x816   : > { %6211 = vadd.xlane.f32.xlu1 %v6210_v32  ;;  %v5865_v32 = vmul.f32 1.442695, %v5645_v26  ;;  %v17414_v8 = vpop.eup %17413  ;;  %v6514_v58 = vmul.f32 %v17412_v35, %v21786_v34  ;;  %v25074_v26 = vld [vmem:[#allocation158_spill] sm:$0xff] }
 0x817   : > { %v17416_v46 = vpop.eup %17415 }
 0x818   : > { %17419 = vpow2.f32 %v5865_v32  ;;  %v25076_v32 = vld [vmem:[#allocation147_spill] sm:$0xff] }
 0x81d   : > { %6226 = vadd.xlane.f32.xlu0 %v6225_v59  ;;  %v25071_v59 = vld [vmem:[#allocation87_spill] sm:$0xff] }
 0x821   : > { %6217 = vadd.xlane.f32.xlu0 %v6216_v11  ;;  %v25072_v11 = vld [vmem:[#allocation154_spill] sm:$0xff] }
 0x827   : > { %16893 = vrot.lane.b32.xlu1 %v25064_v27, %s17775_s25  ;;  %v5650_v27 = vsub.f32 %v25072_v11, %v25071_v59 }
 0x82d   : > { %v22236_v4 = vpop.xlane.xlu1 %6172  ;;  %v22238_v16 = vpop.f32.mrb[92].mxu1 }
 0x82e   : > { %25065 = vst [vmem:[#allocation134_spill] sm:$0xff] %v22238_v16  ;;  %v22240_v55 = vpop.f32.mrb[93].mxu1 }
 0x831   : > { %v22244_v41 = vpop.xlane.xlu1 %6187  ;;  %v22246_v61 = vpop.f32.mrb[94].mxu1 }
 0x832   : > { %25066 = vst [vmem:[#allocation30_spill] sm:$0xff] %v22246_v61  ;;  %v22248_v47 = vpop.f32.mrb[95].mxu1  ;;  %v17418_v61 = vpop.eup %17417 }
 0x833   : > { %25067 = vst [vmem:[#allocation48_spill] sm:$0xff] %v22248_v47  ;;  %v6516_v47 = vmul.f32 %v17416_v46, %v21880_v45  ;;  %v6521_v34 = vmul.f32 %v17418_v61, %v21888_v24 }
 0x835   : > { %v16874_v1 = vpop.permute.xlu1 %16873 }
 0x836   : > { %v16876_v42 = vunpack.i.h.bf16 %v16874_v1  ;;  %v16875_v56 = vunpack.i.l.bf16 %v16874_v1  ;;  %v5875_v1 = vmul.f32 1.442695, %v5650_v27 }
 0x837   : > { %16898 = vrot.lane.b32.xlu0 %v25070_v5, %s17775_s25  ;;  %v6515_v5 = vmul.f32 %v17414_v8, %v21802_v36  ;;  %v25075_v36 = vld [vmem:[#allocation43_spill] sm:$0xff] }
 0x838   : > { %v22256_v9 = vpop.xlane.xlu0 %6202  ;;  %v16206_v37 = vpack.c.bf16 %v16876_v42, %v16875_v56  ;;  %v25073_v42 = vld [vmem:[#allocation6_spill] sm:$0xff]  ;;  %17421 = vpow2.f32 %v5875_v1  ;;  %v5648_v27 = vsub.f32 %v25076_v32, %v25075_v36 }
 0x839   : > { %v5651_v56 = vsub.f32 %v25074_v26, %v25073_v42  ;;  %v25077_v26 = vld [vmem:[#allocation86_spill] sm:$0xff] }
 0x83a   : > { %16207 = vmatprep.subr.bf16.mxu1 %v16206_v37 }
 0x83b   : > { %16209 = vmatpush3.bf16.msra.mxu1 %v16206_v37  ;;  %v5877_v8 = vmul.f32 1.442695, %v5651_v56 }
 0x83c   : > { %v22260_v3 = vpop.xlane.xlu0 %6193 }
 0x83d   : > { %17423 = vpow2.f32 %v5877_v8 }
 0x83e   : > { %15131 = vmatmul.mubr.msk.f32.vlgmr.msra.gmra.mrb[100].mxu1 %vm502_vm0, %v6514_v58  ;;  %v22274_v58 = vpop.eup %17419 }
 0x83f   : > { %15133 = vmatprep.mubr.msk.f32.mxu1 %vm502_vm0, %v6515_v5  ;;  %v5871_v5 = vmul.f32 1.442695, %v5648_v27  ;;  %v6213_v45 = vsel %vm502_vm0, %v22274_v58, 0.0  ;;  %v25080_v27 = vld [vmem:[#allocation77_spill] sm:$0xff] }
 0x840   : > { %v16879_v59 = vpop.permute.xlu0 %16878 }
 0x841   : > { %v16881_v11 = vunpack.i.h.bf16 %v16879_v59  ;;  %v16880_v37 = vunpack.i.l.bf16 %v16879_v59  ;;  %17425 = vpow2.f32 %v5871_v5 }
 0x842   : > { %15134 = vmatmul.mubr.msk.f32.gmra.mrb[102].mxu1 %vm502_vm0, %v6516_v47  ;;  %v22278_v46 = vpop.eup %17421  ;;  %17427 = vrcp.f32 %v22036_v23 }
 0x843   : > { %v16210_v35 = vpack.c.bf16 %v16881_v11, %v16880_v37  ;;  %15158 = vmatprep.mubr.msk.f32.mxu1 %vm502_vm0, %v6521_v34  ;;  %v6228_v24 = vsel %vm502_vm0, %v22278_v46, 0.0  ;;  %v25078_v11 = vld [vmem:[#allocation27_spill] sm:$0xff]  ;;  %v25079_v37 = vld [vmem:[#allocation153_spill] sm:$0xff]  ;;  %17429 = vrcp.f32 %v22132_v43 }
 0x844   : > { %v5647_v34 = vsub.f32 %v25079_v37, %v25078_v11 }
 0x845   : > { %16211 = vmatprep.subr.bf16.mxu0 %v16210_v35 }
 0x846   : > { %16213 = vmatpush3.bf16.msra.mxu0 %v16210_v35 }
 0x847   : > { %v22282_v61 = vpop.eup %17423 }
 0x848   : > { %v6231_v47 = vsel %vm502_vm0, %v22282_v61, 0.0 }
 0x84b   : > { %6214 = vadd.xlane.f32.xlu1 %v6213_v45  ;;  %v22286_v1 = vpop.eup %17425  ;;  %v5869_v45 = vmul.f32 1.442695, %v5647_v34 }
 0x84c   : > { %v6222_v42 = vsel %vm502_vm0, %v22286_v1, 0.0 }
 0x84d   : > { %17431 = vpow2.f32 %v5869_v45 }
 0x84e   : > { %17433 = vrcp.f32 %v22090_v7 }
 0x84f   : > { %6229 = vadd.xlane.f32.xlu1 %v6228_v24  ;;  %17435 = vrcp.f32 %v22180_v48 }
 0x856   : > { %6232 = vadd.xlane.f32.xlu0 %v6231_v47 }
 0x85a   : > { %6223 = vadd.xlane.f32.xlu0 %v6222_v42  ;;  %v25083_v42 = vld [vmem:[#allocation107_spill] sm:$0xff] }
 0x860   : > { %16903 = vrot.lane.b32.xlu1 %v25077_v26, %s17775_s25  ;;  %v25084_v26 = vld [vmem:[#allocation156_spill] sm:$0xff] }
 0x861   : > { %v5652_v16 = vsub.f32 %v25084_v26, %v25083_v42  ;;  %v17428_v26 = vpop.eup %17427 }
 0x863   : > { %v5879_v34 = vmul.f32 1.442695, %v5652_v16  ;;  %v6518_v16 = vmul.f32 %v17428_v26, %v21892_v54  ;;  %v25092_v26 = vld [vmem:[#allocation32_spill] sm:$0xff] }
 0x865   : > { %17437 = vpow2.f32 %v5879_v34 }
 0x866   : > { %v22292_v56 = vpop.xlane.xlu1 %6190 }
 0x86a   : > { %v22294_v59 = vpop.xlane.xlu1 %6205 }
 0x86e   : > { %v16884_v35 = vpop.permute.xlu1 %16883 }
 0x86f   : > { %v16886_v36 = vunpack.i.h.bf16 %v16884_v35  ;;  %v16885_v32 = vunpack.i.l.bf16 %v16884_v35 }
 0x870   : > { %16908 = vrot.lane.b32.xlu0 %v25080_v27, %s17775_s25 }
 0x871   : > { %v22300_v8 = vpop.xlane.xlu0 %6208  ;;  %v22302_v5 = vpop.f32.mrb[116].mxu0  ;;  %v16218_v47 = vpack.c.bf16 %v16886_v36, %v16885_v32  ;;  %v25086_v36 = vld [vmem:[#allocation64_spill] sm:$0xff]  ;;  %v25087_v32 = vld [vmem:[#allocation159_spill] sm:$0xff] }
 0x872   : > { %25081 = vst [vmem:[#allocation29_spill] sm:$0xff] %v22302_v5  ;;  %v22304_v24 = vpop.f32.mrb[117].mxu0  ;;  %v5654_v27 = vsub.f32 %v25087_v32, %v25086_v36 }
 0x873   : > { %25082 = vst [vmem:[#allocation50_spill] sm:$0xff] %v22304_v24  ;;  %16219 = vmatprep.subr.bf16.mxu1 %v16218_v47  ;;  %v17430_v24 = vpop.eup %17429 }
 0x874   : > { %16221 = vmatpush3.bf16.msra.mxu1 %v16218_v47  ;;  %v5883_v5 = vmul.f32 1.442695, %v5654_v27  ;;  %v22320_v45 = vpop.eup %17431  ;;  %v6519_v48 = vmul.f32 %v17430_v24, %v21984_v53 }
 0x875   : > { %v22310_v11 = vpop.xlane.xlu0 %6199  ;;  %v22312_v37 = vpop.f32.mrb[118].mxu0  ;;  %v6219_v34 = vsel %vm502_vm0, %v22320_v45, 0.0 }
 0x876   : > { %25085 = vst [vmem:[#allocation7_spill] sm:$0xff] %v22312_v37  ;;  %v22314_v35 = vpop.f32.mrb[119].mxu0  ;;  %v17434_v7 = vpop.eup %17433  ;;  %17439 = vpow2.f32 %v5883_v5 }
 0x877   : > { %v17436_v37 = vpop.eup %17435  ;;  %v6520_v36 = vmul.f32 %v17434_v7, %v21944_v14  ;;  %v25088_v14 = vld [vmem:[#allocation88_spill] sm:$0xff]  ;;  %17441 = vrcp.f32 %v22074_v38 }
 0x878   : > { %v22329_v32 = vpop.eup %17437  ;;  %v6525_v27 = vmul.f32 %v17436_v37, %v22050_v12  ;;  %17443 = vrcp.f32 %v22084_v10 }
 0x879   : > { %v16889_v23 = vpop.permute.xlu0 %16888  ;;  %v6234_v54 = vsel %vm502_vm0, %v22329_v32, 0.0  ;;  %17445 = vrcp.f32 %v22136_v63 }
 0x87a   : > { %v16891_v42 = vunpack.i.h.bf16 %v16889_v23  ;;  %v16890_v43 = vunpack.i.l.bf16 %v16889_v23  ;;  %17447 = vrcp.f32 %v22144_v52 }
 0x87c   : > { %v16214_v47 = vpack.c.bf16 %v16891_v42, %v16890_v43  ;;  %v25090_v43 = vld [vmem:[#allocation94_spill] sm:$0xff] }
 0x87e   : > { %16215 = vmatprep.subr.bf16.mxu0 %v16214_v47 }
 0x87f   : > { %16217 = vmatpush3.bf16.msra.mxu0 %v16214_v47 }
 0x880   : > { %v22336_v53 = vpop.eup %17439 }
 0x881   : > { %v6240_v5 = vsel %vm502_vm0, %v22336_v53, 0.0 }
 0x882   : > { %15145 = vmatmul.mubr.msk.f32.vlgmr.msra.gmra.mrb[124].mxu0 %vm502_vm0, %v6518_v16  ;;  %v25093_v16 = vld [vmem:[#allocation157_spill] sm:$0xff] }
 0x883   : > { %15147 = vmatprep.mubr.msk.f32.mxu0 %vm502_vm0, %v6519_v48  ;;  %v5653_v7 = vsub.f32 %v25093_v16, %v25092_v26 }
 0x884   : > { %6220 = vadd.xlane.f32.xlu1 %v6219_v34 }
 0x886   : > { %15148 = vmatmul.mubr.msk.f32.gmra.mrb[126].mxu0 %vm502_vm0, %v6520_v36 }
 0x887   : > { %15172 = vmatprep.mubr.msk.f32.mxu0 %vm502_vm0, %v6525_v27  ;;  %v17442_v27 = vpop.eup %17441 }
 0x888   : > { %6235 = vadd.xlane.f32.xlu1 %v6234_v54  ;;  %v5881_v54 = vmul.f32 1.442695, %v5653_v7  ;;  %v6522_v52 = vmul.f32 %v17442_v27, %v21936_v22 }
 0x88a   : > { %17449 = vpow2.f32 %v5881_v54  ;;  %v25097_v54 = vld [vmem:[#allocation96_spill] sm:$0xff] }
 0x88f   : > { %6241 = vadd.xlane.f32.xlu0 %v6240_v5  ;;  %v17444_v5 = vpop.eup %17443 }
 0x890   : > { %v6523_v26 = vmul.f32 %v17444_v5, %v21940_v57  ;;  %v25098_v5 = vld [vmem:[#allocation8_spill] sm:$0xff] }
 0x899   : > { %16913 = vrot.lane.b32.xlu1 %v25088_v14, %s17775_s25  ;;  %v25094_v14 = vld [vmem:[#allocation150_spill] sm:$0xff] }
 0x89f   : > { %v22342_v24 = vpop.xlane.xlu1 %6196  ;;  %v22344_v12 = vpop.f32.mrb[96].mxu1 }
 0x8a0   : > { %v22346_v37 = vpop.f32.mrb[97].mxu1 }
 0x8a3   : > { %v22350_v23 = vpop.xlane.xlu1 %6211  ;;  %v22352_v42 = vpop.f32.mrb[98].mxu1 }
 0x8a4   : > { %25089 = vst [vmem:[#allocation38_spill] sm:$0xff] %v22352_v42  ;;  %v22356_v47 = vpop.f32.mrb[99].mxu1 }
 0x8a5   : > { %16918 = vrot.lane.b32.xlu0 %v25090_v43, %s17775_s25  ;;  %25091 = vst [vmem:[#allocation115_spill] sm:$0xff] %v22356_v47  ;;  %v25095_v43 = vld [vmem:[#allocation37_spill] sm:$0xff]  ;;  %v17446_v47 = vpop.eup %17445 }
 0x8a6   : > { %v5656_v42 = vsub.f32 %v25095_v43, %v25094_v14  ;;  %v17448_v16 = vpop.eup %17447  ;;  %v6524_v14 = vmul.f32 %v17446_v47, %v21993_v44  ;;  %v25099_v43 = vld [vmem:[#allocation161_spill] sm:$0xff] }
 0x8a7   : > { %v16894_v48 = vpop.permute.xlu1 %16893  ;;  %v22376_v57 = vpop.eup %17449 }
 0x8a8   : > { %v16896_v38 = vunpack.i.h.bf16 %v16894_v48  ;;  %v16895_v34 = vunpack.i.l.bf16 %v16894_v48  ;;  %v5887_v48 = vmul.f32 1.442695, %v5656_v42  ;;  %v6237_v42 = vsel %vm502_vm0, %v22376_v57, 0.0 }
 0x8aa   : > { %v22362_v10 = vpop.xlane.xlu0 %6226  ;;  %v16222_v36 = vpack.c.bf16 %v16896_v38, %v16895_v34  ;;  %17451 = vpow2.f32 %v5887_v48 }
 0x8ac   : > { %16223 = vmatprep.subr.bf16.mxu1 %v16222_v36 }
 0x8ad   : > { %16225 = vmatpush3.bf16.msra.mxu1 %v16222_v36  ;;  %v6529_v36 = vmul.f32 %v17448_v16, %v22000_v29  ;;  %v25096_v29 = vld [vmem:[#allocation102_spill] sm:$0xff] }
 0x8ae   : > { %v22366_v63 = vpop.xlane.xlu0 %6217 }
 0x8b0   : > { %15159 = vmatmul.mubr.msk.f32.vlgmr.msra.gmra.mrb[104].mxu1 %vm502_vm0, %v6522_v52  ;;  %v5655_v52 = vsub.f32 %v25099_v43, %v25098_v5 }
 0x8b1   : > { %15161 = vmatprep.mubr.msk.f32.mxu1 %vm502_vm0, %v6523_v26 }
 0x8b2   : > { %v16899_v7 = vpop.permute.xlu0 %16898  ;;  %v5885_v16 = vmul.f32 1.442695, %v5655_v52 }
 0x8b3   : > { %v16901_v38 = vunpack.i.h.bf16 %v16899_v7  ;;  %v16900_v34 = vunpack.i.l.bf16 %v16899_v7 }
 0x8b4   : > { %15162 = vmatmul.mubr.msk.f32.gmra.mrb[106].mxu1 %vm502_vm0, %v6524_v14  ;;  %v22380_v27 = vpop.eup %17451  ;;  %v25101_v14 = vld [vmem:[#allocation162_spill] sm:$0xff]  ;;  %17453 = vpow2.f32 %v5885_v16 }
 0x8b5   : > { %v16226_v22 = vpack.c.bf16 %v16901_v38, %v16900_v34  ;;  %15186 = vmatprep.mubr.msk.f32.mxu1 %vm502_vm0, %v6529_v36  ;;  %v6246_v44 = vsel %vm502_vm0, %v22380_v27, 0.0  ;;  %v25100_v34 = vld [vmem:[#allocation47_spill] sm:$0xff]  ;;  %17455 = vrcp.f32 %v22148_v21 }
 0x8b6   : > { %v5658_v36 = vsub.f32 %v25101_v14, %v25100_v34  ;;  %17457 = vrcp.f32 %v22236_v4 }
 0x8b7   : > { %16227 = vmatprep.subr.bf16.mxu0 %v16226_v22  ;;  %17459 = vrcp.f32 %v22198_v20 }
 0x8b8   : > { %16229 = vmatpush3.bf16.msra.mxu0 %v16226_v22  ;;  %17461 = vrcp.f32 %v22292_v56 }
 0x8bd   : > { %6238 = vadd.xlane.f32.xlu1 %v6237_v42 }
 0x8be   : > { %v22412_v21 = vpop.eup %17453 }
 0x8c4   : > { %6247 = vadd.xlane.f32.xlu0 %v6246_v44 }
 0x8ce   : > { %16923 = vrot.lane.b32.xlu1 %v25096_v29, %s17775_s25 }
 0x8d8   : > { %v22386_v47 = vpop.xlane.xlu1 %6214 }
 0x8da   : > { %16928 = vrot.lane.b32.xlu0 %v25097_v54, %s17775_s25  ;;  %v5891_v54 = vmul.f32 1.442695, %v5658_v36  ;;  %v6243_v36 = vsel %vm502_vm0, %v22412_v21, 0.0 }
 0x8dc   : > { %v22392_v26 = vpop.xlane.xlu1 %6229  ;;  %17463 = vpow2.f32 %v5891_v54 }
 0x8dd   : > { %17465 = vrcp.f32 %v22182_v13 }
 0x8de   : > { %17467 = vrcp.f32 %v22188_v17 }
 0x8df   : > { %17469 = vrcp.f32 %v22244_v41 }
 0x8e0   : > { %v16904_v48 = vpop.permute.xlu1 %16903  ;;  %17471 = vrcp.f32 %v22256_v9 }
 0x8e1   : > { %v16906_v7 = vunpack.i.h.bf16 %v16904_v48  ;;  %v16905_v38 = vunpack.i.l.bf16 %v16904_v48 }
 0x8e3   : > { %v22396_v22 = vpop.xlane.xlu0 %6232  ;;  %v22398_v42 = vpop.f32.mrb[120].mxu0  ;;  %v16234_v29 = vpack.c.bf16 %v16906_v7, %v16905_v38 }
 0x8e4   : > { %v22400_v44 = vpop.f32.mrb[121].mxu0  ;;  %v17456_v38 = vpop.eup %17455 }
 0x8e5   : > { %16235 = vmatprep.subr.bf16.mxu1 %v16234_v29  ;;  %v17458_v34 = vpop.eup %17457  ;;  %v6526_v14 = vmul.f32 %v17456_v38, %v22004_v39  ;;  %v25105_v38 = vld [vmem:[#allocation164_spill] sm:$0xff] }
 0x8e6   : > { %16237 = vmatpush3.bf16.msra.mxu1 %v16234_v29  ;;  %v17460_v29 = vpop.eup %17459  ;;  %v6527_v20 = vmul.f32 %v17458_v34, %v22098_v18  ;;  %v25102_v18 = vld [vmem:[#allocation105_spill] sm:$0xff] }
 0x8e7   : > { %v22404_v5 = vpop.xlane.xlu0 %6223  ;;  %v22406_v43 = vpop.f32.mrb[122].mxu0 }
 0x8e8   : > { %v22408_v52 = vpop.f32.mrb[123].mxu0  ;;  %v17462_v56 = vpop.eup %17461 }
 0x8e9   : > { %v22419_v54 = vpop.eup %17463 }
 0x8ea   : > { %v6252_v39 = vsel %vm502_vm0, %v22419_v54, 0.0 }
 0x8eb   : > { %v16909_v16 = vpop.permute.xlu0 %16908 }
 0x8ec   : > { %v16911_v48 = vunpack.i.h.bf16 %v16909_v16  ;;  %v16910_v7 = vunpack.i.l.bf16 %v16909_v16  ;;  %v6528_v16 = vmul.f32 %v17460_v29, %v22062_v19 }
 0x8ee   : > { %v16230_v4 = vpack.c.bf16 %v16911_v48, %v16910_v7  ;;  %v6533_v48 = vmul.f32 %v17462_v56, %v22162_v31  ;;  %v25103_v7 = vld [vmem:[#allocation26_spill] sm:$0xff] }
 0x8f0   : > { %16231 = vmatprep.subr.bf16.mxu0 %v16230_v4 }
 0x8f1   : > { %16233 = vmatpush3.bf16.msra.mxu0 %v16230_v4  ;;  %v25104_v4 = vld [vmem:[#allocation127_spill] sm:$0xff] }
 0x8f2   : > { %6244 = vadd.xlane.f32.xlu1 %v6243_v36  ;;  %v5657_v34 = vsub.f32 %v25105_v38, %v25104_v4 }
 0x8f4   : > { %15173 = vmatmul.mubr.msk.f32.vlgmr.msra.gmra.mrb[128].mxu0 %vm502_vm0, %v6526_v14  ;;  %v5889_v36 = vmul.f32 1.442695, %v5657_v34  ;;  %v17466_v34 = vpop.eup %17465 }
 0x8f5   : > { %15175 = vmatprep.mubr.msk.f32.mxu0 %vm502_vm0, %v6527_v20 }
 0x8f6   : > { %17473 = vpow2.f32 %v5889_v36 }
 0x8f8   : > { %15176 = vmatmul.mubr.msk.f32.gmra.mrb[130].mxu0 %vm502_vm0, %v6528_v16  ;;  %v25109_v16 = vld [vmem:[#allocation49_spill] sm:$0xff] }
 0x8f9   : > { %6253 = vadd.xlane.f32.xlu0 %v6252_v39  ;;  %15200 = vmatprep.mubr.msk.f32.mxu0 %vm502_vm0, %v6533_v48  ;;  %v25110_v48 = vld [vmem:[#allocation91_spill] sm:$0xff] }
 0x8fa   : > { %v5660_v39 = vsub.f32 %v25110_v48, %v25109_v16  ;;  %v6530_v16 = vmul.f32 %v17466_v34, %v22054_v2 }
 0x8fc   : > { %v5895_v4 = vmul.f32 1.442695, %v5660_v39 }
 0x8fe   : > { %17475 = vpow2.f32 %v5895_v4 }
 0x903   : > { %16933 = vrot.lane.b32.xlu1 %v25102_v18, %s17775_s25 }
 0x90f   : > { %16938 = vrot.lane.b32.xlu0 %v25103_v7, %s17775_s25 }
 0x911   : > { %v22434_v19 = vpop.xlane.xlu1 %6220  ;;  %v22436_v31 = vpop.f32.mrb[100].mxu1 }
 0x912   : > { %25106 = vst [vmem:[#allocation108_spill] sm:$0xff] %v22436_v31  ;;  %v22438_v14 = vpop.f32.mrb[101].mxu1  ;;  %v17468_v31 = vpop.eup %17467 }
 0x913   : > { %v6531_v9 = vmul.f32 %v17468_v31, %v22058_v25 }
 0x915   : > { %v22442_v29 = vpop.xlane.xlu1 %6235  ;;  %v22444_v20 = vpop.f32.mrb[102].mxu1 }
 0x916   : > { %25107 = vst [vmem:[#allocation131_spill] sm:$0xff] %v22444_v20  ;;  %v22446_v56 = vpop.f32.mrb[103].mxu1 }
 0x917   : > { %25108 = vst [vmem:[#allocation144_spill] sm:$0xff] %v22446_v56  ;;  %v17470_v56 = vpop.eup %17469 }
 0x918   : > { %v17472_v36 = vpop.eup %17471 }
 0x919   : > { %v16914_v18 = vpop.permute.xlu1 %16913 }
 0x91a   : > { %v16916_v7 = vunpack.i.h.bf16 %v16914_v18  ;;  %v16915_v13 = vunpack.i.l.bf16 %v16914_v18  ;;  %v22457_v18 = vpop.eup %17473 }
 0x91b   : > { %v6249_v2 = vsel %vm502_vm0, %v22457_v18, 0.0  ;;  %v22466_v25 = vpop.eup %17475 }
 0x91c   : > { %v22452_v17 = vpop.xlane.xlu0 %6241  ;;  %v16238_v38 = vpack.c.bf16 %v16916_v7, %v16915_v13  ;;  %v6532_v7 = vmul.f32 %v17470_v56, %v22107_v28  ;;  %v6537_v13 = vmul.f32 %v17472_v36, %v22114_v62  ;;  %v6258_v31 = vsel %vm502_vm0, %v22466_v25, 0.0  ;;  %v25112_v28 = vld [vmem:[#allocation118_spill] sm:$0xff]  ;;  %v25113_v62 = vld [vmem:[#allocation133_spill] sm:$0xff] }
 0x91d   : > { %v25114_v56 = vld [vmem:[#allocation125_spill] sm:$0xff] }
 0x91e   : > { %16239 = vmatprep.subr.bf16.mxu1 %v16238_v38  ;;  %v5659_v4 = vsub.f32 %v25114_v56, %v25113_v62 }
 0x91f   : > { %16241 = vmatpush3.bf16.msra.mxu1 %v16238_v38 }
 0x920   : > { %v16919_v20 = vpop.permute.xlu0 %16918  ;;  %v5893_v38 = vmul.f32 1.442695, %v5659_v4 }
 0x921   : > { %v16921_v48 = vunpack.i.h.bf16 %v16919_v20  ;;  %v16920_v41 = vunpack.i.l.bf16 %v16919_v20  ;;  %v25111_v20 = vld [vmem:[#allocation52_spill] sm:$0xff] }
 0x922   : > { %15187 = vmatmul.mubr.msk.f32.vlgmr.msra.gmra.mrb[108].mxu1 %vm502_vm0, %v6530_v16  ;;  %v25115_v16 = vld [vmem:[#allocation54_spill] sm:$0xff]  ;;  %17477 = vpow2.f32 %v5893_v38 }
 0x923   : > { %v16242_v39 = vpack.c.bf16 %v16921_v48, %v16920_v41  ;;  %15189 = vmatprep.mubr.msk.f32.mxu1 %vm502_vm0, %v6531_v9  ;;  %v25116_v48 = vld [vmem:[#allocation41_spill] sm:$0xff]  ;;  %17479 = vrcp.f32 %v22260_v3 }
 0x924   : > { %v5662_v41 = vsub.f32 %v25116_v48, %v25115_v16  ;;  %17481 = vrcp.f32 %v22342_v24 }
 0x925   : > { %16243 = vmatprep.subr.bf16.mxu0 %v16242_v39  ;;  %17483 = vrcp.f32 %v22310_v11 }
 0x926   : > { %16245 = vmatpush3.bf16.msra.mxu0 %v16242_v39  ;;  %15190 = vmatmul.mubr.msk.f32.gmra.mrb[110].mxu1 %vm502_vm0, %v6532_v7  ;;  %v5899_v7 = vmul.f32 1.442695, %v5662_v41  ;;  %17485 = vrcp.f32 %v22386_v47 }
 0x927   : > { %6250 = vadd.xlane.f32.xlu1 %v6249_v2  ;;  %15214 = vmatprep.mubr.msk.f32.mxu1 %vm502_vm0, %v6537_v13 }
 0x928   : > { %17487 = vpow2.f32 %v5899_v7 }
 0x929   : > { %17489 = vrcp.f32 %v22294_v59 }
 0x92a   : > { %17491 = vrcp.f32 %v22300_v8 }
 0x92b   : > { %17493 = vrcp.f32 %v22350_v23 }
 0x92c   : > { %v22490_v24 = vpop.eup %17477  ;;  %17495 = vrcp.f32 %v22362_v10 }
 0x92d   : > { %v17480_v4 = vpop.eup %17479  ;;  %v6255_v48 = vsel %vm502_vm0, %v22490_v24, 0.0 }
 0x92e   : > { %6259 = vadd.xlane.f32.xlu0 %v6258_v31  ;;  %v17482_v16 = vpop.eup %17481  ;;  %v6534_v47 = vmul.f32 %v17480_v4, %v22118_v15  ;;  %v25122_v4 = vld [vmem:[#allocation45_spill] sm:$0xff] }
 0x92f   : > { %v17484_v41 = vpop.eup %17483 }
 0x930   : > { %v6536_v7 = vmul.f32 %v17484_v41, %v22174_v0  ;;  %v25124_v41 = vld [vmem:[#allocation17_spill] sm:$0xff] }
 0x938   : > { %16943 = vrot.lane.b32.xlu1 %v25111_v20, %s17775_s25 }
 0x944   : > { %16948 = vrot.lane.b32.xlu0 %v25112_v28, %s17775_s25 }
 0x94a   : > { %v22476_v34 = vpop.xlane.xlu1 %6238 }
 0x94e   : > { %v16924_v9 = vpop.permute.xlu1 %16923 }
 0x94f   : > { %v16926_v36 = vunpack.i.h.bf16 %v16924_v9  ;;  %v16925_v39 = vunpack.i.l.bf16 %v16924_v9  ;;  %v6535_v9 = vmul.f32 %v17482_v16, %v22210_v49  ;;  %v25117_v49 = vld [vmem:[#allocation53_spill] sm:$0xff] }
 0x951   : > { %v22482_v13 = vpop.xlane.xlu0 %6247  ;;  %v16250_v2 = vpack.c.bf16 %v16926_v36, %v16925_v39  ;;  %v17486_v36 = vpop.eup %17485 }
 0x952   : > { %v22501_v39 = vpop.eup %17487 }
 0x953   : > { %16251 = vmatprep.subr.bf16.mxu1 %v16250_v2  ;;  %v6264_v15 = vsel %vm502_vm0, %v22501_v39, 0.0 }
 0x954   : > { %16253 = vmatpush3.bf16.msra.mxu1 %v16250_v2  ;;  %v6541_v2 = vmul.f32 %v17486_v36, %v22274_v58  ;;  %v25121_v58 = vld [vmem:[#allocation145_spill] sm:$0xff]  ;;  %v25125_v36 = vld [vmem:[#allocation80_spill] sm:$0xff] }
 0x955   : > { %v16929_v31 = vpop.permute.xlu0 %16928  ;;  %v22486_v20 = vpop.f32.mrb[124].mxu0  ;;  %v5663_v16 = vsub.f32 %v25122_v4, %v25121_v58 }
 0x956   : > { %v16931_v3 = vunpack.i.h.bf16 %v16929_v31  ;;  %v16930_v28 = vunpack.i.l.bf16 %v16929_v31  ;;  %v22488_v62 = vpop.f32.mrb[125].mxu0  ;;  %v25118_v31 = vld [vmem:[#allocation61_spill] sm:$0xff]  ;;  %v17490_v4 = vpop.eup %17489 }
 0x957   : > { %v5901_v59 = vmul.f32 1.442695, %v5663_v16 }
 0x958   : > { %v16246_v56 = vpack.c.bf16 %v16931_v3, %v16930_v28  ;;  %v25119_v3 = vld [vmem:[#allocation123_spill] sm:$0xff] }
 0x959   : > { %v22492_v38 = vpop.f32.mrb[126].mxu0  ;;  %v25120_v28 = vld [vmem:[#allocation3_spill] sm:$0xff] }
 0x95a   : > { %v22494_v11 = vpop.f32.mrb[127].mxu0  ;;  %16247 = vmatprep.subr.bf16.mxu0 %v16246_v56 }
 0x95b   : > { %16249 = vmatpush3.bf16.msra.mxu0 %v16246_v56  ;;  %v5661_v56 = vsub.f32 %v25120_v28, %v25119_v3 }
 0x95c   : > { %6256 = vadd.xlane.f32.xlu1 %v6255_v48  ;;  %v25123_v48 = vld [vmem:[#allocation143_spill] sm:$0xff] }
 0x95d   : > { %v5897_v0 = vmul.f32 1.442695, %v5661_v56 }
 0x95e   : > { %15201 = vmatmul.mubr.msk.f32.vlgmr.msra.gmra.mrb[132].mxu0 %vm502_vm0, %v6534_v47 }
 0x95f   : > { %15203 = vmatprep.mubr.msk.f32.mxu0 %vm502_vm0, %v6535_v9  ;;  %v5665_v9 = vsub.f32 %v25124_v41, %v25123_v48  ;;  %17497 = vpow2.f32 %v5897_v0  ;;  %v17492_v0 = vpop.eup %17491  ;;  %v6538_v41 = vmul.f32 %v17490_v4, %v22166_v40 }
 0x960   : > { %17499 = vpow2.f32 %v5901_v59 }
 0x961   : > { %v5905_v28 = vmul.f32 1.442695, %v5665_v9  ;;  %v17494_v9 = vpop.eup %17493 }
 0x962   : > { %15204 = vmatmul.mubr.msk.f32.gmra.mrb[134].mxu0 %vm502_vm0, %v6536_v7  ;;  %v25126_v7 = vld [vmem:[#allocation39_spill] sm:$0xff] }
 0x963   : > { %6265 = vadd.xlane.f32.xlu0 %v6264_v15  ;;  %15228 = vmatprep.mubr.msk.f32.mxu0 %vm502_vm0, %v6541_v2  ;;  %v5664_v2 = vsub.f32 %v25126_v7, %v25125_v36  ;;  %17501 = vpow2.f32 %v5905_v28 }
 0x965   : > { %v5903_v23 = vmul.f32 1.442695, %v5664_v2 }
 0x967   : > { %17503 = vpow2.f32 %v5903_v23 }
 0x968   : > { %17505 = vrcp.f32 %v22366_v63 }
 0x969   : > { %17507 = vrcp.f32 %v22434_v19 }
 0x96a   : > { %17509 = vrcp.f32 %v22404_v5 }
 0x96b   : > { %17511 = vrcp.f32 %v22476_v34 }
 0x96d   : > { %16953 = vrot.lane.b32.xlu1 %v25117_v49, %s17775_s25 }
 0x979   : > { %16958 = vrot.lane.b32.xlu0 %v25118_v31, %s17775_s25 }
 0x97f   : > { %v22520_v47 = vpop.xlane.xlu1 %6244 }
 0x983   : > { %v16934_v15 = vpop.permute.xlu1 %16933  ;;  %v22528_v8 = vpop.f32.mrb[104].mxu1 }
 0x984   : > { %v16936_v49 = vunpack.i.h.bf16 %v16934_v15  ;;  %v16935_v31 = vunpack.i.l.bf16 %v16934_v15  ;;  %v22530_v3 = vpop.f32.mrb[105].mxu1  ;;  %v6539_v15 = vmul.f32 %v17492_v0, %v22170_v51  ;;  %v25127_v0 = vld [vmem:[#allocation62_spill] sm:$0xff] }
 0x986   : > { %v22532_v56 = vpop.xlane.xlu0 %6253  ;;  %v16254_v58 = vpack.c.bf16 %v16936_v49, %v16935_v31  ;;  %v17496_v49 = vpop.eup %17495  ;;  %v6540_v31 = vmul.f32 %v17494_v9, %v22219_v60  ;;  %v25130_v9 = vld [vmem:[#allocation12_spill] sm:$0xff] }
 0x987   : > { %v22534_v10 = vpop.f32.mrb[106].mxu1  ;;  %v22541_v59 = vpop.eup %17497  ;;  %v6545_v40 = vmul.f32 %v17496_v49, %v22226_v33 }
 0x988   : > { %v22536_v48 = vpop.f32.mrb[107].mxu1  ;;  %16255 = vmatprep.subr.bf16.mxu1 %v16254_v58  ;;  %v6261_v28 = vsel %vm502_vm0, %v22541_v59, 0.0  ;;  %v22549_v51 = vpop.eup %17499 }
 0x989   : > { %16257 = vmatpush3.bf16.msra.mxu1 %v16254_v58  ;;  %v22552_v58 = vpop.eup %17501  ;;  %v6267_v4 = vsel %vm502_vm0, %v22549_v51, 0.0 }
 0x98a   : > { %v16939_v16 = vpop.permute.xlu0 %16938  ;;  %v22556_v23 = vpop.eup %17503  ;;  %v6273_v60 = vsel %vm502_vm0, %v22552_v58, 0.0 }
 0x98b   : > { %v16941_v36 = vunpack.i.h.bf16 %v16939_v16  ;;  %v16940_v7 = vunpack.i.l.bf16 %v16939_v16  ;;  %v6270_v33 = vsel %vm502_vm0, %v22556_v23, 0.0  ;;  %v25128_v16 = vld [vmem:[#allocation71_spill] sm:$0xff] }
 0x98c   : > { %15215 = vmatmul.mubr.msk.f32.vlgmr.msra.gmra.mrb[112].mxu1 %vm502_vm0, %v6538_v41 }
 0x98d   : > { %v16258_v2 = vpack.c.bf16 %v16941_v36, %v16940_v7  ;;  %15217 = vmatprep.mubr.msk.f32.mxu1 %vm502_vm0, %v6539_v15  ;;  %v25129_v36 = vld [vmem:[#allocation58_spill] sm:$0xff] }
 0x98e   : > { %v5669_v7 = vsub.f32 %v25129_v36, %v21688_v30  ;;  %v25131_v15 = vld [vmem:[#allocation10_spill] sm:$0xff] }
 0x98f   : > { %16259 = vmatprep.subr.bf16.mxu0 %v16258_v2  ;;  %v5666_v49 = vsub.f32 %v25131_v15, %v25130_v9  ;;  %v25133_v36 = vld [vmem:[#allocation78_spill] sm:$0xff] }
 0x990   : > { %16261 = vmatpush3.bf16.msra.mxu0 %v16258_v2  ;;  %15218 = vmatmul.mubr.msk.f32.gmra.mrb[114].mxu1 %vm502_vm0, %v6540_v31 }
 0x991   : > { %6262 = vadd.xlane.f32.xlu1 %v6261_v28  ;;  %15242 = vmatprep.mubr.msk.f32.mxu1 %vm502_vm0, %v6545_v40  ;;  %v5913_v28 = vmul.f32 1.442695, %v5669_v7  ;;  %v25134_v7 = vld [vmem:[#allocation93_spill] sm:$0xff] }
 0x992   : > { %v5668_v9 = vsub.f32 %v25134_v7, %v25133_v36 }
 0x993   : > { %17513 = vpow2.f32 %v5913_v28 }
 0x995   : > { %6268 = vadd.xlane.f32.xlu1 %v6267_v4 }
 0x998   : > { %6274 = vadd.xlane.f32.xlu0 %v6273_v60 }
 0x999   : > { %6271 = vadd.xlane.f32.xlu1 %v6270_v33  ;;  %v5907_v33 = vmul.f32 1.442695, %v5666_v49  ;;  %v17506_v49 = vpop.eup %17505 }
 0x99a   : > { %v6542_v5 = vmul.f32 %v17506_v49, %v22230_v50 }
 0x99b   : > { %17515 = vpow2.f32 %v5907_v33 }
 0x9aa   : > { %16963 = vrot.lane.b32.xlu1 %v25127_v0, %s17775_s25  ;;  %v25132_v0 = vld [vmem:[#allocation11_spill] sm:$0xff] }
 0x9ae   : > { %16968 = vrot.lane.b32.xlu0 %v25128_v16, %s17775_s25  ;;  %v5667_v16 = vsub.f32 %v25132_v0, %v21661_v6  ;;  %v5911_v6 = vmul.f32 1.442695, %v5668_v9 }
 0x9b0   : > { %v5909_v15 = vmul.f32 1.442695, %v5667_v16 }
 0x9b2   : > { %17517 = vpow2.f32 %v5909_v15  ;;  %v25137_v15 = vld [vmem:[#allocation79_spill] sm:$0xff] }
 0x9b3   : > { %17519 = vpow2.f32 %v5911_v6  ;;  %v25140_v6 = vld [vmem:[#allocation132_spill] sm:$0xff] }
 0x9b4   : > { %v22566_v41 = vpop.xlane.xlu1 %6250  ;;  %17521 = vrcp.f32 %v22392_v26  ;;  %v25142_v26 = vld [vmem:[#allocation5_spill] sm:$0xff] }
 0x9b5   : > { %17523 = vrcp.f32 %v22396_v22 }
 0x9b6   : > { %17525 = vrcp.f32 %v22442_v29 }
 0x9b7   : > { %17527 = vrcp.f32 %v22566_v41 }
 0x9b8   : > { %v16944_v2 = vpop.permute.xlu1 %16943 }
 0x9b9   : > { %v16946_v31 = vunpack.i.h.bf16 %v16944_v2  ;;  %v16945_v40 = vunpack.i.l.bf16 %v16944_v2 }
 0x9bb   : > { %v22574_v4 = vpop.xlane.xlu0 %6259  ;;  %v16266_v60 = vpack.c.bf16 %v16946_v31, %v16945_v40  ;;  %v17508_v31 = vpop.eup %17507 }
 0x9bc   : > { %v17510_v34 = vpop.eup %17509  ;;  %v6543_v28 = vmul.f32 %v17508_v31, %v22320_v45  ;;  %v25139_v31 = vld [vmem:[#allocation111_spill] sm:$0xff] }
 0x9bd   : > { %16267 = vmatprep.subr.bf16.mxu1 %v16266_v60  ;;  %v6544_v16 = vmul.f32 %v17510_v34, %v22286_v1 }
 0x9be   : > { %16269 = vmatpush3.bf16.msra.mxu1 %v16266_v60  ;;  %v17512_v60 = vpop.eup %17511 }
 0x9bf   : > { %v16949_v30 = vpop.permute.xlu0 %16948  ;;  %v22589_v0 = vpop.eup %17513 }
 0x9c0   : > { %v16951_v63 = vunpack.i.h.bf16 %v16949_v30  ;;  %v16950_v19 = vunpack.i.l.bf16 %v16949_v30  ;;  %v22593_v30 = vpop.eup %17515  ;;  %v6285_v45 = vsel %vm502_vm0, %v22589_v0, 0.0 }
 0x9c1   : > { %v6276_v36 = vsel %vm502_vm0, %v22593_v30, 0.0  ;;  %v22606_v1 = vpop.eup %17517 }
 0x9c2   : > { %v16262_v2 = vpack.c.bf16 %v16951_v63, %v16950_v19  ;;  %v6549_v63 = vmul.f32 %v17512_v60, %v22376_v57  ;;  %v6279_v7 = vsel %vm502_vm0, %v22606_v1, 0.0  ;;  %v22610_v57 = vpop.eup %17519 }
 0x9c3   : > { %v6282_v9 = vsel %vm502_vm0, %v22610_v57, 0.0  ;;  %v17522_v22 = vpop.eup %17521 }
 0x9c4   : > { %16263 = vmatprep.subr.bf16.mxu0 %v16262_v2  ;;  %v6546_v29 = vmul.f32 %v17522_v22, %v22278_v46 }
 0x9c5   : > { %16265 = vmatpush3.bf16.msra.mxu0 %v16262_v2  ;;  %v25138_v2 = vld [vmem:[#allocation72_spill] sm:$0xff] }
 0x9c7   : > { %v22583_v40 = vpop.f32.mrb[128].mxu0 }
 0x9c8   : > { %v22586_v33 = vpop.f32.mrb[129].mxu0  ;;  %15229 = vmatmul.mubr.msk.f32.vlgmr.msra.gmra.mrb[136].mxu0 %vm502_vm0, %v6542_v5  ;;  %v5672_v5 = vsub.f32 %v25140_v6, %v25139_v31 }
 0x9c9   : > { %15231 = vmatprep.mubr.msk.f32.mxu0 %vm502_vm0, %v6543_v28 }
 0x9cb   : > { %v22595_v50 = vpop.f32.mrb[130].mxu0 }
 0x9cc   : > { %25135 = vst [vmem:[#allocation151_spill] sm:$0xff] %v22595_v50  ;;  %v22598_v19 = vpop.f32.mrb[131].mxu0  ;;  %15232 = vmatmul.mubr.msk.f32.gmra.mrb[138].mxu0 %vm502_vm0, %v6544_v16  ;;  %v5919_v16 = vmul.f32 1.442695, %v5672_v5  ;;  %v25144_v5 = vld [vmem:[#allocation74_spill] sm:$0xff] }
 0x9cd   : > { %25136 = vst [vmem:[#allocation66_spill] sm:$0xff] %v22598_v19  ;;  %6286 = vadd.xlane.f32.xlu0 %v6285_v45  ;;  %15256 = vmatprep.mubr.msk.f32.mxu0 %vm502_vm0, %v6549_v63  ;;  %v25141_v63 = vld [vmem:[#allocation178_spill] sm:$0xff] }
 0x9ce   : > { %6277 = vadd.xlane.f32.xlu1 %v6276_v36  ;;  %v5674_v45 = vsub.f32 %v25142_v26, %v25141_v63  ;;  %17529 = vpow2.f32 %v5919_v16 }
 0x9d2   : > { %6280 = vadd.xlane.f32.xlu1 %v6279_v7 }
 0x9d6   : > { %6283 = vadd.xlane.f32.xlu1 %v6282_v9  ;;  %v17524_v9 = vpop.eup %17523 }
 0x9d7   : > { %v17526_v6 = vpop.eup %17525  ;;  %v6547_v63 = vmul.f32 %v17524_v9, %v22282_v61 }
 0x9d8   : > { %v6548_v46 = vmul.f32 %v17526_v6, %v22329_v32 }
 0x9e3   : > { %16978 = vrot.lane.b32.xlu0 %v25137_v15, %s17775_s25  ;;  %v5923_v15 = vmul.f32 1.442695, %v5674_v45  ;;  %v25147_v45 = vld [vmem:[#allocation148_spill] sm:$0xff] }
 0x9e5   : > { %17531 = vpow2.f32 %v5923_v15 }
 0x9e7   : > { %16973 = vrot.lane.b32.xlu1 %v25138_v2, %s17775_s25 }
 0x9e9   : > { %v22620_v49 = vpop.xlane.xlu1 %6256 }
 0x9ed   : > { %v16954_v34 = vpop.permute.xlu1 %16953 }
 0x9ee   : > { %v16956_v28 = vunpack.i.h.bf16 %v16954_v34  ;;  %v16955_v60 = vunpack.i.l.bf16 %v16954_v34  ;;  %v25143_v34 = vld [vmem:[#allocation4_spill] sm:$0xff] }
 0x9ef   : > { %v5670_v50 = vsub.f32 %v25144_v5, %v25143_v34  ;;  %v25151_v5 = vld [vmem:[#allocation16_spill] sm:$0xff] }
 0x9f0   : > { %v22628_v36 = vpop.xlane.xlu0 %6265  ;;  %v16270_v7 = vpack.c.bf16 %v16956_v28, %v16955_v60  ;;  %v17528_v28 = vpop.eup %17527 }
 0x9f1   : > { %v5915_v16 = vmul.f32 1.442695, %v5670_v50  ;;  %v6553_v61 = vmul.f32 %v17528_v28, %v22457_v18  ;;  %v22650_v15 = vpop.eup %17529  ;;  %v25152_v28 = vld [vmem:[#allocation81_spill] sm:$0xff] }
 0x9f2   : > { %16271 = vmatprep.subr.bf16.mxu1 %v16270_v7  ;;  %v6294_v32 = vsel %vm502_vm0, %v22650_v15, 0.0  ;;  %v22654_v50 = vpop.eup %17531 }
 0x9f3   : > { %16273 = vmatpush3.bf16.msra.mxu1 %v16270_v7  ;;  %v25148_v7 = vld [vmem:[#allocation2_spill] sm:$0xff]  ;;  %17533 = vpow2.f32 %v5915_v16  ;;  %v6300_v18 = vsel %vm502_vm0, %v22654_v50, 0.0 }
 0x9f4   : > { %v16959_v2 = vpop.permute.xlu0 %16958  ;;  %v5671_v22 = vsub.f32 %v25148_v7, %v25147_v45  ;;  %v25154_v16 = vld [vmem:[#allocation142_spill] sm:$0xff] }
 0x9f5   : > { %v16961_v41 = vunpack.i.h.bf16 %v16959_v2  ;;  %v16960_v31 = vunpack.i.l.bf16 %v16959_v2  ;;  %v22633_v19 = vpop.f32.mrb[108].mxu1 }
 0x9f6   : > { %25145 = vst [vmem:[#allocation136_spill] sm:$0xff] %v22633_v19  ;;  %v22636_v26 = vpop.f32.mrb[109].mxu1  ;;  %15243 = vmatmul.mubr.msk.f32.vlgmr.msra.gmra.mrb[116].mxu1 %vm502_vm0, %v6546_v29  ;;  %v5917_v29 = vmul.f32 1.442695, %v5671_v22  ;;  %v25157_v19 = vld [vmem:[#allocation173_spill] sm:$0xff] }
 0x9f7   : > { %v16274_v60 = vpack.c.bf16 %v16961_v41, %v16960_v31  ;;  %25146 = vst [vmem:[#allocation120_spill] sm:$0xff] %v22636_v26  ;;  %15245 = vmatprep.mubr.msk.f32.mxu1 %vm502_vm0, %v6547_v63 }
 0x9f8   : > { %17535 = vpow2.f32 %v5917_v29  ;;  %v25155_v29 = vld [vmem:[#allocation126_spill] sm:$0xff] }
 0x9f9   : > { %16275 = vmatprep.subr.bf16.mxu0 %v16274_v60  ;;  %v22643_v2 = vpop.f32.mrb[110].mxu1  ;;  %17537 = vrcp.f32 %v22452_v17 }
 0x9fa   : > { %25149 = vst [vmem:[#allocation119_spill] sm:$0xff] %v22643_v2  ;;  %16277 = vmatpush3.bf16.msra.mxu0 %v16274_v60  ;;  %v22646_v9 = vpop.f32.mrb[111].mxu1  ;;  %15246 = vmatmul.mubr.msk.f32.gmra.mrb[118].mxu1 %vm502_vm0, %v6548_v46  ;;  %v25153_v46 = vld [vmem:[#allocation103_spill] sm:$0xff]  ;;  %17539 = vrcp.f32 %v22520_v47 }
 0x9fb   : > { %25150 = vst [vmem:[#allocation146_spill] sm:$0xff] %v22646_v9  ;;  %15270 = vmatprep.mubr.msk.f32.mxu1 %vm502_vm0, %v6553_v61  ;;  %v5676_v45 = vsub.f32 %v25154_v16, %v25153_v46  ;;  %17541 = vrcp.f32 %v22482_v13 }
 0x9fd   : > { %v22658_v41 = vpop.eup %17533  ;;  %v5927_v61 = vmul.f32 1.442695, %v5676_v45  ;;  %v25158_v45 = vld [vmem:[#allocation112_spill] sm:$0xff] }
 0x9fe   : > { %v6288_v31 = vsel %vm502_vm0, %v22658_v41, 0.0  ;;  %v5673_v26 = vsub.f32 %v25158_v45, %v25157_v19 }
 0xa02   : > { %6295 = vadd.xlane.f32.xlu0 %v6294_v32  ;;  %v22662_v6 = vpop.eup %17535  ;;  %v25156_v32 = vld [vmem:[#allocation114_spill] sm:$0xff] }
 0xa03   : > { %v6291_v34 = vsel %vm502_vm0, %v22662_v6, 0.0  ;;  %v17538_v47 = vpop.eup %17537 }
 0xa06   : > { %6301 = vadd.xlane.f32.xlu0 %v6300_v18  ;;  %v5678_v18 = vsub.f32 %v25156_v32, %v25155_v29  ;;  %v17540_v29 = vpop.eup %17539 }
 0xa08   : > { %v5931_v2 = vmul.f32 1.442695, %v5678_v18  ;;  %v25159_v18 = vld [vmem:[#allocation90_spill] sm:$0xff] }
 0xa0b   : > { %6289 = vadd.xlane.f32.xlu1 %v6288_v31 }
 0xa0f   : > { %6292 = vadd.xlane.f32.xlu1 %v6291_v34 }
 0xa1c   : > { %16988 = vrot.lane.b32.xlu0 %v25151_v5, %s17775_s25 }
 0xa1e   : > { %v6263_v63 = vpop.xlane.xlu1 %6262 }
 0xa1f   : > { %17543 = vrcp.f32 %v6263_v63  ;;  %v6550_v63 = vmul.f32 %v17538_v47, %v22336_v53 }
 0xa20   : > { %16983 = vrot.lane.b32.xlu1 %v25152_v28, %s17775_s25  ;;  %17545 = vpow2.f32 %v5927_v61  ;;  %v5921_v61 = vmul.f32 1.442695, %v5673_v26 }
 0xa21   : > { %17547 = vpow2.f32 %v5931_v2 }
 0xa22   : > { %v22670_v60 = vpop.xlane.xlu1 %6268  ;;  %17549 = vpow2.f32 %v5921_v61 }
 0xa25   : > { %v22675_v7 = vpop.xlane.xlu0 %6274 }
 0xa26   : > { %v22678_v22 = vpop.xlane.xlu1 %6271 }
 0xa29   : > { %v16969_v31 = vpop.permute.xlu0 %16968 }
 0xa2a   : > { %v16971_v34 = vunpack.i.h.bf16 %v16969_v31  ;;  %v16970_v5 = vunpack.i.l.bf16 %v16969_v31  ;;  %v16964_v28 = vpop.permute.xlu1 %16963  ;;  %v17542_v31 = vpop.eup %17541 }
 0xa2b   : > { %v16966_v16 = vunpack.i.h.bf16 %v16964_v28  ;;  %v16965_v17 = vunpack.i.l.bf16 %v16964_v28  ;;  %v6551_v28 = vmul.f32 %v17540_v29, %v22412_v21  ;;  %v6552_v53 = vmul.f32 %v17542_v31, %v22380_v27  ;;  %v25164_v31 = vld [vmem:[#allocation21_spill] sm:$0xff] }
 0xa2c   : > { %v16282_v46 = vpack.c.bf16 %v16971_v34, %v16970_v5  ;;  %v25160_v34 = vld [vmem:[#allocation63_spill] sm:$0xff] }
 0xa2d   : > { %v16278_v9 = vpack.c.bf16 %v16966_v16, %v16965_v17  ;;  %v5675_v5 = vsub.f32 %v25160_v34, %v25159_v18  ;;  %v17544_v16 = vpop.eup %17543  ;;  %v25165_v34 = vld [vmem:[#allocation92_spill] sm:$0xff] }
 0xa2e   : > { %16283 = vmatprep.subr.bf16.mxu1 %v16282_v46 }
 0xa2f   : > { %16285 = vmatpush3.bf16.msra.mxu1 %v16282_v46  ;;  %16279 = vmatprep.subr.bf16.mxu0 %v16278_v9  ;;  %v5925_v26 = vmul.f32 1.442695, %v5675_v5  ;;  %v6557_v46 = vmul.f32 %v17544_v16, %v22541_v59  ;;  %v25166_v5 = vld [vmem:[#allocation25_spill] sm:$0xff] }
 0xa30   : > { %16281 = vmatpush3.bf16.msra.mxu0 %v16278_v9  ;;  %v22700_v9 = vpop.eup %17545 }
 0xa31   : > { %v22685_v13 = vpop.f32.mrb[132].mxu0  ;;  %v6306_v21 = vsel %vm502_vm0, %v22700_v9, 0.0  ;;  %v22707_v17 = vpop.eup %17547  ;;  %17551 = vpow2.f32 %v5925_v26 }
 0xa32   : > { %v22688_v32 = vpop.f32.mrb[133].mxu0  ;;  %v6312_v27 = vsel %vm502_vm0, %v22707_v17, 0.0  ;;  %v22711_v47 = vpop.eup %17549  ;;  %17553 = vrcp.f32 %v22532_v56 }
 0xa33   : > { %15257 = vmatmul.mubr.msk.f32.vlgmr.msra.gmra.mrb[140].mxu0 %vm502_vm0, %v6550_v63  ;;  %v6297_v59 = vsel %vm502_vm0, %v22711_v47, 0.0  ;;  %v25163_v63 = vld [vmem:[#allocation97_spill] sm:$0xff]  ;;  %17555 = vrcp.f32 %v22620_v49 }
 0xa34   : > { %15259 = vmatprep.mubr.msk.f32.mxu0 %vm502_vm0, %v6551_v28  ;;  %v5680_v28 = vsub.f32 %v25166_v5, %v25165_v34  ;;  %v25171_v5 = vld [vmem:[#allocation22_spill] sm:$0xff] }
 0xa35   : > { %v22694_v19 = vpop.f32.mrb[134].mxu0 }
 0xa36   : > { %25161 = vst [vmem:[#allocation51_spill] sm:$0xff] %v22694_v19  ;;  %v22697_v2 = vpop.f32.mrb[135].mxu0  ;;  %v25173_v19 = vld [vmem:[#allocation104_spill] sm:$0xff] }
 0xa37   : > { %25162 = vst [vmem:[#allocation23_spill] sm:$0xff] %v22697_v2  ;;  %15260 = vmatmul.mubr.msk.f32.gmra.mrb[142].mxu0 %vm502_vm0, %v6552_v53  ;;  %v25174_v2 = vld [vmem:[#allocation75_spill] sm:$0xff] }
 0xa38   : > { %15284 = vmatprep.mubr.msk.f32.mxu0 %vm502_vm0, %v6557_v46 }
 0xa3b   : > { %6307 = vadd.xlane.f32.xlu0 %v6306_v21  ;;  %v22715_v45 = vpop.eup %17551 }
 0xa3c   : > { %v6303_v29 = vsel %vm502_vm0, %v22715_v45, 0.0 }
 0xa3f   : > { %6313 = vadd.xlane.f32.xlu0 %v6312_v27  ;;  %v5935_v27 = vmul.f32 1.442695, %v5680_v28  ;;  %v25172_v28 = vld [vmem:[#allocation169_spill] sm:$0xff] }
 0xa41   : > { %17557 = vpow2.f32 %v5935_v27 }
 0xa42   : > { %17559 = vrcp.f32 %v22574_v4 }
 0xa43   : > { %17561 = vrcp.f32 %v22675_v7 }
 0xa44   : > { %6298 = vadd.xlane.f32.xlu1 %v6297_v59 }
 0xa48   : > { %6304 = vadd.xlane.f32.xlu1 %v6303_v29 }
 0xa55   : > { %16998 = vrot.lane.b32.xlu0 %v25163_v63, %s17775_s25 }
 0xa59   : > { %16993 = vrot.lane.b32.xlu1 %v25164_v31, %s17775_s25 }
 0xa5a   : > { %v22723_v61 = vpop.xlane.xlu0 %6286 }
 0xa5b   : > { %v22725_v18 = vpop.xlane.xlu1 %6277 }
 0xa5e   : > { %v16979_v16 = vpop.permute.xlu0 %16978 }
 0xa5f   : > { %v16981_v53 = vunpack.i.h.bf16 %v16979_v16  ;;  %v16980_v26 = vunpack.i.l.bf16 %v16979_v16  ;;  %v22729_v46 = vpop.xlane.xlu1 %6280  ;;  %v22731_v21 = vpop.f32.mrb[112].mxu1  ;;  %v5677_v16 = vsub.f32 %v25172_v28, %v25171_v5 }
 0xa60   : > { %25167 = vst [vmem:[#allocation122_spill] sm:$0xff] %v22731_v21  ;;  %v22733_v29 = vpop.f32.mrb[113].mxu1  ;;  %v17554_v21 = vpop.eup %17553 }
 0xa61   : > { %v16290_v59 = vpack.c.bf16 %v16981_v53, %v16980_v26  ;;  %25168 = vst [vmem:[#allocation57_spill] sm:$0xff] %v22733_v29  ;;  %v5929_v29 = vmul.f32 1.442695, %v5677_v16  ;;  %v6554_v4 = vmul.f32 %v17554_v21, %v22419_v54 }
 0xa63   : > { %16291 = vmatprep.subr.bf16.mxu0 %v16290_v59  ;;  %v22737_v63 = vpop.xlane.xlu1 %6283  ;;  %v22739_v31 = vpop.f32.mrb[114].mxu1  ;;  %17563 = vpow2.f32 %v5929_v29 }
 0xa64   : > { %25169 = vst [vmem:[#allocation33_spill] sm:$0xff] %v22739_v31  ;;  %16293 = vmatpush3.bf16.msra.mxu0 %v16290_v59  ;;  %v22741_v34 = vpop.f32.mrb[115].mxu1  ;;  %v5679_v31 = vsub.f32 %v25174_v2, %v25173_v19  ;;  %v17556_v59 = vpop.eup %17555 }
 0xa65   : > { %25170 = vst [vmem:[#allocation130_spill] sm:$0xff] %v22741_v34  ;;  %v22749_v27 = vpop.eup %17557  ;;  %v6555_v5 = vmul.f32 %v17556_v59, %v22490_v24 }
 0xa66   : > { %v17560_v7 = vpop.eup %17559  ;;  %v5933_v34 = vmul.f32 1.442695, %v5679_v31  ;;  %v6318_v19 = vsel %vm502_vm0, %v22749_v27, 0.0 }
 0xa67   : > { %v16974_v53 = vpop.permute.xlu1 %16973  ;;  %v17562_v28 = vpop.eup %17561  ;;  %v6556_v2 = vmul.f32 %v17560_v7, %v22466_v25 }
 0xa68   : > { %v16976_v56 = vunpack.i.h.bf16 %v16974_v53  ;;  %v16975_v26 = vunpack.i.l.bf16 %v16974_v53  ;;  %17565 = vpow2.f32 %v5933_v34  ;;  %v6561_v16 = vmul.f32 %v17562_v28, %v22552_v58  ;;  %v25175_v58 = vld [vmem:[#allocation98_spill] sm:$0xff] }
 0xa69   : > { %v25176_v34 = vld [vmem:[#allocation106_spill] sm:$0xff]  ;;  %17567 = vrcp.f32 %v22628_v36 }
 0xa6a   : > { %v16286_v49 = vpack.c.bf16 %v16976_v56, %v16975_v26  ;;  %17569 = vrcp.f32 %v22670_v60 }
 0xa6b   : > { %17571 = vrcp.f32 %v22678_v22 }
 0xa6c   : > { %16287 = vmatprep.subr.bf16.mxu1 %v16286_v49  ;;  %17573 = vrcp.f32 %v22723_v61 }
 0xa6d   : > { %16289 = vmatpush3.bf16.msra.mxu1 %v16286_v49  ;;  %v22761_v54 = vpop.eup %17563  ;;  %17575 = vrcp.f32 %v22725_v18 }
 0xa6e   : > { %v6309_v24 = vsel %vm502_vm0, %v22761_v54, 0.0  ;;  %17577 = vrcp.f32 %v22729_v46 }
 0xa6f   : > { %17579 = vrcp.f32 %v22737_v63 }
 0xa70   : > { %15271 = vmatmul.mubr.msk.f32.vlgmr.msra.gmra.mrb[120].mxu1 %vm502_vm0, %v6554_v4  ;;  %v25177_v4 = vld [vmem:[#allocation109_spill] sm:$0xff] }
 0xa71   : > { %15273 = vmatprep.mubr.msk.f32.mxu1 %vm502_vm0, %v6555_v5 }
 0xa72   : > { %v22765_v21 = vpop.eup %17565 }
 0xa73   : > { %v6315_v29 = vsel %vm502_vm0, %v22765_v21, 0.0 }
 0xa74   : > { %6319 = vadd.xlane.f32.xlu0 %v6318_v19  ;;  %15274 = vmatmul.mubr.msk.f32.gmra.mrb[122].mxu1 %vm502_vm0, %v6556_v2  ;;  %v25178_v19 = vld [vmem:[#allocation28_spill] sm:$0xff] }
 0xa75   : > { %15298 = vmatprep.mubr.msk.f32.mxu1 %vm502_vm0, %v6561_v16 }
 0xa7d   : > { %6310 = vadd.xlane.f32.xlu1 %v6309_v24 }
 0xa81   : > { %6316 = vadd.xlane.f32.xlu1 %v6315_v29  ;;  %v25179_v29 = vld [vmem:[#allocation121_spill] sm:$0xff] }
 0xa8f   : > { %v22769_v25 = vpop.xlane.xlu0 %6295 }
 0xa92   : > { %17003 = vrot.lane.b32.xlu1 %v25175_v58, %s17775_s25 }
 0xa93   : > { %v22773_v31 = vpop.xlane.xlu0 %6301 }
 0xa96   : > { %17008 = vrot.lane.b32.xlu1 %v25176_v34, %s17775_s25  ;;  %v17568_v34 = vpop.eup %17567 }
 0xa97   : > { %v16989_v53 = vpop.permute.xlu0 %16988  ;;  %v6558_v22 = vmul.f32 %v17568_v34, %v22501_v39 }
 0xa98   : > { %v16991_v56 = vunpack.i.h.bf16 %v16989_v53  ;;  %v16990_v26 = vunpack.i.l.bf16 %v16989_v53  ;;  %v22777_v49 = vpop.xlane.xlu1 %6289  ;;  %v17570_v53 = vpop.eup %17569 }
 0xa9a   : > { %v16298_v59 = vpack.c.bf16 %v16991_v56, %v16990_v26  ;;  %17013 = vrot.lane.b32.xlu1 %v25177_v4, %s17775_s25  ;;  %v17572_v56 = vpop.eup %17571  ;;  %v6559_v26 = vmul.f32 %v17570_v53, %v22549_v51 }
 0xa9b   : > { %v22782_v7 = vpop.f32.mrb[136].mxu0  ;;  %v6560_v61 = vmul.f32 %v17572_v56, %v22556_v23 }
 0xa9c   : > { %v22785_v5 = vpop.f32.mrb[137].mxu0  ;;  %16299 = vmatprep.subr.bf16.mxu1 %v16298_v59  ;;  %v22787_v28 = vpop.xlane.xlu1 %6292 }
 0xa9d   : > { %16301 = vmatpush3.bf16.msra.mxu1 %v16298_v59  ;;  %v17574_v59 = vpop.eup %17573 }
 0xa9e   : > { %17018 = vrot.lane.b32.xlu1 %v25178_v19, %s17775_s25  ;;  %v6565_v4 = vmul.f32 %v17574_v59, %v22589_v0 }
 0xa9f   : > { %v22792_v2 = vpop.f32.mrb[138].mxu0 }
 0xaa0   : > { %v22795_v36 = vpop.f32.mrb[139].mxu0  ;;  %v16984_v16 = vpop.permute.xlu1 %16983 }
 0xaa1   : > { %v16986_v24 = vunpack.i.h.bf16 %v16984_v16  ;;  %v16985_v60 = vunpack.i.l.bf16 %v16984_v16 }
 0xaa2   : > { %17023 = vrot.lane.b32.xlu1 %v25179_v29, %s17775_s25 }
 0xaa3   : > { %v16294_v58 = vpack.c.bf16 %v16986_v24, %v16985_v60 }
 0xaa5   : > { %16295 = vmatprep.subr.bf16.mxu0 %v16294_v58 }
 0xaa6   : > { %16297 = vmatpush3.bf16.msra.mxu0 %v16294_v58 }
 0xaa9   : > { %15285 = vmatmul.mubr.msk.f32.vlgmr.msra.gmra.mrb[144].mxu0 %vm502_vm0, %v6558_v22 }
 0xaaa   : > { %15287 = vmatprep.mubr.msk.f32.mxu0 %vm502_vm0, %v6559_v26 }
 0xaad   : > { %15288 = vmatmul.mubr.msk.f32.gmra.mrb[146].mxu0 %vm502_vm0, %v6560_v61  ;;  %v17576_v61 = vpop.eup %17575 }
 0xaae   : > { %15312 = vmatprep.mubr.msk.f32.mxu0 %vm502_vm0, %v6565_v4  ;;  %v17578_v4 = vpop.eup %17577 }
 0xaaf   : > { %v6563_v18 = vmul.f32 %v17578_v4, %v22606_v1 }
 0xac8   : > { %v6308_v19 = vpop.xlane.xlu0 %6307 }
 0xac9   : > { %v22807_v16 = vpop.f32.mrb[116].mxu1 }
 0xaca   : > { %v22809_v39 = vpop.f32.mrb[117].mxu1 }
 0xacc   : > { %v22811_v24 = vpop.xlane.xlu0 %6313 }
 0xacd   : > { %v22813_v51 = vpop.f32.mrb[118].mxu1 }
 0xace   : > { %v22815_v60 = vpop.f32.mrb[119].mxu1 }
 0xad0   : > { %v16999_v29 = vpop.permute.xlu0 %16998 }
 0xad1   : > { %v17001_v58 = vunpack.i.h.bf16 %v16999_v29  ;;  %v17000_v23 = vunpack.i.l.bf16 %v16999_v29  ;;  %v6299_v34 = vpop.xlane.xlu1 %6298  ;;  %v6562_v29 = vmul.f32 %v17576_v61, %v22593_v30 }
 0xad2   : > { %17581 = vrcp.f32 %v6299_v34 }
 0xad3   : > { %v16306_v0 = vpack.c.bf16 %v17001_v58, %v17000_v23  ;;  %v17580_v58 = vpop.eup %17579  ;;  %17583 = vrcp.f32 %v22777_v49 }
 0xad4   : > { %v6564_v63 = vmul.f32 %v17580_v58, %v22610_v57  ;;  %17585 = vrcp.f32 %v22787_v28 }
 0xad5   : > { %16307 = vmatprep.subr.bf16.mxu0 %v16306_v0  ;;  %v6305_v53 = vpop.xlane.xlu1 %6304  ;;  %17587 = vrcp.f32 %v22769_v25 }
 0xad6   : > { %16309 = vmatpush3.bf16.msra.mxu0 %v16306_v0 }
 0xad9   : > { %v16994_v22 = vpop.permute.xlu1 %16993 }
 0xada   : > { %v16996_v56 = vunpack.i.h.bf16 %v16994_v22  ;;  %v16995_v26 = vunpack.i.l.bf16 %v16994_v22 }
 0xadc   : > { %v16302_v59 = vpack.c.bf16 %v16996_v56, %v16995_v26  ;;  %v17582_v46 = vpop.eup %17581 }
 0xadd   : > { %v6569_v23 = vmul.f32 %v17582_v46, %v22711_v47  ;;  %v17584_v61 = vpop.eup %17583 }
 0xade   : > { %16303 = vmatprep.subr.bf16.mxu1 %v16302_v59  ;;  %v6566_v49 = vmul.f32 %v17584_v61, %v22658_v41 }
 0xadf   : > { %16305 = vmatpush3.bf16.msra.mxu1 %v16302_v59 }
 0xae2   : > { %15299 = vmatmul.mubr.msk.f32.vlgmr.msra.gmra.mrb[124].mxu1 %vm502_vm0, %v6562_v29  ;;  %v17586_v29 = vpop.eup %17585 }
 0xae3   : > { %15301 = vmatprep.mubr.msk.f32.mxu1 %vm502_vm0, %v6563_v18  ;;  %v17588_v28 = vpop.eup %17587 }
 0xae6   : > { %15302 = vmatmul.mubr.msk.f32.gmra.mrb[126].mxu1 %vm502_vm0, %v6564_v63 }
 0xae7   : > { %15326 = vmatprep.mubr.msk.f32.mxu1 %vm502_vm0, %v6569_v23  ;;  %v6567_v23 = vmul.f32 %v17586_v29, %v22662_v6 }
 0xb01   : > { %v6320_v46 = vpop.xlane.xlu0 %6319 }
 0xb06   : > { %v22828_v34 = vpop.f32.mrb[140].mxu0 }
 0xb07   : > { %v22830_v0 = vpop.f32.mrb[141].mxu0 }
 0xb0a   : > { %v6311_v30 = vpop.xlane.xlu1 %6310  ;;  %v22832_v22 = vpop.f32.mrb[142].mxu0 }
 0xb0b   : > { %v22834_v1 = vpop.f32.mrb[143].mxu0  ;;  %17589 = vrcp.f32 %v6311_v30 }
 0xb0c   : > { %17591 = vrcp.f32 %v22773_v31 }
 0xb0d   : > { %17593 = vrcp.f32 %v6305_v53 }
 0xb0e   : > { %v6317_v57 = vpop.xlane.xlu1 %6316  ;;  %17595 = vrcp.f32 %v6308_v19  ;;  %v6568_v19 = vmul.f32 %v17588_v28, %v22650_v15 }
 0xb0f   : > { %17597 = vrcp.f32 %v6317_v57 }
 0xb10   : > { %17599 = vrcp.f32 %v22811_v24 }
 0xb11   : > { %17601 = vrcp.f32 %v6320_v46 }
 0xb12   : > { %v17004_v47 = vpop.permute.xlu1 %17003 }
 0xb13   : > { %v17006_v56 = vunpack.i.h.bf16 %v17004_v47  ;;  %v17005_v26 = vunpack.i.l.bf16 %v17004_v47 }
 0xb15   : > { %v16310_v59 = vpack.c.bf16 %v17006_v56, %v17005_v26  ;;  %v17590_v31 = vpop.eup %17589 }
 0xb16   : > { %v17009_v4 = vpop.permute.xlu1 %17008  ;;  %v17592_v57 = vpop.eup %17591  ;;  %v6573_v56 = vmul.f32 %v17590_v31, %v22761_v54  ;;  %v10068_v31 = vld [vmem:[%s24162_s6 + $0x18] sm:$0xff] }
 0xb17   : > { %v17011_v58 = vunpack.i.h.bf16 %v17009_v4  ;;  %v17010_v18 = vunpack.i.l.bf16 %v17009_v4  ;;  %16311 = vmatprep.subr.bf16.mxu0 %v16310_v59  ;;  %v17594_v6 = vpop.eup %17593  ;;  %v6570_v24 = vmul.f32 %v17592_v57, %v22654_v50  ;;  %v25186_v57 = vld [vmem:[#allocation149_spill] sm:$0xff] }
 0xb18   : > { %16313 = vmatpush3.bf16.msra.mxu0 %v16310_v59  ;;  %v17596_v4 = vpop.eup %17595  ;;  %v6571_v15 = vmul.f32 %v17594_v6, %v22715_v45  ;;  %v10065_v45 = vld [vmem:[%s24162_s6] sm:$0xff]  ;;  %v25189_v6 = vld [vmem:[#allocation129_spill] sm:$0xff] }
 0xb19   : > { %v16314_v25 = vpack.c.bf16 %v17011_v58, %v17010_v18  ;;  %v17598_v58 = vpop.eup %17597 }
 0xb1a   : > { %v17014_v63 = vpop.permute.xlu1 %17013  ;;  %v17600_v50 = vpop.eup %17599  ;;  %v6575_v28 = vmul.f32 %v17598_v58, %v22765_v21  ;;  %v25197_v58 = vld [vmem:[#allocation46_spill] sm:$0xff] }
 0xb1b   : > { %v17016_v53 = vunpack.i.h.bf16 %v17014_v63  ;;  %v17015_v30 = vunpack.i.l.bf16 %v17014_v63  ;;  %15313 = vmatmul.mubr.msk.f32.vlgmr.msra.gmra.mrb[148].mxu0 %vm502_vm0, %v6566_v49  ;;  %16315 = vmatprep.subr.bf16.mxu1 %v16314_v25  ;;  %v17602_v46 = vpop.eup %17601  ;;  %v10066_v63 = vld [vmem:[%s24162_s6 + $0x8] sm:$0xff] }
 0xb1c   : > { %15315 = vmatprep.mubr.msk.f32.mxu0 %vm502_vm0, %v6567_v23  ;;  %16317 = vmatpush3.bf16.msra.mxu1 %v16314_v25  ;;  %v6572_v25 = vmul.f32 %v17596_v4, %v22700_v9  ;;  %v6574_v9 = vmul.f32 %v17600_v50, %v22707_v17  ;;  %v6576_v21 = vmul.f32 %v17602_v46, %v22749_v27  ;;  %v10067_v23 = vld [vmem:[%s24162_s6 + $0x10] sm:$0xff]  ;;  %v25181_v17 = vld [vmem:[#allocation95_spill] sm:$0xff]  ;;  %v25194_v4 = vld [vmem:[#allocation73_spill] sm:$0xff] }
 0xb1d   : > { %v16318_v41 = vpack.c.bf16 %v17016_v53, %v17015_v30  ;;  %v25180_v53 = vld [vmem:[#allocation116_spill] sm:$0xff]  ;;  %v25182_v27 = vld [vmem:[#allocation55_spill] sm:$0xff] }
 0xb1e   : > { %v17019_v47 = vpop.permute.xlu1 %17018  ;;  %v25183_v30 = vld [vmem:[#allocation56_spill] sm:$0xff]  ;;  %v25203_v46 = vld [vmem:[#allocation15_spill] sm:$0xff] }
 0xb1f   : > { %v17021_v26 = vunpack.i.h.bf16 %v17019_v47  ;;  %v17020_v59 = vunpack.i.l.bf16 %v17019_v47  ;;  %15316 = vmatmul.mubr.msk.f32.gmra.mrb[150].mxu0 %vm502_vm0, %v6568_v19  ;;  %16319 = vmatprep.subr.bf16.mxu1 %v16318_v41  ;;  %v25185_v19 = vld [vmem:[#allocation99_spill] sm:$0xff]  ;;  %v25187_v47 = vld [vmem:[#allocation44_spill] sm:$0xff] }
 0xb20   : > { %16321 = vmatpush3.bf16.msra.mxu1 %v16318_v41  ;;  %15340 = vmatprep.mubr.msk.f32.mxu0 %vm502_vm0, %v6573_v56  ;;  %v25184_v41 = vld [vmem:[#allocation124_spill] sm:$0xff]  ;;  %v25188_v56 = vld [vmem:[#allocation167_spill] sm:$0xff] }
 0xb21   : > { %v16322_v61 = vpack.c.bf16 %v17021_v26, %v17020_v59  ;;  %v25190_v26 = vld [vmem:[#allocation166_spill] sm:$0xff] }
 0xb22   : > { %v17024_v29 = vpop.permute.xlu1 %17023  ;;  %v25191_v59 = vld [vmem:[#allocation70_spill] sm:$0xff] }
 0xb23   : > { %v17026_v18 = vunpack.i.h.bf16 %v17024_v29  ;;  %v17025_v49 = vunpack.i.l.bf16 %v17024_v29  ;;  %15327 = vmatmul.mubr.msk.f32.vlgmr.msra.gmra.mrb[128].mxu1 %vm502_vm0, %v6570_v24  ;;  %16323 = vmatprep.subr.bf16.mxu0 %v16322_v61  ;;  %v25192_v24 = vld [vmem:[#allocation13_spill] sm:$0xff]  ;;  %v25195_v29 = vld [vmem:[#allocation24_spill] sm:$0xff] }
 0xb24   : > { %16370 = vmatprep.subr.bf16.mxu1 %v16322_v61  ;;  %15329 = vmatprep.mubr.msk.f32.mxu1 %vm502_vm0, %v6571_v15  ;;  %v25196_v15 = vld [vmem:[#allocation165_spill] sm:$0xff] }
 0xb25   : > { %v16326_v54 = vpack.c.bf16 %v17026_v18, %v17025_v49  ;;  %16325 = vmatpush3.bf16.msra.mxu0 %v16322_v61  ;;  %16372 = vmatpush3.bf16.msra.mxu1 %v16322_v61  ;;  %v25193_v61 = vld [vmem:[#allocation68_spill] sm:$0xff]  ;;  %v25198_v18 = vld [vmem:[#allocation65_spill] sm:$0xff]  ;;  %v25199_v49 = vld [vmem:[#allocation82_spill] sm:$0xff] }
 0xb27   : > { %15330 = vmatmul.mubr.msk.f32.gmra.mrb[130].mxu1 %vm502_vm0, %v6572_v25  ;;  %16327 = vmatprep.subr.bf16.mxu0 %v16326_v54  ;;  %v25201_v25 = vld [vmem:[#allocation101_spill] sm:$0xff] }
 0xb28   : > { %16371 = vmatprep.subr.bf16.mxu1 %v16326_v54  ;;  %15343 = vmatprep.mubr.msk.f32.mxu1 %vm502_vm0, %v6575_v28  ;;  %v25202_v28 = vld [vmem:[#allocation19_spill] sm:$0xff] }
 0xb29   : > { %16329 = vmatpush3.bf16.msra.mxu0 %v16326_v54  ;;  %16373 = vmatpush3.bf16.msra.mxu1 %v16326_v54  ;;  %v25200_v54 = vld [vmem:[#allocation168_spill] sm:$0xff] }
 0xb2a   : > { %15346 = vmatprep.subr.mxu1 %v10065_v45  ;;  %15396 = vmatprep.subr.mxu0 %v10066_v63 }
 0xb2c   : > { %15341 = vmatmul.mubr.msk.f32.vlgmr.msra.gmra.mrb[152].mxu0 %vm502_vm0, %v6574_v9  ;;  %15344 = vmatmul.mubr.msk.f32.vlgmr.msra.gmra.mrb[132].mxu1 %vm502_vm0, %v6576_v21  ;;  %v25205_v9 = vld [vmem:[#allocation110_spill] sm:$0xff] }
 0xb2d   : > { %15348 = vmatprep.mubr.msk.f32.mxu1 %vm1688_vm1, %v25180_v53  ;;  %15398 = vmatprep.mubr.msk.f32.mxu0 %vm1688_vm1, %v25181_v17  ;;  %v25208_v17 = vld [vmem:[#allocation179_spill] sm:$0xff] }
 0xb2e   : > { %15347 = vmatpush3.msra.mxu1 %v10065_v45  ;;  %15397 = vmatpush3.msra.mxu0 %v10066_v63  ;;  %v25204_v63 = vld [vmem:[#allocation177_spill] sm:$0xff] }
 0xb2f   : > { %15446 = vmatprep.subr.mxu1 %v10067_v23  ;;  %15496 = vmatprep.subr.mxu0 %v10068_v31 }
 0xb30   : > { %15349 = vmatmul.mubr.msk.f32.vlgmr.msra.gmra.mrb[134].mxu1 %vm1688_vm1, %v25182_v27  ;;  %15399 = vmatmul.mubr.msk.f32.vlgmr.msra.gmra.mrb[154].mxu0 %vm1688_vm1, %v25183_v30  ;;  %v25209_v27 = vld [vmem:[#allocation117_spill] sm:$0xff]  ;;  %v25210_v30 = vld [vmem:[#allocation83_spill] sm:$0xff] }
 0xb31   : > { %15351 = vmatprep.mubr.msk.f32.mxu1 %vm1688_vm1, %v25184_v41  ;;  %15401 = vmatprep.mubr.msk.f32.mxu0 %vm1688_vm1, %v25185_v19  ;;  %v25211_v41 = vld [vmem:[#allocation36_spill] sm:$0xff]  ;;  %v25212_v19 = vld [vmem:[#allocation170_spill] sm:$0xff] }
 0xb32   : > { %15447 = vmatpush3.msra.mxu1 %v10067_v23  ;;  %15497 = vmatpush3.msra.mxu0 %v10068_v31  ;;  %v25206_v23 = vld [vmem:[#allocation175_spill] sm:$0xff]  ;;  %v25207_v31 = vld [vmem:[#allocation84_spill] sm:$0xff] }
 0xb34   : > { %15352 = vmatmul.mubr.msk.f32.gmra.mrb[136].mxu1 %vm1688_vm1, %v25186_v57  ;;  %15402 = vmatmul.mubr.msk.f32.gmra.mrb[156].mxu0 %vm1688_vm1, %v25187_v47  ;;  %v25213_v57 = vld [vmem:[#allocation31_spill] sm:$0xff]  ;;  %v25214_v47 = vld [vmem:[#allocation134_spill] sm:$0xff] }
 0xb35   : > { %15354 = vmatprep.mubr.msk.f32.mxu1 %vm1688_vm1, %v25188_v56  ;;  %15404 = vmatprep.mubr.msk.f32.mxu0 %vm1688_vm1, %v25189_v6  ;;  %v25215_v56 = vld [vmem:[#allocation172_spill] sm:$0xff] }
 0xb36   : > { %v25216_v6 = vld [vmem:[#allocation48_spill] sm:$0xff] }
 0xb38   : > { %15355 = vmatmul.mubr.msk.f32.gmra.mrb[138].mxu1 %vm1688_vm1, %v25190_v26  ;;  %15405 = vmatmul.mubr.msk.f32.gmra.mrb[158].mxu0 %vm1688_vm1, %v25191_v59  ;;  %v25217_v26 = vld [vmem:[#allocation171_spill] sm:$0xff]  ;;  %v25218_v59 = vld [vmem:[#allocation30_spill] sm:$0xff] }
 0xb39   : > { %15357 = vmatprep.mubr.msk.f32.mxu1 %vm1688_vm1, %v25192_v24  ;;  %15407 = vmatprep.mubr.msk.f32.mxu0 %vm1688_vm1, %v25193_v61  ;;  %v25219_v24 = vld [vmem:[#allocation40_spill] sm:$0xff]  ;;  %v25221_v61 = vld [vmem:[#allocation14_spill] sm:$0xff] }
 0xb3c   : > { %15358 = vmatmul.mubr.msk.f32.gmra.mrb[140].mxu1 %vm1688_vm1, %v25194_v4  ;;  %15408 = vmatmul.mubr.msk.f32.gmra.mrb[160].mxu0 %vm1688_vm1, %v25195_v29  ;;  %v25222_v4 = vld [vmem:[#allocation29_spill] sm:$0xff]  ;;  %v25223_v29 = vld [vmem:[#allocation163_spill] sm:$0xff] }
 0xb3d   : > { %15360 = vmatprep.mubr.msk.f32.mxu1 %vm1688_vm1, %v25196_v15  ;;  %15410 = vmatprep.mubr.msk.f32.mxu0 %vm1688_vm1, %v25197_v58  ;;  %v25224_v15 = vld [vmem:[#allocation160_spill] sm:$0xff]  ;;  %v25225_v58 = vld [vmem:[#allocation7_spill] sm:$0xff] }
 0xb40   : > { %15361 = vmatmul.mubr.msk.f32.gmra.mrb[142].mxu1 %vm1688_vm1, %v25198_v18  ;;  %15411 = vmatmul.mubr.msk.f32.gmra.mrb[162].mxu0 %vm1688_vm1, %v25199_v49  ;;  %v25226_v18 = vld [vmem:[#allocation176_spill] sm:$0xff]  ;;  %v25227_v49 = vld [vmem:[#allocation174_spill] sm:$0xff] }
 0xb41   : > { %15363 = vmatprep.mubr.msk.f32.mxu1 %vm1688_vm1, %v25200_v54  ;;  %15413 = vmatprep.mubr.msk.f32.mxu0 %vm1688_vm1, %v25201_v25  ;;  %v25228_v54 = vld [vmem:[#allocation181_spill] sm:$0xff]  ;;  %v25230_v25 = vld [vmem:[#allocation180_spill] sm:$0xff] }
 0xb43   : > { %v22917_v50 = vpop.f32.mrb[120].mxu1 }
 0xb44   : > { %15364 = vmatmul.mubr.msk.f32.gmra.mrb[144].mxu1 %vm1688_vm1, %v25202_v28  ;;  %15414 = vmatmul.mubr.msk.f32.gmra.mrb[164].mxu0 %vm1688_vm1, %v25203_v46  ;;  %v9501_v45 = vpop.f32.mrb[121].mxu1  ;;  %v25231_v28 = vld [vmem:[#allocation38_spill] sm:$0xff] }
 0xb45   : > { %15366 = vmatprep.mubr.msk.f32.mxu1 %vm1688_vm1, %v25204_v63  ;;  %15416 = vmatprep.mubr.msk.f32.mxu0 %vm1688_vm1, %v25205_v9  ;;  %v25232_v46 = vld [vmem:[#allocation42_spill] sm:$0xff]  ;;  %v25235_v63 = vld [vmem:[#allocation20_spill] sm:$0xff] }
 0xb47   : > { %v22927_v21 = vpop.f32.mrb[122].mxu1 }
 0xb48   : > { %15367 = vmatmul.mubr.msk.f32.gmra.mrb[146].mxu1 %vm1688_vm1, %v25206_v23  ;;  %15417 = vmatmul.mubr.msk.f32.gmra.mrb[166].mxu0 %vm1688_vm1, %v25207_v31  ;;  %v9511_v53 = vpop.f32.mrb[123].mxu1 }
 0xb49   : > { %15369 = vmatprep.mubr.msk.f32.mxu1 %vm1688_vm1, %v25208_v17  ;;  %15419 = vmatprep.mubr.msk.f32.mxu0 %vm1688_vm1, %v25209_v27 }
 0xb4c   : > { %15370 = vmatmul.mubr.msk.f32.gmra.mrb[148].mxu1 %vm1688_vm1, %v25210_v30  ;;  %15420 = vmatmul.mubr.msk.f32.gmra.mrb[168].mxu0 %vm1688_vm1, %v25211_v41 }
 0xb4d   : > { %15372 = vmatprep.mubr.msk.f32.mxu1 %vm1688_vm1, %v25212_v19  ;;  %15422 = vmatprep.mubr.msk.f32.mxu0 %vm1688_vm1, %v22240_v55  ;;  %v25220_v55 = vld [vmem:[#allocation50_spill] sm:$0xff] }
 0xb50   : > { %15373 = vmatmul.mubr.msk.f32.gmra.mrb[150].mxu1 %vm1688_vm1, %v25213_v57  ;;  %15423 = vmatmul.mubr.msk.f32.gmra.mrb[170].mxu0 %vm1688_vm1, %v25214_v47 }
 0xb51   : > { %15375 = vmatprep.mubr.msk.f32.mxu1 %vm1688_vm1, %v25215_v56  ;;  %15425 = vmatprep.mubr.msk.f32.mxu0 %vm1688_vm1, %v25216_v6 }
 0xb54   : > { %15376 = vmatmul.mubr.msk.f32.gmra.mrb[152].mxu1 %vm1688_vm1, %v25217_v26  ;;  %15426 = vmatmul.mubr.msk.f32.gmra.mrb[172].mxu0 %vm1688_vm1, %v25218_v59 }
 0xb55   : > { %15378 = vmatprep.mubr.msk.f32.mxu1 %vm1688_vm1, %v25219_v24  ;;  %15428 = vmatprep.mubr.msk.f32.mxu0 %vm1688_vm1, %v25220_v55 }
 0xb58   : > { %15379 = vmatmul.mubr.msk.f32.gmra.mrb[154].mxu1 %vm1688_vm1, %v25221_v61  ;;  %15429 = vmatmul.mubr.msk.f32.gmra.mrb[174].mxu0 %vm1688_vm1, %v25222_v4 }
 0xb59   : > { %15381 = vmatprep.mubr.msk.f32.mxu1 %vm1688_vm1, %v25223_v29  ;;  %15431 = vmatprep.mubr.msk.f32.mxu0 %vm1688_vm1, %v22314_v35  ;;  %v25229_v35 = vld [vmem:[#allocation115_spill] sm:$0xff] }
 0xb5c   : > { %15382 = vmatmul.mubr.msk.f32.gmra.mrb[156].mxu1 %vm1688_vm1, %v25224_v15  ;;  %15432 = vmatmul.mubr.msk.f32.gmra.mrb[176].mxu0 %vm1688_vm1, %v25225_v58 }
 0xb5d   : > { %15384 = vmatprep.mubr.msk.f32.mxu1 %vm1688_vm1, %v25226_v18  ;;  %15434 = vmatprep.mubr.msk.f32.mxu0 %vm1688_vm1, %v22346_v37  ;;  %v25233_v37 = vld [vmem:[#allocation85_spill] sm:$0xff] }
 0xb60   : > { %15385 = vmatmul.mubr.msk.f32.gmra.mrb[158].mxu1 %vm1688_vm1, %v25227_v49  ;;  %15435 = vmatmul.mubr.msk.f32.gmra.mrb[178].mxu0 %vm1688_vm1, %v22344_v12  ;;  %v25234_v12 = vld [vmem:[#allocation60_spill] sm:$0xff] }
 0xb61   : > { %15387 = vmatprep.mubr.msk.f32.mxu1 %vm1688_vm1, %v25228_v54  ;;  %15437 = vmatprep.mubr.msk.f32.mxu0 %vm1688_vm1, %v25229_v35 }
 0xb64   : > { %15388 = vmatmul.mubr.msk.f32.gmra.mrb[160].mxu1 %vm1688_vm1, %v25230_v25  ;;  %15438 = vmatmul.mubr.msk.f32.gmra.mrb[180].mxu0 %vm1688_vm1, %v25231_v28 }
 0xb65   : > { %15390 = vmatprep.mubr.msk.f32.mxu1 %vm1688_vm1, %v25232_v46  ;;  %15440 = vmatprep.mubr.msk.f32.mxu0 %vm1688_vm1, %v22400_v44  ;;  %v25236_v44 = vld [vmem:[#allocation108_spill] sm:$0xff] }
 0xb68   : > { %15391 = vmatmul.mubr.msk.f32.gmra.mrb[162].mxu1 %vm1688_vm1, %v25233_v37  ;;  %15441 = vmatmul.mubr.msk.f32.gmra.mrb[182].mxu0 %vm1688_vm1, %v22398_v42  ;;  %v25237_v42 = vld [vmem:[#allocation144_spill] sm:$0xff] }
 0xb69   : > { %15393 = vmatprep.mubr.msk.f32.mxu1 %vm1688_vm1, %v25234_v12  ;;  %15443 = vmatprep.mubr.msk.f32.mxu0 %vm1688_vm1, %v22408_v52  ;;  %v25238_v52 = vld [vmem:[#allocation131_spill] sm:$0xff] }
 0xb6c   : > { %15394 = vmatmul.mubr.msk.f32.gmra.mrb[164].mxu1 %vm1688_vm1, %v25235_v63  ;;  %15444 = vmatmul.mubr.msk.f32.gmra.mrb[184].mxu0 %vm1688_vm1, %v22406_v43 }
 0xb6d   : > { %15448 = vmatprep.mubr.msk.f32.mxu1 %vm1688_vm1, %v22438_v14  ;;  %15498 = vmatprep.mubr.msk.f32.mxu0 %vm1688_vm1, %v22809_v39  ;;  %v25248_v39 = vld [vmem:[#allocation122_spill] sm:$0xff] }
 0xb70   : > { %15449 = vmatmul.mubr.msk.f32.vlgmr.msra.gmra.mrb[166].mxu1 %vm1688_vm1, %v25236_v44  ;;  %15499 = vmatmul.mubr.msk.f32.vlgmr.msra.gmra.mrb[186].mxu0 %vm1688_vm1, %v22807_v16  ;;  %v25247_v16 = vld [vmem:[#allocation57_spill] sm:$0xff] }
 0xb71   : > { %15451 = vmatprep.mubr.msk.f32.mxu1 %vm1688_vm1, %v25237_v42  ;;  %15501 = vmatprep.mubr.msk.f32.mxu0 %vm1688_vm1, %v22815_v60  ;;  %v25250_v60 = vld [vmem:[#allocation33_spill] sm:$0xff] }
 0xb74   : > { %15452 = vmatmul.mubr.msk.f32.gmra.mrb[168].mxu1 %vm1688_vm1, %v25238_v52  ;;  %15502 = vmatmul.mubr.msk.f32.gmra.mrb[188].mxu0 %vm1688_vm1, %v22813_v51  ;;  %v25249_v51 = vld [vmem:[#allocation130_spill] sm:$0xff] }
 0xb75   : > { %15454 = vmatprep.mubr.msk.f32.mxu1 %vm1688_vm1, %v22488_v62  ;;  %15504 = vmatprep.mubr.msk.f32.mxu0 %vm1688_vm1, %v22830_v0 }
 0xb78   : > { %15455 = vmatmul.mubr.msk.f32.gmra.mrb[170].mxu1 %vm1688_vm1, %v22486_v20  ;;  %15505 = vmatmul.mubr.msk.f32.gmra.mrb[190].mxu0 %vm1688_vm1, %v22828_v34 }
 0xb79   : > { %15457 = vmatprep.mubr.msk.f32.mxu1 %vm1688_vm1, %v22494_v11  ;;  %15507 = vmatprep.mubr.msk.f32.mxu0 %vm1688_vm1, %v22834_v1  ;;  %v25240_v11 = vld [vmem:[#allocation151_spill] sm:$0xff] }
 0xb7c   : > { %15458 = vmatmul.mubr.msk.f32.gmra.mrb[172].mxu1 %vm1688_vm1, %v22492_v38  ;;  %15508 = vmatmul.mubr.msk.f32.gmra.mrb[192].mxu0 %vm1688_vm1, %v22832_v22  ;;  %v15286_v43 = vpop.f32.mrb[144].mxu0  ;;  %v25239_v38 = vld [vmem:[#allocation66_spill] sm:$0xff] }
 0xb7d   : > { %15460 = vmatprep.mubr.msk.f32.mxu1 %vm1688_vm1, %v22530_v3  ;;  %15510 = vmatprep.mubr.msk.f32.mxu0 %vm1688_vm1, %v9501_v45  ;;  %v9610_v14 = vpop.f32.mrb[145].mxu0  ;;  %v25242_v3 = vld [vmem:[#allocation136_spill] sm:$0xff] }
 0xb80   : > { %15461 = vmatmul.mubr.msk.f32.gmra.mrb[174].mxu1 %vm1688_vm1, %v22528_v8  ;;  %15511 = vmatmul.mubr.msk.f32.gmra.mrb[194].mxu0 %vm1688_vm1, %v22917_v50  ;;  %v15289_v20 = vpop.f32.mrb[146].mxu0  ;;  %v25241_v8 = vld [vmem:[#allocation120_spill] sm:$0xff] }
 0xb81   : > { %15463 = vmatprep.mubr.msk.f32.mxu1 %vm1688_vm1, %v22536_v48  ;;  %15513 = vmatprep.mubr.msk.f32.mxu0 %vm1688_vm1, %v9511_v53  ;;  %v9620_v62 = vpop.f32.mrb[147].mxu0  ;;  %v25244_v48 = vld [vmem:[#allocation119_spill] sm:$0xff] }
 0xb84   : > { %15464 = vmatmul.mubr.msk.f32.gmra.mrb[176].mxu1 %vm1688_vm1, %v22534_v10  ;;  %15514 = vmatmul.mubr.msk.f32.gmra.mrb[196].mxu0 %vm1688_vm1, %v22927_v21  ;;  %v25243_v10 = vld [vmem:[#allocation146_spill] sm:$0xff] }
 0xb85   : > { %15466 = vmatprep.mubr.msk.f32.mxu1 %vm1688_vm1, %v22586_v33  ;;  %15516 = vmatprep.mubr.msk.f32.mxu0 %vm1688_vm1, %v9610_v14  ;;  %v25246_v33 = vld [vmem:[#allocation51_spill] sm:$0xff] }
 0xb88   : > { %15467 = vmatmul.mubr.msk.f32.gmra.mrb[178].mxu1 %vm1688_vm1, %v22583_v40  ;;  %15517 = vmatmul.mubr.msk.f32.gmra.mrb[198].mxu0 %vm1688_vm1, %v15286_v43  ;;  %v25245_v40 = vld [vmem:[#allocation23_spill] sm:$0xff] }
 0xb89   : > { %15469 = vmatprep.mubr.msk.f32.mxu1 %vm1688_vm1, %v25239_v38  ;;  %15519 = vmatprep.mubr.msk.f32.mxu0 %vm1688_vm1, %v9620_v62 }
 0xb8c   : > { %15470 = vmatmul.mubr.msk.f32.gmra.mrb[180].mxu1 %vm1688_vm1, %v25240_v11  ;;  %15520 = vmatmul.mubr.msk.f32.gmra.mrb[200].mxu0 %vm1688_vm1, %v15289_v20 }
 0xb8d   : > { %15472 = vmatprep.mubr.msk.f32.mxu1 %vm1688_vm1, %v25241_v8 }
 0xb90   : > { %15473 = vmatmul.mubr.msk.f32.gmra.mrb[182].mxu1 %vm1688_vm1, %v25242_v3 }
 0xb91   : > { %15475 = vmatprep.mubr.msk.f32.mxu1 %vm1688_vm1, %v25243_v10 }
 0xb94   : > { %15476 = vmatmul.mubr.msk.f32.gmra.mrb[184].mxu1 %vm1688_vm1, %v25244_v48 }
 0xb95   : > { %15478 = vmatprep.mubr.msk.f32.mxu1 %vm1688_vm1, %v22688_v32 }
 0xb98   : > { %15479 = vmatmul.mubr.msk.f32.gmra.mrb[186].mxu1 %vm1688_vm1, %v22685_v13 }
 0xb99   : > { %15481 = vmatprep.mubr.msk.f32.mxu1 %vm1688_vm1, %v25245_v40 }
 0xb9c   : > { %15482 = vmatmul.mubr.msk.f32.gmra.mrb[188].mxu1 %vm1688_vm1, %v25246_v33 }
 0xb9d   : > { %15484 = vmatprep.mubr.msk.f32.mxu1 %vm1688_vm1, %v25247_v16 }
 0xba0   : > { %15485 = vmatmul.mubr.msk.f32.gmra.mrb[190].mxu1 %vm1688_vm1, %v25248_v39 }
 0xba1   : > { %15487 = vmatprep.mubr.msk.f32.mxu1 %vm1688_vm1, %v25249_v51 }
 0xba4   : > { %15488 = vmatmul.mubr.msk.f32.gmra.mrb[192].mxu1 %vm1688_vm1, %v25250_v60 }
 0xba5   : > { %15490 = vmatprep.mubr.msk.f32.mxu1 %vm1688_vm1, %v22785_v5 }
 0xba8   : > { %15491 = vmatmul.mubr.msk.f32.gmra.mrb[194].mxu1 %vm1688_vm1, %v22782_v7 }
 0xba9   : > { %15493 = vmatprep.mubr.msk.f32.mxu1 %vm1688_vm1, %v22795_v36 }
 0xbac   : > { %15494 = vmatmul.mubr.msk.f32.gmra.mrb[196].mxu1 %vm1688_vm1, %v22792_v2 }
 0xbb5   : > { %v15300_v13 = vpop.f32.mrb[124].mxu1 }
 0xbb6   : > { %v9719_v32 = vpop.f32.mrb[125].mxu1 }
 0xbb7   : > { %15522 = vmatprep.mubr.msk.f32.mxu0 %vm1688_vm1, %v9719_v32 }
 0xbb8   : > { %15523 = vmatmul.mubr.msk.f32.gmra.mrb[202].mxu0 %vm1688_vm1, %v15300_v13 }
 0xbb9   : > { %v15303_v34 = vpop.f32.mrb[126].mxu1 }
 0xbba   : > { %v9729_v0 = vpop.f32.mrb[127].mxu1 }
 0xbbb   : > { %15525 = vmatprep.mubr.msk.f32.mxu0 %vm1688_vm1, %v9729_v0 }
 0xbbc   : > { %15526 = vmatmul.mubr.msk.f32.gmra.mrb[204].mxu0 %vm1688_vm1, %v15303_v34 }
 0xbee   : > { %v15314_v5 = vpop.f32.mrb[148].mxu0 }
 0xbef   : > { %v9828_v7 = vpop.f32.mrb[149].mxu0 }
 0xbf0   : > { %15528 = vmatprep.mubr.msk.f32.mxu0 %vm1688_vm1, %v9828_v7 }
 0xbf1   : > { %15529 = vmatmul.mubr.msk.f32.gmra.mrb[206].mxu0 %vm1688_vm1, %v15314_v5 }
 0xbf2   : > { %v15317_v36 = vpop.f32.mrb[150].mxu0 }
 0xbf3   : > { %v9838_v2 = vpop.f32.mrb[151].mxu0 }
 0xbf4   : > { %15531 = vmatprep.mubr.msk.f32.mxu0 %vm1688_vm1, %v9838_v2 }
 0xbf5   : > { %15532 = vmatmul.mubr.msk.f32.gmra.mrb[208].mxu0 %vm1688_vm1, %v15317_v36 }
 0xbf6   : > { %v15328_v22 = vpop.f32.mrb[128].mxu1 }
 0xbf7   : > { %v9937_v1 = vpop.f32.mrb[129].mxu1 }
 0xbf8   : > { %15534 = vmatprep.mubr.msk.f32.mxu0 %vm1688_vm1, %v9937_v1 }
 0xbf9   : > { %15535 = vmatmul.mubr.msk.f32.gmra.mrb[210].mxu0 %vm1688_vm1, %v15328_v22 }
 0xbfa   : > { %v15331_v50 = vpop.f32.mrb[130].mxu1 }
 0xbfb   : > { %v9947_v45 = vpop.f32.mrb[131].mxu1 }
 0xbfc   : > { %15537 = vmatprep.mubr.msk.f32.mxu0 %vm1688_vm1, %v9947_v45 }
 0xbfd   : > { %15538 = vmatmul.mubr.msk.f32.gmra.mrb[212].mxu0 %vm1688_vm1, %v15331_v50 }
 0xbff   : > { %v15342_v9 = vpop.f32.mrb[152].mxu0  ;;  %v15345_v21 = vpop.f32.mrb[132].mxu1 }
 0xc00   : > { %v10046_v23 = vpop.f32.mrb[153].mxu0  ;;  %v10056_v31 = vpop.f32.mrb[133].mxu1 }
 0xc01   : > { %15540 = vmatprep.mubr.msk.f32.mxu0 %vm1688_vm1, %v10046_v23 }
 0xc02   : > { %15541 = vmatmul.mubr.msk.f32.gmra.mrb[214].mxu0 %vm1688_vm1, %v15342_v9 }
 0xc03   : > { %v15350_v53 = vpop.f32.mrb[134].mxu1  ;;  %v15400_v17 = vpop.f32.mrb[154].mxu0  ;;  %15543 = vmatprep.mubr.msk.f32.mxu0 %vm1688_vm1, %v10056_v31 }
 0xc04   : > { %v11360_v27 = vsel %vm502_vm0, %v15350_v53, 0.0  ;;  %v11361_v30 = vsel %vm502_vm0, %v15400_v17, 0.0  ;;  %v10231_v41 = vpop.f32.mrb[135].mxu1  ;;  %v10552_v19 = vpop.f32.mrb[155].mxu0 }
 0xc05   : > { %v23112_v57 = vadd.f32 %v11361_v30, %v11360_v27  ;;  %v11353_v47 = vsel %vm502_vm0, %v10231_v41, 0.0  ;;  %v11354_v56 = vsel %vm502_vm0, %v10552_v19, 0.0 }
 0xc06   : > { %v23116_v6 = vadd.f32 %v11354_v56, %v11353_v47  ;;  %15544 = vmatmul.mubr.msk.f32.gmra.mrb[216].mxu0 %vm1688_vm1, %v15345_v21 }
 0xc07   : > { %v15353_v26 = vpop.f32.mrb[136].mxu1  ;;  %v15403_v59 = vpop.f32.mrb[156].mxu0 }
 0xc08   : > { %v11374_v24 = vsel %vm502_vm0, %v15353_v26, 0.0  ;;  %v11375_v55 = vsel %vm502_vm0, %v15403_v59, 0.0  ;;  %v10241_v61 = vpop.f32.mrb[137].mxu1  ;;  %v10562_v4 = vpop.f32.mrb[157].mxu0 }
 0xc09   : > { %v23121_v29 = vadd.f32 %v11375_v55, %v11374_v24  ;;  %v11367_v15 = vsel %vm502_vm0, %v10241_v61, 0.0  ;;  %v11368_v58 = vsel %vm502_vm0, %v10562_v4, 0.0 }
 0xc0a   : > { %v23125_v18 = vadd.f32 %v11368_v58, %v11367_v15 }
 0xc0b   : > { %v15356_v49 = vpop.f32.mrb[138].mxu1  ;;  %v15406_v54 = vpop.f32.mrb[158].mxu0 }
 0xc0c   : > { %v11388_v35 = vsel %vm502_vm0, %v15356_v49, 0.0  ;;  %v11389_v25 = vsel %vm502_vm0, %v15406_v54, 0.0  ;;  %v10251_v28 = vpop.f32.mrb[139].mxu1  ;;  %v10572_v46 = vpop.f32.mrb[159].mxu0 }
 0xc0d   : > { %v23129_v37 = vadd.f32 %v11389_v25, %v11388_v35  ;;  %v11381_v12 = vsel %vm502_vm0, %v10251_v28, 0.0  ;;  %v11382_v63 = vsel %vm502_vm0, %v10572_v46, 0.0 }
 0xc0e   : > { %v23133_v44 = vadd.f32 %v11382_v63, %v11381_v12 }
 0xc0f   : > { %v15359_v42 = vpop.f32.mrb[140].mxu1  ;;  %v15409_v52 = vpop.f32.mrb[160].mxu0 }
 0xc10   : > { %v11402_v43 = vsel %vm502_vm0, %v15359_v42, 0.0  ;;  %v11403_v14 = vsel %vm502_vm0, %v15409_v52, 0.0  ;;  %v10261_v20 = vpop.f32.mrb[141].mxu1  ;;  %v10582_v62 = vpop.f32.mrb[161].mxu0 }
 0xc11   : > { %v23137_v38 = vadd.f32 %v11403_v14, %v11402_v43  ;;  %v11395_v11 = vsel %vm502_vm0, %v10261_v20, 0.0  ;;  %v11396_v8 = vsel %vm502_vm0, %v10582_v62, 0.0 }
 0xc12   : > { %v23141_v3 = vadd.f32 %v11396_v8, %v11395_v11 }
 0xc13   : > { %v15362_v10 = vpop.f32.mrb[142].mxu1  ;;  %v15412_v48 = vpop.f32.mrb[162].mxu0 }
 0xc14   : > { %v11416_v40 = vsel %vm502_vm0, %v15362_v10, 0.0  ;;  %v11417_v33 = vsel %vm502_vm0, %v15412_v48, 0.0  ;;  %v10271_v16 = vpop.f32.mrb[143].mxu1  ;;  %v10592_v39 = vpop.f32.mrb[163].mxu0 }
 0xc15   : > { %v23145_v51 = vadd.f32 %v11417_v33, %v11416_v40  ;;  %v11409_v60 = vsel %vm502_vm0, %v10271_v16, 0.0  ;;  %v11410_v13 = vsel %vm502_vm0, %v10592_v39, 0.0 }
 0xc16   : > { %v23149_v32 = vadd.f32 %v11410_v13, %v11409_v60 }
 0xc17   : > { %v15365_v34 = vpop.f32.mrb[144].mxu1  ;;  %v15415_v0 = vpop.f32.mrb[164].mxu0 }
 0xc18   : > { %v11430_v5 = vsel %vm502_vm0, %v15365_v34, 0.0  ;;  %v11431_v7 = vsel %vm502_vm0, %v15415_v0, 0.0  ;;  %v10281_v36 = vpop.f32.mrb[145].mxu1  ;;  %v10602_v2 = vpop.f32.mrb[165].mxu0 }
 0xc19   : > { %v23153_v22 = vadd.f32 %v11431_v7, %v11430_v5  ;;  %v11423_v1 = vsel %vm502_vm0, %v10281_v36, 0.0  ;;  %v11424_v50 = vsel %vm502_vm0, %v10602_v2, 0.0 }
 0xc1a   : > { %v23157_v45 = vadd.f32 %v11424_v50, %v11423_v1 }
 0xc1b   : > { %v15368_v9 = vpop.f32.mrb[146].mxu1  ;;  %v15418_v21 = vpop.f32.mrb[166].mxu0 }
 0xc1c   : > { %v11444_v23 = vsel %vm502_vm0, %v15368_v9, 0.0  ;;  %v11445_v31 = vsel %vm502_vm0, %v15418_v21, 0.0  ;;  %v10291_v53 = vpop.f32.mrb[147].mxu1  ;;  %v10612_v17 = vpop.f32.mrb[167].mxu0 }
 0xc1d   : > { %v23161_v27 = vadd.f32 %v11445_v31, %v11444_v23  ;;  %v11437_v30 = vsel %vm502_vm0, %v10291_v53, 0.0  ;;  %v11438_v41 = vsel %vm502_vm0, %v10612_v17, 0.0 }
 0xc1e   : > { %v23165_v19 = vadd.f32 %v11438_v41, %v11437_v30 }
 0xc1f   : > { %v15371_v47 = vpop.f32.mrb[148].mxu1  ;;  %v15421_v56 = vpop.f32.mrb[168].mxu0 }
 0xc20   : > { %v11458_v26 = vsel %vm502_vm0, %v15371_v47, 0.0  ;;  %v11459_v59 = vsel %vm502_vm0, %v15421_v56, 0.0  ;;  %v10301_v24 = vpop.f32.mrb[149].mxu1  ;;  %v10622_v55 = vpop.f32.mrb[169].mxu0 }
 0xc21   : > { %v23169_v61 = vadd.f32 %v11459_v59, %v11458_v26  ;;  %v11451_v4 = vsel %vm502_vm0, %v10301_v24, 0.0  ;;  %v11452_v15 = vsel %vm502_vm0, %v10622_v55, 0.0 }
 0xc22   : > { %v23173_v58 = vadd.f32 %v11452_v15, %v11451_v4 }
 0xc23   : > { %v15374_v49 = vpop.f32.mrb[150].mxu1  ;;  %v15424_v54 = vpop.f32.mrb[170].mxu0 }
 0xc24   : > { %v11472_v35 = vsel %vm502_vm0, %v15374_v49, 0.0  ;;  %v11473_v25 = vsel %vm502_vm0, %v15424_v54, 0.0  ;;  %v10311_v28 = vpop.f32.mrb[151].mxu1  ;;  %v10632_v46 = vpop.f32.mrb[171].mxu0 }
 0xc25   : > { %v23177_v12 = vadd.f32 %v11473_v25, %v11472_v35  ;;  %v11465_v63 = vsel %vm502_vm0, %v10311_v28, 0.0  ;;  %v11466_v42 = vsel %vm502_vm0, %v10632_v46, 0.0 }
 0xc26   : > { %v23181_v52 = vadd.f32 %v11466_v42, %v11465_v63 }
 0xc27   : > { %v15377_v43 = vpop.f32.mrb[152].mxu1  ;;  %v15427_v14 = vpop.f32.mrb[172].mxu0 }
 0xc28   : > { %v11486_v20 = vsel %vm502_vm0, %v15377_v43, 0.0  ;;  %v11487_v62 = vsel %vm502_vm0, %v15427_v14, 0.0  ;;  %v10321_v11 = vpop.f32.mrb[153].mxu1  ;;  %v10642_v8 = vpop.f32.mrb[173].mxu0 }
 0xc29   : > { %v23185_v10 = vadd.f32 %v11487_v62, %v11486_v20  ;;  %v11479_v48 = vsel %vm502_vm0, %v10321_v11, 0.0  ;;  %v11480_v40 = vsel %vm502_vm0, %v10642_v8, 0.0 }
 0xc2a   : > { %v23189_v33 = vadd.f32 %v11480_v40, %v11479_v48 }
 0xc2b   : > { %v15380_v16 = vpop.f32.mrb[154].mxu1  ;;  %v15430_v39 = vpop.f32.mrb[174].mxu0 }
 0xc2c   : > { %v11500_v60 = vsel %vm502_vm0, %v15380_v16, 0.0  ;;  %v11501_v13 = vsel %vm502_vm0, %v15430_v39, 0.0  ;;  %v10331_v34 = vpop.f32.mrb[155].mxu1  ;;  %v10652_v0 = vpop.f32.mrb[175].mxu0 }
 0xc2d   : > { %v23193_v5 = vadd.f32 %v11501_v13, %v11500_v60  ;;  %v11493_v7 = vsel %vm502_vm0, %v10331_v34, 0.0  ;;  %v11494_v36 = vsel %vm502_vm0, %v10652_v0, 0.0 }
 0xc2e   : > { %v23197_v2 = vadd.f32 %v11494_v36, %v11493_v7 }
 0xc2f   : > { %v15383_v1 = vpop.f32.mrb[156].mxu1  ;;  %v15433_v50 = vpop.f32.mrb[176].mxu0 }
 0xc30   : > { %v11514_v9 = vsel %vm502_vm0, %v15383_v1, 0.0  ;;  %v11515_v21 = vsel %vm502_vm0, %v15433_v50, 0.0  ;;  %v10341_v23 = vpop.f32.mrb[157].mxu1  ;;  %v10662_v31 = vpop.f32.mrb[177].mxu0 }
 0xc31   : > { %v23201_v53 = vadd.f32 %v11515_v21, %v11514_v9  ;;  %v11507_v17 = vsel %vm502_vm0, %v10341_v23, 0.0  ;;  %v11508_v30 = vsel %vm502_vm0, %v10662_v31, 0.0 }
 0xc32   : > { %v23205_v41 = vadd.f32 %v11508_v30, %v11507_v17 }
 0xc33   : > { %v15386_v47 = vpop.f32.mrb[158].mxu1  ;;  %v15436_v56 = vpop.f32.mrb[178].mxu0 }
 0xc34   : > { %v11528_v26 = vsel %vm502_vm0, %v15386_v47, 0.0  ;;  %v11529_v59 = vsel %vm502_vm0, %v15436_v56, 0.0  ;;  %v10351_v24 = vpop.f32.mrb[159].mxu1  ;;  %v10672_v55 = vpop.f32.mrb[179].mxu0 }
 0xc35   : > { %v23209_v4 = vadd.f32 %v11529_v59, %v11528_v26  ;;  %v11521_v15 = vsel %vm502_vm0, %v10351_v24, 0.0  ;;  %v11522_v49 = vsel %vm502_vm0, %v10672_v55, 0.0 }
 0xc36   : > { %v23213_v54 = vadd.f32 %v11522_v49, %v11521_v15 }
 0xc37   : > { %v15389_v35 = vpop.f32.mrb[160].mxu1  ;;  %v15439_v25 = vpop.f32.mrb[180].mxu0 }
 0xc38   : > { %v11542_v28 = vsel %vm502_vm0, %v15389_v35, 0.0  ;;  %v11543_v46 = vsel %vm502_vm0, %v15439_v25, 0.0  ;;  %v10361_v63 = vpop.f32.mrb[161].mxu1  ;;  %v10682_v42 = vpop.f32.mrb[181].mxu0 }
 0xc39   : > { %v23217_v43 = vadd.f32 %v11543_v46, %v11542_v28  ;;  %v11535_v14 = vsel %vm502_vm0, %v10361_v63, 0.0  ;;  %v11536_v20 = vsel %vm502_vm0, %v10682_v42, 0.0  ;;  %v23248_v42 = vld [vmem:[%s24163_s7] ss:$0 sm:$0xff] }
 0xc3a   : > { %v23221_v62 = vadd.f32 %v11536_v20, %v11535_v14 }
 0xc3b   : > { %v15392_v11 = vpop.f32.mrb[162].mxu1  ;;  %v15442_v8 = vpop.f32.mrb[182].mxu0 }
 0xc3c   : > { %v11556_v48 = vsel %vm502_vm0, %v15392_v11, 0.0  ;;  %v11557_v40 = vsel %vm502_vm0, %v15442_v8, 0.0  ;;  %v10371_v16 = vpop.f32.mrb[163].mxu1  ;;  %v10692_v39 = vpop.f32.mrb[183].mxu0  ;;  %v17731_v8 = vld [vmem:[%s17867_s18 + $0x8] sm:$0xff] }
 0xc3d   : > { %v23225_v60 = vadd.f32 %v11557_v40, %v11556_v48  ;;  %v11549_v13 = vsel %vm502_vm0, %v10371_v16, 0.0  ;;  %v11550_v34 = vsel %vm502_vm0, %v10692_v39, 0.0  ;;  %v17732_v16 = vld [vmem:[%s17867_s18] sm:$0xff] }
 0xc3e   : > { %v23229_v0 = vadd.f32 %v11550_v34, %v11549_v13 }
 0xc3f   : > { %v15395_v7 = vpop.f32.mrb[164].mxu1  ;;  %v15445_v36 = vpop.f32.mrb[184].mxu0 }
 0xc40   : > { %v11570_v1 = vsel %vm502_vm0, %v15395_v7, 0.0  ;;  %v11571_v50 = vsel %vm502_vm0, %v15445_v36, 0.0  ;;  %v10381_v9 = vpop.f32.mrb[165].mxu1  ;;  %v10702_v21 = vpop.f32.mrb[185].mxu0 }
 0xc41   : > { %v23233_v23 = vadd.f32 %v11571_v50, %v11570_v1  ;;  %v11563_v31 = vsel %vm502_vm0, %v10381_v9, 0.0  ;;  %v11564_v17 = vsel %vm502_vm0, %v10702_v21, 0.0 }
 0xc42   : > { %v23237_v30 = vadd.f32 %v11564_v17, %v11563_v31 }
 0xc43   : > { %v15450_v47 = vpop.f32.mrb[166].mxu1  ;;  %v15500_v56 = vpop.f32.mrb[186].mxu0 }
 0xc44   : > { %v11363_v26 = vsel %vm502_vm0, %v15450_v47, 0.0  ;;  %v10873_v59 = vpop.f32.mrb[167].mxu1  ;;  %v11194_v24 = vpop.f32.mrb[187].mxu0  ;;  %v11365_v49 = vsel %vm502_vm0, %v15500_v56, 0.0  ;;  %v17733_v56 = vld [vmem:[%s17867_s18 + $0x18] sm:$0xff] }
 0xc45   : > { %v11364_v55 = vadd.f32 %v11363_v26, %v23112_v57  ;;  %v11356_v15 = vsel %vm502_vm0, %v10873_v59, 0.0  ;;  %v11358_v28 = vsel %vm502_vm0, %v11194_v24, 0.0 }
 0xc46   : > { %v11357_v35 = vadd.f32 %v11356_v15, %v23116_v6 }
 0xc47   : > { %v11366_v25 = vadd.f32 %v11365_v49, %v11364_v55  ;;  %v15453_v46 = vpop.f32.mrb[168].mxu1  ;;  %v15503_v63 = vpop.f32.mrb[188].mxu0  ;;  %v17734_v55 = vld [vmem:[%s17867_s18 + $0x10] sm:$0xff] }
 0xc48   : > { %v11359_v14 = vadd.f32 %v11358_v28, %v11357_v35  ;;  %v11377_v57 = vsel %vm502_vm0, %v15453_v46, 0.0  ;;  %v10883_v20 = vpop.f32.mrb[169].mxu1  ;;  %v11204_v11 = vpop.f32.mrb[189].mxu0  ;;  %v11379_v13 = vsel %vm502_vm0, %v15503_v63, 0.0 }
 0xc49   : > { %v11578_v48 = vadd.f32 %v17731_v8, %v11366_v25  ;;  %v11378_v40 = vadd.f32 %v11377_v57, %v23121_v29  ;;  %v11370_v6 = vsel %vm502_vm0, %v10883_v20, 0.0  ;;  %v11372_v1 = vsel %vm502_vm0, %v11204_v11, 0.0 }
 0xc4a   : > { %v11577_v39 = vadd.f32 %v17732_v16, %v11359_v14  ;;  %v11371_v34 = vadd.f32 %v11370_v6, %v23125_v18  ;;  %v17735_v6 = vld [vmem:[%s17867_s18 + $0x20] sm:$0xff] }
 0xc4b   : > { %v23258_v7 = vadd.f32 %v23248_v42, %v11578_v48  ;;  %v11380_v36 = vadd.f32 %v11379_v13, %v11378_v40  ;;  %v15456_v50 = vpop.f32.mrb[170].mxu1  ;;  %v15506_v9 = vpop.f32.mrb[190].mxu0 }
 0xc4c   : > { %v23262_v29 = vadd.f32 %v23248_v42, %v11577_v39  ;;  %v11373_v21 = vadd.f32 %v11372_v1, %v11371_v34  ;;  %v11391_v31 = vsel %vm502_vm0, %v15456_v50, 0.0  ;;  %v10893_v17 = vpop.f32.mrb[171].mxu1  ;;  %v11214_v47 = vpop.f32.mrb[191].mxu0  ;;  %v11393_v59 = vsel %vm502_vm0, %v15506_v9, 0.0 }
 0xc4d   : > { %v11580_v26 = vadd.f32 %v17733_v56, %v11380_v36  ;;  %v11392_v18 = vadd.f32 %v11391_v31, %v23129_v37  ;;  %v11384_v24 = vsel %vm502_vm0, %v10893_v17, 0.0  ;;  %v11653_v35 = vsel %vm502_vm0, %v23258_v7, 0.0 }
 0xc4e   : > { %v11579_v15 = vadd.f32 %v17734_v55, %v11373_v21  ;;  %v11385_v49 = vadd.f32 %v11384_v24, %v23133_v44  ;;  %v11650_v25 = vsel %vm502_vm0, %v23262_v29, 0.0  ;;  %v11386_v46 = vsel %vm502_vm0, %v11214_v47, 0.0  ;;  %11654 = vadd.xlane.f32.xlu1 %v11653_v35  ;;  %v17736_v47 = vld [vmem:[%s17867_s18 + $0x28] sm:$0xff] }
 0xc4f   : > { %v11394_v28 = vadd.f32 %v11393_v59, %v11392_v18  ;;  %v15459_v37 = vpop.f32.mrb[172].mxu1  ;;  %11651 = vadd.xlane.f32.xlu0 %v11650_v25  ;;  %v15509_v63 = vpop.f32.mrb[192].mxu0  ;;  %v23281_v8 = vadd.f32 %v23248_v42, %v11580_v26 }
 0xc50   : > { %v23277_v14 = vadd.f32 %v23248_v42, %v11579_v15  ;;  %v11387_v57 = vadd.f32 %v11386_v46, %v11385_v49  ;;  %v11405_v44 = vsel %vm502_vm0, %v15459_v37, 0.0  ;;  %v10903_v20 = vpop.f32.mrb[173].mxu1  ;;  %v11224_v11 = vpop.f32.mrb[193].mxu0  ;;  %v11407_v39 = vsel %vm502_vm0, %v15509_v63, 0.0 }
 0xc51   : > { %v11406_v48 = vadd.f32 %v11405_v44, %v23137_v38  ;;  %v11398_v40 = vsel %vm502_vm0, %v10903_v20, 0.0  ;;  %v11400_v1 = vsel %vm502_vm0, %v11224_v11, 0.0  ;;  %v11582_v56 = vadd.f32 %v17736_v47, %v11394_v28  ;;  %v17737_v44 = vld [vmem:[%s17867_s18 + $0x30] sm:$0xff] }
 0xc52   : > { %v11581_v16 = vadd.f32 %v17735_v6, %v11387_v57  ;;  %v11399_v13 = vadd.f32 %v11398_v40, %v23141_v3  ;;  %v11656_v34 = vsel %vm502_vm0, %v23277_v14, 0.0  ;;  %v11659_v55 = vsel %vm502_vm0, %v23281_v8, 0.0 }
 0xc53   : > { %v11408_v36 = vadd.f32 %v11407_v39, %v11406_v48  ;;  %v15462_v50 = vpop.f32.mrb[174].mxu1  ;;  %11657 = vadd.xlane.f32.xlu0 %v11656_v34  ;;  %v15512_v9 = vpop.f32.mrb[194].mxu0  ;;  %v23307_v63 = vadd.f32 %v23248_v42, %v11582_v56  ;;  %v17738_v34 = vld [vmem:[%s17867_s18 + $0x38] sm:$0xff] }
 0xc54   : > { %v11401_v21 = vadd.f32 %v11400_v1, %v11399_v13  ;;  %v11419_v38 = vsel %vm502_vm0, %v15462_v50, 0.0  ;;  %v10913_v31 = vpop.f32.mrb[175].mxu1  ;;  %v11234_v17 = vpop.f32.mrb[195].mxu0  ;;  %v23296_v18 = vadd.f32 %v23248_v42, %v11581_v16  ;;  %v11421_v59 = vsel %vm502_vm0, %v15512_v9, 0.0 }
 0xc55   : > { %v11420_v26 = vadd.f32 %v11419_v38, %v23145_v51  ;;  %v11412_v3 = vsel %vm502_vm0, %v10913_v31, 0.0  ;;  %v11414_v49 = vsel %vm502_vm0, %v11234_v17, 0.0  ;;  %v17739_v38 = vld [vmem:[%s17867_s18 + $0x58] sm:$0xff] }
 0xc56   : > { %v11413_v24 = vadd.f32 %v11412_v3, %v23149_v32  ;;  %v11583_v20 = vadd.f32 %v17737_v44, %v11401_v21  ;;  %v11662_v40 = vsel %vm502_vm0, %v23296_v18, 0.0 }
 0xc57   : > { %v23302_v15 = vadd.f32 %v11421_v59, %v11420_v26  ;;  %v15465_v35 = vpop.f32.mrb[176].mxu1  ;;  %11660 = vadd.xlane.f32.xlu0 %v11659_v55  ;;  %v15515_v51 = vpop.f32.mrb[196].mxu0  ;;  %v11665_v26 = vsel %vm502_vm0, %v23307_v63, 0.0 }
 0xc58   : > { %v11415_v25 = vadd.f32 %v11414_v49, %v11413_v24  ;;  %v11433_v28 = vsel %vm502_vm0, %v15465_v35, 0.0  ;;  %v10923_v46 = vpop.f32.mrb[177].mxu1  ;;  %v11244_v37 = vpop.f32.mrb[197].mxu0  ;;  %v11435_v11 = vsel %vm502_vm0, %v15515_v51, 0.0  ;;  %v23325_v47 = vadd.f32 %v23248_v42, %v11583_v20 }
 0xc59   : > { %v11434_v32 = vadd.f32 %v11433_v28, %v23153_v22  ;;  %v11426_v57 = vsel %vm502_vm0, %v10923_v46, 0.0  ;;  %v11428_v16 = vsel %vm502_vm0, %v11244_v37, 0.0  ;;  %v11584_v22 = vadd.f32 %v17738_v34, %v11408_v36  ;;  %v17740_v46 = vld [vmem:[%s17867_s18 + $0x40] sm:$0xff] }
 0xc5a   : > { %v11427_v48 = vadd.f32 %v11426_v57, %v23157_v45  ;;  %v11585_v37 = vadd.f32 %v17740_v46, %v11415_v25 }
 0xc5b   : > { %v11436_v6 = vadd.f32 %v11435_v11, %v11434_v32  ;;  %v15468_v39 = vpop.f32.mrb[178].mxu1  ;;  %11663 = vadd.xlane.f32.xlu0 %v11662_v40  ;;  %v15518_v13 = vpop.f32.mrb[198].mxu0  ;;  %v23336_v49 = vadd.f32 %v23248_v42, %v11584_v22  ;;  %v17741_v32 = vld [vmem:[%s17867_s18 + $0x68] sm:$0xff]  ;;  %v17742_v22 = vld [vmem:[%s17867_s18 + $0x78] sm:$0xff] }
 0xc5c   : > { %v23318_v1 = vadd.f32 %v11428_v16, %v11427_v48  ;;  %v11447_v50 = vsel %vm502_vm0, %v15468_v39, 0.0  ;;  %v10933_v9 = vpop.f32.mrb[179].mxu1  ;;  %v11254_v21 = vpop.f32.mrb[199].mxu0  ;;  %v11449_v56 = vsel %vm502_vm0, %v15518_v13, 0.0 }
 0xc5d   : > { %v11588_v31 = vadd.f32 %v17739_v38, %v11436_v6  ;;  %v11448_v45 = vadd.f32 %v11447_v50, %v23161_v27  ;;  %v11440_v17 = vsel %vm502_vm0, %v10933_v9, 0.0  ;;  %v11442_v27 = vsel %vm502_vm0, %v11254_v21, 0.0 }
 0xc5e   : > { %v11441_v36 = vadd.f32 %v11440_v17, %v23165_v19  ;;  %v11668_v6 = vsel %vm502_vm0, %v23325_v47, 0.0  ;;  %v23364_v17 = vadd.f32 %v23248_v42, %v11585_v37 }
 0xc5f   : > { %v23332_v3 = vadd.f32 %v23248_v42, %v11588_v31  ;;  %v11450_v59 = vadd.f32 %v11449_v56, %v11448_v45  ;;  %v15471_v24 = vpop.f32.mrb[180].mxu1  ;;  %11666 = vadd.xlane.f32.xlu0 %v11665_v26  ;;  %v15521_v55 = vpop.f32.mrb[200].mxu0  ;;  %v17743_v31 = vld [vmem:[%s17867_s18 + $0x48] sm:$0xff] }
 0xc60   : > { %v11443_v35 = vadd.f32 %v11442_v27, %v11441_v36  ;;  %v11461_v51 = vsel %vm502_vm0, %v15471_v24, 0.0  ;;  %v10943_v28 = vpop.f32.mrb[181].mxu1  ;;  %v11264_v19 = vpop.f32.mrb[201].mxu0  ;;  %v11463_v11 = vsel %vm502_vm0, %v15521_v55, 0.0  ;;  %v11586_v45 = vadd.f32 %v17743_v31, %v23302_v15 }
 0xc61   : > { %v11590_v57 = vadd.f32 %v17741_v32, %v11450_v59  ;;  %v11462_v44 = vadd.f32 %v11461_v51, %v23169_v61  ;;  %v11454_v20 = vsel %vm502_vm0, %v10943_v28, 0.0  ;;  %v11683_v40 = vsel %vm502_vm0, %v23332_v3, 0.0  ;;  %v17744_v51 = vld [vmem:[%s17867_s18 + $0x50] sm:$0xff] }
 0xc62   : > { %v11455_v48 = vadd.f32 %v11454_v20, %v23173_v58  ;;  %v11456_v39 = vsel %vm502_vm0, %v11264_v19, 0.0  ;;  %11684 = vadd.xlane.f32.xlu1 %v11683_v40  ;;  %v11671_v36 = vsel %vm502_vm0, %v23336_v49, 0.0  ;;  %v23382_v55 = vadd.f32 %v23248_v42, %v11586_v45 }
 0xc63   : > { %v23350_v25 = vadd.f32 %v23248_v42, %v11590_v57  ;;  %v11464_v16 = vadd.f32 %v11463_v11, %v11462_v44  ;;  %v15474_v61 = vpop.f32.mrb[182].mxu1  ;;  %11669 = vadd.xlane.f32.xlu0 %v11668_v6  ;;  %v11587_v28 = vadd.f32 %v17744_v51, %v23318_v1  ;;  %v11674_v46 = vsel %vm502_vm0, %v23364_v17, 0.0 }
 0xc64   : > { %v11457_v13 = vadd.f32 %v11456_v39, %v11455_v48  ;;  %v11475_v34 = vsel %vm502_vm0, %v15474_v61, 0.0  ;;  %v10953_v58 = vpop.f32.mrb[183].mxu1  ;;  %v11677_v48 = vsel %vm502_vm0, %v23382_v55, 0.0 }
 0xc65   : > { %v11592_v50 = vadd.f32 %v17742_v22, %v11464_v16  ;;  %v23356_v9 = vadd.f32 %v11475_v34, %v23177_v12  ;;  %v11468_v21 = vsel %vm502_vm0, %v10953_v58, 0.0  ;;  %v11689_v38 = vsel %vm502_vm0, %v23350_v25, 0.0 }
 0xc66   : > { %v23367_v56 = vadd.f32 %v11468_v21, %v23181_v52  ;;  %11690 = vadd.xlane.f32.xlu1 %v11689_v38  ;;  %v23397_v1 = vadd.f32 %v23248_v42, %v11587_v28 }
 0xc67   : > { %v23372_v12 = vadd.f32 %v23248_v42, %v11592_v50  ;;  %v15477_v26 = vpop.f32.mrb[184].mxu1  ;;  %11672 = vadd.xlane.f32.xlu0 %v11671_v36 }
 0xc68   : > { %v11489_v59 = vsel %vm502_vm0, %v15477_v26, 0.0  ;;  %v10963_v27 = vpop.f32.mrb[185].mxu1  ;;  %v11680_v58 = vsel %vm502_vm0, %v23397_v1, 0.0 }
 0xc69   : > { %v23376_v15 = vadd.f32 %v11489_v59, %v23185_v10  ;;  %v11482_v24 = vsel %vm502_vm0, %v10963_v27, 0.0  ;;  %v11695_v52 = vsel %vm502_vm0, %v23372_v12, 0.0 }
 0xc6a   : > { %v23387_v19 = vadd.f32 %v11482_v24, %v23189_v33  ;;  %11696 = vadd.xlane.f32.xlu1 %v11695_v52  ;;  %v17745_v33 = vld [vmem:[%s17867_s18 + $0x60] sm:$0xff] }
 0xc6b   : > { %v15480_v10 = vpop.f32.mrb[186].mxu1  ;;  %11675 = vadd.xlane.f32.xlu0 %v11674_v46  ;;  %v11589_v20 = vadd.f32 %v17745_v33, %v11443_v35  ;;  %v17746_v35 = vld [vmem:[%s17867_s18 + $0x70] sm:$0xff] }
 0xc6c   : > { %v11503_v37 = vsel %vm502_vm0, %v15480_v10, 0.0  ;;  %v10973_v32 = vpop.f32.mrb[187].mxu1  ;;  %v11591_v34 = vadd.f32 %v17746_v35, %v11457_v13  ;;  %v17748_v35 = vld [vmem:[%s17867_s18 + $0x80] sm:$0xff] }
 0xc6d   : > { %v23393_v57 = vadd.f32 %v11503_v37, %v23193_v5  ;;  %v11496_v44 = vsel %vm502_vm0, %v10973_v32, 0.0  ;;  %v23411_v61 = vadd.f32 %v23248_v42, %v11589_v20 }
 0xc6e   : > { %v23401_v11 = vadd.f32 %v11496_v44, %v23197_v2  ;;  %v23425_v31 = vadd.f32 %v23248_v42, %v11591_v34 }
 0xc6f   : > { %v15483_v40 = vpop.f32.mrb[188].mxu1  ;;  %11678 = vadd.xlane.f32.xlu0 %v11677_v48 }
 0xc70   : > { %v11517_v6 = vsel %vm502_vm0, %v15483_v40, 0.0  ;;  %v10983_v16 = vpop.f32.mrb[189].mxu1  ;;  %25251 = vst [vmem:[#allocation9_spill] sm:$0xff] %v23425_v31 }
 0xc71   : > { %v23407_v5 = vadd.f32 %v11517_v6, %v23201_v53  ;;  %v11510_v39 = vsel %vm502_vm0, %v10983_v16, 0.0  ;;  %v17747_v16 = vld [vmem:[%s17867_s18 + $0x88] sm:$0xff] }
 0xc72   : > { %v23415_v2 = vadd.f32 %v11510_v39, %v23205_v41  ;;  %v11686_v41 = vsel %vm502_vm0, %v23411_v61, 0.0 }
 0xc73   : > { %v15486_v22 = vpop.f32.mrb[190].mxu1  ;;  %11681 = vadd.xlane.f32.xlu0 %v11680_v58 }
 0xc74   : > { %v11531_v50 = vsel %vm502_vm0, %v15486_v22, 0.0  ;;  %v10993_v21 = vpop.f32.mrb[191].mxu1 }
 0xc75   : > { %v23421_v53 = vadd.f32 %v11531_v50, %v23209_v4  ;;  %v11524_v38 = vsel %vm502_vm0, %v10993_v21, 0.0 }
 0xc76   : > { %v23428_v13 = vadd.f32 %v11524_v38, %v23213_v54  ;;  %v11692_v54 = vsel %vm502_vm0, %v23425_v31, 0.0  ;;  %v17749_v38 = vld [vmem:[%s17867_s18 + $0x98] sm:$0xff] }
 0xc77   : > { %v15489_v45 = vpop.f32.mrb[192].mxu1  ;;  %11687 = vadd.xlane.f32.xlu0 %v11686_v41 }
 0xc78   : > { %v11545_v36 = vsel %vm502_vm0, %v15489_v45, 0.0  ;;  %v11003_v26 = vpop.f32.mrb[193].mxu1 }
 0xc79   : > { %v23434_v59 = vadd.f32 %v11545_v36, %v23217_v43  ;;  %v11538_v4 = vsel %vm502_vm0, %v11003_v26, 0.0  ;;  %v17750_v36 = vld [vmem:[%s17867_s18 + $0x90] sm:$0xff] }
 0xc7a   : > { %v23438_v27 = vadd.f32 %v11538_v4, %v23221_v62 }
 0xc7b   : > { %v15492_v24 = vpop.f32.mrb[194].mxu1  ;;  %11693 = vadd.xlane.f32.xlu0 %v11692_v54 }
 0xc7c   : > { %v11559_v52 = vsel %vm502_vm0, %v15492_v24, 0.0  ;;  %v11013_v51 = vpop.f32.mrb[195].mxu1 }
 0xc7d   : > { %v23444_v28 = vadd.f32 %v11559_v52, %v23225_v60  ;;  %v11552_v43 = vsel %vm502_vm0, %v11013_v51, 0.0 }
 0xc7e   : > { %v23448_v46 = vadd.f32 %v11552_v43, %v23229_v0 }
 0xc7f   : > { %v15495_v62 = vpop.f32.mrb[196].mxu1 }
 0xc80   : > { %v11573_v10 = vsel %vm502_vm0, %v15495_v62, 0.0  ;;  %v11023_v37 = vpop.f32.mrb[197].mxu1 }
 0xc81   : > { %v23452_v32 = vadd.f32 %v11573_v10, %v23233_v23  ;;  %v11566_v44 = vsel %vm502_vm0, %v11023_v37, 0.0 }
 0xc82   : > { %v23456_v33 = vadd.f32 %v11566_v44, %v23237_v30  ;;  %v17751_v44 = vld [vmem:[%s17867_s18 + $0xa8] sm:$0xff] }
 0xc8b   : > { %v15524_v60 = vpop.f32.mrb[202].mxu0 }
 0xc8c   : > { %v11477_v20 = vsel %vm502_vm0, %v15524_v60, 0.0  ;;  %v11274_v48 = vpop.f32.mrb[203].mxu0 }
 0xc8d   : > { %v11478_v0 = vadd.f32 %v11477_v20, %v23356_v9  ;;  %v11470_v40 = vsel %vm502_vm0, %v11274_v48, 0.0  ;;  %v17752_v48 = vld [vmem:[%s17867_s18 + $0xa0] sm:$0xff] }
 0xc8e   : > { %v11471_v6 = vadd.f32 %v11470_v40, %v23367_v56 }
 0xc8f   : > { %v11594_v23 = vadd.f32 %v17747_v16, %v11478_v0  ;;  %v15527_v39 = vpop.f32.mrb[204].mxu0 }
 0xc90   : > { %v11593_v34 = vadd.f32 %v17748_v35, %v11471_v6  ;;  %v11491_v30 = vsel %vm502_vm0, %v15527_v39, 0.0  ;;  %v11284_v58 = vpop.f32.mrb[205].mxu0  ;;  %v17753_v35 = vld [vmem:[%s17867_s18 + $0xb8] sm:$0xff] }
 0xc91   : > { %v23466_v22 = vadd.f32 %v23248_v42, %v11594_v23  ;;  %v11492_v50 = vadd.f32 %v11491_v30, %v23376_v15  ;;  %v11484_v9 = vsel %vm502_vm0, %v11284_v58, 0.0 }
 0xc92   : > { %v23471_v21 = vadd.f32 %v23248_v42, %v11593_v34  ;;  %v11485_v56 = vadd.f32 %v11484_v9, %v23387_v19 }
 0xc93   : > { %25252 = vst [vmem:[#allocation139_spill] sm:$0xff] %v23466_v22  ;;  %v11596_v41 = vadd.f32 %v17749_v38, %v11492_v50  ;;  %v11701_v45 = vsel %vm502_vm0, %v23466_v22, 0.0  ;;  %v17754_v50 = vld [vmem:[%s17867_s18 + $0xb0] sm:$0xff] }
 0xc94   : > { %25253 = vst [vmem:[#allocation100_spill] sm:$0xff] %v23471_v21  ;;  %v11595_v26 = vadd.f32 %v17750_v36, %v11485_v56  ;;  %11702 = vadd.xlane.f32.xlu1 %v11701_v45  ;;  %v11698_v4 = vsel %vm502_vm0, %v23471_v21, 0.0 }
 0xc95   : > { %v23481_v15 = vadd.f32 %v23248_v42, %v11596_v41  ;;  %11699 = vadd.xlane.f32.xlu0 %v11698_v4  ;;  %v17755_v4 = vld [vmem:[%s17867_s18 + $0xc8] sm:$0xff] }
 0xc96   : > { %v23484_v54 = vadd.f32 %v23248_v42, %v11595_v26 }
 0xc97   : > { %25254 = vst [vmem:[#allocation152_spill] sm:$0xff] %v23481_v15  ;;  %v11707_v19 = vsel %vm502_vm0, %v23481_v15, 0.0 }
 0xc98   : > { %25255 = vst [vmem:[#allocation35_spill] sm:$0xff] %v23484_v54  ;;  %11708 = vadd.xlane.f32.xlu1 %v11707_v19  ;;  %v11704_v24 = vsel %vm502_vm0, %v23484_v54, 0.0 }
 0xc99   : > { %11705 = vadd.xlane.f32.xlu0 %v11704_v24 }
 0xcc4   : > { %v15530_v52 = vpop.f32.mrb[206].mxu0 }
 0xcc5   : > { %v11505_v51 = vsel %vm502_vm0, %v15530_v52, 0.0  ;;  %v11294_v43 = vpop.f32.mrb[207].mxu0 }
 0xcc6   : > { %v11506_v62 = vadd.f32 %v11505_v51, %v23393_v57  ;;  %v11498_v10 = vsel %vm502_vm0, %v11294_v43, 0.0  ;;  %v17756_v51 = vld [vmem:[%s17867_s18 + $0xc0] sm:$0xff] }
 0xcc7   : > { %v11499_v37 = vadd.f32 %v11498_v10, %v23401_v11 }
 0xcc8   : > { %v11598_v60 = vadd.f32 %v17751_v44, %v11506_v62  ;;  %v15533_v20 = vpop.f32.mrb[208].mxu0 }
 0xcc9   : > { %v11597_v0 = vadd.f32 %v17752_v48, %v11499_v37  ;;  %v11519_v40 = vsel %vm502_vm0, %v15533_v20, 0.0  ;;  %v11304_v6 = vpop.f32.mrb[209].mxu0  ;;  %v17757_v48 = vld [vmem:[%s17867_s18 + $0xd8] sm:$0xff] }
 0xcca   : > { %v23498_v16 = vadd.f32 %v23248_v42, %v11598_v60  ;;  %v11520_v23 = vadd.f32 %v11519_v40, %v23407_v5  ;;  %v11512_v57 = vsel %vm502_vm0, %v11304_v6, 0.0  ;;  %v17758_v6 = vld [vmem:[%s17867_s18 + $0xd0] sm:$0xff] }
 0xccb   : > { %v23503_v39 = vadd.f32 %v23248_v42, %v11597_v0  ;;  %v11513_v11 = vadd.f32 %v11512_v57, %v23415_v2 }
 0xccc   : > { %25256 = vst [vmem:[#allocation141_spill] sm:$0xff] %v23498_v16  ;;  %v11600_v34 = vadd.f32 %v17753_v35, %v11520_v23  ;;  %v15536_v30 = vpop.f32.mrb[210].mxu0  ;;  %v11713_v58 = vsel %vm502_vm0, %v23498_v16, 0.0 }
 0xccd   : > { %25257 = vst [vmem:[#allocation67_spill] sm:$0xff] %v23503_v39  ;;  %v11599_v9 = vadd.f32 %v17754_v50, %v11513_v11  ;;  %v11533_v56 = vsel %vm502_vm0, %v15536_v30, 0.0  ;;  %11714 = vadd.xlane.f32.xlu1 %v11713_v58  ;;  %v11314_v5 = vpop.f32.mrb[211].mxu0  ;;  %v11710_v38 = vsel %vm502_vm0, %v23503_v39, 0.0 }
 0xcce   : > { %v23514_v41 = vadd.f32 %v23248_v42, %v11600_v34  ;;  %v11534_v2 = vadd.f32 %v11533_v56, %v23421_v53  ;;  %v11526_v45 = vsel %vm502_vm0, %v11314_v5, 0.0  ;;  %11711 = vadd.xlane.f32.xlu0 %v11710_v38  ;;  %v17759_v56 = vld [vmem:[%s17867_s18 + $0xe8] sm:$0xff] }
 0xccf   : > { %v23519_v36 = vadd.f32 %v23248_v42, %v11599_v9  ;;  %v11527_v26 = vadd.f32 %v11526_v45, %v23428_v13  ;;  %v17760_v45 = vld [vmem:[%s17867_s18 + $0xe0] sm:$0xff] }
 0xcd0   : > { %25258 = vst [vmem:[#allocation89_spill] sm:$0xff] %v23514_v41  ;;  %v11602_v19 = vadd.f32 %v17755_v4, %v11534_v2  ;;  %v15539_v24 = vpop.f32.mrb[212].mxu0  ;;  %v11719_v52 = vsel %vm502_vm0, %v23514_v41, 0.0 }
 0xcd1   : > { %25259 = vst [vmem:[#allocation128_spill] sm:$0xff] %v23519_v36  ;;  %v11601_v43 = vadd.f32 %v17756_v51, %v11527_v26  ;;  %v11547_v53 = vsel %vm502_vm0, %v15539_v24, 0.0  ;;  %11720 = vadd.xlane.f32.xlu1 %v11719_v52  ;;  %v11324_v62 = vpop.f32.mrb[213].mxu0  ;;  %v11716_v10 = vsel %vm502_vm0, %v23519_v36, 0.0 }
 0xcd2   : > { %v23530_v37 = vadd.f32 %v23248_v42, %v11602_v19  ;;  %v11548_v13 = vadd.f32 %v11547_v53, %v23434_v59  ;;  %v11540_v44 = vsel %vm502_vm0, %v11324_v62, 0.0  ;;  %11717 = vadd.xlane.f32.xlu0 %v11716_v10  ;;  %v17761_v62 = vld [vmem:[%s17867_s18 + $0xf8] sm:$0xff] }
 0xcd3   : > { %v23535_v60 = vadd.f32 %v23248_v42, %v11601_v43  ;;  %v11541_v20 = vadd.f32 %v11540_v44, %v23438_v27 }
 0xcd4   : > { %25260 = vst [vmem:[#allocation59_spill] sm:$0xff] %v23530_v37  ;;  %v11604_v0 = vadd.f32 %v17757_v48, %v11548_v13  ;;  %v11725_v40 = vsel %vm502_vm0, %v23530_v37, 0.0  ;;  %v17762_v48 = vld [vmem:[%s17867_s18 + $0xf0] sm:$0xff] }
 0xcd5   : > { %25261 = vst [vmem:[#allocation138_spill] sm:$0xff] %v23535_v60  ;;  %v11603_v23 = vadd.f32 %v17758_v6, %v11541_v20  ;;  %v15542_v57 = vpop.f32.mrb[214].mxu0  ;;  %11726 = vadd.xlane.f32.xlu1 %v11725_v40  ;;  %v11722_v59 = vsel %vm502_vm0, %v23535_v60, 0.0 }
 0xcd6   : > { %v23545_v11 = vadd.f32 %v23248_v42, %v11604_v0  ;;  %v11561_v35 = vsel %vm502_vm0, %v15542_v57, 0.0  ;;  %v11334_v27 = vpop.f32.mrb[215].mxu0  ;;  %11723 = vadd.xlane.f32.xlu0 %v11722_v59 }
 0xcd7   : > { %v23549_v34 = vadd.f32 %v23248_v42, %v11603_v23  ;;  %v11562_v30 = vadd.f32 %v11561_v35, %v23444_v28  ;;  %v11554_v58 = vsel %vm502_vm0, %v11334_v27, 0.0 }
 0xcd8   : > { %25262 = vst [vmem:[#allocation135_spill] sm:$0xff] %v23545_v11  ;;  %v11555_v50 = vadd.f32 %v11554_v58, %v23448_v46  ;;  %v11731_v9 = vsel %vm502_vm0, %v23545_v11, 0.0 }
 0xcd9   : > { %25263 = vst [vmem:[#allocation113_spill] sm:$0xff] %v23549_v34  ;;  %v11606_v5 = vadd.f32 %v17759_v56, %v11562_v30  ;;  %v15545_v38 = vpop.f32.mrb[216].mxu0  ;;  %11732 = vadd.xlane.f32.xlu1 %v11731_v9  ;;  %v11728_v2 = vsel %vm502_vm0, %v23549_v34, 0.0 }
 0xcda   : > { %v11605_v26 = vadd.f32 %v17760_v45, %v11555_v50  ;;  %v11575_v28 = vsel %vm502_vm0, %v15545_v38, 0.0  ;;  %v11344_v4 = vpop.f32.mrb[217].mxu0  ;;  %11729 = vadd.xlane.f32.xlu0 %v11728_v2 }
 0xcdb   : > { %v23562_v46 = vadd.f32 %v23248_v42, %v11606_v5  ;;  %v11576_v19 = vadd.f32 %v11575_v28, %v23452_v32  ;;  %v11568_v24 = vsel %vm502_vm0, %v11344_v4, 0.0  ;;  %v11655_v43 = vpop.xlane.xlu1 %11654 }
 0xcdc   : > { %v23567_v52 = vadd.f32 %v23248_v42, %v11605_v26  ;;  %v11569_v51 = vadd.f32 %v11568_v24, %v23456_v33  ;;  %v11652_v53 = vpop.xlane.xlu0 %11651  ;;  %v11747_v13 = vmul.f32 0.03125, %v11655_v43 }
 0xcdd   : > { %25264 = vst [vmem:[#allocation155_spill] sm:$0xff] %v23562_v46  ;;  %v11608_v10 = vadd.f32 %v17761_v62, %v11576_v19  ;;  %v11746_v44 = vmul.f32 0.03125, %v11652_v53  ;;  %v11737_v20 = vsel %vm502_vm0, %v23562_v46, 0.0 }
 0xcde   : > { %25265 = vst [vmem:[#allocation18_spill] sm:$0xff] %v23567_v52  ;;  %v11607_v0 = vadd.f32 %v17762_v48, %v11569_v51  ;;  %11738 = vadd.xlane.f32.xlu1 %v11737_v20  ;;  %v11734_v32 = vsel %vm502_vm0, %v23567_v52, 0.0  ;;  %v23580_v33 = vsub.f32 %v23258_v7, %v11747_v13 }
 0xcdf   : > { %v23577_v40 = vadd.f32 %v23248_v42, %v11608_v10  ;;  %v23583_v6 = vsub.f32 %v23262_v29, %v11746_v44  ;;  %11735 = vadd.xlane.f32.xlu0 %v11734_v32 }
 0xce0   : > { %v23586_v23 = vadd.f32 %v23248_v42, %v11607_v0  ;;  %v11658_v57 = vpop.xlane.xlu0 %11657  ;;  %v11811_v27 = vmul.f32 %v23580_v33, %v23580_v33 }
 0xce1   : > { %25266 = vst [vmem:[#allocation137_spill] sm:$0xff] %v23577_v40  ;;  %v11748_v59 = vmul.f32 0.03125, %v11658_v57  ;;  %v11743_v35 = vsel %vm502_vm0, %v23577_v40, 0.0  ;;  %v11810_v58 = vmul.f32 %v23583_v6, %v23583_v6 }
 0xce2   : > { %25267 = vst [vmem:[#allocation69_spill] sm:$0xff] %v23586_v23  ;;  %11744 = vadd.xlane.f32.xlu1 %v11743_v35  ;;  %v11740_v30 = vsel %vm502_vm0, %v23586_v23, 0.0  ;;  %v11845_v56 = vsel %vm502_vm0, %v11811_v27, 0.0 }
 0xce3   : > { %v23597_v50 = vsub.f32 %v23277_v14, %v11748_v59  ;;  %11741 = vadd.xlane.f32.xlu0 %v11740_v30  ;;  %v11842_v5 = vsel %vm502_vm0, %v11810_v58, 0.0 }
 0xce4   : > { %v11661_v42 = vpop.xlane.xlu0 %11660 }
 0xce5   : > { %v11749_v9 = vmul.f32 0.03125, %v11661_v42  ;;  %v11812_v38 = vmul.f32 %v23597_v50, %v23597_v50 }
 0xce6   : > { %11846 = vadd.xlane.f32.xlu1 %v11845_v56 }
 0xce7   : > { %v23604_v2 = vsub.f32 %v23281_v8, %v11749_v9  ;;  %11843 = vadd.xlane.f32.xlu0 %v11842_v5  ;;  %v11848_v4 = vsel %vm502_vm0, %v11812_v38, 0.0 }
 0xce8   : > { %v11664_v45 = vpop.xlane.xlu0 %11663 }
 0xce9   : > { %v11750_v26 = vmul.f32 0.03125, %v11664_v45  ;;  %v11813_v28 = vmul.f32 %v23604_v2, %v23604_v2 }
 0xceb   : > { %v23610_v19 = vsub.f32 %v23296_v18, %v11750_v26  ;;  %11849 = vadd.xlane.f32.xlu0 %v11848_v4  ;;  %v11851_v24 = vsel %vm502_vm0, %v11813_v28, 0.0 }
 0xcec   : > { %v11667_v51 = vpop.xlane.xlu0 %11666  ;;  %11852 = vadd.xlane.f32.xlu1 %v11851_v24 }
 0xced   : > { %v11751_v43 = vmul.f32 0.03125, %v11667_v51  ;;  %v11814_v53 = vmul.f32 %v23610_v19, %v23610_v19 }
 0xcef   : > { %v23616_v62 = vsub.f32 %v23307_v63, %v11751_v43  ;;  %v11854_v10 = vsel %vm502_vm0, %v11814_v53, 0.0  ;;  %v11685_v32 = vpop.xlane.xlu1 %11684 }
 0xcf0   : > { %v11670_v13 = vpop.xlane.xlu0 %11669  ;;  %11855 = vadd.xlane.f32.xlu0 %v11854_v10  ;;  %v11757_v56 = vmul.f32 0.03125, %v11685_v32  ;;  %v12143_v32 = vld [vmem:[%s24166_s10 + $0x8] sm:$0xff] }
 0xcf1   : > { %v11752_v44 = vmul.f32 0.03125, %v11670_v13  ;;  %v11815_v20 = vmul.f32 %v23616_v62, %v23616_v62 }
 0xcf2   : > { %v23640_v24 = vsub.f32 %v23332_v3, %v11757_v56 }
 0xcf3   : > { %v23622_v48 = vsub.f32 %v23325_v47, %v11752_v44  ;;  %v11857_v0 = vsel %vm502_vm0, %v11815_v20, 0.0  ;;  %v11691_v5 = vpop.xlane.xlu1 %11690 }
 0xcf4   : > { %v11673_v57 = vpop.xlane.xlu0 %11672  ;;  %11858 = vadd.xlane.f32.xlu1 %v11857_v0  ;;  %v11759_v51 = vmul.f32 0.03125, %v11691_v5  ;;  %v12142_v0 = vld [vmem:[%s24166_s10] sm:$0xff] }
 0xcf5   : > { %v11753_v59 = vmul.f32 0.03125, %v11673_v57  ;;  %v11816_v35 = vmul.f32 %v23622_v48, %v23622_v48  ;;  %v11821_v57 = vmul.f32 %v23640_v24, %v23640_v24 }
 0xcf7   : > { %v23628_v27 = vsub.f32 %v23336_v49, %v11753_v59  ;;  %v11860_v30 = vsel %vm502_vm0, %v11816_v35, 0.0  ;;  %v11697_v10 = vpop.xlane.xlu1 %11696  ;;  %v16330_v59 = vpack.c.bf16 %v12143_v32, %v12142_v0  ;;  %v23657_v35 = vsub.f32 %v23350_v25, %v11759_v51 }
 0xcf8   : > { %v11676_v58 = vpop.xlane.xlu0 %11675  ;;  %11861 = vadd.xlane.f32.xlu0 %v11860_v30  ;;  %v11761_v30 = vmul.f32 0.03125, %v11697_v10 }
 0xcf9   : > { %v11754_v42 = vmul.f32 0.03125, %v11676_v58  ;;  %v11817_v9 = vmul.f32 %v23628_v27, %v23628_v27  ;;  %16331 = vmatprep.subr.bf16.mxu1 %v16330_v59 }
 0xcfa   : > { %16333 = vmatpush3.bf16.msra.mxu1 %v16330_v59  ;;  %v23673_v51 = vsub.f32 %v23372_v12, %v11761_v30 }
 0xcfb   : > { %v23634_v38 = vsub.f32 %v23364_v17, %v11754_v42  ;;  %v11863_v45 = vsel %vm502_vm0, %v11817_v9, 0.0 }
 0xcfc   : > { %v11679_v26 = vpop.xlane.xlu0 %11678  ;;  %11864 = vadd.xlane.f32.xlu1 %v11863_v45  ;;  %v12144_v45 = vld [vmem:[%s24166_s10 + $0x10] sm:$0xff]  ;;  %v11825_v30 = vmul.f32 %v23673_v51, %v23673_v51 }
 0xcfd   : > { %v11755_v28 = vmul.f32 0.03125, %v11679_v26  ;;  %v11818_v4 = vmul.f32 %v23634_v38, %v23634_v38  ;;  %v12145_v26 = vld [vmem:[%s24166_s10 + $0x18] sm:$0xff] }
 0xcff   : > { %v23643_v43 = vsub.f32 %v23382_v55, %v11755_v28  ;;  %v11866_v53 = vsel %vm502_vm0, %v11818_v4, 0.0  ;;  %v11875_v28 = vsel %vm502_vm0, %v11821_v57, 0.0  ;;  %v16334_v4 = vpack.c.bf16 %v12145_v26, %v12144_v45 }
 0xd00   : > { %v11682_v13 = vpop.xlane.xlu0 %11681  ;;  %11867 = vadd.xlane.f32.xlu0 %v11866_v53 }
 0xd01   : > { %v11756_v44 = vmul.f32 0.03125, %v11682_v13  ;;  %v11819_v20 = vmul.f32 %v23643_v43, %v23643_v43  ;;  %v11823_v13 = vmul.f32 %v23657_v35, %v23657_v35  ;;  %16335 = vmatprep.subr.bf16.mxu1 %v16334_v4 }
 0xd02   : > { %16337 = vmatpush3.bf16.msra.mxu1 %v16334_v4 }
 0xd03   : > { %v23660_v58 = vsub.f32 %v23397_v1, %v11756_v44  ;;  %v11869_v42 = vsel %vm502_vm0, %v11819_v20, 0.0  ;;  %v11881_v57 = vsel %vm502_vm0, %v11823_v13, 0.0 }
 0xd04   : > { %v11688_v9 = vpop.xlane.xlu0 %11687  ;;  %11870 = vadd.xlane.f32.xlu1 %v11869_v42 }
 0xd05   : > { %v11758_v56 = vmul.f32 0.03125, %v11688_v9  ;;  %v11820_v5 = vmul.f32 %v23660_v58, %v23660_v58  ;;  %v11887_v9 = vsel %vm502_vm0, %v11825_v30, 0.0 }
 0xd07   : > { %v23676_v53 = vsub.f32 %v23411_v61, %v11758_v56  ;;  %v11872_v10 = vsel %vm502_vm0, %v11820_v5, 0.0 }
 0xd08   : > { %v11694_v44 = vpop.xlane.xlu0 %11693  ;;  %11876 = vadd.xlane.f32.xlu1 %v11875_v28  ;;  %11873 = vadd.xlane.f32.xlu0 %v11872_v10 }
 0xd09   : > { %v11760_v20 = vmul.f32 0.03125, %v11694_v44  ;;  %v11822_v0 = vmul.f32 %v23676_v53, %v23676_v53 }
 0xd0b   : > { %v23684_v32 = vsub.f32 %v23425_v31, %v11760_v20  ;;  %v11878_v59 = vsel %vm502_vm0, %v11822_v0, 0.0 }
 0xd0c   : > { %11882 = vadd.xlane.f32.xlu1 %v11881_v57  ;;  %11879 = vadd.xlane.f32.xlu0 %v11878_v59 }
 0xd0d   : > { %v11824_v42 = vmul.f32 %v23684_v32, %v23684_v32 }
 0xd0f   : > { %v11884_v56 = vsel %vm502_vm0, %v11824_v42, 0.0 }
 0xd10   : > { %11888 = vadd.xlane.f32.xlu1 %v11887_v9  ;;  %11885 = vadd.xlane.f32.xlu0 %v11884_v56 }
 0xd21   : > { %v11703_v5 = vpop.xlane.xlu1 %11702 }
 0xd22   : > { %v11763_v45 = vmul.f32 0.03125, %v11703_v5  ;;  %v11700_v26 = vpop.xlane.xlu0 %11699 }
 0xd23   : > { %v11762_v28 = vmul.f32 0.03125, %v11700_v26 }
 0xd24   : > { %v23695_v4 = vsub.f32 %v23466_v22, %v11763_v45 }
 0xd25   : > { %v23698_v10 = vsub.f32 %v23471_v21, %v11762_v28  ;;  %v11709_v13 = vpop.xlane.xlu1 %11708 }
 0xd26   : > { %v11765_v44 = vmul.f32 0.03125, %v11709_v13  ;;  %v11706_v20 = vpop.xlane.xlu0 %11705  ;;  %v11827_v0 = vmul.f32 %v23695_v4, %v23695_v4 }
 0xd27   : > { %v11764_v57 = vmul.f32 0.03125, %v11706_v20  ;;  %v11826_v59 = vmul.f32 %v23698_v10, %v23698_v10 }
 0xd28   : > { %v23705_v30 = vsub.f32 %v23481_v15, %v11765_v44  ;;  %v11893_v42 = vsel %vm502_vm0, %v11827_v0, 0.0 }
 0xd29   : > { %v23709_v9 = vsub.f32 %v23484_v54, %v11764_v57  ;;  %11894 = vadd.xlane.f32.xlu1 %v11893_v42  ;;  %v11890_v56 = vsel %vm502_vm0, %v11826_v59, 0.0 }
 0xd2a   : > { %11891 = vadd.xlane.f32.xlu0 %v11890_v56  ;;  %v11829_v5 = vmul.f32 %v23705_v30, %v23705_v30 }
 0xd2b   : > { %v11828_v45 = vmul.f32 %v23709_v9, %v23709_v9 }
 0xd2c   : > { %v11899_v26 = vsel %vm502_vm0, %v11829_v5, 0.0 }
 0xd2d   : > { %11900 = vadd.xlane.f32.xlu1 %v11899_v26  ;;  %v11896_v28 = vsel %vm502_vm0, %v11828_v45, 0.0 }
 0xd2e   : > { %11897 = vadd.xlane.f32.xlu0 %v11896_v28 }
 0xd5a   : > { %v11715_v13 = vpop.xlane.xlu1 %11714 }
 0xd5b   : > { %v11767_v44 = vmul.f32 0.03125, %v11715_v13  ;;  %v11712_v20 = vpop.xlane.xlu0 %11711 }
 0xd5c   : > { %v11766_v0 = vmul.f32 0.03125, %v11712_v20 }
 0xd5d   : > { %v23719_v57 = vsub.f32 %v23498_v16, %v11767_v44 }
 0xd5e   : > { %v23722_v59 = vsub.f32 %v23503_v39, %v11766_v0  ;;  %v11721_v42 = vpop.xlane.xlu1 %11720 }
 0xd5f   : > { %v11769_v56 = vmul.f32 0.03125, %v11721_v42  ;;  %v11718_v54 = vpop.xlane.xlu0 %11717  ;;  %v11831_v5 = vmul.f32 %v23719_v57, %v23719_v57 }
 0xd60   : > { %v11768_v26 = vmul.f32 0.03125, %v11718_v54  ;;  %v11830_v45 = vmul.f32 %v23722_v59, %v23722_v59 }
 0xd61   : > { %v23729_v28 = vsub.f32 %v23514_v41, %v11769_v56  ;;  %v11905_v13 = vsel %vm502_vm0, %v11831_v5, 0.0 }
 0xd62   : > { %v23733_v44 = vsub.f32 %v23519_v36, %v11768_v26  ;;  %v11727_v20 = vpop.xlane.xlu1 %11726  ;;  %11906 = vadd.xlane.f32.xlu1 %v11905_v13  ;;  %v11902_v0 = vsel %vm502_vm0, %v11830_v45, 0.0 }
 0xd63   : > { %v11771_v42 = vmul.f32 0.03125, %v11727_v20  ;;  %v11724_v39 = vpop.xlane.xlu0 %11723  ;;  %11903 = vadd.xlane.f32.xlu0 %v11902_v0  ;;  %v11833_v54 = vmul.f32 %v23729_v28, %v23729_v28 }
 0xd64   : > { %v11770_v16 = vmul.f32 0.03125, %v11724_v39  ;;  %v11832_v56 = vmul.f32 %v23733_v44, %v23733_v44 }
 0xd65   : > { %v23741_v41 = vsub.f32 %v23530_v37, %v11771_v42  ;;  %v11911_v5 = vsel %vm502_vm0, %v11833_v54, 0.0 }
 0xd66   : > { %v23745_v26 = vsub.f32 %v23535_v60, %v11770_v16  ;;  %v11733_v13 = vpop.xlane.xlu1 %11732  ;;  %11912 = vadd.xlane.f32.xlu1 %v11911_v5  ;;  %v11908_v45 = vsel %vm502_vm0, %v11832_v56, 0.0 }
 0xd67   : > { %v11773_v20 = vmul.f32 0.03125, %v11733_v13  ;;  %v11730_v0 = vpop.xlane.xlu0 %11729  ;;  %11909 = vadd.xlane.f32.xlu0 %v11908_v45  ;;  %v11835_v39 = vmul.f32 %v23741_v41, %v23741_v41 }
 0xd68   : > { %v11772_v36 = vmul.f32 0.03125, %v11730_v0  ;;  %v11834_v42 = vmul.f32 %v23745_v26, %v23745_v26 }
 0xd69   : > { %v23753_v37 = vsub.f32 %v23545_v11, %v11773_v20  ;;  %v11917_v16 = vsel %vm502_vm0, %v11835_v39, 0.0 }
 0xd6a   : > { %v23757_v54 = vsub.f32 %v23549_v34, %v11772_v36  ;;  %11918 = vadd.xlane.f32.xlu1 %v11917_v16  ;;  %v11914_v56 = vsel %vm502_vm0, %v11834_v42, 0.0 }
 0xd6b   : > { %v11739_v5 = vpop.xlane.xlu1 %11738  ;;  %11915 = vadd.xlane.f32.xlu0 %v11914_v56  ;;  %v11837_v13 = vmul.f32 %v23753_v37, %v23753_v37 }
 0xd6c   : > { %v11775_v45 = vmul.f32 0.03125, %v11739_v5  ;;  %v11736_v0 = vpop.xlane.xlu0 %11735  ;;  %v11836_v60 = vmul.f32 %v23757_v54, %v23757_v54 }
 0xd6d   : > { %v11774_v20 = vmul.f32 0.03125, %v11736_v0  ;;  %v11923_v11 = vsel %vm502_vm0, %v11837_v13, 0.0 }
 0xd6e   : > { %v23766_v39 = vsub.f32 %v23562_v46, %v11775_v45  ;;  %11924 = vadd.xlane.f32.xlu1 %v11923_v11  ;;  %v11920_v36 = vsel %vm502_vm0, %v11836_v60, 0.0 }
 0xd6f   : > { %v23770_v42 = vsub.f32 %v23567_v52, %v11774_v20  ;;  %v11745_v16 = vpop.xlane.xlu1 %11744  ;;  %11921 = vadd.xlane.f32.xlu0 %v11920_v36 }
 0xd70   : > { %v11777_v56 = vmul.f32 0.03125, %v11745_v16  ;;  %v11742_v5 = vpop.xlane.xlu0 %11741  ;;  %v11839_v34 = vmul.f32 %v23766_v39, %v23766_v39 }
 0xd71   : > { %v11776_v15 = vmul.f32 0.03125, %v11742_v5  ;;  %v11838_v13 = vmul.f32 %v23770_v42, %v23770_v42 }
 0xd72   : > { %v23777_v45 = vsub.f32 %v23577_v40, %v11777_v56  ;;  %v11929_v11 = vsel %vm502_vm0, %v11839_v34, 0.0 }
 0xd73   : > { %v23781_v60 = vsub.f32 %v23586_v23, %v11776_v15  ;;  %11930 = vadd.xlane.f32.xlu1 %v11929_v11  ;;  %v11847_v0 = vpop.xlane.xlu1 %11846  ;;  %v11926_v20 = vsel %vm502_vm0, %v11838_v13, 0.0 }
 0xd74   : > { %v11939_v36 = vmul.f32 0.03125, %v11847_v0  ;;  %11927 = vadd.xlane.f32.xlu0 %v11926_v20  ;;  %v11844_v16 = vpop.xlane.xlu0 %11843  ;;  %v11841_v5 = vmul.f32 %v23777_v45, %v23777_v45 }
 0xd75   : > { %v11938_v52 = vmul.f32 0.03125, %v11844_v16  ;;  %v11840_v56 = vmul.f32 %v23781_v60, %v23781_v60 }
 0xd76   : > { %v11971_v40 = vadd.f32 1e-05, %v11939_v36  ;;  %v11935_v34 = vsel %vm502_vm0, %v11841_v5, 0.0 }
 0xd77   : > { %v11970_v46 = vadd.f32 1e-05, %v11938_v52  ;;  %11936 = vadd.xlane.f32.xlu1 %v11935_v34  ;;  %v11932_v15 = vsel %vm502_vm0, %v11840_v56, 0.0  ;;  %v23793_v52 = vld [vmem:[%s24164_s8] ss:$0 sm:$0xff] }
 0xd78   : > { %17603 = vrsqrt.f32 %v11971_v40  ;;  %11933 = vadd.xlane.f32.xlu0 %v11932_v15  ;;  %v11850_v13 = vpop.xlane.xlu0 %11849 }
 0xd79   : > { %17605 = vrsqrt.f32 %v11970_v46  ;;  %v11940_v11 = vmul.f32 0.03125, %v11850_v13  ;;  %v11853_v0 = vpop.xlane.xlu1 %11852 }
 0xd7a   : > { %v11941_v20 = vmul.f32 0.03125, %v11853_v0 }
 0xd7b   : > { %v11972_v23 = vadd.f32 1e-05, %v11940_v11 }
 0xd7c   : > { %v11973_v21 = vadd.f32 1e-05, %v11941_v20 }
 0xd7d   : > { %17607 = vrsqrt.f32 %v11972_v23  ;;  %v11856_v16 = vpop.xlane.xlu0 %11855 }
 0xd7e   : > { %17609 = vrsqrt.f32 %v11973_v21  ;;  %v11942_v22 = vmul.f32 0.03125, %v11856_v16  ;;  %v23800_v21 = vld [vmem:[%s24165_s9] ss:$0 sm:$0xff] }
 0xd80   : > { %v11974_v36 = vadd.f32 1e-05, %v11942_v22 }
 0xd81   : > { %v11859_v31 = vpop.xlane.xlu1 %11858 }
 0xd82   : > { %v17604_v5 = vpop.eup %17603  ;;  %17611 = vrsqrt.f32 %v11974_v36  ;;  %v11943_v40 = vmul.f32 0.03125, %v11859_v31 }
 0xd83   : > { %v17606_v46 = vpop.eup %17605  ;;  %v12035_v56 = vmul.f32 %v17604_v5, %v23580_v33 }
 0xd84   : > { %v11975_v34 = vadd.f32 1e-05, %v11943_v40  ;;  %v12034_v15 = vmul.f32 %v17606_v46, %v23583_v6 }
 0xd85   : > { %v12073_v22 = vmul.f32 %v23793_v52, %v12035_v56  ;;  %v11862_v23 = vpop.xlane.xlu0 %11861 }
 0xd86   : > { %17613 = vrsqrt.f32 %v11975_v34  ;;  %v11944_v13 = vmul.f32 0.03125, %v11862_v23  ;;  %v12072_v11 = vmul.f32 %v23793_v52, %v12034_v15 }
 0xd87   : > { %v17608_v0 = vpop.eup %17607  ;;  %v12111_v6 = vadd.f32 %v23800_v21, %v12073_v22 }
 0xd88   : > { %v17610_v31 = vpop.eup %17609  ;;  %v11976_v20 = vadd.f32 1e-05, %v11944_v13  ;;  %v12110_v33 = vadd.f32 %v23800_v21, %v12072_v11  ;;  %v12036_v16 = vmul.f32 %v17608_v0, %v23597_v50 }
 0xd89   : > { %v11865_v36 = vpop.xlane.xlu1 %11864  ;;  %v12037_v5 = vmul.f32 %v17610_v31, %v23604_v2 }
 0xd8a   : > { %17615 = vrsqrt.f32 %v11976_v20  ;;  %v11945_v40 = vmul.f32 0.03125, %v11865_v36  ;;  %15554 = vmatprep.mubr.msk.f32.mxu1 %vm502_vm0, %v12110_v33  ;;  %v12074_v46 = vmul.f32 %v23793_v52, %v12036_v16 }
 0xd8b   : > { %15555 = vmatmul.mubr.msk.f32.vlgmr.msra.gmra.mrb[198].mxu1 %vm502_vm0, %v12111_v6  ;;  %v12075_v56 = vmul.f32 %v23793_v52, %v12037_v5 }
 0xd8c   : > { %v17612_v34 = vpop.eup %17611  ;;  %v11977_v15 = vadd.f32 1e-05, %v11945_v40  ;;  %v12112_v23 = vadd.f32 %v23800_v21, %v12074_v46 }
 0xd8d   : > { %v11868_v50 = vpop.xlane.xlu0 %11867  ;;  %v12113_v22 = vadd.f32 %v23800_v21, %v12075_v56  ;;  %v12038_v13 = vmul.f32 %v17612_v34, %v23610_v19 }
 0xd8e   : > { %17617 = vrsqrt.f32 %v11977_v15  ;;  %v11946_v2 = vmul.f32 0.03125, %v11868_v50  ;;  %15557 = vmatprep.mubr.msk.f32.mxu1 %vm502_vm0, %v12112_v23 }
 0xd8f   : > { %15558 = vmatmul.mubr.msk.f32.gmra.mrb[200].mxu1 %vm502_vm0, %v12113_v22  ;;  %v12076_v11 = vmul.f32 %v23793_v52, %v12038_v13 }
 0xd90   : > { %v17614_v0 = vpop.eup %17613  ;;  %v11978_v31 = vadd.f32 1e-05, %v11946_v2 }
 0xd91   : > { %v11871_v20 = vpop.xlane.xlu1 %11870  ;;  %v12114_v33 = vadd.f32 %v23800_v21, %v12076_v11  ;;  %v12039_v16 = vmul.f32 %v17614_v0, %v23616_v62 }
 0xd92   : > { %17619 = vrsqrt.f32 %v11978_v31  ;;  %v11947_v6 = vmul.f32 0.03125, %v11871_v20 }
 0xd93   : > { %15560 = vmatprep.mubr.msk.f32.mxu1 %vm502_vm0, %v12114_v33  ;;  %v12077_v19 = vmul.f32 %v23793_v52, %v12039_v16 }
 0xd94   : > { %v17616_v36 = vpop.eup %17615  ;;  %v11979_v5 = vadd.f32 1e-05, %v11947_v6 }
 0xd95   : > { %v11877_v40 = vpop.xlane.xlu1 %11876  ;;  %v11874_v46 = vpop.xlane.xlu0 %11873  ;;  %v12115_v56 = vadd.f32 %v23800_v21, %v12077_v19  ;;  %v12040_v34 = vmul.f32 %v17616_v36, %v23622_v48  ;;  %v12634_v36 = vld [vmem:[%s24168_s12] sm:$0xff] }
 0xd96   : > { %17621 = vrsqrt.f32 %v11979_v5  ;;  %v11949_v15 = vmul.f32 0.03125, %v11877_v40  ;;  %v11948_v23 = vmul.f32 0.03125, %v11874_v46  ;;  %v12635_v5 = vld [vmem:[%s24168_s12 + $0x8] sm:$0xff] }
 0xd97   : > { %15561 = vmatmul.mubr.msk.f32.gmra.mrb[202].mxu1 %vm502_vm0, %v12115_v56  ;;  %v12078_v62 = vmul.f32 %v23793_v52, %v12040_v34  ;;  %v16338_v34 = vpack.c.bf16 %v12635_v5, %v12634_v36 }
 0xd98   : > { %v17618_v50 = vpop.eup %17617  ;;  %v11981_v22 = vadd.f32 1e-05, %v11949_v15  ;;  %v11980_v13 = vadd.f32 1e-05, %v11948_v23  ;;  %v12636_v15 = vld [vmem:[%s24168_s12 + $0x10] sm:$0xff]  ;;  %v12637_v23 = vld [vmem:[%s24168_s12 + $0x18] sm:$0xff] }
 0xd99   : > { %v11883_v2 = vpop.xlane.xlu1 %11882  ;;  %v11880_v11 = vpop.xlane.xlu0 %11879  ;;  %v12116_v0 = vadd.f32 %v23800_v21, %v12078_v62  ;;  %v12041_v31 = vmul.f32 %v17618_v50, %v23628_v27  ;;  %16339 = vmatprep.subr.bf16.mxu0 %v16338_v34 }
 0xd9a   : > { %17623 = vrsqrt.f32 %v11981_v22  ;;  %v11951_v20 = vmul.f32 0.03125, %v11883_v2  ;;  %v11950_v33 = vmul.f32 0.03125, %v11880_v11  ;;  %v16342_v22 = vpack.c.bf16 %v12637_v23, %v12636_v15  ;;  %16341 = vmatpush3.bf16.msra.mxu0 %v16338_v34 }
 0xd9b   : > { %17625 = vrsqrt.f32 %v11980_v13  ;;  %15563 = vmatprep.mubr.msk.f32.mxu1 %vm502_vm0, %v12116_v0  ;;  %v12079_v48 = vmul.f32 %v23793_v52, %v12041_v31  ;;  %v12638_v13 = vld [vmem:[%s24168_s12 + $0x20] sm:$0xff] }
 0xd9c   : > { %v17620_v16 = vpop.eup %17619  ;;  %v11983_v6 = vadd.f32 1e-05, %v11951_v20  ;;  %v11982_v19 = vadd.f32 1e-05, %v11950_v33  ;;  %16343 = vmatprep.subr.bf16.mxu0 %v16342_v22 }
 0xd9d   : > { %v11889_v27 = vpop.xlane.xlu1 %11888  ;;  %v11886_v40 = vpop.xlane.xlu0 %11885  ;;  %v12117_v46 = vadd.f32 %v23800_v21, %v12079_v48  ;;  %v12042_v56 = vmul.f32 %v17620_v16, %v23634_v38  ;;  %v12639_v38 = vld [vmem:[%s24168_s12 + $0x28] sm:$0xff] }
 0xd9e   : > { %17627 = vrsqrt.f32 %v11983_v6  ;;  %v11953_v62 = vmul.f32 0.03125, %v11889_v27  ;;  %v11952_v50 = vmul.f32 0.03125, %v11886_v40  ;;  %v16346_v48 = vpack.c.bf16 %v12639_v38, %v12638_v13  ;;  %16345 = vmatpush3.bf16.msra.mxu0 %v16342_v22 }
 0xd9f   : > { %17629 = vrsqrt.f32 %v11982_v19  ;;  %15564 = vmatmul.mubr.msk.f32.gmra.mrb[204].mxu1 %vm502_vm0, %v12117_v46  ;;  %v12080_v2 = vmul.f32 %v23793_v52, %v12042_v56 }
 0xda0   : > { %v17622_v11 = vpop.eup %17621  ;;  %v11985_v0 = vadd.f32 1e-05, %v11953_v62  ;;  %v11984_v31 = vadd.f32 1e-05, %v11952_v50  ;;  %16347 = vmatprep.subr.bf16.mxu0 %v16346_v48 }
 0xda1   : > { %v12118_v20 = vadd.f32 %v23800_v21, %v12080_v2  ;;  %v12043_v33 = vmul.f32 %v17622_v11, %v23643_v43 }
 0xda2   : > { %17631 = vrsqrt.f32 %v11985_v0  ;;  %16349 = vmatpush3.bf16.msra.mxu0 %v16346_v48 }
 0xda3   : > { %17633 = vrsqrt.f32 %v11984_v31  ;;  %15566 = vmatprep.mubr.msk.f32.mxu1 %vm502_vm0, %v12118_v20  ;;  %v12081_v16 = vmul.f32 %v23793_v52, %v12043_v33 }
 0xda4   : > { %v17624_v6 = vpop.eup %17623 }
 0xda5   : > { %v17626_v19 = vpop.eup %17625  ;;  %v12119_v36 = vadd.f32 %v23800_v21, %v12081_v16  ;;  %v12045_v5 = vmul.f32 %v17624_v6, %v23640_v24 }
 0xda6   : > { %v12044_v27 = vmul.f32 %v17626_v19, %v23660_v58 }
 0xda7   : > { %15567 = vmatmul.mubr.msk.f32.gmra.mrb[206].mxu1 %vm502_vm0, %v12119_v36  ;;  %v12083_v43 = vmul.f32 %v23793_v52, %v12045_v5 }
 0xda8   : > { %v17628_v40 = vpop.eup %17627  ;;  %v12082_v46 = vmul.f32 %v23793_v52, %v12044_v27 }
 0xda9   : > { %v17630_v56 = vpop.eup %17629  ;;  %v12121_v34 = vadd.f32 %v23800_v21, %v12083_v43  ;;  %v12047_v15 = vmul.f32 %v17628_v40, %v23657_v35 }
 0xdaa   : > { %v12120_v23 = vadd.f32 %v23800_v21, %v12082_v46  ;;  %v12046_v24 = vmul.f32 %v17630_v56, %v23676_v53 }
 0xdab   : > { %v12085_v62 = vmul.f32 %v23793_v52, %v12047_v15 }
 0xdac   : > { %v17632_v58 = vpop.eup %17631  ;;  %15569 = vmatprep.mubr.msk.f32.mxu1 %vm502_vm0, %v12120_v23  ;;  %v12084_v50 = vmul.f32 %v23793_v52, %v12046_v24 }
 0xdad   : > { %v17634_v22 = vpop.eup %17633  ;;  %15570 = vmatmul.mubr.msk.f32.gmra.mrb[208].mxu1 %vm502_vm0, %v12121_v34  ;;  %v12123_v13 = vadd.f32 %v23800_v21, %v12085_v62  ;;  %v12049_v38 = vmul.f32 %v17632_v58, %v23673_v51 }
 0xdae   : > { %v12122_v35 = vadd.f32 %v23800_v21, %v12084_v50  ;;  %v12048_v2 = vmul.f32 %v17634_v22, %v23684_v32 }
 0xdaf   : > { %v12087_v53 = vmul.f32 %v23793_v52, %v12049_v38 }
 0xdb0   : > { %15572 = vmatprep.mubr.msk.f32.mxu1 %vm502_vm0, %v12122_v35  ;;  %v12086_v11 = vmul.f32 %v23793_v52, %v12048_v2 }
 0xdb1   : > { %15573 = vmatmul.mubr.msk.f32.gmra.mrb[210].mxu1 %vm502_vm0, %v12123_v13  ;;  %v12125_v0 = vadd.f32 %v23800_v21, %v12087_v53  ;;  %v12642_v53 = vld [vmem:[%s24168_s12 + $0x40] sm:$0xff] }
 0xdb2   : > { %v12124_v31 = vadd.f32 %v23800_v21, %v12086_v11  ;;  %v12643_v11 = vld [vmem:[%s24168_s12 + $0x48] sm:$0xff] }
 0xdb4   : > { %15575 = vmatprep.mubr.msk.f32.mxu1 %vm502_vm0, %v12124_v31  ;;  %v12644_v31 = vld [vmem:[%s24168_s12 + $0x50] sm:$0xff] }
 0xdb5   : > { %15576 = vmatmul.mubr.msk.f32.gmra.mrb[212].mxu1 %vm502_vm0, %v12125_v0  ;;  %v16354_v0 = vpack.c.bf16 %v12643_v11, %v12642_v53 }
 0xdb6   : > { %v11895_v51 = vpop.xlane.xlu1 %11894 }
 0xdb7   : > { %v11955_v20 = vmul.f32 0.03125, %v11895_v51  ;;  %v11892_v33 = vpop.xlane.xlu0 %11891  ;;  %v12645_v51 = vld [vmem:[%s24168_s12 + $0x58] sm:$0xff] }
 0xdb8   : > { %v11954_v32 = vmul.f32 0.03125, %v11892_v33  ;;  %v12646_v33 = vld [vmem:[%s24168_s12 + $0x60] sm:$0xff] }
 0xdb9   : > { %v11987_v48 = vadd.f32 1e-05, %v11955_v20  ;;  %v16358_v20 = vpack.c.bf16 %v12645_v51, %v12644_v31 }
 0xdba   : > { %v11986_v16 = vadd.f32 1e-05, %v11954_v32  ;;  %v11901_v6 = vpop.xlane.xlu1 %11900  ;;  %v12647_v32 = vld [vmem:[%s24168_s12 + $0x68] sm:$0xff] }
 0xdbb   : > { %17635 = vrsqrt.f32 %v11987_v48  ;;  %v11957_v19 = vmul.f32 0.03125, %v11901_v6  ;;  %v11898_v36 = vpop.xlane.xlu0 %11897  ;;  %v16362_v48 = vpack.c.bf16 %v12647_v32, %v12646_v33  ;;  %v12649_v6 = vld [vmem:[%s24168_s12 + $0x78] sm:$0xff] }
 0xdbc   : > { %17637 = vrsqrt.f32 %v11986_v16  ;;  %v11956_v5 = vmul.f32 0.03125, %v11898_v36  ;;  %v12648_v16 = vld [vmem:[%s24168_s12 + $0x70] sm:$0xff] }
 0xdbd   : > { %v11989_v27 = vadd.f32 1e-05, %v11957_v19  ;;  %v16366_v36 = vpack.c.bf16 %v12649_v6, %v12648_v16 }
 0xdbe   : > { %v11988_v43 = vadd.f32 1e-05, %v11956_v5 }
 0xdbf   : > { %17639 = vrsqrt.f32 %v11989_v27 }
 0xdc0   : > { %17641 = vrsqrt.f32 %v11988_v43 }
 0xdc5   : > { %v17636_v40 = vpop.eup %17635 }
 0xdc6   : > { %v17638_v46 = vpop.eup %17637  ;;  %v12051_v56 = vmul.f32 %v17636_v40, %v23695_v4 }
 0xdc7   : > { %v12050_v34 = vmul.f32 %v17638_v46, %v23698_v10 }
 0xdc8   : > { %v12089_v15 = vmul.f32 %v23793_v52, %v12051_v56 }
 0xdc9   : > { %v17640_v23 = vpop.eup %17639  ;;  %v12088_v24 = vmul.f32 %v23793_v52, %v12050_v34 }
 0xdca   : > { %v17642_v62 = vpop.eup %17641  ;;  %v12053_v58 = vmul.f32 %v17640_v23, %v23705_v30  ;;  %v12127_v13 = vadd.f32 %v23800_v21, %v12089_v15  ;;  %v12640_v30 = vld [vmem:[%s24168_s12 + $0x30] sm:$0xff] }
 0xdcb   : > { %v12126_v50 = vadd.f32 %v23800_v21, %v12088_v24  ;;  %v12052_v22 = vmul.f32 %v17642_v62, %v23709_v9  ;;  %v12641_v9 = vld [vmem:[%s24168_s12 + $0x38] sm:$0xff] }
 0xdcc   : > { %v12091_v38 = vmul.f32 %v23793_v52, %v12053_v58  ;;  %v16350_v2 = vpack.c.bf16 %v12641_v9, %v12640_v30 }
 0xdcd   : > { %15578 = vmatprep.mubr.msk.f32.mxu1 %vm502_vm0, %v12126_v50  ;;  %v12090_v4 = vmul.f32 %v23793_v52, %v12052_v22 }
 0xdce   : > { %15579 = vmatmul.mubr.msk.f32.gmra.mrb[214].mxu1 %vm502_vm0, %v12127_v13  ;;  %v12129_v35 = vadd.f32 %v23800_v21, %v12091_v38  ;;  %16351 = vmatprep.subr.bf16.mxu0 %v16350_v2 }
 0xdcf   : > { %v12128_v10 = vadd.f32 %v23800_v21, %v12090_v4  ;;  %16353 = vmatpush3.bf16.msra.mxu0 %v16350_v2 }
 0xdd0   : > { %16355 = vmatprep.subr.bf16.mxu0 %v16354_v0 }
 0xdd1   : > { %15581 = vmatprep.mubr.msk.f32.mxu1 %vm502_vm0, %v12128_v10 }
 0xdd2   : > { %15582 = vmatmul.mubr.msk.f32.gmra.mrb[216].mxu1 %vm502_vm0, %v12129_v35 }
 0xdd3   : > { %16357 = vmatpush3.bf16.msra.mxu0 %v16354_v0 }
 0xdd4   : > { %16359 = vmatprep.subr.bf16.mxu0 %v16358_v20 }
 0xdd7   : > { %16361 = vmatpush3.bf16.msra.mxu0 %v16358_v20 }
 0xdd8   : > { %16363 = vmatprep.subr.bf16.mxu0 %v16362_v48 }
 0xddb   : > { %16365 = vmatpush3.bf16.msra.mxu0 %v16362_v48 }
 0xddc   : > { %16367 = vmatprep.subr.bf16.mxu0 %v16366_v36 }
 0xddf   : > { %16369 = vmatpush3.bf16.msra.mxu0 %v16366_v36 }
 0xdef   : > { %v11907_v19 = vpop.xlane.xlu1 %11906 }
 0xdf0   : > { %v11959_v5 = vmul.f32 0.03125, %v11907_v19  ;;  %v11904_v27 = vpop.xlane.xlu0 %11903 }
 0xdf1   : > { %v11958_v43 = vmul.f32 0.03125, %v11904_v27 }
 0xdf2   : > { %v11991_v40 = vadd.f32 1e-05, %v11959_v5 }
 0xdf3   : > { %v11990_v46 = vadd.f32 1e-05, %v11958_v43  ;;  %v11913_v56 = vpop.xlane.xlu1 %11912 }
 0xdf4   : > { %17643 = vrsqrt.f32 %v11991_v40  ;;  %v11961_v34 = vmul.f32 0.03125, %v11913_v56  ;;  %v11910_v15 = vpop.xlane.xlu0 %11909 }
 0xdf5   : > { %17645 = vrsqrt.f32 %v11990_v46  ;;  %v11960_v23 = vmul.f32 0.03125, %v11910_v15 }
 0xdf6   : > { %v11993_v24 = vadd.f32 1e-05, %v11961_v34 }
 0xdf7   : > { %v11992_v62 = vadd.f32 1e-05, %v11960_v23  ;;  %v11919_v58 = vpop.xlane.xlu1 %11918 }
 0xdf8   : > { %17647 = vrsqrt.f32 %v11993_v24  ;;  %v11963_v50 = vmul.f32 0.03125, %v11919_v58  ;;  %v11916_v22 = vpop.xlane.xlu0 %11915 }
 0xdf9   : > { %17649 = vrsqrt.f32 %v11992_v62  ;;  %v11962_v13 = vmul.f32 0.03125, %v11916_v22 }
 0xdfa   : > { %v11995_v38 = vadd.f32 1e-05, %v11963_v50 }
 0xdfb   : > { %v11994_v4 = vadd.f32 1e-05, %v11962_v13  ;;  %v11925_v10 = vpop.xlane.xlu1 %11924 }
 0xdfc   : > { %17651 = vrsqrt.f32 %v11995_v38  ;;  %v11965_v35 = vmul.f32 0.03125, %v11925_v10  ;;  %v11922_v30 = vpop.xlane.xlu0 %11921 }
 0xdfd   : > { %17653 = vrsqrt.f32 %v11994_v4  ;;  %v11964_v9 = vmul.f32 0.03125, %v11922_v30 }
 0xdfe   : > { %v17644_v2 = vpop.eup %17643  ;;  %v11997_v53 = vadd.f32 1e-05, %v11965_v35 }
 0xdff   : > { %v17646_v11 = vpop.eup %17645  ;;  %v11996_v0 = vadd.f32 1e-05, %v11964_v9  ;;  %v12055_v31 = vmul.f32 %v17644_v2, %v23719_v57 }
 0xe00   : > { %17655 = vrsqrt.f32 %v11997_v53  ;;  %v11931_v51 = vpop.xlane.xlu1 %11930  ;;  %v12054_v20 = vmul.f32 %v17646_v11, %v23722_v59 }
 0xe01   : > { %17657 = vrsqrt.f32 %v11996_v0  ;;  %v11967_v33 = vmul.f32 0.03125, %v11931_v51  ;;  %v11928_v32 = vpop.xlane.xlu0 %11927  ;;  %v12093_v48 = vmul.f32 %v23793_v52, %v12055_v31 }
 0xe02   : > { %v17648_v16 = vpop.eup %17647  ;;  %v11966_v6 = vmul.f32 0.03125, %v11928_v32  ;;  %v12092_v19 = vmul.f32 %v23793_v52, %v12054_v20 }
 0xe03   : > { %v17650_v36 = vpop.eup %17649  ;;  %v11999_v5 = vadd.f32 1e-05, %v11967_v33  ;;  %v12057_v27 = vmul.f32 %v17648_v16, %v23729_v28  ;;  %v12131_v34 = vadd.f32 %v23800_v21, %v12093_v48 }
 0xe04   : > { %v11998_v43 = vadd.f32 1e-05, %v11966_v6  ;;  %v11937_v40 = vpop.xlane.xlu1 %11936  ;;  %v12130_v57 = vadd.f32 %v23800_v21, %v12092_v19  ;;  %v12056_v46 = vmul.f32 %v17650_v36, %v23733_v44 }
 0xe05   : > { %17659 = vrsqrt.f32 %v11999_v5  ;;  %v11969_v59 = vmul.f32 0.03125, %v11937_v40  ;;  %v11934_v56 = vpop.xlane.xlu0 %11933  ;;  %v12095_v15 = vmul.f32 %v23793_v52, %v12057_v27 }
 0xe06   : > { %v17652_v23 = vpop.eup %17651  ;;  %17661 = vrsqrt.f32 %v11998_v43  ;;  %v11968_v24 = vmul.f32 0.03125, %v11934_v56  ;;  %15584 = vmatprep.mubr.msk.f32.mxu1 %vm502_vm0, %v12130_v57  ;;  %v12094_v28 = vmul.f32 %v23793_v52, %v12056_v46 }
 0xe07   : > { %v17654_v62 = vpop.eup %17653  ;;  %v12001_v58 = vadd.f32 1e-05, %v11969_v59  ;;  %15585 = vmatmul.mubr.msk.f32.gmra.mrb[218].mxu1 %vm502_vm0, %v12131_v34  ;;  %v12059_v44 = vmul.f32 %v17652_v23, %v23741_v41  ;;  %v12133_v38 = vadd.f32 %v23800_v21, %v12095_v15 }
 0xe08   : > { %v12000_v50 = vadd.f32 1e-05, %v11968_v24  ;;  %v12132_v22 = vadd.f32 %v23800_v21, %v12094_v28  ;;  %v12058_v13 = vmul.f32 %v17654_v62, %v23745_v26 }
 0xe09   : > { %17663 = vrsqrt.f32 %v12001_v58  ;;  %v12097_v4 = vmul.f32 %v23793_v52, %v12059_v44 }
 0xe0a   : > { %v17656_v10 = vpop.eup %17655  ;;  %17665 = vrsqrt.f32 %v12000_v50  ;;  %15587 = vmatprep.mubr.msk.f32.mxu1 %vm502_vm0, %v12132_v22  ;;  %v12096_v35 = vmul.f32 %v23793_v52, %v12058_v13 }
 0xe0b   : > { %v17658_v30 = vpop.eup %17657  ;;  %15588 = vmatmul.mubr.msk.f32.gmra.mrb[220].mxu1 %vm502_vm0, %v12133_v38  ;;  %v12061_v41 = vmul.f32 %v17656_v10, %v23753_v37  ;;  %v12135_v2 = vadd.f32 %v23800_v21, %v12097_v4 }
 0xe0c   : > { %v12134_v9 = vadd.f32 %v23800_v21, %v12096_v35  ;;  %v12060_v26 = vmul.f32 %v17658_v30, %v23757_v54 }
 0xe0d   : > { %v12099_v53 = vmul.f32 %v23793_v52, %v12061_v41 }
 0xe0e   : > { %15590 = vmatprep.mubr.msk.f32.mxu1 %vm502_vm0, %v12134_v9  ;;  %v12098_v11 = vmul.f32 %v23793_v52, %v12060_v26 }
 0xe0f   : > { %v17660_v0 = vpop.eup %17659  ;;  %15591 = vmatmul.mubr.msk.f32.gmra.mrb[222].mxu1 %vm502_vm0, %v12135_v2  ;;  %v12137_v20 = vadd.f32 %v23800_v21, %v12099_v53 }
 0xe10   : > { %v17662_v31 = vpop.eup %17661  ;;  %v12136_v51 = vadd.f32 %v23800_v21, %v12098_v11  ;;  %v12063_v37 = vmul.f32 %v17660_v0, %v23766_v39 }
 0xe11   : > { %v12062_v54 = vmul.f32 %v17662_v31, %v23770_v42 }
 0xe12   : > { %15593 = vmatprep.mubr.msk.f32.mxu1 %vm502_vm0, %v12136_v51  ;;  %v12101_v33 = vmul.f32 %v23793_v52, %v12063_v37 }
 0xe13   : > { %v17664_v32 = vpop.eup %17663  ;;  %15594 = vmatmul.mubr.msk.f32.gmra.mrb[224].mxu1 %vm502_vm0, %v12137_v20  ;;  %v12100_v48 = vmul.f32 %v23793_v52, %v12062_v54 }
 0xe14   : > { %v17666_v16 = vpop.eup %17665  ;;  %v12065_v6 = vmul.f32 %v17664_v32, %v23777_v45  ;;  %v12139_v36 = vadd.f32 %v23800_v21, %v12101_v33  ;;  %v23979_v45 = vld [vmem:[%s24167_s11] ss:$0 sm:$0xff] }
 0xe15   : > { %v12138_v19 = vadd.f32 %v23800_v21, %v12100_v48  ;;  %v12064_v39 = vmul.f32 %v17666_v16, %v23781_v60 }
 0xe16   : > { %v12103_v42 = vmul.f32 %v23793_v52, %v12065_v6 }
 0xe17   : > { %15596 = vmatprep.mubr.msk.f32.mxu1 %vm502_vm0, %v12138_v19  ;;  %v12102_v5 = vmul.f32 %v23793_v52, %v12064_v39 }
 0xe18   : > { %15597 = vmatmul.mubr.msk.f32.gmra.mrb[226].mxu1 %vm502_vm0, %v12139_v36  ;;  %v12141_v43 = vadd.f32 %v23800_v21, %v12103_v42 }
 0xe19   : > { %v12140_v27 = vadd.f32 %v23800_v21, %v12102_v5 }
 0xe1b   : > { %15599 = vmatprep.mubr.msk.f32.mxu1 %vm502_vm0, %v12140_v27 }
 0xe1c   : > { %15600 = vmatmul.mubr.msk.f32.gmra.mrb[228].mxu1 %vm502_vm0, %v12141_v43 }
 0xe5e   : > { %v15556_v60 = vpop.f32.mrb[198].mxu1 }
 0xe5f   : > { %v12321_v40 = vadd.f32 %v15556_v60, %v23979_v45  ;;  %v12315_v57 = vpop.f32.mrb[199].mxu1 }
 0xe60   : > { %v12316_v52 = vadd.f32 %v23979_v45, %v12315_v57 }
 0xe61   : > { %v12507_v46 = vmul.f32 0.70710677, %v12321_v40  ;;  %v12475_v30 = vmul.f32 0.5, %v12321_v40 }
 0xe62   : > { %v12506_v59 = vmul.f32 0.70710677, %v12316_v52  ;;  %v15559_v56 = vpop.f32.mrb[200].mxu1  ;;  %v12474_v10 = vmul.f32 0.5, %v12316_v52 }
 0xe63   : > { %17667 = verf.f32 %v12507_v46  ;;  %v12331_v21 = vadd.f32 %v15559_v56, %v23979_v45  ;;  %v12325_v34 = vpop.f32.mrb[201].mxu1 }
 0xe64   : > { %17669 = verf.f32 %v12506_v59  ;;  %v12326_v15 = vadd.f32 %v23979_v45, %v12325_v34 }
 0xe65   : > { %v12509_v23 = vmul.f32 0.70710677, %v12331_v21  ;;  %v12477_v20 = vmul.f32 0.5, %v12331_v21 }
 0xe66   : > { %v12508_v24 = vmul.f32 0.70710677, %v12326_v15  ;;  %v12476_v0 = vmul.f32 0.5, %v12326_v15 }
 0xe67   : > { %17671 = verf.f32 %v12509_v23 }
 0xe68   : > { %17673 = verf.f32 %v12508_v24 }
 0xe6a   : > { %v15562_v28 = vpop.f32.mrb[202].mxu1 }
 0xe6b   : > { %v12341_v62 = vadd.f32 %v15562_v28, %v23979_v45  ;;  %v12335_v58 = vpop.f32.mrb[203].mxu1 }
 0xe6c   : > { %v12336_v44 = vadd.f32 %v23979_v45, %v12335_v58 }
 0xe6d   : > { %v17668_v50 = vpop.eup %17667  ;;  %v12511_v22 = vmul.f32 0.70710677, %v12341_v62  ;;  %v12479_v60 = vmul.f32 0.5, %v12341_v62 }
 0xe6e   : > { %v17670_v13 = vpop.eup %17669  ;;  %v12571_v38 = vadd.f32 1.0, %v17668_v50  ;;  %v12510_v4 = vmul.f32 0.70710677, %v12336_v44  ;;  %v12478_v42 = vmul.f32 0.5, %v12336_v44 }
 0xe6f   : > { %v12570_v35 = vadd.f32 1.0, %v17670_v13  ;;  %17675 = verf.f32 %v12511_v22 }
 0xe70   : > { %17677 = verf.f32 %v12510_v4  ;;  %v12603_v2 = vmul.f32 %v12571_v38, %v12475_v30 }
 0xe71   : > { %v17672_v41 = vpop.eup %17671  ;;  %v12602_v9 = vmul.f32 %v12570_v35, %v12474_v10 }
 0xe72   : > { %v17674_v26 = vpop.eup %17673  ;;  %v12573_v53 = vadd.f32 1.0, %v17672_v41  ;;  %v15565_v11 = vpop.f32.mrb[204].mxu1 }
 0xe73   : > { %v12572_v31 = vadd.f32 1.0, %v17674_v26  ;;  %v12351_v51 = vadd.f32 %v15565_v11, %v23979_v45  ;;  %v12345_v37 = vpop.f32.mrb[205].mxu1  ;;  %15634 = vmatprep.mubr.f32.mxu0 %v12602_v9 }
 0xe74   : > { %v12346_v54 = vadd.f32 %v23979_v45, %v12345_v37  ;;  %15635 = vmatmul.mubr.f32.vlgmr.msra.gmra.mrb[218].mxu0 %v12603_v2  ;;  %v12605_v16 = vmul.f32 %v12573_v53, %v12477_v20 }
 0xe75   : > { %v12513_v33 = vmul.f32 0.70710677, %v12351_v51  ;;  %v12604_v32 = vmul.f32 %v12572_v31, %v12476_v0  ;;  %v12481_v50 = vmul.f32 0.5, %v12351_v51 }
 0xe76   : > { %v12512_v48 = vmul.f32 0.70710677, %v12346_v54  ;;  %v12480_v62 = vmul.f32 0.5, %v12346_v54 }
 0xe77   : > { %17679 = verf.f32 %v12513_v33  ;;  %15637 = vmatprep.mubr.f32.mxu0 %v12604_v32 }
 0xe78   : > { %17681 = verf.f32 %v12512_v48  ;;  %15638 = vmatmul.mubr.f32.gmra.mrb[220].mxu0 %v12605_v16 }
 0xe79   : > { %v17676_v6 = vpop.eup %17675 }
 0xe7a   : > { %v17678_v19 = vpop.eup %17677  ;;  %v12575_v39 = vadd.f32 1.0, %v17676_v6  ;;  %v15568_v36 = vpop.f32.mrb[206].mxu1 }
 0xe7b   : > { %v12574_v5 = vadd.f32 1.0, %v17678_v19  ;;  %v12361_v27 = vadd.f32 %v15568_v36, %v23979_v45  ;;  %v12355_v43 = vpop.f32.mrb[207].mxu1 }
 0xe7c   : > { %v12356_v40 = vadd.f32 %v23979_v45, %v12355_v43  ;;  %v12607_v59 = vmul.f32 %v12575_v39, %v12479_v60 }
 0xe7d   : > { %v12515_v57 = vmul.f32 0.70710677, %v12361_v27  ;;  %v12606_v52 = vmul.f32 %v12574_v5, %v12478_v42  ;;  %v12483_v33 = vmul.f32 0.5, %v12361_v27 }
 0xe7e   : > { %v12514_v46 = vmul.f32 0.70710677, %v12356_v40  ;;  %v12482_v37 = vmul.f32 0.5, %v12356_v40 }
 0xe7f   : > { %17683 = verf.f32 %v12515_v57  ;;  %15640 = vmatprep.mubr.f32.mxu0 %v12606_v52 }
 0xe80   : > { %17685 = verf.f32 %v12514_v46  ;;  %v15571_v56 = vpop.f32.mrb[208].mxu1  ;;  %15641 = vmatmul.mubr.f32.gmra.mrb[222].mxu0 %v12607_v59 }
 0xe81   : > { %v17680_v21 = vpop.eup %17679  ;;  %v12371_v34 = vadd.f32 %v15571_v56, %v23979_v45  ;;  %v12365_v15 = vpop.f32.mrb[209].mxu1 }
 0xe82   : > { %v17682_v23 = vpop.eup %17681  ;;  %v12577_v24 = vadd.f32 1.0, %v17680_v21  ;;  %v12366_v28 = vadd.f32 %v23979_v45, %v12365_v15 }
 0xe83   : > { %v12576_v58 = vadd.f32 1.0, %v17682_v23  ;;  %v12517_v44 = vmul.f32 0.70710677, %v12371_v34  ;;  %v12485_v5 = vmul.f32 0.5, %v12371_v34 }
 0xe84   : > { %v12516_v22 = vmul.f32 0.70710677, %v12366_v28  ;;  %v15574_v13 = vpop.f32.mrb[210].mxu1  ;;  %v12609_v30 = vmul.f32 %v12577_v24, %v12481_v50  ;;  %v12484_v36 = vmul.f32 0.5, %v12366_v28 }
 0xe85   : > { %17687 = verf.f32 %v12517_v44  ;;  %v12381_v38 = vadd.f32 %v15574_v13, %v23979_v45  ;;  %v12375_v4 = vpop.f32.mrb[211].mxu1  ;;  %v12608_v10 = vmul.f32 %v12576_v58, %v12480_v62 }
 0xe86   : > { %17689 = verf.f32 %v12516_v22  ;;  %v12376_v35 = vadd.f32 %v23979_v45, %v12375_v4 }
 0xe87   : > { %v12519_v41 = vmul.f32 0.70710677, %v12381_v38  ;;  %15643 = vmatprep.mubr.f32.mxu0 %v12608_v10  ;;  %v12487_v59 = vmul.f32 0.5, %v12381_v38 }
 0xe88   : > { %v12518_v9 = vmul.f32 0.70710677, %v12376_v35  ;;  %v15577_v26 = vpop.f32.mrb[212].mxu1  ;;  %15644 = vmatmul.mubr.f32.gmra.mrb[224].mxu0 %v12609_v30  ;;  %v12486_v46 = vmul.f32 0.5, %v12376_v35 }
 0xe89   : > { %v17684_v2 = vpop.eup %17683  ;;  %17691 = verf.f32 %v12519_v41  ;;  %v12391_v53 = vadd.f32 %v15577_v26, %v23979_v45  ;;  %v12385_v11 = vpop.f32.mrb[213].mxu1 }
 0xe8a   : > { %v17686_v0 = vpop.eup %17685  ;;  %v12579_v31 = vadd.f32 1.0, %v17684_v2  ;;  %17693 = verf.f32 %v12518_v9  ;;  %v12386_v51 = vadd.f32 %v23979_v45, %v12385_v11 }
 0xe8b   : > { %v12578_v20 = vadd.f32 1.0, %v17686_v0  ;;  %v12521_v54 = vmul.f32 0.70710677, %v12391_v53  ;;  %v12489_v28 = vmul.f32 0.5, %v12391_v53 }
 0xe8c   : > { %v12520_v32 = vmul.f32 0.70710677, %v12386_v51  ;;  %v12611_v16 = vmul.f32 %v12579_v31, %v12483_v33  ;;  %v12488_v62 = vmul.f32 0.5, %v12386_v51 }
 0xe8d   : > { %17695 = verf.f32 %v12521_v54  ;;  %v12610_v48 = vmul.f32 %v12578_v20, %v12482_v37 }
 0xe8e   : > { %17697 = verf.f32 %v12520_v32 }
 0xe8f   : > { %v17688_v6 = vpop.eup %17687  ;;  %15646 = vmatprep.mubr.f32.mxu0 %v12610_v48 }
 0xe90   : > { %v17690_v19 = vpop.eup %17689  ;;  %v12581_v39 = vadd.f32 1.0, %v17688_v6  ;;  %15647 = vmatmul.mubr.f32.gmra.mrb[226].mxu0 %v12611_v16 }
 0xe91   : > { %v12580_v42 = vadd.f32 1.0, %v17690_v19 }
 0xe92   : > { %v12613_v52 = vmul.f32 %v12581_v39, %v12485_v5 }
 0xe93   : > { %v17692_v43 = vpop.eup %17691  ;;  %v12612_v60 = vmul.f32 %v12580_v42, %v12484_v36 }
 0xe94   : > { %v17694_v57 = vpop.eup %17693  ;;  %v12583_v40 = vadd.f32 1.0, %v17692_v43 }
 0xe95   : > { %v12582_v27 = vadd.f32 1.0, %v17694_v57  ;;  %15649 = vmatprep.mubr.f32.mxu0 %v12612_v60 }
 0xe96   : > { %15650 = vmatmul.mubr.f32.gmra.mrb[228].mxu0 %v12613_v52  ;;  %v12615_v24 = vmul.f32 %v12583_v40, %v12487_v59 }
 0xe97   : > { %v17696_v56 = vpop.eup %17695  ;;  %v12614_v21 = vmul.f32 %v12582_v27, %v12486_v46 }
 0xe98   : > { %v17698_v15 = vpop.eup %17697  ;;  %v12585_v23 = vadd.f32 1.0, %v17696_v56 }
 0xe99   : > { %v12584_v58 = vadd.f32 1.0, %v17698_v15  ;;  %15652 = vmatprep.mubr.f32.mxu0 %v12614_v21 }
 0xe9a   : > { %15653 = vmatmul.mubr.f32.gmra.mrb[230].mxu0 %v12615_v24  ;;  %v12617_v44 = vmul.f32 %v12585_v23, %v12489_v28 }
 0xe9b   : > { %v12616_v34 = vmul.f32 %v12584_v58, %v12488_v62 }
 0xe9d   : > { %15655 = vmatprep.mubr.f32.mxu0 %v12616_v34 }
 0xe9e   : > { %15656 = vmatmul.mubr.f32.gmra.mrb[232].mxu0 %v12617_v44 }
 0xea1   : > { %v15580_v50 = vpop.f32.mrb[214].mxu1 }
 0xea2   : > { %v12401_v22 = vadd.f32 %v15580_v50, %v23979_v45  ;;  %v12395_v13 = vpop.f32.mrb[215].mxu1 }
 0xea3   : > { %v12396_v38 = vadd.f32 %v23979_v45, %v12395_v13 }
 0xea4   : > { %v12523_v4 = vmul.f32 0.70710677, %v12401_v22  ;;  %v12491_v37 = vmul.f32 0.5, %v12401_v22 }
 0xea5   : > { %v12522_v10 = vmul.f32 0.70710677, %v12396_v38  ;;  %v15583_v35 = vpop.f32.mrb[216].mxu1  ;;  %v12490_v31 = vmul.f32 0.5, %v12396_v38 }
 0xea6   : > { %17699 = verf.f32 %v12523_v4  ;;  %v12411_v30 = vadd.f32 %v15583_v35, %v23979_v45  ;;  %v12405_v41 = vpop.f32.mrb[217].mxu1 }
 0xea7   : > { %17701 = verf.f32 %v12522_v10  ;;  %v12406_v9 = vadd.f32 %v23979_v45, %v12405_v41 }
 0xea8   : > { %v12525_v26 = vmul.f32 0.70710677, %v12411_v30  ;;  %v12493_v19 = vmul.f32 0.5, %v12411_v30 }
 0xea9   : > { %v12524_v2 = vmul.f32 0.70710677, %v12406_v9  ;;  %v12492_v16 = vmul.f32 0.5, %v12406_v9 }
 0xeaa   : > { %17703 = verf.f32 %v12525_v26 }
 0xeab   : > { %17705 = verf.f32 %v12524_v2 }
 0xeb0   : > { %v17700_v53 = vpop.eup %17699 }
 0xeb1   : > { %v17702_v11 = vpop.eup %17701  ;;  %v12587_v0 = vadd.f32 1.0, %v17700_v53 }
 0xeb2   : > { %v12586_v51 = vadd.f32 1.0, %v17702_v11 }
 0xeb3   : > { %v12619_v48 = vmul.f32 %v12587_v0, %v12491_v37 }
 0xeb4   : > { %v17704_v20 = vpop.eup %17703  ;;  %v12618_v54 = vmul.f32 %v12586_v51, %v12490_v31 }
 0xeb5   : > { %v17706_v33 = vpop.eup %17705  ;;  %v12589_v32 = vadd.f32 1.0, %v17704_v20 }
 0xeb6   : > { %v12588_v6 = vadd.f32 1.0, %v17706_v33  ;;  %15658 = vmatprep.mubr.f32.mxu0 %v12618_v54 }
 0xeb7   : > { %15659 = vmatmul.mubr.f32.gmra.mrb[234].mxu0 %v12619_v48  ;;  %v12621_v36 = vmul.f32 %v12589_v32, %v12493_v19 }
 0xeb8   : > { %v12620_v39 = vmul.f32 %v12588_v6, %v12492_v16 }
 0xeba   : > { %15661 = vmatprep.mubr.f32.mxu0 %v12620_v39 }
 0xebb   : > { %15662 = vmatmul.mubr.f32.gmra.mrb[236].mxu0 %v12621_v36 }
 0xeda   : > { %v15586_v42 = vpop.f32.mrb[218].mxu1 }
 0xedb   : > { %v12421_v5 = vadd.f32 %v15586_v42, %v23979_v45  ;;  %v12415_v43 = vpop.f32.mrb[219].mxu1 }
 0xedc   : > { %v12416_v60 = vadd.f32 %v23979_v45, %v12415_v43 }
 0xedd   : > { %v12527_v57 = vmul.f32 0.70710677, %v12421_v5  ;;  %v12495_v26 = vmul.f32 0.5, %v12421_v5 }
 0xede   : > { %v12526_v40 = vmul.f32 0.70710677, %v12416_v60  ;;  %v15589_v52 = vpop.f32.mrb[220].mxu1  ;;  %v12494_v30 = vmul.f32 0.5, %v12416_v60 }
 0xedf   : > { %17707 = verf.f32 %v12527_v57  ;;  %v12431_v46 = vadd.f32 %v15589_v52, %v23979_v45  ;;  %v12425_v27 = vpop.f32.mrb[221].mxu1 }
 0xee0   : > { %17709 = verf.f32 %v12526_v40  ;;  %v12426_v59 = vadd.f32 %v23979_v45, %v12425_v27 }
 0xee1   : > { %v12529_v56 = vmul.f32 0.70710677, %v12431_v46  ;;  %v12497_v6 = vmul.f32 0.5, %v12431_v46 }
 0xee2   : > { %v12528_v21 = vmul.f32 0.70710677, %v12426_v59  ;;  %v15592_v15 = vpop.f32.mrb[222].mxu1  ;;  %v12496_v33 = vmul.f32 0.5, %v12426_v59 }
 0xee3   : > { %17711 = verf.f32 %v12529_v56  ;;  %v12441_v23 = vadd.f32 %v15592_v15, %v23979_v45  ;;  %v12435_v24 = vpop.f32.mrb[223].mxu1 }
 0xee4   : > { %17713 = verf.f32 %v12528_v21  ;;  %v12436_v62 = vadd.f32 %v23979_v45, %v12435_v24 }
 0xee5   : > { %v12531_v58 = vmul.f32 0.70710677, %v12441_v23  ;;  %v12499_v56 = vmul.f32 0.5, %v12441_v23 }
 0xee6   : > { %v12530_v28 = vmul.f32 0.70710677, %v12436_v62  ;;  %v15595_v34 = vpop.f32.mrb[224].mxu1  ;;  %v12498_v52 = vmul.f32 0.5, %v12436_v62 }
 0xee7   : > { %17715 = verf.f32 %v12531_v58  ;;  %v12451_v44 = vadd.f32 %v15595_v34, %v23979_v45  ;;  %v12445_v50 = vpop.f32.mrb[225].mxu1 }
 0xee8   : > { %17717 = verf.f32 %v12530_v28  ;;  %v12446_v22 = vadd.f32 %v23979_v45, %v12445_v50 }
 0xee9   : > { %v17708_v13 = vpop.eup %17707  ;;  %v12533_v38 = vmul.f32 0.70710677, %v12451_v44  ;;  %v12501_v34 = vmul.f32 0.5, %v12451_v44 }
 0xeea   : > { %v17710_v4 = vpop.eup %17709  ;;  %v12591_v10 = vadd.f32 1.0, %v17708_v13  ;;  %v12532_v35 = vmul.f32 0.70710677, %v12446_v22  ;;  %v12500_v28 = vmul.f32 0.5, %v12446_v22 }
 0xeeb   : > { %v12590_v41 = vadd.f32 1.0, %v17710_v4  ;;  %17719 = verf.f32 %v12533_v38  ;;  %v15598_v9 = vpop.f32.mrb[226].mxu1 }
 0xeec   : > { %17721 = verf.f32 %v12532_v35  ;;  %v12461_v2 = vadd.f32 %v15598_v9, %v23979_v45  ;;  %v12455_v53 = vpop.f32.mrb[227].mxu1  ;;  %v12623_v54 = vmul.f32 %v12591_v10, %v12495_v26 }
 0xeed   : > { %v17712_v11 = vpop.eup %17711  ;;  %v12456_v0 = vadd.f32 %v23979_v45, %v12455_v53  ;;  %v12622_v31 = vmul.f32 %v12590_v41, %v12494_v30 }
 0xeee   : > { %v17714_v51 = vpop.eup %17713  ;;  %v12593_v37 = vadd.f32 1.0, %v17712_v11  ;;  %v12535_v20 = vmul.f32 0.70710677, %v12461_v2  ;;  %v12503_v35 = vmul.f32 0.5, %v12461_v2  ;;  %v24016_v2 = vld [vmem:[%s24169_s13] ss:$0 sm:$0xff] }
 0xeef   : > { %v12592_v32 = vadd.f32 1.0, %v17714_v51  ;;  %v12534_v48 = vmul.f32 0.70710677, %v12456_v0  ;;  %v15601_v16 = vpop.f32.mrb[228].mxu1  ;;  %15664 = vmatprep.mubr.f32.mxu0 %v12622_v31  ;;  %v12502_v23 = vmul.f32 0.5, %v12456_v0 }
 0xef0   : > { %17723 = verf.f32 %v12535_v20  ;;  %v12471_v19 = vadd.f32 %v15601_v16, %v23979_v45  ;;  %v12465_v39 = vpop.f32.mrb[229].mxu1  ;;  %15665 = vmatmul.mubr.f32.gmra.mrb[238].mxu0 %v12623_v54  ;;  %v12625_v40 = vmul.f32 %v12593_v37, %v12497_v6 }
 0xef1   : > { %v17716_v36 = vpop.eup %17715  ;;  %17725 = verf.f32 %v12534_v48  ;;  %v12466_v42 = vadd.f32 %v23979_v45, %v12465_v39  ;;  %v12624_v5 = vmul.f32 %v12592_v32, %v12496_v33 }
 0xef2   : > { %v17718_v43 = vpop.eup %17717  ;;  %v12595_v60 = vadd.f32 1.0, %v17716_v36  ;;  %v12537_v57 = vmul.f32 0.70710677, %v12471_v19  ;;  %v12505_v44 = vmul.f32 0.5, %v12471_v19 }
 0xef3   : > { %v12594_v27 = vadd.f32 1.0, %v17718_v43  ;;  %v12536_v59 = vmul.f32 0.70710677, %v12466_v42  ;;  %15667 = vmatprep.mubr.f32.mxu0 %v12624_v5  ;;  %v12504_v53 = vmul.f32 0.5, %v12466_v42 }
 0xef4   : > { %17727 = verf.f32 %v12537_v57  ;;  %15668 = vmatmul.mubr.f32.gmra.mrb[240].mxu0 %v12625_v40  ;;  %v12627_v58 = vmul.f32 %v12595_v60, %v12499_v56 }
 0xef5   : > { %v17720_v46 = vpop.eup %17719  ;;  %17729 = verf.f32 %v12536_v59  ;;  %v12626_v21 = vmul.f32 %v12594_v27, %v12498_v52 }
 0xef6   : > { %v17722_v15 = vpop.eup %17721  ;;  %v12597_v24 = vadd.f32 1.0, %v17720_v46 }
 0xef7   : > { %v12596_v45 = vadd.f32 1.0, %v17722_v15  ;;  %15670 = vmatprep.mubr.f32.mxu0 %v12626_v21 }
 0xef8   : > { %15671 = vmatmul.mubr.f32.gmra.mrb[242].mxu0 %v12627_v58  ;;  %v12629_v62 = vmul.f32 %v12597_v24, %v12501_v34 }
 0xef9   : > { %v12628_v50 = vmul.f32 %v12596_v45, %v12500_v28 }
 0xefa   : > { %v17724_v13 = vpop.eup %17723 }
 0xefb   : > { %v17726_v38 = vpop.eup %17725  ;;  %v12599_v4 = vadd.f32 1.0, %v17724_v13  ;;  %15673 = vmatprep.mubr.f32.mxu0 %v12628_v50 }
 0xefc   : > { %v12598_v10 = vadd.f32 1.0, %v17726_v38  ;;  %15674 = vmatmul.mubr.f32.gmra.mrb[244].mxu0 %v12629_v62  ;;  %v25268_v38 = vld [vmem:[#allocation9_spill] sm:$0xff] }
 0xefd   : > { %v12631_v22 = vmul.f32 %v12599_v4, %v12503_v35 }
 0xefe   : > { %v17728_v30 = vpop.eup %17727  ;;  %v12630_v41 = vmul.f32 %v12598_v10, %v12502_v23  ;;  %v25269_v10 = vld [vmem:[#allocation139_spill] sm:$0xff] }
 0xeff   : > { %v17730_v9 = vpop.eup %17729  ;;  %v12601_v26 = vadd.f32 1.0, %v17728_v30  ;;  %v25270_v30 = vld [vmem:[#allocation100_spill] sm:$0xff] }
 0xf00   : > { %v12600_v11 = vadd.f32 1.0, %v17730_v9  ;;  %15676 = vmatprep.mubr.f32.mxu0 %v12630_v41 }
 0xf01   : > { %15677 = vmatmul.mubr.f32.gmra.mrb[246].mxu0 %v12631_v22  ;;  %v12633_v51 = vmul.f32 %v12601_v26, %v12505_v44 }
 0xf02   : > { %v12632_v31 = vmul.f32 %v12600_v11, %v12504_v53  ;;  %v25271_v53 = vld [vmem:[#allocation152_spill] sm:$0xff] }
 0xf04   : > { %15679 = vmatprep.mubr.f32.mxu0 %v12632_v31  ;;  %v25272_v31 = vld [vmem:[#allocation35_spill] sm:$0xff] }
 0xf05   : > { %15680 = vmatmul.mubr.f32.gmra.mrb[248].mxu0 %v12633_v51 }
 0xf47   : > { %v15636_v37 = vpop.f32.mrb[218].mxu0 }
 0xf48   : > { %v12876_v0 = vadd.f32 %v15636_v37, %v23258_v7  ;;  %v12716_v20 = vpop.f32.mrb[219].mxu0 }
 0xf49   : > { %v12875_v54 = vadd.f32 %v12716_v20, %v23262_v29 }
 0xf4a   : > { %v12915_v33 = vadd.f32 %v24016_v2, %v12876_v0 }
 0xf4b   : > { %v12914_v32 = vadd.f32 %v24016_v2, %v12875_v54  ;;  %v15639_v48 = vpop.f32.mrb[220].mxu0  ;;  %v25273_v54 = vld [vmem:[#allocation141_spill] sm:$0xff] }
 0xf4c   : > { %12947 = vst.msk [vmem:[%s24024_s24 + $0x8] sm:$0xff] %vm502_vm0, %v12915_v33  ;;  %v12878_v7 = vadd.f32 %v15639_v48, %v23281_v8  ;;  %v12726_v16 = vpop.f32.mrb[221].mxu0  ;;  %v25274_v48 = vld [vmem:[#allocation67_spill] sm:$0xff] }
 0xf4d   : > { %12946 = vst.msk [vmem:[%s24024_s24] sm:$0xff] %vm502_vm0, %v12914_v32  ;;  %v12877_v6 = vadd.f32 %v12726_v16, %v23277_v14 }
 0xf4e   : > { %v12917_v19 = vadd.f32 %v24016_v2, %v12878_v7 }
 0xf4f   : > { %v12916_v29 = vadd.f32 %v24016_v2, %v12877_v6 }
 0xf50   : > { %12949 = vst.msk [vmem:[%s24024_s24 + $0x18] sm:$0xff] %vm502_vm0, %v12917_v19 }
 0xf51   : > { %12948 = vst.msk [vmem:[%s24024_s24 + $0x10] sm:$0xff] %vm502_vm0, %v12916_v29  ;;  %v25275_v29 = vld [vmem:[#allocation89_spill] sm:$0xff] }
 0xf53   : > { %v15642_v39 = vpop.f32.mrb[222].mxu0 }
 0xf54   : > { %v12880_v36 = vadd.f32 %v15642_v39, %v23307_v63  ;;  %v12736_v42 = vpop.f32.mrb[223].mxu0 }
 0xf55   : > { %v12879_v8 = vadd.f32 %v12736_v42, %v23296_v18  ;;  %v25276_v42 = vld [vmem:[#allocation128_spill] sm:$0xff] }
 0xf56   : > { %v12919_v5 = vadd.f32 %v24016_v2, %v12880_v36 }
 0xf57   : > { %v12918_v14 = vadd.f32 %v24016_v2, %v12879_v8 }
 0xf58   : > { %12951 = vst.msk [vmem:[%s24024_s24 + $0x28] sm:$0xff] %vm502_vm0, %v12919_v5 }
 0xf59   : > { %12950 = vst.msk [vmem:[%s24024_s24 + $0x20] sm:$0xff] %vm502_vm0, %v12918_v14 }
 0xf5b   : > { %v15645_v43 = vpop.f32.mrb[224].mxu0 }
 0xf5c   : > { %v12882_v60 = vadd.f32 %v15645_v43, %v23336_v49  ;;  %v12746_v57 = vpop.f32.mrb[225].mxu0 }
 0xf5d   : > { %v12881_v40 = vadd.f32 %v12746_v57, %v23325_v47 }
 0xf5e   : > { %v12921_v63 = vadd.f32 %v24016_v2, %v12882_v60  ;;  %v25277_v60 = vld [vmem:[#allocation59_spill] sm:$0xff] }
 0xf5f   : > { %v12920_v18 = vadd.f32 %v24016_v2, %v12881_v40 }
 0xf60   : > { %12953 = vst.msk [vmem:[%s24024_s24 + $0x38] sm:$0xff] %vm502_vm0, %v12921_v63  ;;  %v25278_v63 = vld [vmem:[#allocation138_spill] sm:$0xff] }
 0xf61   : > { %12952 = vst.msk [vmem:[%s24024_s24 + $0x30] sm:$0xff] %vm502_vm0, %v12920_v18 }
 0xf63   : > { %v15648_v52 = vpop.f32.mrb[226].mxu0 }
 0xf64   : > { %v12884_v27 = vadd.f32 %v15648_v52, %v23382_v55  ;;  %v12756_v59 = vpop.f32.mrb[227].mxu0 }
 0xf65   : > { %v12883_v56 = vadd.f32 %v12756_v59, %v23364_v17 }
 0xf66   : > { %v12923_v49 = vadd.f32 %v24016_v2, %v12884_v27 }
 0xf67   : > { %v12922_v47 = vadd.f32 %v24016_v2, %v12883_v56  ;;  %v25279_v56 = vld [vmem:[#allocation135_spill] sm:$0xff] }
 0xf68   : > { %12955 = vst.msk [vmem:[%s24024_s24 + $0x48] sm:$0xff] %vm502_vm0, %v12923_v49 }
 0xf69   : > { %12954 = vst.msk [vmem:[%s24024_s24 + $0x40] sm:$0xff] %vm502_vm0, %v12922_v47  ;;  %v15651_v46 = vpop.f32.mrb[228].mxu0 }
 0xf6a   : > { %v12886_v21 = vadd.f32 %v15651_v46, %v23332_v3  ;;  %v12766_v15 = vpop.f32.mrb[229].mxu0  ;;  %v25280_v46 = vld [vmem:[#allocation113_spill] sm:$0xff] }
 0xf6b   : > { %v12885_v55 = vadd.f32 %v12766_v15, %v23397_v1 }
 0xf6c   : > { %v12925_v24 = vadd.f32 %v24016_v2, %v12886_v21 }
 0xf6d   : > { %v12924_v17 = vadd.f32 %v24016_v2, %v12885_v55  ;;  %v15654_v58 = vpop.f32.mrb[230].mxu0 }
 0xf6e   : > { %12957 = vst.msk [vmem:[%s24024_s24 + $0x58] sm:$0xff] %vm502_vm0, %v12925_v24  ;;  %v12888_v28 = vadd.f32 %v15654_v58, %v23350_v25  ;;  %v12776_v45 = vpop.f32.mrb[231].mxu0 }
 0xf6f   : > { %12956 = vst.msk [vmem:[%s24024_s24 + $0x50] sm:$0xff] %vm502_vm0, %v12924_v17  ;;  %v12887_v3 = vadd.f32 %v12776_v45, %v23411_v61  ;;  %v25281_v17 = vld [vmem:[#allocation155_spill] sm:$0xff]  ;;  %v25282_v45 = vld [vmem:[#allocation18_spill] sm:$0xff] }
 0xf70   : > { %v12927_v34 = vadd.f32 %v24016_v2, %v12888_v28 }
 0xf71   : > { %v12926_v1 = vadd.f32 %v24016_v2, %v12887_v3  ;;  %v15657_v50 = vpop.f32.mrb[232].mxu0 }
 0xf72   : > { %12959 = vst.msk [vmem:[%s24024_s24 + $0x68] sm:$0xff] %vm502_vm0, %v12927_v34  ;;  %v12890_v13 = vadd.f32 %v15657_v50, %v23372_v12  ;;  %v12786_v62 = vpop.f32.mrb[233].mxu0 }
 0xf73   : > { %12958 = vst.msk [vmem:[%s24024_s24 + $0x60] sm:$0xff] %vm502_vm0, %v12926_v1  ;;  %v12889_v25 = vadd.f32 %v12786_v62, %v25268_v38 }
 0xf74   : > { %v12929_v4 = vadd.f32 %v24016_v2, %v12890_v13  ;;  %v25283_v13 = vld [vmem:[#allocation137_spill] sm:$0xff] }
 0xf75   : > { %v12928_v61 = vadd.f32 %v24016_v2, %v12889_v25  ;;  %v25284_v25 = vld [vmem:[#allocation69_spill] sm:$0xff] }
 0xf76   : > { %12961 = vst.msk [vmem:[%s24024_s24 + $0x78] sm:$0xff] %vm502_vm0, %v12929_v4 }
 0xf77   : > { %12960 = vst.msk [vmem:[%s24024_s24 + $0x70] sm:$0xff] %vm502_vm0, %v12928_v61 }
 0xf8a   : > { %v15660_v23 = vpop.f32.mrb[234].mxu0 }
 0xf8b   : > { %v12892_v35 = vadd.f32 %v15660_v23, %v25269_v10  ;;  %v12796_v12 = vpop.f32.mrb[235].mxu0 }
 0xf8c   : > { %v12891_v41 = vadd.f32 %v12796_v12, %v25270_v30 }
 0xf8d   : > { %v12931_v9 = vadd.f32 %v24016_v2, %v12892_v35 }
 0xf8e   : > { %v12930_v26 = vadd.f32 %v24016_v2, %v12891_v41  ;;  %v15663_v22 = vpop.f32.mrb[236].mxu0 }
 0xf8f   : > { %12963 = vst.msk [vmem:[%s24024_s24 + $0x88] sm:$0xff] %vm502_vm0, %v12931_v9  ;;  %v12894_v11 = vadd.f32 %v15663_v22, %v25271_v53  ;;  %v12806_v44 = vpop.f32.mrb[237].mxu0 }
 0xf90   : > { %12962 = vst.msk [vmem:[%s24024_s24 + $0x80] sm:$0xff] %vm502_vm0, %v12930_v26  ;;  %v12893_v51 = vadd.f32 %v12806_v44, %v25272_v31 }
 0xf91   : > { %v12933_v37 = vadd.f32 %v24016_v2, %v12894_v11 }
 0xf92   : > { %v12932_v0 = vadd.f32 %v24016_v2, %v12893_v51 }
 0xf93   : > { %12965 = vst.msk [vmem:[%s24024_s24 + $0x98] sm:$0xff] %vm502_vm0, %v12933_v37 }
 0xf94   : > { %12964 = vst.msk [vmem:[%s24024_s24 + $0x90] sm:$0xff] %vm502_vm0, %v12932_v0 }
 0xfc3   : > { %v15666_v20 = vpop.f32.mrb[238].mxu0 }
 0xfc4   : > { %v12896_v33 = vadd.f32 %v15666_v20, %v25273_v54  ;;  %v12816_v32 = vpop.f32.mrb[239].mxu0 }
 0xfc5   : > { %v12895_v7 = vadd.f32 %v12816_v32, %v25274_v48 }
 0xfc6   : > { %v12935_v16 = vadd.f32 %v24016_v2, %v12896_v33 }
 0xfc7   : > { %v12934_v6 = vadd.f32 %v24016_v2, %v12895_v7  ;;  %v15669_v19 = vpop.f32.mrb[240].mxu0 }
 0xfc8   : > { %12967 = vst.msk [vmem:[%s24024_s24 + $0xa8] sm:$0xff] %vm502_vm0, %v12935_v16  ;;  %v12898_v39 = vadd.f32 %v15669_v19, %v25275_v29  ;;  %v12826_v36 = vpop.f32.mrb[241].mxu0 }
 0xfc9   : > { %12966 = vst.msk [vmem:[%s24024_s24 + $0xa0] sm:$0xff] %vm502_vm0, %v12934_v6  ;;  %v12897_v8 = vadd.f32 %v12826_v36, %v25276_v42 }
 0xfca   : > { %v12937_v5 = vadd.f32 %v24016_v2, %v12898_v39 }
 0xfcb   : > { %v12936_v14 = vadd.f32 %v24016_v2, %v12897_v8  ;;  %v15672_v43 = vpop.f32.mrb[242].mxu0 }
 0xfcc   : > { %12969 = vst.msk [vmem:[%s24024_s24 + $0xb8] sm:$0xff] %vm502_vm0, %v12937_v5  ;;  %v12900_v57 = vadd.f32 %v15672_v43, %v25277_v60  ;;  %v12836_v40 = vpop.f32.mrb[243].mxu0 }
 0xfcd   : > { %12968 = vst.msk [vmem:[%s24024_s24 + $0xb0] sm:$0xff] %vm502_vm0, %v12936_v14  ;;  %v12899_v18 = vadd.f32 %v12836_v40, %v25278_v63 }
 0xfce   : > { %v12939_v52 = vadd.f32 %v24016_v2, %v12900_v57 }
 0xfcf   : > { %v12938_v27 = vadd.f32 %v24016_v2, %v12899_v18  ;;  %v15675_v59 = vpop.f32.mrb[244].mxu0 }
 0xfd0   : > { %12971 = vst.msk [vmem:[%s24024_s24 + $0xc8] sm:$0xff] %vm502_vm0, %v12939_v52  ;;  %v12902_v49 = vadd.f32 %v15675_v59, %v25279_v56  ;;  %v12846_v47 = vpop.f32.mrb[245].mxu0 }
 0xfd1   : > { %12970 = vst.msk [vmem:[%s24024_s24 + $0xc0] sm:$0xff] %vm502_vm0, %v12938_v27  ;;  %v12901_v21 = vadd.f32 %v12846_v47, %v25280_v46 }
 0xfd2   : > { %v12941_v15 = vadd.f32 %v24016_v2, %v12902_v49 }
 0xfd3   : > { %v12940_v55 = vadd.f32 %v24016_v2, %v12901_v21 }
 0xfd4   : > { %12973 = vst.msk [vmem:[%s24024_s24 + $0xd8] sm:$0xff] %vm502_vm0, %v12941_v15  ;;  %v15678_v24 = vpop.f32.mrb[246].mxu0 }
 0xfd5   : > { %12972 = vst.msk [vmem:[%s24024_s24 + $0xd0] sm:$0xff] %vm502_vm0, %v12940_v55  ;;  %v12904_v58 = vadd.f32 %v15678_v24, %v25281_v17  ;;  %v12856_v28 = vpop.f32.mrb[247].mxu0 }
 0xfd6   : > { %v12903_v3 = vadd.f32 %v12856_v28, %v25282_v45 }
 0xfd7   : > { %v12943_v34 = vadd.f32 %v24016_v2, %v12904_v58 }
 0xfd8   : > { %v12942_v1 = vadd.f32 %v24016_v2, %v12903_v3  ;;  %v15681_v50 = vpop.f32.mrb[248].mxu0 }
 0xfd9   : > { %12975 = vst.msk [vmem:[%s24024_s24 + $0xe8] sm:$0xff] %vm502_vm0, %v12943_v34  ;;  %v12906_v62 = vadd.f32 %v15681_v50, %v25283_v13  ;;  %v12866_v38 = vpop.f32.mrb[249].mxu0 }
 0xfda   : > { %12974 = vst.msk [vmem:[%s24024_s24 + $0xe0] sm:$0xff] %vm502_vm0, %v12942_v1  ;;  %v12905_v4 = vadd.f32 %v12866_v38, %v25284_v25 }
 0xfdb   : > { %v12945_v61 = vadd.f32 %v24016_v2, %v12906_v62 }
 0xfdc   : > { %v12944_v23 = vadd.f32 %v24016_v2, %v12905_v4 }
 0xfdd   : > { %12977 = vst.msk [vmem:[%s24024_s24 + $0xf8] sm:$0xff] %vm502_vm0, %v12945_v61 }
 0xfde   : > { %12976 = vst.msk [vmem:[%s24024_s24 + $0xf0] sm:$0xff] %vm502_vm0, %v12944_v23 }
 0xfdf PF: > { %s24_s29 = sadd.s32 1, %s17769_s29  }
 0xfe0   : > { %p21_p4 = scmp.ge.s32.totalorder %s24_s29, 4  }
 0xfe2   :  { %23 = sbr.rel (!%p21_p4) target bundleno = 1 (0x1), region = 106 }

</bundles_post_ra>
